<compile_context>
chip_gen: v7x
topology: tpu7x:2x2x1
jax: 0.10.0
libtpu: 0.0.40
codegen_flags: <defaults>
</compile_context>

<pallas_src>
import math

import jax
import jax.numpy as jnp
from jax.experimental import pallas as pl

# ----------------------------- configuration --------------------------------
B = 2            # batch
C_IN = 1         # mono audio (MusicGen uses mono)
L = 256          # raw waveform length
K_CONV = 8       # encoder conv kernel == stride (downsample factor)
T = L // K_CONV  # number of code frames = 32
D_ENC = 32       # encoder hidden width
D_LAT = 32       # latent / codebook dim
NUM_Q = 4        # number of RVQ codebooks (musicgen-small uses 4)
CB_SIZE = 64     # entries per codebook (synthetic; real is 2048)
D_MODEL = 128    # decoder hidden size
N_HEADS = 2
D_HEAD = D_MODEL // N_HEADS
D_FFN = 256
N_LAYERS = 2
EXTRACT_LAYER = -1


# ------------------------------ fused Pallas kernel ---------------------------
def _layernorm(x, g, b):
    mu = jnp.mean(x, axis=-1, keepdims=True)
    var = jnp.mean((x - mu) ** 2, axis=-1, keepdims=True)
    return (x - mu) * jax.lax.rsqrt(var + 1e-5) * g + b


def fused_forward_kernel(
    patches_ref,                     # [N, K*C]            f32
    attn_bias_ref,                   # [N, N]               f32 (0 / -1e30)
    pos_ref,                         # [N, D_MODEL]         f32
    enc_w1_ref, enc_b1_ref,          # [K*C, D_ENC], [1, D_ENC]         f32
    enc_w2_ref, enc_b2_ref,          # [D_ENC, D_LAT], [1, D_LAT]       f32
    cb_t_ref,                        # [Q, D_LAT, CB]       bf16 (pre-transposed)
    cb_ref,                          # [Q, CB, D_LAT]       bf16
    cb_sq_ref,                       # [Q, 1, CB]           f32 (pre-computed norms)
    embed_ref,                       # [Q, CB, D_MODEL]     bf16
    ln1_g_ref, ln1_b_ref,            # [L, 1, D_MODEL]      f32
    wq_ref, wk_ref, wv_ref,          # [L*H, D_MODEL, D_HEAD]  bf16
    bq_ref, bk_ref, bv_ref,          # [L*H, 1, D_HEAD]     f32
    wo_ref,                          # [L*H, D_HEAD, D_MODEL]  bf16
    bo_ref,                          # [L, 1, D_MODEL]      f32
    ln2_g_ref, ln2_b_ref,            # [L, 1, D_MODEL]      f32
    w1_ref, b1_ref,                  # [L, D_MODEL, D_FFN], [L, 1, D_FFN]
    w2_ref, b2_ref,                  # [L, D_FFN, D_MODEL], [L, 1, D_MODEL]
    lnf_g_ref, lnf_b_ref,            # [1, D_MODEL]         f32
    hs_ref,                          # out: [L+1, N, D_MODEL] f32
):
    n = patches_ref.shape[0]

    # ---- EnCodec-like encoder: im2col'd conv1d + ELU + projection (f32) ----
    x = patches_ref[...]
    h = jnp.dot(x, enc_w1_ref[...], preferred_element_type=jnp.float32) + enc_b1_ref[...]
    h = jnp.where(h > 0.0, h, jnp.exp(jnp.minimum(h, 0.0)) - 1.0)      # safe ELU
    latent = jnp.dot(h, enc_w2_ref[...], preferred_element_type=jnp.float32) + enc_b2_ref[...]

    # ---- residual vector quantization; codes consumed on-chip via one-hot ----
    lane_idx = jax.lax.broadcasted_iota(jnp.int32, (n, CB_SIZE), 1)    # built once
    residual = latent                                                   # [N, D_LAT] f32
    x_emb = pos_ref[...]                                                # start with positions
    for q in range(NUM_Q):                                              # static unroll
        scores = jnp.dot(residual.astype(jnp.bfloat16), cb_t_ref[q],
                         preferred_element_type=jnp.float32)            # [N, CB]
        dist = cb_sq_ref[q] - 2.0 * scores                              # ||r-c||^2 - ||r||^2
        min_d = jnp.min(dist, axis=-1, keepdims=True)
        idx = jnp.min(jnp.where(dist <= min_d, lane_idx, CB_SIZE),
                      axis=-1, keepdims=True)                           # lowest-index tie break
        onehot = (lane_idx == idx).astype(jnp.bfloat16)                 # [N, CB]
        # embedding sum directly from one-hot codes (codes never touch HBM)
        x_emb = x_emb + jnp.dot(onehot, embed_ref[q],
                                preferred_element_type=jnp.float32)     # [N, D_MODEL]
        if q + 1 < NUM_Q:
            residual = residual - jnp.dot(onehot, cb_ref[q],
                                          preferred_element_type=jnp.float32)

    x = x_emb
    hs_ref[0] = x                                                       # embeddings + pos

    # ---- transformer decoder layers (pre-LN, causal self-attn + GELU MLP) ----
    scale = 1.0 / math.sqrt(D_HEAD)
    bias = attn_bias_ref[...]                                           # block-diag causal
    for layer in range(N_LAYERS):                                       # static unroll
        h_ln = _layernorm(x, ln1_g_ref[layer], ln1_b_ref[layer])
        h16 = h_ln.astype(jnp.bfloat16)
        attn = jnp.zeros((n, D_MODEL), jnp.float32)
        for hh in range(N_HEADS):                                       # static unroll
            w = layer * N_HEADS + hh
            qh = jnp.dot(h16, wq_ref[w], preferred_element_type=jnp.float32) + bq_ref[w]
            kh = jnp.dot(h16, wk_ref[w], preferred_element_type=jnp.float32) + bk_ref[w]
            vh = jnp.dot(h16, wv_ref[w], preferred_element_type=jnp.float32) + bv_ref[w]
            s = jax.lax.dot_general(
                qh.astype(jnp.bfloat16), kh.astype(jnp.bfloat16),
                (((1,), (1,)), ((), ())),
                preferred_element_type=jnp.float32)                     # q @ k^T, no XLU transpose
            s = s * scale + bias
            m = jnp.max(s, axis=-1, keepdims=True)
            p = jnp.exp(s - m)
            p = p / jnp.sum(p, axis=-1, keepdims=True)
            ctx = jnp.dot(p.astype(jnp.bfloat16), vh.astype(jnp.bfloat16),
                          preferred_element_type=jnp.float32)           # [N, D_HEAD]
            # accumulate output projection per head (no concat / lane slicing)
            attn = attn + jnp.dot(ctx.astype(jnp.bfloat16), wo_ref[w],
                                  preferred_element_type=jnp.float32)
        x = x + attn + bo_ref[layer]

        h2 = _layernorm(x, ln2_g_ref[layer], ln2_b_ref[layer])
        f = jnp.dot(h2.astype(jnp.bfloat16), w1_ref[layer],
                    preferred_element_type=jnp.float32) + b1_ref[layer]
        f = jax.nn.gelu(f, approximate=True)
        y = jnp.dot(f.astype(jnp.bfloat16), w2_ref[layer],
                    preferred_element_type=jnp.float32) + b2_ref[layer]
        x = x + y
        if layer + 1 < N_LAYERS:
            hs_ref[layer + 1] = x

    # final layernorm applied to the last hidden state (matches HF convention)
    hs_ref[N_LAYERS] = _layernorm(x, lnf_g_ref[...], lnf_b_ref[...])


def run_fused(patches, attn_bias, pos, p):
    n = patches.shape[0]
    return pl.pallas_call(
        fused_forward_kernel,
        out_shape=jax.ShapeDtypeStruct((N_LAYERS + 1, n, D_MODEL), jnp.float32),
    )(patches, attn_bias, pos,
      p["enc_w1"], p["enc_b1"], p["enc_w2"], p["enc_b2"],
      p["cb_t"], p["cb"], p["cb_sq"], p["embed"],
      p["ln1_g"], p["ln1_b"],
      p["wq"], p["wk"], p["wv"], p["bq"], p["bk"], p["bv"], p["wo"], p["bo"],
      p["ln2_g"], p["ln2_b"], p["w1"], p["b1"], p["w2"], p["b2"],
      p["lnf_g"], p["lnf_b"])


# ------------------------------- parameters ----------------------------------
def init_params(seed=1):
    keys = jax.random.split(jax.random.PRNGKey(seed), 64)
    ki = iter(keys)
    nrm = lambda shape, s=0.02: (s * jax.random.normal(next(ki), shape)).astype(jnp.float32)

    codebooks = nrm((NUM_Q, CB_SIZE, D_LAT), 1.0)
    cb_bf = codebooks.astype(jnp.bfloat16)
    cb_f32 = cb_bf.astype(jnp.float32)               # norms consistent with bf16 matmul operands

    wq = nrm((N_LAYERS, N_HEADS, D_MODEL, D_HEAD))
    wk = nrm((N_LAYERS, N_HEADS, D_MODEL, D_HEAD))
    wv = nrm((N_LAYERS, N_HEADS, D_MODEL, D_HEAD))
    wo = nrm((N_LAYERS, N_HEADS, D_HEAD, D_MODEL))

    params = {
        # encoder (conv-as-matmul + pointwise projection) — tiny, kept f32
        "enc_w1": nrm((K_CONV * C_IN, D_ENC), 0.3),
        "enc_b1": jnp.zeros((1, D_ENC), jnp.float32),
        "enc_w2": nrm((D_ENC, D_LAT), 0.3),
        "enc_b2": jnp.zeros((1, D_LAT), jnp.float32),
        # RVQ codebooks: precomputed transpose + squared norms (no in-kernel XLU work)
        "cb": cb_bf,                                                    # [Q, CB, D_LAT]
        "cb_t": jnp.transpose(cb_bf, (0, 2, 1)),                        # [Q, D_LAT, CB]
        "cb_sq": jnp.transpose(
            jnp.sum(cb_f32 * cb_f32, axis=-1, keepdims=True), (0, 2, 1)),  # [Q, 1, CB]
        # decoder token embeddings (one table per codebook, summed on-chip)
        "embed": nrm((NUM_Q, CB_SIZE, D_MODEL), 0.02).astype(jnp.bfloat16),
        # decoder layers, stacked along layer / (layer*head) leading axes
        "ln1_g": jnp.ones((N_LAYERS, 1, D_MODEL), jnp.float32),
        "ln1_b": jnp.zeros((N_LAYERS, 1, D_MODEL), jnp.float32),
        "wq": wq.reshape(N_LAYERS * N_HEADS, D_MODEL, D_HEAD).astype(jnp.bfloat16),
        "wk": wk.reshape(N_LAYERS * N_HEADS, D_MODEL, D_HEAD).astype(jnp.bfloat16),
        "wv": wv.reshape(N_LAYERS * N_HEADS, D_MODEL, D_HEAD).astype(jnp.bfloat16),
        "bq": jnp.zeros((N_LAYERS * N_HEADS, 1, D_HEAD), jnp.float32),
        "bk": jnp.zeros((N_LAYERS * N_HEADS, 1, D_HEAD), jnp.float32),
        "bv": jnp.zeros((N_LAYERS * N_HEADS, 1, D_HEAD), jnp.float32),
        "wo": wo.reshape(N_LAYERS * N_HEADS, D_HEAD, D_MODEL).astype(jnp.bfloat16),
        "bo": jnp.zeros((N_LAYERS, 1, D_MODEL), jnp.float32),
        "ln2_g": jnp.ones((N_LAYERS, 1, D_MODEL), jnp.float32),
        "ln2_b": jnp.zeros((N_LAYERS, 1, D_MODEL), jnp.float32),
        "w1": nrm((N_LAYERS, D_MODEL, D_FFN)).astype(jnp.bfloat16),
        "b1": jnp.zeros((N_LAYERS, 1, D_FFN), jnp.float32),
        "w2": nrm((N_LAYERS, D_FFN, D_MODEL)).astype(jnp.bfloat16),
        "b2": jnp.zeros((N_LAYERS, 1, D_MODEL), jnp.float32),
        # final layernorm
        "lnf_g": jnp.ones((1, D_MODEL), jnp.float32),
        "lnf_b": jnp.zeros((1, D_MODEL), jnp.float32),
    }
    return params


def sinusoidal_positions(t, d):
    pos = jnp.arange(t, dtype=jnp.float32)[:, None]
    dim = jnp.arange(d // 2, dtype=jnp.float32)[None, :]
    inv = jnp.exp(-(jnp.log(10000.0)) * (2.0 * dim) / d)
    ang = pos * inv
    return jnp.concatenate([jnp.sin(ang), jnp.cos(ang)], axis=-1)        # [T, D]


# ------------------------------ forward (module) ------------------------------
def _forward(params, wav):
    bsz, c_in, length = wav.shape
    t = length // K_CONV
    n = bsz * t

    # im2col for the stride==kernel encoder conv: [N, K*C] patch matrix
    patches = (wav.reshape(bsz, c_in, t, K_CONV)
                  .transpose(0, 2, 1, 3)
                  .reshape(n, c_in * K_CONV))

    # sinusoidal positions, tiled per batch row-block (batch folded into rows)
    pos = jnp.tile(sinusoidal_positions(t, D_MODEL), (bsz, 1))           # [N, D]

    # block-diagonal causal bias for batch-folded [N, N] attention scores
    row = jnp.arange(n)[:, None]
    col = jnp.arange(n)[None, :]
    mask = ((row // t) == (col // t)) & (row >= col)
    attn_bias = jnp.where(mask, 0.0, -1e30).astype(jnp.float32)

    hs = run_fused(patches, attn_bias, pos, params)                      # [L+1, N, D]
    return hs.reshape(N_LAYERS + 1, bsz, t, D_MODEL)


class MusicGenPallas:
    def __init__(self, extract_layer=EXTRACT_LAYER):
        self.layer = extract_layer
        self.params = init_params()
        self._forward = jax.jit(_forward)

    def __call__(self, wav):
        # mirror the PyTorch shape handling
        if wav.ndim == 1:
            wav = wav[None, None, :]
        if wav.ndim == 2:
            assert wav.shape[0] == 1
            wav = wav[None, :]
        assert wav.shape[1] == C_IN and wav.shape[2] % K_CONV == 0
        hs = self._forward(self.params, wav)                             # [L+1, B, T, D]
        if self.layer is not None:
            return hs[self.layer]
        return tuple(hs[i] for i in range(hs.shape[0]))


# ---------------------------------- main --------------------------------------
if __name__ == "__main__":
    key = jax.random.PRNGKey(0)
    wav = jax.random.normal(key, (B, C_IN, L), dtype=jnp.float32)

    model = MusicGenPallas(extract_layer=-1)
    out = model(wav)
    out = jax.block_until_ready(out)

    assert out.shape == (B, T, D_MODEL), out.shape
    assert jnp.all(jnp.isfinite(out))
    print("KERNEL_OK")
</pallas_src>

<mosaic_0001>
module attributes {stable_mosaic.version = 11 : i64} {
  func.func @fused_forward_kernel(%arg0: memref<64x8xf32, #tpu.memory_space<vmem>>, %arg1: memref<64x64xf32, #tpu.memory_space<vmem>>, %arg2: memref<64x128xf32, #tpu.memory_space<vmem>>, %arg3: memref<8x32xf32, #tpu.memory_space<vmem>>, %arg4: memref<1x32xf32, #tpu.memory_space<vmem>>, %arg5: memref<32x32xf32, #tpu.memory_space<vmem>>, %arg6: memref<1x32xf32, #tpu.memory_space<vmem>>, %arg7: memref<4x32x64xbf16, #tpu.memory_space<vmem>>, %arg8: memref<4x64x32xbf16, #tpu.memory_space<vmem>>, %arg9: memref<4x1x64xf32, #tpu.memory_space<vmem>>, %arg10: memref<4x64x128xbf16, #tpu.memory_space<vmem>>, %arg11: memref<2x1x128xf32, #tpu.memory_space<vmem>>, %arg12: memref<2x1x128xf32, #tpu.memory_space<vmem>>, %arg13: memref<4x128x64xbf16, #tpu.memory_space<vmem>>, %arg14: memref<4x128x64xbf16, #tpu.memory_space<vmem>>, %arg15: memref<4x128x64xbf16, #tpu.memory_space<vmem>>, %arg16: memref<4x1x64xf32, #tpu.memory_space<vmem>>, %arg17: memref<4x1x64xf32, #tpu.memory_space<vmem>>, %arg18: memref<4x1x64xf32, #tpu.memory_space<vmem>>, %arg19: memref<4x64x128xbf16, #tpu.memory_space<vmem>>, %arg20: memref<2x1x128xf32, #tpu.memory_space<vmem>>, %arg21: memref<2x1x128xf32, #tpu.memory_space<vmem>>, %arg22: memref<2x1x128xf32, #tpu.memory_space<vmem>>, %arg23: memref<2x128x256xbf16, #tpu.memory_space<vmem>>, %arg24: memref<2x1x256xf32, #tpu.memory_space<vmem>>, %arg25: memref<2x256x128xbf16, #tpu.memory_space<vmem>>, %arg26: memref<2x1x128xf32, #tpu.memory_space<vmem>>, %arg27: memref<1x128xf32, #tpu.memory_space<vmem>>, %arg28: memref<1x128xf32, #tpu.memory_space<vmem>>, %arg29: memref<3x64x128xf32, #tpu.memory_space<vmem>>) attributes {dimension_semantics = [], scalar_prefetch = 0 : i64, scratch_operands = 0 : i64, tpu.core_type = #tpu.core_type<tc>} {
    %c0 = arith.constant 0 : index
    %c0_0 = arith.constant 0 : index
    %0 = vector.load %arg0[%c0, %c0_0] : memref<64x8xf32, #tpu.memory_space<vmem>>, vector<64x8xf32>
    %c0_1 = arith.constant 0 : index
    %c0_2 = arith.constant 0 : index
    %1 = vector.load %arg3[%c0_1, %c0_2] : memref<8x32xf32, #tpu.memory_space<vmem>>, vector<8x32xf32>
    %cst = arith.constant dense<0.000000e+00> : vector<64x32xf32>
    %2 = tpu.matmul %0, %1, %cst {dimension_numbers = #tpu.dot_dimension_numbers<[1], [0], [0], [1], [0, 0, 1, 1], [], []>} : vector<64x8xf32>, vector<8x32xf32>, vector<64x32xf32> -> vector<64x32xf32>
    %c0_3 = arith.constant 0 : index
    %c0_4 = arith.constant 0 : index
    %3 = vector.load %arg4[%c0_3, %c0_4] : memref<1x32xf32, #tpu.memory_space<vmem>>, vector<1x32xf32>
    %4 = vector.broadcast %3 : vector<1x32xf32> to vector<64x32xf32>
    %5 = arith.addf %2, %4 : vector<64x32xf32>
    %cst_5 = arith.constant 0.000000e+00 : f32
    %6 = vector.broadcast %cst_5 : f32 to vector<64x32xf32>
    %7 = arith.cmpf ogt, %5, %6 : vector<64x32xf32>
    %cst_6 = arith.constant 0.000000e+00 : f32
    %8 = vector.broadcast %cst_6 : f32 to vector<64x32xf32>
    %9 = arith.minimumf %5, %8 : vector<64x32xf32>
    %10 = math.exp %9 : vector<64x32xf32>
    %cst_7 = arith.constant 1.000000e+00 : f32
    %11 = vector.broadcast %cst_7 : f32 to vector<64x32xf32>
    %12 = arith.subf %10, %11 : vector<64x32xf32>
    %13 = arith.select %7, %5, %12 : vector<64x32xi1>, vector<64x32xf32>
    %c0_8 = arith.constant 0 : index
    %c0_9 = arith.constant 0 : index
    %14 = vector.load %arg5[%c0_8, %c0_9] : memref<32x32xf32, #tpu.memory_space<vmem>>, vector<32x32xf32>
    %cst_10 = arith.constant dense<0.000000e+00> : vector<64x32xf32>
    %15 = tpu.matmul %13, %14, %cst_10 {dimension_numbers = #tpu.dot_dimension_numbers<[1], [0], [0], [1], [0, 0, 1, 1], [], []>} : vector<64x32xf32>, vector<32x32xf32>, vector<64x32xf32> -> vector<64x32xf32>
    %c0_11 = arith.constant 0 : index
    %c0_12 = arith.constant 0 : index
    %16 = vector.load %arg6[%c0_11, %c0_12] : memref<1x32xf32, #tpu.memory_space<vmem>>, vector<1x32xf32>
    %17 = vector.broadcast %16 : vector<1x32xf32> to vector<64x32xf32>
    %18 = arith.addf %15, %17 : vector<64x32xf32>
    %19 = tpu.iota {dimensions = array<i32: 1>} : vector<64x64xi32>
    %c0_13 = arith.constant 0 : index
    %c0_14 = arith.constant 0 : index
    %20 = vector.load %arg2[%c0_13, %c0_14] : memref<64x128xf32, #tpu.memory_space<vmem>>, vector<64x128xf32>
    %21 = arith.truncf %18 : vector<64x32xf32> to vector<64x32xbf16>
    %c0_15 = arith.constant 0 : index
    %c0_16 = arith.constant 0 : index
    %c0_17 = arith.constant 0 : index
    %22 = vector.load %arg7[%c0_15, %c0_16, %c0_17] : memref<4x32x64xbf16, #tpu.memory_space<vmem>>, vector<1x32x64xbf16>
    %23 = vector.shape_cast %22 : vector<1x32x64xbf16> to vector<32x64xbf16>
    %cst_18 = arith.constant dense<0.000000e+00> : vector<64x64xf32>
    %24 = tpu.matmul %21, %23, %cst_18 {dimension_numbers = #tpu.dot_dimension_numbers<[1], [0], [0], [1], [0, 0, 1, 1], [], []>} : vector<64x32xbf16>, vector<32x64xbf16>, vector<64x64xf32> -> vector<64x64xf32>
    %c0_19 = arith.constant 0 : index
    %c0_20 = arith.constant 0 : index
    %c0_21 = arith.constant 0 : index
    %25 = vector.load %arg9[%c0_19, %c0_20, %c0_21] : memref<4x1x64xf32, #tpu.memory_space<vmem>>, vector<1x1x64xf32>
    %26 = vector.shape_cast %25 : vector<1x1x64xf32> to vector<1x64xf32>
    %cst_22 = arith.constant 2.000000e+00 : f32
    %27 = vector.broadcast %cst_22 : f32 to vector<64x64xf32>
    %28 = arith.mulf %27, %24 : vector<64x64xf32>
    %29 = vector.broadcast %26 : vector<1x64xf32> to vector<64x64xf32>
    %30 = arith.subf %29, %28 : vector<64x64xf32>
    %cst_23 = arith.constant dense<0x7F800000> : vector<64xf32>
    %31 = vector.multi_reduction <minimumf>, %30, %cst_23 [1] : vector<64x64xf32> to vector<64xf32>
    %32 = vector.shape_cast %31 : vector<64xf32> to vector<64x1xf32>
    %33 = vector.broadcast %32 : vector<64x1xf32> to vector<64x64xf32>
    %34 = arith.cmpf ole, %30, %33 : vector<64x64xf32>
    %c64_i32 = arith.constant 64 : i32
    %35 = vector.broadcast %c64_i32 : i32 to vector<64x64xi32>
    %36 = arith.select %34, %19, %35 : vector<64x64xi1>, vector<64x64xi32>
    %cst_24 = arith.constant dense<2147483647> : vector<64xi32>
    %37 = vector.multi_reduction <minsi>, %36, %cst_24 [1] : vector<64x64xi32> to vector<64xi32>
    %38 = vector.shape_cast %37 : vector<64xi32> to vector<64x1xi32>
    %39 = vector.broadcast %38 : vector<64x1xi32> to vector<64x64xi32>
    %40 = arith.cmpi eq, %19, %39 : vector<64x64xi32>
    %41 = arith.extui %40 : vector<64x64xi1> to vector<64x64xi32>
    %42 = arith.sitofp %41 : vector<64x64xi32> to vector<64x64xf32>
    %43 = arith.truncf %42 : vector<64x64xf32> to vector<64x64xbf16>
    %c0_25 = arith.constant 0 : index
    %c0_26 = arith.constant 0 : index
    %c0_27 = arith.constant 0 : index
    %44 = vector.load %arg10[%c0_25, %c0_26, %c0_27] : memref<4x64x128xbf16, #tpu.memory_space<vmem>>, vector<1x64x128xbf16>
    %45 = vector.shape_cast %44 : vector<1x64x128xbf16> to vector<64x128xbf16>
    %cst_28 = arith.constant dense<0.000000e+00> : vector<64x128xf32>
    %46 = tpu.matmul %43, %45, %cst_28 {dimension_numbers = #tpu.dot_dimension_numbers<[1], [0], [0], [1], [0, 0, 1, 1], [], []>} : vector<64x64xbf16>, vector<64x128xbf16>, vector<64x128xf32> -> vector<64x128xf32>
    %47 = arith.addf %20, %46 : vector<64x128xf32>
    %c0_29 = arith.constant 0 : index
    %c0_30 = arith.constant 0 : index
    %c0_31 = arith.constant 0 : index
    %48 = vector.load %arg8[%c0_29, %c0_30, %c0_31] : memref<4x64x32xbf16, #tpu.memory_space<vmem>>, vector<1x64x32xbf16>
    %49 = vector.shape_cast %48 : vector<1x64x32xbf16> to vector<64x32xbf16>
    %cst_32 = arith.constant dense<0.000000e+00> : vector<64x32xf32>
    %50 = tpu.matmul %43, %49, %cst_32 {dimension_numbers = #tpu.dot_dimension_numbers<[1], [0], [0], [1], [0, 0, 1, 1], [], []>} : vector<64x64xbf16>, vector<64x32xbf16>, vector<64x32xf32> -> vector<64x32xf32>
    %51 = arith.subf %18, %50 : vector<64x32xf32>
    %52 = arith.truncf %51 : vector<64x32xf32> to vector<64x32xbf16>
    %c1 = arith.constant 1 : index
    %c0_33 = arith.constant 0 : index
    %c0_34 = arith.constant 0 : index
    %53 = vector.load %arg7[%c1, %c0_33, %c0_34] : memref<4x32x64xbf16, #tpu.memory_space<vmem>>, vector<1x32x64xbf16>
    %54 = vector.shape_cast %53 : vector<1x32x64xbf16> to vector<32x64xbf16>
    %cst_35 = arith.constant dense<0.000000e+00> : vector<64x64xf32>
    %55 = tpu.matmul %52, %54, %cst_35 {dimension_numbers = #tpu.dot_dimension_numbers<[1], [0], [0], [1], [0, 0, 1, 1], [], []>} : vector<64x32xbf16>, vector<32x64xbf16>, vector<64x64xf32> -> vector<64x64xf32>
    %c1_36 = arith.constant 1 : index
    %c0_37 = arith.constant 0 : index
    %c0_38 = arith.constant 0 : index
    %56 = vector.load %arg9[%c1_36, %c0_37, %c0_38] : memref<4x1x64xf32, #tpu.memory_space<vmem>>, vector<1x1x64xf32>
    %57 = vector.shape_cast %56 : vector<1x1x64xf32> to vector<1x64xf32>
    %cst_39 = arith.constant 2.000000e+00 : f32
    %58 = vector.broadcast %cst_39 : f32 to vector<64x64xf32>
    %59 = arith.mulf %58, %55 : vector<64x64xf32>
    %60 = vector.broadcast %57 : vector<1x64xf32> to vector<64x64xf32>
    %61 = arith.subf %60, %59 : vector<64x64xf32>
    %cst_40 = arith.constant dense<0x7F800000> : vector<64xf32>
    %62 = vector.multi_reduction <minimumf>, %61, %cst_40 [1] : vector<64x64xf32> to vector<64xf32>
    %63 = vector.shape_cast %62 : vector<64xf32> to vector<64x1xf32>
    %64 = vector.broadcast %63 : vector<64x1xf32> to vector<64x64xf32>
    %65 = arith.cmpf ole, %61, %64 : vector<64x64xf32>
    %c64_i32_41 = arith.constant 64 : i32
    %66 = vector.broadcast %c64_i32_41 : i32 to vector<64x64xi32>
    %67 = arith.select %65, %19, %66 : vector<64x64xi1>, vector<64x64xi32>
    %cst_42 = arith.constant dense<2147483647> : vector<64xi32>
    %68 = vector.multi_reduction <minsi>, %67, %cst_42 [1] : vector<64x64xi32> to vector<64xi32>
    %69 = vector.shape_cast %68 : vector<64xi32> to vector<64x1xi32>
    %70 = vector.broadcast %69 : vector<64x1xi32> to vector<64x64xi32>
    %71 = arith.cmpi eq, %19, %70 : vector<64x64xi32>
    %72 = arith.extui %71 : vector<64x64xi1> to vector<64x64xi32>
    %73 = arith.sitofp %72 : vector<64x64xi32> to vector<64x64xf32>
    %74 = arith.truncf %73 : vector<64x64xf32> to vector<64x64xbf16>
    %c1_43 = arith.constant 1 : index
    %c0_44 = arith.constant 0 : index
    %c0_45 = arith.constant 0 : index
    %75 = vector.load %arg10[%c1_43, %c0_44, %c0_45] : memref<4x64x128xbf16, #tpu.memory_space<vmem>>, vector<1x64x128xbf16>
    %76 = vector.shape_cast %75 : vector<1x64x128xbf16> to vector<64x128xbf16>
    %cst_46 = arith.constant dense<0.000000e+00> : vector<64x128xf32>
    %77 = tpu.matmul %74, %76, %cst_46 {dimension_numbers = #tpu.dot_dimension_numbers<[1], [0], [0], [1], [0, 0, 1, 1], [], []>} : vector<64x64xbf16>, vector<64x128xbf16>, vector<64x128xf32> -> vector<64x128xf32>
    %78 = arith.addf %47, %77 : vector<64x128xf32>
    %c1_47 = arith.constant 1 : index
    %c0_48 = arith.constant 0 : index
    %c0_49 = arith.constant 0 : index
    %79 = vector.load %arg8[%c1_47, %c0_48, %c0_49] : memref<4x64x32xbf16, #tpu.memory_space<vmem>>, vector<1x64x32xbf16>
    %80 = vector.shape_cast %79 : vector<1x64x32xbf16> to vector<64x32xbf16>
    %cst_50 = arith.constant dense<0.000000e+00> : vector<64x32xf32>
    %81 = tpu.matmul %74, %80, %cst_50 {dimension_numbers = #tpu.dot_dimension_numbers<[1], [0], [0], [1], [0, 0, 1, 1], [], []>} : vector<64x64xbf16>, vector<64x32xbf16>, vector<64x32xf32> -> vector<64x32xf32>
    %82 = arith.subf %51, %81 : vector<64x32xf32>
    %83 = arith.truncf %82 : vector<64x32xf32> to vector<64x32xbf16>
    %c2 = arith.constant 2 : index
    %c0_51 = arith.constant 0 : index
    %c0_52 = arith.constant 0 : index
    %84 = vector.load %arg7[%c2, %c0_51, %c0_52] : memref<4x32x64xbf16, #tpu.memory_space<vmem>>, vector<1x32x64xbf16>
    %85 = vector.shape_cast %84 : vector<1x32x64xbf16> to vector<32x64xbf16>
    %cst_53 = arith.constant dense<0.000000e+00> : vector<64x64xf32>
    %86 = tpu.matmul %83, %85, %cst_53 {dimension_numbers = #tpu.dot_dimension_numbers<[1], [0], [0], [1], [0, 0, 1, 1], [], []>} : vector<64x32xbf16>, vector<32x64xbf16>, vector<64x64xf32> -> vector<64x64xf32>
    %c2_54 = arith.constant 2 : index
    %c0_55 = arith.constant 0 : index
    %c0_56 = arith.constant 0 : index
    %87 = vector.load %arg9[%c2_54, %c0_55, %c0_56] : memref<4x1x64xf32, #tpu.memory_space<vmem>>, vector<1x1x64xf32>
    %88 = vector.shape_cast %87 : vector<1x1x64xf32> to vector<1x64xf32>
    %cst_57 = arith.constant 2.000000e+00 : f32
    %89 = vector.broadcast %cst_57 : f32 to vector<64x64xf32>
    %90 = arith.mulf %89, %86 : vector<64x64xf32>
    %91 = vector.broadcast %88 : vector<1x64xf32> to vector<64x64xf32>
    %92 = arith.subf %91, %90 : vector<64x64xf32>
    %cst_58 = arith.constant dense<0x7F800000> : vector<64xf32>
    %93 = vector.multi_reduction <minimumf>, %92, %cst_58 [1] : vector<64x64xf32> to vector<64xf32>
    %94 = vector.shape_cast %93 : vector<64xf32> to vector<64x1xf32>
    %95 = vector.broadcast %94 : vector<64x1xf32> to vector<64x64xf32>
    %96 = arith.cmpf ole, %92, %95 : vector<64x64xf32>
    %c64_i32_59 = arith.constant 64 : i32
    %97 = vector.broadcast %c64_i32_59 : i32 to vector<64x64xi32>
    %98 = arith.select %96, %19, %97 : vector<64x64xi1>, vector<64x64xi32>
    %cst_60 = arith.constant dense<2147483647> : vector<64xi32>
    %99 = vector.multi_reduction <minsi>, %98, %cst_60 [1] : vector<64x64xi32> to vector<64xi32>
    %100 = vector.shape_cast %99 : vector<64xi32> to vector<64x1xi32>
    %101 = vector.broadcast %100 : vector<64x1xi32> to vector<64x64xi32>
    %102 = arith.cmpi eq, %19, %101 : vector<64x64xi32>
    %103 = arith.extui %102 : vector<64x64xi1> to vector<64x64xi32>
    %104 = arith.sitofp %103 : vector<64x64xi32> to vector<64x64xf32>
    %105 = arith.truncf %104 : vector<64x64xf32> to vector<64x64xbf16>
    %c2_61 = arith.constant 2 : index
    %c0_62 = arith.constant 0 : index
    %c0_63 = arith.constant 0 : index
    %106 = vector.load %arg10[%c2_61, %c0_62, %c0_63] : memref<4x64x128xbf16, #tpu.memory_space<vmem>>, vector<1x64x128xbf16>
    %107 = vector.shape_cast %106 : vector<1x64x128xbf16> to vector<64x128xbf16>
    %cst_64 = arith.constant dense<0.000000e+00> : vector<64x128xf32>
    %108 = tpu.matmul %105, %107, %cst_64 {dimension_numbers = #tpu.dot_dimension_numbers<[1], [0], [0], [1], [0, 0, 1, 1], [], []>} : vector<64x64xbf16>, vector<64x128xbf16>, vector<64x128xf32> -> vector<64x128xf32>
    %109 = arith.addf %78, %108 : vector<64x128xf32>
    %c2_65 = arith.constant 2 : index
    %c0_66 = arith.constant 0 : index
    %c0_67 = arith.constant 0 : index
    %110 = vector.load %arg8[%c2_65, %c0_66, %c0_67] : memref<4x64x32xbf16, #tpu.memory_space<vmem>>, vector<1x64x32xbf16>
    %111 = vector.shape_cast %110 : vector<1x64x32xbf16> to vector<64x32xbf16>
    %cst_68 = arith.constant dense<0.000000e+00> : vector<64x32xf32>
    %112 = tpu.matmul %105, %111, %cst_68 {dimension_numbers = #tpu.dot_dimension_numbers<[1], [0], [0], [1], [0, 0, 1, 1], [], []>} : vector<64x64xbf16>, vector<64x32xbf16>, vector<64x32xf32> -> vector<64x32xf32>
    %113 = arith.subf %82, %112 : vector<64x32xf32>
    %114 = arith.truncf %113 : vector<64x32xf32> to vector<64x32xbf16>
    %c3 = arith.constant 3 : index
    %c0_69 = arith.constant 0 : index
    %c0_70 = arith.constant 0 : index
    %115 = vector.load %arg7[%c3, %c0_69, %c0_70] : memref<4x32x64xbf16, #tpu.memory_space<vmem>>, vector<1x32x64xbf16>
    %116 = vector.shape_cast %115 : vector<1x32x64xbf16> to vector<32x64xbf16>
    %cst_71 = arith.constant dense<0.000000e+00> : vector<64x64xf32>
    %117 = tpu.matmul %114, %116, %cst_71 {dimension_numbers = #tpu.dot_dimension_numbers<[1], [0], [0], [1], [0, 0, 1, 1], [], []>} : vector<64x32xbf16>, vector<32x64xbf16>, vector<64x64xf32> -> vector<64x64xf32>
    %c3_72 = arith.constant 3 : index
    %c0_73 = arith.constant 0 : index
    %c0_74 = arith.constant 0 : index
    %118 = vector.load %arg9[%c3_72, %c0_73, %c0_74] : memref<4x1x64xf32, #tpu.memory_space<vmem>>, vector<1x1x64xf32>
    %119 = vector.shape_cast %118 : vector<1x1x64xf32> to vector<1x64xf32>
    %cst_75 = arith.constant 2.000000e+00 : f32
    %120 = vector.broadcast %cst_75 : f32 to vector<64x64xf32>
    %121 = arith.mulf %120, %117 : vector<64x64xf32>
    %122 = vector.broadcast %119 : vector<1x64xf32> to vector<64x64xf32>
    %123 = arith.subf %122, %121 : vector<64x64xf32>
    %cst_76 = arith.constant dense<0x7F800000> : vector<64xf32>
    %124 = vector.multi_reduction <minimumf>, %123, %cst_76 [1] : vector<64x64xf32> to vector<64xf32>
    %125 = vector.shape_cast %124 : vector<64xf32> to vector<64x1xf32>
    %126 = vector.broadcast %125 : vector<64x1xf32> to vector<64x64xf32>
    %127 = arith.cmpf ole, %123, %126 : vector<64x64xf32>
    %c64_i32_77 = arith.constant 64 : i32
    %128 = vector.broadcast %c64_i32_77 : i32 to vector<64x64xi32>
    %129 = arith.select %127, %19, %128 : vector<64x64xi1>, vector<64x64xi32>
    %cst_78 = arith.constant dense<2147483647> : vector<64xi32>
    %130 = vector.multi_reduction <minsi>, %129, %cst_78 [1] : vector<64x64xi32> to vector<64xi32>
    %131 = vector.shape_cast %130 : vector<64xi32> to vector<64x1xi32>
    %132 = vector.broadcast %131 : vector<64x1xi32> to vector<64x64xi32>
    %133 = arith.cmpi eq, %19, %132 : vector<64x64xi32>
    %134 = arith.extui %133 : vector<64x64xi1> to vector<64x64xi32>
    %135 = arith.sitofp %134 : vector<64x64xi32> to vector<64x64xf32>
    %136 = arith.truncf %135 : vector<64x64xf32> to vector<64x64xbf16>
    %c3_79 = arith.constant 3 : index
    %c0_80 = arith.constant 0 : index
    %c0_81 = arith.constant 0 : index
    %137 = vector.load %arg10[%c3_79, %c0_80, %c0_81] : memref<4x64x128xbf16, #tpu.memory_space<vmem>>, vector<1x64x128xbf16>
    %138 = vector.shape_cast %137 : vector<1x64x128xbf16> to vector<64x128xbf16>
    %cst_82 = arith.constant dense<0.000000e+00> : vector<64x128xf32>
    %139 = tpu.matmul %136, %138, %cst_82 {dimension_numbers = #tpu.dot_dimension_numbers<[1], [0], [0], [1], [0, 0, 1, 1], [], []>} : vector<64x64xbf16>, vector<64x128xbf16>, vector<64x128xf32> -> vector<64x128xf32>
    %140 = arith.addf %109, %139 : vector<64x128xf32>
    %c0_83 = arith.constant 0 : index
    %c0_84 = arith.constant 0 : index
    %c0_85 = arith.constant 0 : index
    %141 = vector.load %arg29[%c0_83, %c0_84, %c0_85] : memref<3x64x128xf32, #tpu.memory_space<vmem>>, vector<1x64x128xf32>
    %142 = vector.shape_cast %141 : vector<1x64x128xf32> to vector<64x128xf32>
    %143 = vector.shape_cast %140 : vector<64x128xf32> to vector<1x64x128xf32>
    tpu.vector_store %arg29[%c0_83, %c0_84, %c0_85], %143 {strides = array<i32>} : memref<3x64x128xf32, #tpu.memory_space<vmem>>, vector<1x64x128xf32>,
    %c0_86 = arith.constant 0 : index
    %c0_87 = arith.constant 0 : index
    %144 = vector.load %arg1[%c0_86, %c0_87] : memref<64x64xf32, #tpu.memory_space<vmem>>, vector<64x64xf32>
    %c0_88 = arith.constant 0 : index
    %c0_89 = arith.constant 0 : index
    %c0_90 = arith.constant 0 : index
    %145 = vector.load %arg11[%c0_88, %c0_89, %c0_90] : memref<2x1x128xf32, #tpu.memory_space<vmem>>, vector<1x1x128xf32>
    %146 = vector.shape_cast %145 : vector<1x1x128xf32> to vector<1x128xf32>
    %c0_91 = arith.constant 0 : index
    %c0_92 = arith.constant 0 : index
    %c0_93 = arith.constant 0 : index
    %147 = vector.load %arg12[%c0_91, %c0_92, %c0_93] : memref<2x1x128xf32, #tpu.memory_space<vmem>>, vector<1x1x128xf32>
    %148 = vector.shape_cast %147 : vector<1x1x128xf32> to vector<1x128xf32>
    %cst_94 = arith.constant dense<0.000000e+00> : vector<64xf32>
    %149 = vector.multi_reduction <add>, %140, %cst_94 [1] : vector<64x128xf32> to vector<64xf32>
    %150 = vector.shape_cast %149 : vector<64xf32> to vector<64x1xf32>
    %cst_95 = arith.constant 1.280000e+02 : f32
    %151 = vector.broadcast %cst_95 : f32 to vector<64x1xf32>
    %152 = arith.divf %150, %151 : vector<64x1xf32>
    %153 = vector.broadcast %152 : vector<64x1xf32> to vector<64x128xf32>
    %154 = arith.subf %140, %153 : vector<64x128xf32>
    %155 = arith.mulf %154, %154 : vector<64x128xf32>
    %cst_96 = arith.constant dense<0.000000e+00> : vector<64xf32>
    %156 = vector.multi_reduction <add>, %155, %cst_96 [1] : vector<64x128xf32> to vector<64xf32>
    %157 = vector.shape_cast %156 : vector<64xf32> to vector<64x1xf32>
    %cst_97 = arith.constant 1.280000e+02 : f32
    %158 = vector.broadcast %cst_97 : f32 to vector<64x1xf32>
    %159 = arith.divf %157, %158 : vector<64x1xf32>
    %160 = vector.broadcast %152 : vector<64x1xf32> to vector<64x128xf32>
    %161 = arith.subf %140, %160 : vector<64x128xf32>
    %cst_98 = arith.constant 9.99999974E-6 : f32
    %162 = vector.broadcast %cst_98 : f32 to vector<64x1xf32>
    %163 = arith.addf %159, %162 : vector<64x1xf32>
    %164 = math.rsqrt %163 : vector<64x1xf32>
    %165 = vector.broadcast %164 : vector<64x1xf32> to vector<64x128xf32>
    %166 = arith.mulf %161, %165 : vector<64x128xf32>
    %167 = vector.broadcast %146 : vector<1x128xf32> to vector<64x128xf32>
    %168 = arith.mulf %166, %167 : vector<64x128xf32>
    %169 = vector.broadcast %148 : vector<1x128xf32> to vector<64x128xf32>
    %170 = arith.addf %168, %169 : vector<64x128xf32>
    %171 = arith.truncf %170 : vector<64x128xf32> to vector<64x128xbf16>
    %cst_99 = arith.constant 0.000000e+00 : f32
    %172 = vector.broadcast %cst_99 : f32 to vector<64x128xf32>
    %c0_100 = arith.constant 0 : index
    %c0_101 = arith.constant 0 : index
    %c0_102 = arith.constant 0 : index
    %173 = vector.load %arg13[%c0_100, %c0_101, %c0_102] : memref<4x128x64xbf16, #tpu.memory_space<vmem>>, vector<1x128x64xbf16>
    %174 = vector.shape_cast %173 : vector<1x128x64xbf16> to vector<128x64xbf16>
    %cst_103 = arith.constant dense<0.000000e+00> : vector<64x64xf32>
    %175 = tpu.matmul %171, %174, %cst_103 {dimension_numbers = #tpu.dot_dimension_numbers<[1], [0], [0], [1], [0, 0, 1, 1], [], []>} : vector<64x128xbf16>, vector<128x64xbf16>, vector<64x64xf32> -> vector<64x64xf32>
    %c0_104 = arith.constant 0 : index
    %c0_105 = arith.constant 0 : index
    %c0_106 = arith.constant 0 : index
    %176 = vector.load %arg16[%c0_104, %c0_105, %c0_106] : memref<4x1x64xf32, #tpu.memory_space<vmem>>, vector<1x1x64xf32>
    %177 = vector.shape_cast %176 : vector<1x1x64xf32> to vector<1x64xf32>
    %178 = vector.broadcast %177 : vector<1x64xf32> to vector<64x64xf32>
    %179 = arith.addf %175, %178 : vector<64x64xf32>
    %c0_107 = arith.constant 0 : index
    %c0_108 = arith.constant 0 : index
    %c0_109 = arith.constant 0 : index
    %180 = vector.load %arg14[%c0_107, %c0_108, %c0_109] : memref<4x128x64xbf16, #tpu.memory_space<vmem>>, vector<1x128x64xbf16>
    %181 = vector.shape_cast %180 : vector<1x128x64xbf16> to vector<128x64xbf16>
    %cst_110 = arith.constant dense<0.000000e+00> : vector<64x64xf32>
    %182 = tpu.matmul %171, %181, %cst_110 {dimension_numbers = #tpu.dot_dimension_numbers<[1], [0], [0], [1], [0, 0, 1, 1], [], []>} : vector<64x128xbf16>, vector<128x64xbf16>, vector<64x64xf32> -> vector<64x64xf32>
    %c0_111 = arith.constant 0 : index
    %c0_112 = arith.constant 0 : index
    %c0_113 = arith.constant 0 : index
    %183 = vector.load %arg17[%c0_111, %c0_112, %c0_113] : memref<4x1x64xf32, #tpu.memory_space<vmem>>, vector<1x1x64xf32>
    %184 = vector.shape_cast %183 : vector<1x1x64xf32> to vector<1x64xf32>
    %185 = vector.broadcast %184 : vector<1x64xf32> to vector<64x64xf32>
    %186 = arith.addf %182, %185 : vector<64x64xf32>
    %c0_114 = arith.constant 0 : index
    %c0_115 = arith.constant 0 : index
    %c0_116 = arith.constant 0 : index
    %187 = vector.load %arg15[%c0_114, %c0_115, %c0_116] : memref<4x128x64xbf16, #tpu.memory_space<vmem>>, vector<1x128x64xbf16>
    %188 = vector.shape_cast %187 : vector<1x128x64xbf16> to vector<128x64xbf16>
    %cst_117 = arith.constant dense<0.000000e+00> : vector<64x64xf32>
    %189 = tpu.matmul %171, %188, %cst_117 {dimension_numbers = #tpu.dot_dimension_numbers<[1], [0], [0], [1], [0, 0, 1, 1], [], []>} : vector<64x128xbf16>, vector<128x64xbf16>, vector<64x64xf32> -> vector<64x64xf32>
    %c0_118 = arith.constant 0 : index
    %c0_119 = arith.constant 0 : index
    %c0_120 = arith.constant 0 : index
    %190 = vector.load %arg18[%c0_118, %c0_119, %c0_120] : memref<4x1x64xf32, #tpu.memory_space<vmem>>, vector<1x1x64xf32>
    %191 = vector.shape_cast %190 : vector<1x1x64xf32> to vector<1x64xf32>
    %192 = vector.broadcast %191 : vector<1x64xf32> to vector<64x64xf32>
    %193 = arith.addf %189, %192 : vector<64x64xf32>
    %194 = arith.truncf %179 : vector<64x64xf32> to vector<64x64xbf16>
    %195 = arith.truncf %186 : vector<64x64xf32> to vector<64x64xbf16>
    %cst_121 = arith.constant dense<0.000000e+00> : vector<64x64xf32>
    %196 = tpu.matmul %194, %195, %cst_121 {dimension_numbers = #tpu.dot_dimension_numbers<[1], [1], [0], [0], [0, 0, 1, 0], [], []>} : vector<64x64xbf16>, vector<64x64xbf16>, vector<64x64xf32> -> vector<64x64xf32>
    %cst_122 = arith.constant 1.250000e-01 : f32
    %197 = vector.broadcast %cst_122 : f32 to vector<64x64xf32>
    %198 = arith.mulf %196, %197 : vector<64x64xf32>
    %199 = arith.addf %198, %144 : vector<64x64xf32>
    %cst_123 = arith.constant dense<0xFF800000> : vector<64xf32>
    %200 = vector.multi_reduction <maximumf>, %199, %cst_123 [1] : vector<64x64xf32> to vector<64xf32>
    %201 = vector.shape_cast %200 : vector<64xf32> to vector<64x1xf32>
    %202 = vector.broadcast %201 : vector<64x1xf32> to vector<64x64xf32>
    %203 = arith.subf %199, %202 : vector<64x64xf32>
    %204 = math.exp %203 : vector<64x64xf32>
    %cst_124 = arith.constant dense<0.000000e+00> : vector<64xf32>
    %205 = vector.multi_reduction <add>, %204, %cst_124 [1] : vector<64x64xf32> to vector<64xf32>
    %206 = vector.shape_cast %205 : vector<64xf32> to vector<64x1xf32>
    %207 = vector.broadcast %206 : vector<64x1xf32> to vector<64x64xf32>
    %208 = arith.divf %204, %207 : vector<64x64xf32>
    %209 = arith.truncf %208 : vector<64x64xf32> to vector<64x64xbf16>
    %210 = arith.truncf %193 : vector<64x64xf32> to vector<64x64xbf16>
    %cst_125 = arith.constant dense<0.000000e+00> : vector<64x64xf32>
    %211 = tpu.matmul %209, %210, %cst_125 {dimension_numbers = #tpu.dot_dimension_numbers<[1], [0], [0], [1], [0, 0, 1, 1], [], []>} : vector<64x64xbf16>, vector<64x64xbf16>, vector<64x64xf32> -> vector<64x64xf32>
    %212 = arith.truncf %211 : vector<64x64xf32> to vector<64x64xbf16>
    %c0_126 = arith.constant 0 : index
    %c0_127 = arith.constant 0 : index
    %c0_128 = arith.constant 0 : index
    %213 = vector.load %arg19[%c0_126, %c0_127, %c0_128] : memref<4x64x128xbf16, #tpu.memory_space<vmem>>, vector<1x64x128xbf16>
    %214 = vector.shape_cast %213 : vector<1x64x128xbf16> to vector<64x128xbf16>
    %cst_129 = arith.constant dense<0.000000e+00> : vector<64x128xf32>
    %215 = tpu.matmul %212, %214, %cst_129 {dimension_numbers = #tpu.dot_dimension_numbers<[1], [0], [0], [1], [0, 0, 1, 1], [], []>} : vector<64x64xbf16>, vector<64x128xbf16>, vector<64x128xf32> -> vector<64x128xf32>
    %216 = arith.addf %172, %215 : vector<64x128xf32>
    %c1_130 = arith.constant 1 : index
    %c0_131 = arith.constant 0 : index
    %c0_132 = arith.constant 0 : index
    %217 = vector.load %arg13[%c1_130, %c0_131, %c0_132] : memref<4x128x64xbf16, #tpu.memory_space<vmem>>, vector<1x128x64xbf16>
    %218 = vector.shape_cast %217 : vector<1x128x64xbf16> to vector<128x64xbf16>
    %cst_133 = arith.constant dense<0.000000e+00> : vector<64x64xf32>
    %219 = tpu.matmul %171, %218, %cst_133 {dimension_numbers = #tpu.dot_dimension_numbers<[1], [0], [0], [1], [0, 0, 1, 1], [], []>} : vector<64x128xbf16>, vector<128x64xbf16>, vector<64x64xf32> -> vector<64x64xf32>
    %c1_134 = arith.constant 1 : index
    %c0_135 = arith.constant 0 : index
    %c0_136 = arith.constant 0 : index
    %220 = vector.load %arg16[%c1_134, %c0_135, %c0_136] : memref<4x1x64xf32, #tpu.memory_space<vmem>>, vector<1x1x64xf32>
    %221 = vector.shape_cast %220 : vector<1x1x64xf32> to vector<1x64xf32>
    %222 = vector.broadcast %221 : vector<1x64xf32> to vector<64x64xf32>
    %223 = arith.addf %219, %222 : vector<64x64xf32>
    %c1_137 = arith.constant 1 : index
    %c0_138 = arith.constant 0 : index
    %c0_139 = arith.constant 0 : index
    %224 = vector.load %arg14[%c1_137, %c0_138, %c0_139] : memref<4x128x64xbf16, #tpu.memory_space<vmem>>, vector<1x128x64xbf16>
    %225 = vector.shape_cast %224 : vector<1x128x64xbf16> to vector<128x64xbf16>
    %cst_140 = arith.constant dense<0.000000e+00> : vector<64x64xf32>
    %226 = tpu.matmul %171, %225, %cst_140 {dimension_numbers = #tpu.dot_dimension_numbers<[1], [0], [0], [1], [0, 0, 1, 1], [], []>} : vector<64x128xbf16>, vector<128x64xbf16>, vector<64x64xf32> -> vector<64x64xf32>
    %c1_141 = arith.constant 1 : index
    %c0_142 = arith.constant 0 : index
    %c0_143 = arith.constant 0 : index
    %227 = vector.load %arg17[%c1_141, %c0_142, %c0_143] : memref<4x1x64xf32, #tpu.memory_space<vmem>>, vector<1x1x64xf32>
    %228 = vector.shape_cast %227 : vector<1x1x64xf32> to vector<1x64xf32>
    %229 = vector.broadcast %228 : vector<1x64xf32> to vector<64x64xf32>
    %230 = arith.addf %226, %229 : vector<64x64xf32>
    %c1_144 = arith.constant 1 : index
    %c0_145 = arith.constant 0 : index
    %c0_146 = arith.constant 0 : index
    %231 = vector.load %arg15[%c1_144, %c0_145, %c0_146] : memref<4x128x64xbf16, #tpu.memory_space<vmem>>, vector<1x128x64xbf16>
    %232 = vector.shape_cast %231 : vector<1x128x64xbf16> to vector<128x64xbf16>
    %cst_147 = arith.constant dense<0.000000e+00> : vector<64x64xf32>
    %233 = tpu.matmul %171, %232, %cst_147 {dimension_numbers = #tpu.dot_dimension_numbers<[1], [0], [0], [1], [0, 0, 1, 1], [], []>} : vector<64x128xbf16>, vector<128x64xbf16>, vector<64x64xf32> -> vector<64x64xf32>
    %c1_148 = arith.constant 1 : index
    %c0_149 = arith.constant 0 : index
    %c0_150 = arith.constant 0 : index
    %234 = vector.load %arg18[%c1_148, %c0_149, %c0_150] : memref<4x1x64xf32, #tpu.memory_space<vmem>>, vector<1x1x64xf32>
    %235 = vector.shape_cast %234 : vector<1x1x64xf32> to vector<1x64xf32>
    %236 = vector.broadcast %235 : vector<1x64xf32> to vector<64x64xf32>
    %237 = arith.addf %233, %236 : vector<64x64xf32>
    %238 = arith.truncf %223 : vector<64x64xf32> to vector<64x64xbf16>
    %239 = arith.truncf %230 : vector<64x64xf32> to vector<64x64xbf16>
    %cst_151 = arith.constant dense<0.000000e+00> : vector<64x64xf32>
    %240 = tpu.matmul %238, %239, %cst_151 {dimension_numbers = #tpu.dot_dimension_numbers<[1], [1], [0], [0], [0, 0, 1, 0], [], []>} : vector<64x64xbf16>, vector<64x64xbf16>, vector<64x64xf32> -> vector<64x64xf32>
    %cst_152 = arith.constant 1.250000e-01 : f32
    %241 = vector.broadcast %cst_152 : f32 to vector<64x64xf32>
    %242 = arith.mulf %240, %241 : vector<64x64xf32>
    %243 = arith.addf %242, %144 : vector<64x64xf32>
    %cst_153 = arith.constant dense<0xFF800000> : vector<64xf32>
    %244 = vector.multi_reduction <maximumf>, %243, %cst_153 [1] : vector<64x64xf32> to vector<64xf32>
    %245 = vector.shape_cast %244 : vector<64xf32> to vector<64x1xf32>
    %246 = vector.broadcast %245 : vector<64x1xf32> to vector<64x64xf32>
    %247 = arith.subf %243, %246 : vector<64x64xf32>
    %248 = math.exp %247 : vector<64x64xf32>
    %cst_154 = arith.constant dense<0.000000e+00> : vector<64xf32>
    %249 = vector.multi_reduction <add>, %248, %cst_154 [1] : vector<64x64xf32> to vector<64xf32>
    %250 = vector.shape_cast %249 : vector<64xf32> to vector<64x1xf32>
    %251 = vector.broadcast %250 : vector<64x1xf32> to vector<64x64xf32>
    %252 = arith.divf %248, %251 : vector<64x64xf32>
    %253 = arith.truncf %252 : vector<64x64xf32> to vector<64x64xbf16>
    %254 = arith.truncf %237 : vector<64x64xf32> to vector<64x64xbf16>
    %cst_155 = arith.constant dense<0.000000e+00> : vector<64x64xf32>
    %255 = tpu.matmul %253, %254, %cst_155 {dimension_numbers = #tpu.dot_dimension_numbers<[1], [0], [0], [1], [0, 0, 1, 1], [], []>} : vector<64x64xbf16>, vector<64x64xbf16>, vector<64x64xf32> -> vector<64x64xf32>
    %256 = arith.truncf %255 : vector<64x64xf32> to vector<64x64xbf16>
    %c1_156 = arith.constant 1 : index
    %c0_157 = arith.constant 0 : index
    %c0_158 = arith.constant 0 : index
    %257 = vector.load %arg19[%c1_156, %c0_157, %c0_158] : memref<4x64x128xbf16, #tpu.memory_space<vmem>>, vector<1x64x128xbf16>
    %258 = vector.shape_cast %257 : vector<1x64x128xbf16> to vector<64x128xbf16>
    %cst_159 = arith.constant dense<0.000000e+00> : vector<64x128xf32>
    %259 = tpu.matmul %256, %258, %cst_159 {dimension_numbers = #tpu.dot_dimension_numbers<[1], [0], [0], [1], [0, 0, 1, 1], [], []>} : vector<64x64xbf16>, vector<64x128xbf16>, vector<64x128xf32> -> vector<64x128xf32>
    %260 = arith.addf %216, %259 : vector<64x128xf32>
    %261 = arith.addf %140, %260 : vector<64x128xf32>
    %c0_160 = arith.constant 0 : index
    %c0_161 = arith.constant 0 : index
    %c0_162 = arith.constant 0 : index
    %262 = vector.load %arg20[%c0_160, %c0_161, %c0_162] : memref<2x1x128xf32, #tpu.memory_space<vmem>>, vector<1x1x128xf32>
    %263 = vector.shape_cast %262 : vector<1x1x128xf32> to vector<1x128xf32>
    %264 = vector.broadcast %263 : vector<1x128xf32> to vector<64x128xf32>
    %265 = arith.addf %261, %264 : vector<64x128xf32>
    %c0_163 = arith.constant 0 : index
    %c0_164 = arith.constant 0 : index
    %c0_165 = arith.constant 0 : index
    %266 = vector.load %arg21[%c0_163, %c0_164, %c0_165] : memref<2x1x128xf32, #tpu.memory_space<vmem>>, vector<1x1x128xf32>
    %267 = vector.shape_cast %266 : vector<1x1x128xf32> to vector<1x128xf32>
    %c0_166 = arith.constant 0 : index
    %c0_167 = arith.constant 0 : index
    %c0_168 = arith.constant 0 : index
    %268 = vector.load %arg22[%c0_166, %c0_167, %c0_168] : memref<2x1x128xf32, #tpu.memory_space<vmem>>, vector<1x1x128xf32>
    %269 = vector.shape_cast %268 : vector<1x1x128xf32> to vector<1x128xf32>
    %cst_169 = arith.constant dense<0.000000e+00> : vector<64xf32>
    %270 = vector.multi_reduction <add>, %265, %cst_169 [1] : vector<64x128xf32> to vector<64xf32>
    %271 = vector.shape_cast %270 : vector<64xf32> to vector<64x1xf32>
    %cst_170 = arith.constant 1.280000e+02 : f32
    %272 = vector.broadcast %cst_170 : f32 to vector<64x1xf32>
    %273 = arith.divf %271, %272 : vector<64x1xf32>
    %274 = vector.broadcast %273 : vector<64x1xf32> to vector<64x128xf32>
    %275 = arith.subf %265, %274 : vector<64x128xf32>
    %276 = arith.mulf %275, %275 : vector<64x128xf32>
    %cst_171 = arith.constant dense<0.000000e+00> : vector<64xf32>
    %277 = vector.multi_reduction <add>, %276, %cst_171 [1] : vector<64x128xf32> to vector<64xf32>
    %278 = vector.shape_cast %277 : vector<64xf32> to vector<64x1xf32>
    %cst_172 = arith.constant 1.280000e+02 : f32
    %279 = vector.broadcast %cst_172 : f32 to vector<64x1xf32>
    %280 = arith.divf %278, %279 : vector<64x1xf32>
    %281 = vector.broadcast %273 : vector<64x1xf32> to vector<64x128xf32>
    %282 = arith.subf %265, %281 : vector<64x128xf32>
    %cst_173 = arith.constant 9.99999974E-6 : f32
    %283 = vector.broadcast %cst_173 : f32 to vector<64x1xf32>
    %284 = arith.addf %280, %283 : vector<64x1xf32>
    %285 = math.rsqrt %284 : vector<64x1xf32>
    %286 = vector.broadcast %285 : vector<64x1xf32> to vector<64x128xf32>
    %287 = arith.mulf %282, %286 : vector<64x128xf32>
    %288 = vector.broadcast %267 : vector<1x128xf32> to vector<64x128xf32>
    %289 = arith.mulf %287, %288 : vector<64x128xf32>
    %290 = vector.broadcast %269 : vector<1x128xf32> to vector<64x128xf32>
    %291 = arith.addf %289, %290 : vector<64x128xf32>
    %292 = arith.truncf %291 : vector<64x128xf32> to vector<64x128xbf16>
    %c0_174 = arith.constant 0 : index
    %c0_175 = arith.constant 0 : index
    %c0_176 = arith.constant 0 : index
    %293 = vector.load %arg23[%c0_174, %c0_175, %c0_176] : memref<2x128x256xbf16, #tpu.memory_space<vmem>>, vector<1x128x256xbf16>
    %294 = vector.shape_cast %293 : vector<1x128x256xbf16> to vector<128x256xbf16>
    %cst_177 = arith.constant dense<0.000000e+00> : vector<64x256xf32>
    %295 = tpu.matmul %292, %294, %cst_177 {dimension_numbers = #tpu.dot_dimension_numbers<[1], [0], [0], [1], [0, 0, 1, 1], [], []>} : vector<64x128xbf16>, vector<128x256xbf16>, vector<64x256xf32> -> vector<64x256xf32>
    %c0_178 = arith.constant 0 : index
    %c0_179 = arith.constant 0 : index
    %c0_180 = arith.constant 0 : index
    %296 = vector.load %arg24[%c0_178, %c0_179, %c0_180] : memref<2x1x256xf32, #tpu.memory_space<vmem>>, vector<1x1x256xf32>
    %297 = vector.shape_cast %296 : vector<1x1x256xf32> to vector<1x256xf32>
    %298 = vector.broadcast %297 : vector<1x256xf32> to vector<64x256xf32>
    %299 = arith.addf %295, %298 : vector<64x256xf32>
    %300 = arith.mulf %299, %299 : vector<64x256xf32>
    %301 = arith.mulf %299, %300 : vector<64x256xf32>
    %cst_181 = arith.constant 4.471500e-02 : f32
    %302 = vector.broadcast %cst_181 : f32 to vector<64x256xf32>
    %303 = arith.mulf %302, %301 : vector<64x256xf32>
    %304 = arith.addf %299, %303 : vector<64x256xf32>
    %cst_182 = arith.constant 0.797884583 : f32
    %305 = vector.broadcast %cst_182 : f32 to vector<64x256xf32>
    %306 = arith.mulf %305, %304 : vector<64x256xf32>
    %307 = math.tanh %306 : vector<64x256xf32>
    %cst_183 = arith.constant 1.000000e+00 : f32
    %308 = vector.broadcast %cst_183 : f32 to vector<64x256xf32>
    %309 = arith.addf %308, %307 : vector<64x256xf32>
    %cst_184 = arith.constant 5.000000e-01 : f32
    %310 = vector.broadcast %cst_184 : f32 to vector<64x256xf32>
    %311 = arith.mulf %310, %309 : vector<64x256xf32>
    %312 = arith.mulf %299, %311 : vector<64x256xf32>
    %313 = arith.truncf %312 : vector<64x256xf32> to vector<64x256xbf16>
    %c0_185 = arith.constant 0 : index
    %c0_186 = arith.constant 0 : index
    %c0_187 = arith.constant 0 : index
    %314 = vector.load %arg25[%c0_185, %c0_186, %c0_187] : memref<2x256x128xbf16, #tpu.memory_space<vmem>>, vector<1x256x128xbf16>
    %315 = vector.shape_cast %314 : vector<1x256x128xbf16> to vector<256x128xbf16>
    %cst_188 = arith.constant dense<0.000000e+00> : vector<64x128xf32>
    %316 = tpu.matmul %313, %315, %cst_188 {dimension_numbers = #tpu.dot_dimension_numbers<[1], [0], [0], [1], [0, 0, 1, 1], [], []>} : vector<64x256xbf16>, vector<256x128xbf16>, vector<64x128xf32> -> vector<64x128xf32>
    %c0_189 = arith.constant 0 : index
    %c0_190 = arith.constant 0 : index
    %c0_191 = arith.constant 0 : index
    %317 = vector.load %arg26[%c0_189, %c0_190, %c0_191] : memref<2x1x128xf32, #tpu.memory_space<vmem>>, vector<1x1x128xf32>
    %318 = vector.shape_cast %317 : vector<1x1x128xf32> to vector<1x128xf32>
    %319 = vector.broadcast %318 : vector<1x128xf32> to vector<64x128xf32>
    %320 = arith.addf %316, %319 : vector<64x128xf32>
    %321 = arith.addf %265, %320 : vector<64x128xf32>
    %c1_192 = arith.constant 1 : index
    %c0_193 = arith.constant 0 : index
    %c0_194 = arith.constant 0 : index
    %322 = vector.load %arg29[%c1_192, %c0_193, %c0_194] : memref<3x64x128xf32, #tpu.memory_space<vmem>>, vector<1x64x128xf32>
    %323 = vector.shape_cast %322 : vector<1x64x128xf32> to vector<64x128xf32>
    %324 = vector.shape_cast %321 : vector<64x128xf32> to vector<1x64x128xf32>
    tpu.vector_store %arg29[%c1_192, %c0_193, %c0_194], %324 {strides = array<i32>} : memref<3x64x128xf32, #tpu.memory_space<vmem>>, vector<1x64x128xf32>,
    %c1_195 = arith.constant 1 : index
    %c0_196 = arith.constant 0 : index
    %c0_197 = arith.constant 0 : index
    %325 = vector.load %arg11[%c1_195, %c0_196, %c0_197] : memref<2x1x128xf32, #tpu.memory_space<vmem>>, vector<1x1x128xf32>
    %326 = vector.shape_cast %325 : vector<1x1x128xf32> to vector<1x128xf32>
    %c1_198 = arith.constant 1 : index
    %c0_199 = arith.constant 0 : index
    %c0_200 = arith.constant 0 : index
    %327 = vector.load %arg12[%c1_198, %c0_199, %c0_200] : memref<2x1x128xf32, #tpu.memory_space<vmem>>, vector<1x1x128xf32>
    %328 = vector.shape_cast %327 : vector<1x1x128xf32> to vector<1x128xf32>
    %cst_201 = arith.constant dense<0.000000e+00> : vector<64xf32>
    %329 = vector.multi_reduction <add>, %321, %cst_201 [1] : vector<64x128xf32> to vector<64xf32>
    %330 = vector.shape_cast %329 : vector<64xf32> to vector<64x1xf32>
    %cst_202 = arith.constant 1.280000e+02 : f32
    %331 = vector.broadcast %cst_202 : f32 to vector<64x1xf32>
    %332 = arith.divf %330, %331 : vector<64x1xf32>
    %333 = vector.broadcast %332 : vector<64x1xf32> to vector<64x128xf32>
    %334 = arith.subf %321, %333 : vector<64x128xf32>
    %335 = arith.mulf %334, %334 : vector<64x128xf32>
    %cst_203 = arith.constant dense<0.000000e+00> : vector<64xf32>
    %336 = vector.multi_reduction <add>, %335, %cst_203 [1] : vector<64x128xf32> to vector<64xf32>
    %337 = vector.shape_cast %336 : vector<64xf32> to vector<64x1xf32>
    %cst_204 = arith.constant 1.280000e+02 : f32
    %338 = vector.broadcast %cst_204 : f32 to vector<64x1xf32>
    %339 = arith.divf %337, %338 : vector<64x1xf32>
    %340 = vector.broadcast %332 : vector<64x1xf32> to vector<64x128xf32>
    %341 = arith.subf %321, %340 : vector<64x128xf32>
    %cst_205 = arith.constant 9.99999974E-6 : f32
    %342 = vector.broadcast %cst_205 : f32 to vector<64x1xf32>
    %343 = arith.addf %339, %342 : vector<64x1xf32>
    %344 = math.rsqrt %343 : vector<64x1xf32>
    %345 = vector.broadcast %344 : vector<64x1xf32> to vector<64x128xf32>
    %346 = arith.mulf %341, %345 : vector<64x128xf32>
    %347 = vector.broadcast %326 : vector<1x128xf32> to vector<64x128xf32>
    %348 = arith.mulf %346, %347 : vector<64x128xf32>
    %349 = vector.broadcast %328 : vector<1x128xf32> to vector<64x128xf32>
    %350 = arith.addf %348, %349 : vector<64x128xf32>
    %351 = arith.truncf %350 : vector<64x128xf32> to vector<64x128xbf16>
    %cst_206 = arith.constant 0.000000e+00 : f32
    %352 = vector.broadcast %cst_206 : f32 to vector<64x128xf32>
    %c2_207 = arith.constant 2 : index
    %c0_208 = arith.constant 0 : index
    %c0_209 = arith.constant 0 : index
    %353 = vector.load %arg13[%c2_207, %c0_208, %c0_209] : memref<4x128x64xbf16, #tpu.memory_space<vmem>>, vector<1x128x64xbf16>
    %354 = vector.shape_cast %353 : vector<1x128x64xbf16> to vector<128x64xbf16>
    %cst_210 = arith.constant dense<0.000000e+00> : vector<64x64xf32>
    %355 = tpu.matmul %351, %354, %cst_210 {dimension_numbers = #tpu.dot_dimension_numbers<[1], [0], [0], [1], [0, 0, 1, 1], [], []>} : vector<64x128xbf16>, vector<128x64xbf16>, vector<64x64xf32> -> vector<64x64xf32>
    %c2_211 = arith.constant 2 : index
    %c0_212 = arith.constant 0 : index
    %c0_213 = arith.constant 0 : index
    %356 = vector.load %arg16[%c2_211, %c0_212, %c0_213] : memref<4x1x64xf32, #tpu.memory_space<vmem>>, vector<1x1x64xf32>
    %357 = vector.shape_cast %356 : vector<1x1x64xf32> to vector<1x64xf32>
    %358 = vector.broadcast %357 : vector<1x64xf32> to vector<64x64xf32>
    %359 = arith.addf %355, %358 : vector<64x64xf32>
    %c2_214 = arith.constant 2 : index
    %c0_215 = arith.constant 0 : index
    %c0_216 = arith.constant 0 : index
    %360 = vector.load %arg14[%c2_214, %c0_215, %c0_216] : memref<4x128x64xbf16, #tpu.memory_space<vmem>>, vector<1x128x64xbf16>
    %361 = vector.shape_cast %360 : vector<1x128x64xbf16> to vector<128x64xbf16>
    %cst_217 = arith.constant dense<0.000000e+00> : vector<64x64xf32>
    %362 = tpu.matmul %351, %361, %cst_217 {dimension_numbers = #tpu.dot_dimension_numbers<[1], [0], [0], [1], [0, 0, 1, 1], [], []>} : vector<64x128xbf16>, vector<128x64xbf16>, vector<64x64xf32> -> vector<64x64xf32>
    %c2_218 = arith.constant 2 : index
    %c0_219 = arith.constant 0 : index
    %c0_220 = arith.constant 0 : index
    %363 = vector.load %arg17[%c2_218, %c0_219, %c0_220] : memref<4x1x64xf32, #tpu.memory_space<vmem>>, vector<1x1x64xf32>
    %364 = vector.shape_cast %363 : vector<1x1x64xf32> to vector<1x64xf32>
    %365 = vector.broadcast %364 : vector<1x64xf32> to vector<64x64xf32>
    %366 = arith.addf %362, %365 : vector<64x64xf32>
    %c2_221 = arith.constant 2 : index
    %c0_222 = arith.constant 0 : index
    %c0_223 = arith.constant 0 : index
    %367 = vector.load %arg15[%c2_221, %c0_222, %c0_223] : memref<4x128x64xbf16, #tpu.memory_space<vmem>>, vector<1x128x64xbf16>
    %368 = vector.shape_cast %367 : vector<1x128x64xbf16> to vector<128x64xbf16>
    %cst_224 = arith.constant dense<0.000000e+00> : vector<64x64xf32>
    %369 = tpu.matmul %351, %368, %cst_224 {dimension_numbers = #tpu.dot_dimension_numbers<[1], [0], [0], [1], [0, 0, 1, 1], [], []>} : vector<64x128xbf16>, vector<128x64xbf16>, vector<64x64xf32> -> vector<64x64xf32>
    %c2_225 = arith.constant 2 : index
    %c0_226 = arith.constant 0 : index
    %c0_227 = arith.constant 0 : index
    %370 = vector.load %arg18[%c2_225, %c0_226, %c0_227] : memref<4x1x64xf32, #tpu.memory_space<vmem>>, vector<1x1x64xf32>
    %371 = vector.shape_cast %370 : vector<1x1x64xf32> to vector<1x64xf32>
    %372 = vector.broadcast %371 : vector<1x64xf32> to vector<64x64xf32>
    %373 = arith.addf %369, %372 : vector<64x64xf32>
    %374 = arith.truncf %359 : vector<64x64xf32> to vector<64x64xbf16>
    %375 = arith.truncf %366 : vector<64x64xf32> to vector<64x64xbf16>
    %cst_228 = arith.constant dense<0.000000e+00> : vector<64x64xf32>
    %376 = tpu.matmul %374, %375, %cst_228 {dimension_numbers = #tpu.dot_dimension_numbers<[1], [1], [0], [0], [0, 0, 1, 0], [], []>} : vector<64x64xbf16>, vector<64x64xbf16>, vector<64x64xf32> -> vector<64x64xf32>
    %cst_229 = arith.constant 1.250000e-01 : f32
    %377 = vector.broadcast %cst_229 : f32 to vector<64x64xf32>
    %378 = arith.mulf %376, %377 : vector<64x64xf32>
    %379 = arith.addf %378, %144 : vector<64x64xf32>
    %cst_230 = arith.constant dense<0xFF800000> : vector<64xf32>
    %380 = vector.multi_reduction <maximumf>, %379, %cst_230 [1] : vector<64x64xf32> to vector<64xf32>
    %381 = vector.shape_cast %380 : vector<64xf32> to vector<64x1xf32>
    %382 = vector.broadcast %381 : vector<64x1xf32> to vector<64x64xf32>
    %383 = arith.subf %379, %382 : vector<64x64xf32>
    %384 = math.exp %383 : vector<64x64xf32>
    %cst_231 = arith.constant dense<0.000000e+00> : vector<64xf32>
    %385 = vector.multi_reduction <add>, %384, %cst_231 [1] : vector<64x64xf32> to vector<64xf32>
    %386 = vector.shape_cast %385 : vector<64xf32> to vector<64x1xf32>
    %387 = vector.broadcast %386 : vector<64x1xf32> to vector<64x64xf32>
    %388 = arith.divf %384, %387 : vector<64x64xf32>
    %389 = arith.truncf %388 : vector<64x64xf32> to vector<64x64xbf16>
    %390 = arith.truncf %373 : vector<64x64xf32> to vector<64x64xbf16>
    %cst_232 = arith.constant dense<0.000000e+00> : vector<64x64xf32>
    %391 = tpu.matmul %389, %390, %cst_232 {dimension_numbers = #tpu.dot_dimension_numbers<[1], [0], [0], [1], [0, 0, 1, 1], [], []>} : vector<64x64xbf16>, vector<64x64xbf16>, vector<64x64xf32> -> vector<64x64xf32>
    %392 = arith.truncf %391 : vector<64x64xf32> to vector<64x64xbf16>
    %c2_233 = arith.constant 2 : index
    %c0_234 = arith.constant 0 : index
    %c0_235 = arith.constant 0 : index
    %393 = vector.load %arg19[%c2_233, %c0_234, %c0_235] : memref<4x64x128xbf16, #tpu.memory_space<vmem>>, vector<1x64x128xbf16>
    %394 = vector.shape_cast %393 : vector<1x64x128xbf16> to vector<64x128xbf16>
    %cst_236 = arith.constant dense<0.000000e+00> : vector<64x128xf32>
    %395 = tpu.matmul %392, %394, %cst_236 {dimension_numbers = #tpu.dot_dimension_numbers<[1], [0], [0], [1], [0, 0, 1, 1], [], []>} : vector<64x64xbf16>, vector<64x128xbf16>, vector<64x128xf32> -> vector<64x128xf32>
    %396 = arith.addf %352, %395 : vector<64x128xf32>
    %c3_237 = arith.constant 3 : index
    %c0_238 = arith.constant 0 : index
    %c0_239 = arith.constant 0 : index
    %397 = vector.load %arg13[%c3_237, %c0_238, %c0_239] : memref<4x128x64xbf16, #tpu.memory_space<vmem>>, vector<1x128x64xbf16>
    %398 = vector.shape_cast %397 : vector<1x128x64xbf16> to vector<128x64xbf16>
    %cst_240 = arith.constant dense<0.000000e+00> : vector<64x64xf32>
    %399 = tpu.matmul %351, %398, %cst_240 {dimension_numbers = #tpu.dot_dimension_numbers<[1], [0], [0], [1], [0, 0, 1, 1], [], []>} : vector<64x128xbf16>, vector<128x64xbf16>, vector<64x64xf32> -> vector<64x64xf32>
    %c3_241 = arith.constant 3 : index
    %c0_242 = arith.constant 0 : index
    %c0_243 = arith.constant 0 : index
    %400 = vector.load %arg16[%c3_241, %c0_242, %c0_243] : memref<4x1x64xf32, #tpu.memory_space<vmem>>, vector<1x1x64xf32>
    %401 = vector.shape_cast %400 : vector<1x1x64xf32> to vector<1x64xf32>
    %402 = vector.broadcast %401 : vector<1x64xf32> to vector<64x64xf32>
    %403 = arith.addf %399, %402 : vector<64x64xf32>
    %c3_244 = arith.constant 3 : index
    %c0_245 = arith.constant 0 : index
    %c0_246 = arith.constant 0 : index
    %404 = vector.load %arg14[%c3_244, %c0_245, %c0_246] : memref<4x128x64xbf16, #tpu.memory_space<vmem>>, vector<1x128x64xbf16>
    %405 = vector.shape_cast %404 : vector<1x128x64xbf16> to vector<128x64xbf16>
    %cst_247 = arith.constant dense<0.000000e+00> : vector<64x64xf32>
    %406 = tpu.matmul %351, %405, %cst_247 {dimension_numbers = #tpu.dot_dimension_numbers<[1], [0], [0], [1], [0, 0, 1, 1], [], []>} : vector<64x128xbf16>, vector<128x64xbf16>, vector<64x64xf32> -> vector<64x64xf32>
    %c3_248 = arith.constant 3 : index
    %c0_249 = arith.constant 0 : index
    %c0_250 = arith.constant 0 : index
    %407 = vector.load %arg17[%c3_248, %c0_249, %c0_250] : memref<4x1x64xf32, #tpu.memory_space<vmem>>, vector<1x1x64xf32>
    %408 = vector.shape_cast %407 : vector<1x1x64xf32> to vector<1x64xf32>
    %409 = vector.broadcast %408 : vector<1x64xf32> to vector<64x64xf32>
    %410 = arith.addf %406, %409 : vector<64x64xf32>
    %c3_251 = arith.constant 3 : index
    %c0_252 = arith.constant 0 : index
    %c0_253 = arith.constant 0 : index
    %411 = vector.load %arg15[%c3_251, %c0_252, %c0_253] : memref<4x128x64xbf16, #tpu.memory_space<vmem>>, vector<1x128x64xbf16>
    %412 = vector.shape_cast %411 : vector<1x128x64xbf16> to vector<128x64xbf16>
    %cst_254 = arith.constant dense<0.000000e+00> : vector<64x64xf32>
    %413 = tpu.matmul %351, %412, %cst_254 {dimension_numbers = #tpu.dot_dimension_numbers<[1], [0], [0], [1], [0, 0, 1, 1], [], []>} : vector<64x128xbf16>, vector<128x64xbf16>, vector<64x64xf32> -> vector<64x64xf32>
    %c3_255 = arith.constant 3 : index
    %c0_256 = arith.constant 0 : index
    %c0_257 = arith.constant 0 : index
    %414 = vector.load %arg18[%c3_255, %c0_256, %c0_257] : memref<4x1x64xf32, #tpu.memory_space<vmem>>, vector<1x1x64xf32>
    %415 = vector.shape_cast %414 : vector<1x1x64xf32> to vector<1x64xf32>
    %416 = vector.broadcast %415 : vector<1x64xf32> to vector<64x64xf32>
    %417 = arith.addf %413, %416 : vector<64x64xf32>
    %418 = arith.truncf %403 : vector<64x64xf32> to vector<64x64xbf16>
    %419 = arith.truncf %410 : vector<64x64xf32> to vector<64x64xbf16>
    %cst_258 = arith.constant dense<0.000000e+00> : vector<64x64xf32>
    %420 = tpu.matmul %418, %419, %cst_258 {dimension_numbers = #tpu.dot_dimension_numbers<[1], [1], [0], [0], [0, 0, 1, 0], [], []>} : vector<64x64xbf16>, vector<64x64xbf16>, vector<64x64xf32> -> vector<64x64xf32>
    %cst_259 = arith.constant 1.250000e-01 : f32
    %421 = vector.broadcast %cst_259 : f32 to vector<64x64xf32>
    %422 = arith.mulf %420, %421 : vector<64x64xf32>
    %423 = arith.addf %422, %144 : vector<64x64xf32>
    %cst_260 = arith.constant dense<0xFF800000> : vector<64xf32>
    %424 = vector.multi_reduction <maximumf>, %423, %cst_260 [1] : vector<64x64xf32> to vector<64xf32>
    %425 = vector.shape_cast %424 : vector<64xf32> to vector<64x1xf32>
    %426 = vector.broadcast %425 : vector<64x1xf32> to vector<64x64xf32>
    %427 = arith.subf %423, %426 : vector<64x64xf32>
    %428 = math.exp %427 : vector<64x64xf32>
    %cst_261 = arith.constant dense<0.000000e+00> : vector<64xf32>
    %429 = vector.multi_reduction <add>, %428, %cst_261 [1] : vector<64x64xf32> to vector<64xf32>
    %430 = vector.shape_cast %429 : vector<64xf32> to vector<64x1xf32>
    %431 = vector.broadcast %430 : vector<64x1xf32> to vector<64x64xf32>
    %432 = arith.divf %428, %431 : vector<64x64xf32>
    %433 = arith.truncf %432 : vector<64x64xf32> to vector<64x64xbf16>
    %434 = arith.truncf %417 : vector<64x64xf32> to vector<64x64xbf16>
    %cst_262 = arith.constant dense<0.000000e+00> : vector<64x64xf32>
    %435 = tpu.matmul %433, %434, %cst_262 {dimension_numbers = #tpu.dot_dimension_numbers<[1], [0], [0], [1], [0, 0, 1, 1], [], []>} : vector<64x64xbf16>, vector<64x64xbf16>, vector<64x64xf32> -> vector<64x64xf32>
    %436 = arith.truncf %435 : vector<64x64xf32> to vector<64x64xbf16>
    %c3_263 = arith.constant 3 : index
    %c0_264 = arith.constant 0 : index
    %c0_265 = arith.constant 0 : index
    %437 = vector.load %arg19[%c3_263, %c0_264, %c0_265] : memref<4x64x128xbf16, #tpu.memory_space<vmem>>, vector<1x64x128xbf16>
    %438 = vector.shape_cast %437 : vector<1x64x128xbf16> to vector<64x128xbf16>
    %cst_266 = arith.constant dense<0.000000e+00> : vector<64x128xf32>
    %439 = tpu.matmul %436, %438, %cst_266 {dimension_numbers = #tpu.dot_dimension_numbers<[1], [0], [0], [1], [0, 0, 1, 1], [], []>} : vector<64x64xbf16>, vector<64x128xbf16>, vector<64x128xf32> -> vector<64x128xf32>
    %440 = arith.addf %396, %439 : vector<64x128xf32>
    %441 = arith.addf %321, %440 : vector<64x128xf32>
    %c1_267 = arith.constant 1 : index
    %c0_268 = arith.constant 0 : index
    %c0_269 = arith.constant 0 : index
    %442 = vector.load %arg20[%c1_267, %c0_268, %c0_269] : memref<2x1x128xf32, #tpu.memory_space<vmem>>, vector<1x1x128xf32>
    %443 = vector.shape_cast %442 : vector<1x1x128xf32> to vector<1x128xf32>
    %444 = vector.broadcast %443 : vector<1x128xf32> to vector<64x128xf32>
    %445 = arith.addf %441, %444 : vector<64x128xf32>
    %c1_270 = arith.constant 1 : index
    %c0_271 = arith.constant 0 : index
    %c0_272 = arith.constant 0 : index
    %446 = vector.load %arg21[%c1_270, %c0_271, %c0_272] : memref<2x1x128xf32, #tpu.memory_space<vmem>>, vector<1x1x128xf32>
    %447 = vector.shape_cast %446 : vector<1x1x128xf32> to vector<1x128xf32>
    %c1_273 = arith.constant 1 : index
    %c0_274 = arith.constant 0 : index
    %c0_275 = arith.constant 0 : index
    %448 = vector.load %arg22[%c1_273, %c0_274, %c0_275] : memref<2x1x128xf32, #tpu.memory_space<vmem>>, vector<1x1x128xf32>
    %449 = vector.shape_cast %448 : vector<1x1x128xf32> to vector<1x128xf32>
    %cst_276 = arith.constant dense<0.000000e+00> : vector<64xf32>
    %450 = vector.multi_reduction <add>, %445, %cst_276 [1] : vector<64x128xf32> to vector<64xf32>
    %451 = vector.shape_cast %450 : vector<64xf32> to vector<64x1xf32>
    %cst_277 = arith.constant 1.280000e+02 : f32
    %452 = vector.broadcast %cst_277 : f32 to vector<64x1xf32>
    %453 = arith.divf %451, %452 : vector<64x1xf32>
    %454 = vector.broadcast %453 : vector<64x1xf32> to vector<64x128xf32>
    %455 = arith.subf %445, %454 : vector<64x128xf32>
    %456 = arith.mulf %455, %455 : vector<64x128xf32>
    %cst_278 = arith.constant dense<0.000000e+00> : vector<64xf32>
    %457 = vector.multi_reduction <add>, %456, %cst_278 [1] : vector<64x128xf32> to vector<64xf32>
    %458 = vector.shape_cast %457 : vector<64xf32> to vector<64x1xf32>
    %cst_279 = arith.constant 1.280000e+02 : f32
    %459 = vector.broadcast %cst_279 : f32 to vector<64x1xf32>
    %460 = arith.divf %458, %459 : vector<64x1xf32>
    %461 = vector.broadcast %453 : vector<64x1xf32> to vector<64x128xf32>
    %462 = arith.subf %445, %461 : vector<64x128xf32>
    %cst_280 = arith.constant 9.99999974E-6 : f32
    %463 = vector.broadcast %cst_280 : f32 to vector<64x1xf32>
    %464 = arith.addf %460, %463 : vector<64x1xf32>
    %465 = math.rsqrt %464 : vector<64x1xf32>
    %466 = vector.broadcast %465 : vector<64x1xf32> to vector<64x128xf32>
    %467 = arith.mulf %462, %466 : vector<64x128xf32>
    %468 = vector.broadcast %447 : vector<1x128xf32> to vector<64x128xf32>
    %469 = arith.mulf %467, %468 : vector<64x128xf32>
    %470 = vector.broadcast %449 : vector<1x128xf32> to vector<64x128xf32>
    %471 = arith.addf %469, %470 : vector<64x128xf32>
    %472 = arith.truncf %471 : vector<64x128xf32> to vector<64x128xbf16>
    %c1_281 = arith.constant 1 : index
    %c0_282 = arith.constant 0 : index
    %c0_283 = arith.constant 0 : index
    %473 = vector.load %arg23[%c1_281, %c0_282, %c0_283] : memref<2x128x256xbf16, #tpu.memory_space<vmem>>, vector<1x128x256xbf16>
    %474 = vector.shape_cast %473 : vector<1x128x256xbf16> to vector<128x256xbf16>
    %cst_284 = arith.constant dense<0.000000e+00> : vector<64x256xf32>
    %475 = tpu.matmul %472, %474, %cst_284 {dimension_numbers = #tpu.dot_dimension_numbers<[1], [0], [0], [1], [0, 0, 1, 1], [], []>} : vector<64x128xbf16>, vector<128x256xbf16>, vector<64x256xf32> -> vector<64x256xf32>
    %c1_285 = arith.constant 1 : index
    %c0_286 = arith.constant 0 : index
    %c0_287 = arith.constant 0 : index
    %476 = vector.load %arg24[%c1_285, %c0_286, %c0_287] : memref<2x1x256xf32, #tpu.memory_space<vmem>>, vector<1x1x256xf32>
    %477 = vector.shape_cast %476 : vector<1x1x256xf32> to vector<1x256xf32>
    %478 = vector.broadcast %477 : vector<1x256xf32> to vector<64x256xf32>
    %479 = arith.addf %475, %478 : vector<64x256xf32>
    %480 = arith.mulf %479, %479 : vector<64x256xf32>
    %481 = arith.mulf %479, %480 : vector<64x256xf32>
    %cst_288 = arith.constant 4.471500e-02 : f32
    %482 = vector.broadcast %cst_288 : f32 to vector<64x256xf32>
    %483 = arith.mulf %482, %481 : vector<64x256xf32>
    %484 = arith.addf %479, %483 : vector<64x256xf32>
    %cst_289 = arith.constant 0.797884583 : f32
    %485 = vector.broadcast %cst_289 : f32 to vector<64x256xf32>
    %486 = arith.mulf %485, %484 : vector<64x256xf32>
    %487 = math.tanh %486 : vector<64x256xf32>
    %cst_290 = arith.constant 1.000000e+00 : f32
    %488 = vector.broadcast %cst_290 : f32 to vector<64x256xf32>
    %489 = arith.addf %488, %487 : vector<64x256xf32>
    %cst_291 = arith.constant 5.000000e-01 : f32
    %490 = vector.broadcast %cst_291 : f32 to vector<64x256xf32>
    %491 = arith.mulf %490, %489 : vector<64x256xf32>
    %492 = arith.mulf %479, %491 : vector<64x256xf32>
    %493 = arith.truncf %492 : vector<64x256xf32> to vector<64x256xbf16>
    %c1_292 = arith.constant 1 : index
    %c0_293 = arith.constant 0 : index
    %c0_294 = arith.constant 0 : index
    %494 = vector.load %arg25[%c1_292, %c0_293, %c0_294] : memref<2x256x128xbf16, #tpu.memory_space<vmem>>, vector<1x256x128xbf16>
    %495 = vector.shape_cast %494 : vector<1x256x128xbf16> to vector<256x128xbf16>
    %cst_295 = arith.constant dense<0.000000e+00> : vector<64x128xf32>
    %496 = tpu.matmul %493, %495, %cst_295 {dimension_numbers = #tpu.dot_dimension_numbers<[1], [0], [0], [1], [0, 0, 1, 1], [], []>} : vector<64x256xbf16>, vector<256x128xbf16>, vector<64x128xf32> -> vector<64x128xf32>
    %c1_296 = arith.constant 1 : index
    %c0_297 = arith.constant 0 : index
    %c0_298 = arith.constant 0 : index
    %497 = vector.load %arg26[%c1_296, %c0_297, %c0_298] : memref<2x1x128xf32, #tpu.memory_space<vmem>>, vector<1x1x128xf32>
    %498 = vector.shape_cast %497 : vector<1x1x128xf32> to vector<1x128xf32>
    %499 = vector.broadcast %498 : vector<1x128xf32> to vector<64x128xf32>
    %500 = arith.addf %496, %499 : vector<64x128xf32>
    %501 = arith.addf %445, %500 : vector<64x128xf32>
    %c0_299 = arith.constant 0 : index
    %c0_300 = arith.constant 0 : index
    %502 = vector.load %arg27[%c0_299, %c0_300] : memref<1x128xf32, #tpu.memory_space<vmem>>, vector<1x128xf32>
    %c0_301 = arith.constant 0 : index
    %c0_302 = arith.constant 0 : index
    %503 = vector.load %arg28[%c0_301, %c0_302] : memref<1x128xf32, #tpu.memory_space<vmem>>, vector<1x128xf32>
    %cst_303 = arith.constant dense<0.000000e+00> : vector<64xf32>
    %504 = vector.multi_reduction <add>, %501, %cst_303 [1] : vector<64x128xf32> to vector<64xf32>
    %505 = vector.shape_cast %504 : vector<64xf32> to vector<64x1xf32>
    %cst_304 = arith.constant 1.280000e+02 : f32
    %506 = vector.broadcast %cst_304 : f32 to vector<64x1xf32>
    %507 = arith.divf %505, %506 : vector<64x1xf32>
    %508 = vector.broadcast %507 : vector<64x1xf32> to vector<64x128xf32>
    %509 = arith.subf %501, %508 : vector<64x128xf32>
    %510 = arith.mulf %509, %509 : vector<64x128xf32>
    %cst_305 = arith.constant dense<0.000000e+00> : vector<64xf32>
    %511 = vector.multi_reduction <add>, %510, %cst_305 [1] : vector<64x128xf32> to vector<64xf32>
    %512 = vector.shape_cast %511 : vector<64xf32> to vector<64x1xf32>
    %cst_306 = arith.constant 1.280000e+02 : f32
    %513 = vector.broadcast %cst_306 : f32 to vector<64x1xf32>
    %514 = arith.divf %512, %513 : vector<64x1xf32>
    %515 = vector.broadcast %507 : vector<64x1xf32> to vector<64x128xf32>
    %516 = arith.subf %501, %515 : vector<64x128xf32>
    %cst_307 = arith.constant 9.99999974E-6 : f32
    %517 = vector.broadcast %cst_307 : f32 to vector<64x1xf32>
    %518 = arith.addf %514, %517 : vector<64x1xf32>
    %519 = math.rsqrt %518 : vector<64x1xf32>
    %520 = vector.broadcast %519 : vector<64x1xf32> to vector<64x128xf32>
    %521 = arith.mulf %516, %520 : vector<64x128xf32>
    %522 = vector.broadcast %502 : vector<1x128xf32> to vector<64x128xf32>
    %523 = arith.mulf %521, %522 : vector<64x128xf32>
    %524 = vector.broadcast %503 : vector<1x128xf32> to vector<64x128xf32>
    %525 = arith.addf %523, %524 : vector<64x128xf32>
    %c2_308 = arith.constant 2 : index
    %c0_309 = arith.constant 0 : index
    %c0_310 = arith.constant 0 : index
    %526 = vector.load %arg29[%c2_308, %c0_309, %c0_310] : memref<3x64x128xf32, #tpu.memory_space<vmem>>, vector<1x64x128xf32>
    %527 = vector.shape_cast %526 : vector<1x64x128xf32> to vector<64x128xf32>
    %528 = vector.shape_cast %525 : vector<64x128xf32> to vector<1x64x128xf32>
    tpu.vector_store %arg29[%c2_308, %c0_309, %c0_310], %528 {strides = array<i32>} : memref<3x64x128xf32, #tpu.memory_space<vmem>>, vector<1x64x128xf32>,
    return
  }
}

</mosaic_0001>

<bundles_post_ra>
// kernel: _forward.1
= control target key start
LH: loop header
LB: loop body
LE: loop exit
PB: predicated region body
PF: predicated region fallthrough
CT: control target
= control target key end

     0   :  { %s10028_s6 = smov 1   ;;  %s10029_s10 = smov 2   ;;  %s11912_s0 = inlined_call_operand.smem [shape: u32[30], index: -1, kind: input, shape index: {}] }
   0x1   :  { %s10070_s5 = sld [smem:[%s11912_s0]]   ;;  %s10030_s14 = smov 3  }
   0x2   :  { %s10075_s9 = sld [smem:[%s11912_s0 + %s10028_s6]]   ;;  %s10031_s18 = smov 4  }
   0x3   :  { %s10080_s13 = sld [smem:[%s11912_s0 + %s10029_s10]]   ;;  %s10032_s22 = smov 5  }
   0x4   :  { %s10085_s17 = sld [smem:[%s11912_s0 + %s10030_s14]]   ;;  %s10033_s26 = smov 6  }
   0x5   :  { %s10090_s21 = sld [smem:[%s11912_s0 + %s10031_s18]]   ;;  %s10034_s30 = smov 7  }
   0x6   :  { %s10095_s25 = sld [smem:[%s11912_s0 + %s10032_s22]]   ;;  %s10035_s4 = smov 8  }
   0x7   :  { %s10100_s29 = sld [smem:[%s11912_s0 + %s10033_s26]]   ;;  %s10036_s10 = smov 9  }
   0x8   :  { %11925 = sst [smem:[#allocation5_spill]] %s10075_s9  ;;  %s10037_s15 = smov 10  }
   0x9   :  { %s10105_s3 = sld [smem:[%s11912_s0 + %s10034_s30]]   ;;  %s10038_s20 = smov 11  }
   0xa   :  { %s10110_s8 = sld [smem:[%s11912_s0 + %s10035_s4]]   ;;  %s10039_s26 = smov 12  }
   0xb   :  { %s10115_s14 = sld [smem:[%s11912_s0 + %s10036_s10]]   ;;  %s10040_s1 = smov 13  }
   0xc   :  { %s10120_s19 = sld [smem:[%s11912_s0 + %s10037_s15]]   ;;  %s10041_s7 = smov 14  }
   0xd   :  { %s10125_s24 = sld [smem:[%s11912_s0 + %s10038_s20]]   ;;  %s10042_s15 = smov 15  }
   0xe   :  { %s10130_s30 = sld [smem:[%s11912_s0 + %s10039_s26]]   ;;  %s10043_s22 = smov 16  }
   0xf   :  { %s10135_s6 = sld [smem:[%s11912_s0 + %s10040_s1]]   ;;  %s10044_s28 = smov 17  }
  0x10   :  { %s10140_s12 = sld [smem:[%s11912_s0 + %s10041_s7]]   ;;  %s10045_s7 = smov 18  }
  0x11   :  { %s10145_s20 = sld [smem:[%s11912_s0 + %s10042_s15]]   ;;  %s10046_s15 = smov 19  }
  0x12   :  { %s10150_s27 = sld [smem:[%s11912_s0 + %s10043_s22]]   ;;  %s10047_s22 = smov 20  }
  0x13   :  { %s10155_s4 = sld [smem:[%s11912_s0 + %s10044_s28]]   ;;  %s10048_s28 = smov 21  }
  0x14   :  { %11926 = sst [smem:[#allocation6_spill]] %s10130_s30 }
  0x15   :  { %s10160_s9 = sld [smem:[%s11912_s0 + %s10045_s7]]   ;;  %s10049_s7 = smov 22  }
  0x16   :  { %s10165_s30 = sld [smem:[%s11912_s0 + %s10046_s15]]   ;;  %s10050_s15 = smov 23  }
  0x18   :  { %11927 = sst [smem:[#allocation7_spill]] %s10150_s27 }
  0x19   :  { %11928 = sst [smem:[#allocation8_spill]] %s10155_s4 }
  0x1a   :  { %s10170_s27 = sld [smem:[%s11912_s0 + %s10047_s22]]   ;;  %s10051_s22 = smov 24  }
  0x1b   :  { %11929 = sst [smem:[#allocation9_spill]] %s10160_s9 }
  0x1c   :  { %11930 = sst [smem:[#allocation10_spill]] %s10165_s30 }
  0x1d   :  { %s10175_s4 = sld [smem:[%s11912_s0 + %s10048_s28]]   ;;  %s10052_s28 = smov 25  }
  0x1e   :  { %s10180_s9 = sld [smem:[%s11912_s0 + %s10049_s7]]   ;;  %s10053_s7 = smov 26  }
  0x1f   :  { %s10185_s30 = sld [smem:[%s11912_s0 + %s10050_s15]]   ;;  %s10054_s15 = smov 27  }
  0x20   :  { %11931 = sst [smem:[#allocation11_spill]] %s10170_s27 }
  0x21   :  { %s10190_s27 = sld [smem:[%s11912_s0 + %s10051_s22]]   ;;  %s10055_s22 = smov 28  }
  0x23   :  { %11932 = sst [smem:[#allocation12_spill]] %s10175_s4 }
  0x24   :  { %11933 = sst [smem:[#allocation13_spill]] %s10180_s9 }
  0x25   :  { %11934 = sst [smem:[#allocation14_spill]] %s10185_s30 }
  0x26   :  { %s10195_s4 = sld [smem:[%s11912_s0 + %s10052_s28]]   ;;  %s10056_s28 = smov 29  }
  0x27   :  { %11935 = sst [smem:[#allocation15_spill]] %s10190_s27 }
  0x28   :  { %s10200_s9 = sld [smem:[%s11912_s0 + %s10053_s7]]  }
  0x29   :  { %s10205_s30 = sld [smem:[%s11912_s0 + %s10054_s15]]  }
  0x2a   :  { %s10210_s27 = sld [smem:[%s11912_s0 + %s10055_s22]]  }
  0x2c   :  { %11936 = sst [smem:[#allocation16_spill]] %s10195_s4 }
  0x2d   :  { %s10215_s4 = sld [smem:[%s11912_s0 + %s10056_s28]]  }
  0x2e   :  { %v132_v0 = vld [vmem:[%s10085_s17] sm:$0xff]  ;;  %vm140_vm0 = vcmask 64512   ;;  %v125_v2 = vld [vmem:[%s10070_s5 + $0x8] sm:$0xff]  ;;  %v126_v3 = vld [vmem:[%s10070_s5 + $0x10] sm:$0xff] }
  0x2f   :  { %v124_v1 = vld [vmem:[%s10070_s5] sm:$0xff]  ;;  %8668 = vmatprep.subr.mxu0 %v132_v0  ;;  %v127_v4 = vld [vmem:[%s10070_s5 + $0x18] sm:$0xff]  ;;  %v129_v6 = vld [vmem:[%s10070_s5 + $0x28] sm:$0xff] }
  0x30   :  { %8670 = vmatprep.mubr.msk.f32.mxu0 %vm140_vm0, %v124_v1  ;;  %8669 = vmatpush3.msra.mxu0 %v132_v0  ;;  %v128_v5 = vld [vmem:[%s10070_s5 + $0x20] sm:$0xff]  ;;  %v130_v7 = vld [vmem:[%s10070_s5 + $0x30] sm:$0xff]  ;;  %v131_v8 = vld [vmem:[%s10070_s5 + $0x38] sm:$0xff] }
  0x31   :  { %8671 = vmatmul.mubr.msk.f32.vlgmr.msra.gmra.mrb[0].mxu0 %vm140_vm0, %v125_v2  ;;  %v318_v9 = vld [vmem:[%s10095_s25] sm:$0xff]  ;;  %v319_v10 = vld [vmem:[%s10095_s25 + $0x8] sm:$0xff]  ;;  %v320_v12 = vld [vmem:[%s10095_s25 + $0x10] sm:$0xff] }
  0x32   :  { %8673 = vmatprep.mubr.msk.f32.mxu0 %vm140_vm0, %v126_v3  ;;  %v9342_v11 = vpack.c.bf16 %v319_v10, %v318_v9  ;;  %v321_v13 = vld [vmem:[%s10095_s25 + $0x18] sm:$0xff]  ;;  %v9464_v15 = vld [vmem:[%s10105_s3] sm:$0xff]  }
  0x33   :  { %v9346_v14 = vpack.c.bf16 %v321_v13, %v320_v12  ;;  %8702 = vmatprep.subr.bf16.mxu0 %v9464_v15 }
  0x34   :  { %9343 = vmatprep.subr.bf16.mxu1 %v9342_v11  ;;  %8703 = vmatpush3.bf16.msra.mxu0 %v9464_v15 }
  0x35   :  { %8674 = vmatmul.mubr.msk.f32.gmra.mrb[2].mxu0 %vm140_vm0, %v127_v4  ;;  %9345 = vmatpush3.bf16.msra.mxu1 %v9342_v11 }
  0x36   :  { %8676 = vmatprep.mubr.msk.f32.mxu0 %vm140_vm0, %v128_v5  ;;  %9347 = vmatprep.subr.bf16.mxu1 %v9346_v14 }
  0x39   :  { %8677 = vmatmul.mubr.msk.f32.gmra.mrb[4].mxu0 %vm140_vm0, %v129_v6  ;;  %9349 = vmatpush3.bf16.msra.mxu1 %v9346_v14 }
  0x3a   :  { %8679 = vmatprep.mubr.msk.f32.mxu0 %vm140_vm0, %v130_v7 }
  0x3d   :  { %8680 = vmatmul.mubr.msk.f32.gmra.mrb[6].mxu0 %vm140_vm0, %v131_v8 }
  0x3e   :  { %64 = vsyncpa [#allocation3], 0  ;;  %v7568_v16 = vld [vmem:[%s10090_s21] ss:$0 sm:$0xff]  ;;  %vm329_vm1 = vcmask 261120   ;;  %v9465_v9 = vld [vmem:[%s10105_s3 + $0x8] sm:$0xff]  }
  0x3f   :  { %8704 = vmatprep.subr.bf16.mxu0 %v9465_v9  ;;  %v7585_v10 = vld [vmem:[%s10100_s29] ss:$0 sm:$0xff]  ;;  %vm589_vm10 = vcmask 523264   ;;  %s11937_s0 = sld [smem:[#allocation6_spill]]  ;;  %s11938_s5 = sld [smem:[#allocation7_spill]] }
  0x40   :  { %8705 = vmatpush3.bf16.msra.mxu0 %v9465_v9  ;;  %s11940_s17 = sld [smem:[#allocation9_spill]]  ;;  %s11941_s21 = sld [smem:[#allocation5_spill]] }
  0x41   :  { %s11942_s25 = sld [smem:[#allocation10_spill]]  ;;  %s11943_s29 = sld [smem:[#allocation11_spill]] }
  0x42   :  { %s11948_s7 = sld [smem:[#allocation15_spill]] }
 0x104   :  { %v8672_v17 = vpop.f32.mrb[0].mxu0 }
 0x105   :  { %v237_v18 = vadd.f32 %v8672_v17, %v7568_v16  ;;  %v231_v19 = vpop.f32.mrb[1].mxu0 }
 0x106   :  { %v232_v20 = vadd.f32 %v7568_v16, %v231_v19 }
 0x107   :  { %v279_v21 = vmin.f32 %v237_v18, 0.0  ;;  %vm271_vm3 = vcmp.gt.f32.partialorder %v237_v18, 0.0 }
 0x108   :  { %v278_v22 = vmin.f32 %v232_v20, 0.0  ;;  %v8675_v23 = vpop.f32.mrb[2].mxu0  ;;  %vm270_vm2 = vcmp.gt.f32.partialorder %v232_v20, 0.0 }
 0x109   :  { %v288_v24 = vmul.f32 1.442695, %v279_v21  ;;  %v247_v25 = vadd.f32 %v8675_v23, %v7568_v16  ;;  %v241_v26 = vpop.f32.mrb[3].mxu0 }
 0x10a   :  { %v286_v27 = vmul.f32 1.442695, %v278_v22  ;;  %v242_v28 = vadd.f32 %v7568_v16, %v241_v26 }
 0x10b   :  { %9692 = vpow2.f32 %v288_v24  ;;  %v281_v29 = vmin.f32 %v247_v25, 0.0  ;;  %vm273_vm5 = vcmp.gt.f32.partialorder %v247_v25, 0.0 }
 0x10c   :  { %9694 = vpow2.f32 %v286_v27  ;;  %v280_v30 = vmin.f32 %v242_v28, 0.0  ;;  %v8678_v31 = vpop.f32.mrb[4].mxu0  ;;  %vm272_vm4 = vcmp.gt.f32.partialorder %v242_v28, 0.0 }
 0x10d   :  { %v292_v32 = vmul.f32 1.442695, %v281_v29  ;;  %v257_v33 = vadd.f32 %v8678_v31, %v7568_v16  ;;  %v251_v34 = vpop.f32.mrb[5].mxu0 }
 0x10e   :  { %v290_v35 = vmul.f32 1.442695, %v280_v30  ;;  %v252_v36 = vadd.f32 %v7568_v16, %v251_v34 }
 0x10f   :  { %9696 = vpow2.f32 %v292_v32  ;;  %v283_v37 = vmin.f32 %v257_v33, 0.0  ;;  %vm275_vm7 = vcmp.gt.f32.partialorder %v257_v33, 0.0  ;;  %v7600_v32 = vld [vmem:[%s10115_s14] ss:$0 sm:$0xff] }
 0x110   :  { %9698 = vpow2.f32 %v290_v35  ;;  %v282_v38 = vmin.f32 %v252_v36, 0.0  ;;  %v8681_v39 = vpop.f32.mrb[6].mxu0  ;;  %vm274_vm6 = vcmp.gt.f32.partialorder %v252_v36, 0.0 }
 0x111   :  { %v296_v40 = vmul.f32 1.442695, %v283_v37  ;;  %v267_v41 = vadd.f32 %v8681_v39, %v7568_v16  ;;  %v261_v42 = vpop.f32.mrb[7].mxu0 }
 0x112   :  { %v294_v43 = vmul.f32 1.442695, %v282_v38  ;;  %v262_v44 = vadd.f32 %v7568_v16, %v261_v42 }
 0x113   :  { %9700 = vpow2.f32 %v296_v40  ;;  %v285_v45 = vmin.f32 %v267_v41, 0.0  ;;  %vm277_vm9 = vcmp.gt.f32.partialorder %v267_v41, 0.0 }
 0x114   :  { %9702 = vpow2.f32 %v294_v43  ;;  %v284_v46 = vmin.f32 %v262_v44, 0.0  ;;  %vm276_vm8 = vcmp.gt.f32.partialorder %v262_v44, 0.0 }
 0x115   :  { %v9693_v47 = vpop.eup %9692  ;;  %v300_v48 = vmul.f32 1.442695, %v285_v45 }
 0x116   :  { %v9695_v49 = vpop.eup %9694  ;;  %v298_v50 = vmul.f32 1.442695, %v284_v46  ;;  %v7578_v51 = vadd.f32 -1.0, %v9693_v47 }
 0x117   :  { %9704 = vpow2.f32 %v300_v48  ;;  %v7577_v52 = vadd.f32 -1.0, %v9695_v49 }
 0x118   :  { %9706 = vpow2.f32 %v298_v50  ;;  %v311_v56 = vsel %vm271_vm3, %v237_v18, %v7578_v51 }
 0x119   :  { %v9697_v53 = vpop.eup %9696  ;;  %v310_v54 = vsel %vm270_vm2, %v232_v20, %v7577_v52 }
 0x11a   :  { %v9699_v55 = vpop.eup %9698  ;;  %8690 = vmatprep.mubr.msk.f32.mxu1 %vm329_vm1, %v310_v54  ;;  %v7580_v57 = vadd.f32 -1.0, %v9697_v53 }
 0x11b   :  { %8691 = vmatmul.mubr.msk.f32.vlgmr.msra.gmra.mrb[0].mxu1 %vm329_vm1, %v311_v56  ;;  %v7579_v58 = vadd.f32 -1.0, %v9699_v55 }
 0x11c   :  { %v313_v62 = vsel %vm273_vm5, %v247_v25, %v7580_v57 }
 0x11d   :  { %v9701_v59 = vpop.eup %9700  ;;  %v312_v60 = vsel %vm272_vm4, %v242_v28, %v7579_v58 }
 0x11e   :  { %v9703_v61 = vpop.eup %9702  ;;  %8693 = vmatprep.mubr.msk.f32.mxu1 %vm329_vm1, %v312_v60  ;;  %v7582_v63 = vadd.f32 -1.0, %v9701_v59 }
 0x11f   :  { %8694 = vmatmul.mubr.msk.f32.gmra.mrb[2].mxu1 %vm329_vm1, %v313_v62  ;;  %v7581_v0 = vadd.f32 -1.0, %v9703_v61 }
 0x120   :  { %v315_v4 = vsel %vm275_vm7, %v257_v33, %v7582_v63 }
 0x121   :  { %v9705_v1 = vpop.eup %9704  ;;  %v314_v2 = vsel %vm274_vm6, %v252_v36, %v7581_v0  ;;  %v459_v0 = vlaneseq }
 0x122   :  { %v9707_v3 = vpop.eup %9706  ;;  %8696 = vmatprep.mubr.msk.f32.mxu1 %vm329_vm1, %v314_v2  ;;  %v7584_v5 = vadd.f32 -1.0, %v9705_v1 }
 0x123   :  { %8697 = vmatmul.mubr.msk.f32.gmra.mrb[4].mxu1 %vm329_vm1, %v315_v4  ;;  %v7583_v6 = vadd.f32 -1.0, %v9707_v3  ;;  %v10288_v1 = vand.u32 127, %v459_v0 }
 0x124   :  { %v317_v8 = vsel %vm277_vm9, %v267_v41, %v7584_v5 }
 0x125   :  { %v316_v7 = vsel %vm276_vm8, %v262_v44, %v7583_v6 }
 0x126   :  { %8699 = vmatprep.mubr.msk.f32.mxu1 %vm329_vm1, %v316_v7 }
 0x127   :  { %8700 = vmatmul.mubr.msk.f32.gmra.mrb[6].mxu1 %vm329_vm1, %v317_v8 }
 0x1ee   :  { %v8692_v11 = vpop.f32.mrb[0].mxu1 }
 0x1ef   :  { %v10250_v12 = vadd.f32 %v8692_v11, %v7585_v10  ;;  %v420_v13 = vpop.f32.mrb[1].mxu1 }
 0x1f0   :  { %v10252_v14 = vadd.f32 %v7585_v10, %v420_v13 }
 0x1f2   :  { %v469_v15 = vpack.c.bf16 %v10250_v12, %v10252_v14  ;;  %v8695_v16 = vpop.f32.mrb[2].mxu1 }
 0x1f3   :  { %v10256_v17 = vadd.f32 %v8695_v16, %v7585_v10  ;;  %v430_v18 = vpop.f32.mrb[3].mxu1 }
 0x1f4   :  { %v10258_v19 = vadd.f32 %v7585_v10, %v430_v18  ;;  %8706 = vmatprep.mubr.msk.bf16.mxu0 %vm329_vm1, %v469_v15 }
 0x1f6   :  { %v470_v20 = vpack.c.bf16 %v10256_v17, %v10258_v19  ;;  %v8698_v21 = vpop.f32.mrb[4].mxu1 }
 0x1f7   :  { %v10263_v22 = vadd.f32 %v8698_v21, %v7585_v10  ;;  %v440_v23 = vpop.f32.mrb[5].mxu1 }
 0x1f8   :  { %v10265_v24 = vadd.f32 %v7585_v10, %v440_v23  ;;  %8707 = vmatmul.mubr.msk.bf16.vlgmr.msra.gmra.mrb[8].mxu0 %vm329_vm1, %v470_v20 }
 0x1fa   :  { %v471_v25 = vpack.c.bf16 %v10263_v22, %v10265_v24  ;;  %v8701_v26 = vpop.f32.mrb[6].mxu1 }
 0x1fb   :  { %v10270_v27 = vadd.f32 %v8701_v26, %v7585_v10  ;;  %v450_v28 = vpop.f32.mrb[7].mxu1 }
 0x1fc   :  { %v10272_v29 = vadd.f32 %v7585_v10, %v450_v28  ;;  %8710 = vmatprep.mubr.msk.bf16.mxu0 %vm329_vm1, %v471_v25 }
 0x1fe   :  { %v472_v30 = vpack.c.bf16 %v10270_v27, %v10272_v29 }
 0x200   :  { %8711 = vmatmul.mubr.msk.bf16.gmra.mrb[12].mxu0 %vm329_vm1, %v472_v30 }
 0x2cb   :  { %v8708_v31 = vpop.f32.mrb[8].mxu0 }
 0x2cc   :  { %v569_v33 = vmul.f32 2.0, %v8708_v31  ;;  %v535_v34 = vpop.f32.mrb[9].mxu0 }
 0x2cd   :  { %v567_v35 = vmul.f32 2.0, %v535_v34  ;;  %v8709_v36 = vpop.f32.mrb[10].mxu0 }
 0x2ce   :  { %v570_v37 = vmul.f32 2.0, %v8709_v36  ;;  %v538_v38 = vpop.f32.mrb[11].mxu0  ;;  %v583_v39 = vsub.f32 %v7600_v32, %v569_v33 }
 0x2cf   :  { %v568_v40 = vmul.f32 2.0, %v538_v38  ;;  %v581_v41 = vsub.f32 %v7600_v32, %v567_v35 }
 0x2d0   :  { %v596_v42 = vsel %vm589_vm10, %v583_v39, inf  ;;  %v584_v43 = vsub.f32 %v7600_v32, %v570_v37 }
 0x2d1   :  { %597 = vmin.xlane.f32.xlu1 %v596_v42  ;;  %v590_v44 = vsel %vm589_vm10, %v581_v41, inf  ;;  %v582_v45 = vsub.f32 %v7600_v32, %v568_v40 }
 0x2d2   :  { %591 = vmin.xlane.f32.xlu0 %v590_v44  ;;  %v599_v48 = vsel %vm589_vm10, %v584_v43, inf }
 0x2d3   :  { %v8712_v46 = vpop.f32.mrb[12].mxu0  ;;  %v593_v52 = vsel %vm589_vm10, %v582_v45, inf }
 0x2d4   :  { %v551_v47 = vpop.f32.mrb[13].mxu0  ;;  %v573_v49 = vmul.f32 2.0, %v8712_v46 }
 0x2d5   :  { %v571_v50 = vmul.f32 2.0, %v551_v47  ;;  %600 = vmin.xlane.f32.xlu1 %v599_v48  ;;  %v8713_v51 = vpop.f32.mrb[14].mxu0 }
 0x2d6   :  { %594 = vmin.xlane.f32.xlu0 %v593_v52  ;;  %v554_v53 = vpop.f32.mrb[15].mxu0  ;;  %v574_v54 = vmul.f32 2.0, %v8713_v51  ;;  %v587_v59 = vsub.f32 %v7600_v32, %v573_v49 }
 0x2d7   :  { %v572_v55 = vmul.f32 2.0, %v554_v53  ;;  %v585_v56 = vsub.f32 %v7600_v32, %v571_v50  ;;  %v9466_v50 = vld [vmem:[%s10110_s8] sm:$0xff]  }
 0x2d8   :  { %v588_v61 = vsub.f32 %v7600_v32, %v574_v54  ;;  %v608_v62 = vsel %vm589_vm10, %v587_v59, inf  ;;  %8730 = vmatprep.subr.bf16.mxu0 %v9466_v50 }
 0x2d9   :  { %v602_v57 = vsel %vm589_vm10, %v585_v56, inf  ;;  %v586_v58 = vsub.f32 %v7600_v32, %v572_v55  ;;  %8731 = vmatpush3.bf16.msra.mxu0 %v9466_v50 }
 0x2da   :  { %603 = vmin.xlane.f32.xlu0 %v602_v57  ;;  %v611_v63 = vsel %vm589_vm10, %v588_v61, inf }
 0x2db   :  { %v605_v60 = vsel %vm589_vm10, %v586_v58, inf }
 0x2dc   :  { %606 = vmin.xlane.f32.xlu1 %v605_v60 }
 0x2de   :  { %609 = vmin.xlane.f32.xlu0 %v608_v62 }
 0x2e0   :  { %612 = vmin.xlane.f32.xlu1 %v611_v63 }
 0x35e   :  { %v598_v2 = vpop.xlane.xlu1 %597 }
 0x35f   :  { %vm616_vm11 = vcmp.le.f32.partialorder %v583_v39, %v598_v2  ;;  %v592_v3 = vpop.xlane.xlu0 %591 }
 0x360   :  { %v624_v4 = vsel %vm616_vm11, %v10288_v1, 64  ;;  %vm614_vm12 = vcmp.le.f32.partialorder %v581_v41, %v592_v3 }
 0x361   :  { %v622_v5 = vsel %vm614_vm12, %v10288_v1, 64  ;;  %v660_v8 = vsel %vm589_vm10, %v624_v4, 2147483647 }
 0x362   :  { %v601_v6 = vpop.xlane.xlu1 %600  ;;  %v630_v7 = vsel %vm589_vm10, %v622_v5, 2147483647  ;;  %v662_v16 = vshra.s32 %v660_v8, 16  ;;  %v661_v54 = vand.u32 65535, %v660_v8 }
 0x363   :  { %vm617_vm13 = vcmp.le.f32.partialorder %v584_v43, %v601_v6  ;;  %v595_v9 = vpop.xlane.xlu0 %594  ;;  %v632_v10 = vshra.s32 %v630_v7, 16  ;;  %v631_v51 = vand.u32 65535, %v630_v7 }
 0x364   :  { %v625_v11 = vsel %vm617_vm13, %v10288_v1, 64  ;;  %vm615_vm14 = vcmp.le.f32.partialorder %v582_v45, %v595_v9  ;;  %v664_v28 = vcvt.s32.f32 %v662_v16 }
 0x365   :  { %v623_v13 = vsel %vm615_vm14, %v10288_v1, 64  ;;  %v634_v15 = vcvt.s32.f32 %v632_v10  ;;  %v10298_v20 = vsel %vm589_vm10, %v625_v11, 2147483647  ;;  %v633_v53 = vcvt.s32.f32 %v631_v51 }
 0x366   :  { %v645_v18 = vsel %vm589_vm10, %v623_v13, 2147483647  ;;  %v677_v31 = vshra.s32 %v10298_v20, 16  ;;  %v676_v62 = vand.u32 65535, %v10298_v20 }
 0x367   :  { %635 = vmin.xlane.f32.xlu0 %v634_v15  ;;  %v604_v21 = vpop.xlane.xlu0 %603  ;;  %v647_v23 = vshra.s32 %v645_v18, 16  ;;  %v646_v55 = vand.u32 65535, %v645_v18 }
 0x368   :  { %vm618_vm15 = vcmp.le.f32.partialorder %v585_v56, %v604_v21  ;;  %v679_v40 = vcvt.s32.f32 %v677_v31  ;;  %v678_v6 = vcvt.s32.f32 %v676_v62  ;;  %v9469_v31 = vld [vmem:[%s10120_s19 + $0x8] sm:$0xff]   ;;  %v10057_v62 = vmov 0.0  }
 0x369   :  { %v626_v25 = vsel %vm618_vm15, %v10288_v1, 64  ;;  %v607_v26 = vpop.xlane.xlu1 %606  ;;  %v649_v30 = vcvt.s32.f32 %v647_v23  ;;  %v648_v60 = vcvt.s32.f32 %v646_v55 }
 0x36a   :  { %vm619_vm0 = vcmp.le.f32.partialorder %v586_v58, %v607_v26  ;;  %v690_v32 = vsel %vm589_vm10, %v626_v25, 2147483647  ;;  %v9467_v26 = vld [vmem:[%s10120_s19] sm:$0xff]  }
 0x36b   :  { %v627_v33 = vsel %vm619_vm0, %v10288_v1, 64  ;;  %665 = vmin.xlane.f32.xlu0 %v664_v28  ;;  %v610_v34 = vpop.xlane.xlu0 %609  ;;  %650 = vmin.xlane.f32.xlu1 %v649_v30  ;;  %v692_v35 = vshra.s32 %v690_v32, 16 }
 0x36c   :  { %vm620_vm2 = vcmp.le.f32.partialorder %v587_v59, %v610_v34  ;;  %v705_v36 = vsel %vm589_vm10, %v627_v33, 2147483647  ;;  %v663_v59 = vcvt.s32.f32 %v661_v54  ;;  %8714 = vmatprep.subr.bf16.mxu1 %v9467_v26  ;;  %v9471_v33 = vld [vmem:[%s10120_s19 + $0x10] sm:$0xff]   ;;  %v9472_v34 = vld [vmem:[%s10110_s8 + $0x18] sm:$0xff]  }
 0x36d   :  { %v628_v37 = vsel %vm620_vm2, %v10288_v1, 64  ;;  %v613_v38 = vpop.xlane.xlu1 %612  ;;  %v694_v39 = vcvt.s32.f32 %v692_v35  ;;  %v707_v41 = vshra.s32 %v705_v36, 16  ;;  %v706_v8 = vand.u32 65535, %v705_v36  ;;  %8715 = vmatpush3.bf16.msra.mxu1 %v9467_v26  ;;  %v9473_v35 = vld [vmem:[%s10120_s19 + $0x18] sm:$0xff]   ;;  %v9474_v36 = vld [vmem:[%s10105_s3 + $0x10] sm:$0xff]  }
 0x36e   :  { %vm621_vm3 = vcmp.le.f32.partialorder %v588_v61, %v613_v38  ;;  %v720_v42 = vsel %vm589_vm10, %v628_v37, 2147483647  ;;  %v691_v61 = vand.u32 65535, %v690_v32  ;;  %8716 = vmatprep.subr.bf16.mxu1 %v9469_v31  ;;  %v9470_v32 = vld [vmem:[%s10110_s8 + $0x10] sm:$0xff]  }
 0x36f   :  { %v629_v43 = vsel %vm621_vm3, %v10288_v1, 64  ;;  %695 = vmin.xlane.f32.xlu0 %v694_v39  ;;  %680 = vmin.xlane.f32.xlu1 %v679_v40  ;;  %v722_v44 = vshra.s32 %v720_v42, 16  ;;  %v709_v47 = vcvt.s32.f32 %v707_v41  ;;  %v721_v7 = vand.u32 65535, %v720_v42 }
 0x370   :  { %v735_v45 = vsel %vm589_vm10, %v629_v43, 2147483647  ;;  %v693_v5 = vcvt.s32.f32 %v691_v61  ;;  %v708_v16 = vcvt.s32.f32 %v706_v8 }
 0x371   :  { %v724_v46 = vcvt.s32.f32 %v722_v44  ;;  %v737_v48 = vshra.s32 %v735_v45, 16  ;;  %v736_v18 = vand.u32 65535, %v735_v45  ;;  %8717 = vmatpush3.bf16.msra.mxu1 %v9469_v31 }
 0x372   :  { %8718 = vmatprep.subr.bf16.mxu1 %v9471_v33 }
 0x373   :  { %725 = vmin.xlane.f32.xlu0 %v724_v46  ;;  %710 = vmin.xlane.f32.xlu1 %v709_v47  ;;  %v739_v49 = vcvt.s32.f32 %v737_v48  ;;  %v738_v25 = vcvt.s32.f32 %v736_v18 }
 0x375   :  { %8719 = vmatpush3.bf16.msra.mxu1 %v9471_v33 }
 0x376   :  { %8720 = vmatprep.subr.bf16.mxu1 %v9473_v35 }
 0x377   :  { %740 = vmin.xlane.f32.xlu1 %v739_v49 }
 0x379   :  { %8721 = vmatpush3.bf16.msra.mxu1 %v9473_v35 }
 0x37a   :  { %8746 = vmatprep.subr.bf16.mxu1 %v9474_v36 }
 0x3f4   :  { %v10310_v52 = vpop.xlane.xlu0 %635 }
 0x3f5   :  { %vm637_vm4 = vcmp.eq.f32.partialorder %v634_v15, %v10310_v52  ;;  %v723_v15 = vcvt.s32.f32 %v721_v7  ;;  %v642_v37 = vcvt.f32.s32 %v10310_v52 }
 0x3f6   :  { %v638_v56 = vsel %vm637_vm4, %v633_v53, inf }
 0x3f7   :  { %639 = vmin.xlane.f32.xlu0 %v638_v56 }
 0x3f8   :  { %v10313_v57 = vpop.xlane.xlu0 %665  ;;  %v10315_v58 = vpop.xlane.xlu1 %650 }
 0x3f9   :  { %vm667_vm5 = vcmp.eq.f32.partialorder %v664_v28, %v10313_v57  ;;  %vm652_vm6 = vcmp.eq.f32.partialorder %v649_v30, %v10315_v58  ;;  %v9468_v30 = vld [vmem:[%s10110_s8 + $0x8] sm:$0xff]   ;;  %v672_v38 = vcvt.f32.s32 %v10313_v57  ;;  %v657_v41 = vcvt.f32.s32 %v10315_v58 }
 0x3fa   :  { %v668_v63 = vsel %vm667_vm5, %v663_v59, inf  ;;  %v653_v2 = vsel %vm652_vm6, %v648_v60, inf  ;;  %8732 = vmatprep.subr.bf16.mxu0 %v9468_v30 }
 0x3fb   :  { %669 = vmin.xlane.f32.xlu0 %v668_v63  ;;  %654 = vmin.xlane.f32.xlu1 %v653_v2  ;;  %v673_v44 = vshll.u32 %v672_v38, 16  ;;  %v658_v48 = vshll.u32 %v657_v41, 16 }
 0x3fc   :  { %v10320_v3 = vpop.xlane.xlu0 %695  ;;  %v10322_v4 = vpop.xlane.xlu1 %680  ;;  %8733 = vmatpush3.bf16.msra.mxu0 %v9468_v30 }
 0x3fd   :  { %vm697_vm7 = vcmp.eq.f32.partialorder %v694_v39, %v10320_v3  ;;  %vm682_vm8 = vcmp.eq.f32.partialorder %v679_v40, %v10322_v4  ;;  %8734 = vmatprep.subr.bf16.mxu0 %v9470_v32  ;;  %v643_v40 = vshll.u32 %v642_v37, 16  ;;  %v702_v45 = vcvt.f32.s32 %v10320_v3 }
 0x3fe   :  { %v698_v9 = vsel %vm697_vm7, %v693_v5, inf  ;;  %v683_v10 = vsel %vm682_vm8, %v678_v6, inf }
 0x3ff   :  { %699 = vmin.xlane.f32.xlu0 %v698_v9  ;;  %684 = vmin.xlane.f32.xlu1 %v683_v10  ;;  %v703_v54 = vshll.u32 %v702_v45, 16 }
 0x400   :  { %v10326_v11 = vpop.xlane.xlu0 %725  ;;  %v10328_v13 = vpop.xlane.xlu1 %710  ;;  %8735 = vmatpush3.bf16.msra.mxu0 %v9470_v32 }
 0x401   :  { %vm727_vm9 = vcmp.eq.f32.partialorder %v724_v46, %v10326_v11  ;;  %vm712_vm11 = vcmp.eq.f32.partialorder %v709_v47, %v10328_v13  ;;  %8736 = vmatprep.subr.bf16.mxu0 %v9472_v34  ;;  %v732_v55 = vcvt.f32.s32 %v10326_v11  ;;  %v717_v56 = vcvt.f32.s32 %v10328_v13 }
 0x402   :  { %v728_v20 = vsel %vm727_vm9, %v723_v15, inf  ;;  %v713_v21 = vsel %vm712_vm11, %v708_v16, inf }
 0x403   :  { %729 = vmin.xlane.f32.xlu0 %v728_v20  ;;  %714 = vmin.xlane.f32.xlu1 %v713_v21  ;;  %v733_v6 = vshll.u32 %v732_v55, 16  ;;  %v718_v7 = vshll.u32 %v717_v56, 16 }
 0x404   :  { %v10332_v23 = vpop.xlane.xlu1 %740  ;;  %8737 = vmatpush3.bf16.msra.mxu0 %v9472_v34 }
 0x405   :  { %vm742_vm12 = vcmp.eq.f32.partialorder %v739_v49, %v10332_v23  ;;  %v687_v49 = vcvt.f32.s32 %v10322_v4  ;;  %v747_v10 = vcvt.f32.s32 %v10332_v23 }
 0x406   :  { %v743_v28 = vsel %vm742_vm12, %v738_v25, inf }
 0x407   :  { %744 = vmin.xlane.f32.xlu1 %v743_v28  ;;  %v688_v59 = vshll.u32 %v687_v49, 16  ;;  %v748_v26 = vshll.u32 %v747_v10, 16 }
 0x484   :  { %v640_v39 = vpop.xlane.xlu0 %639 }
 0x485   :  { %v641_v42 = vcvt.f32.s32 %v640_v39 }
 0x487   :  { %v644_v43 = vadd.s32 %v643_v40, %v641_v42 }
 0x488   :  { %v670_v46 = vpop.xlane.xlu0 %669  ;;  %v655_v47 = vpop.xlane.xlu1 %654 }
 0x489   :  { %v671_v50 = vcvt.f32.s32 %v670_v46  ;;  %v656_v51 = vcvt.f32.s32 %v655_v47  ;;  %vm750_vm13 = vcmp.eq.s32.totalorder %v10288_v1, %v644_v43 }
 0x48a   :  { %v7601_v63 = vsel %vm750_vm13, 1.0, %v10057_v62 }
 0x48b   :  { %v674_v52 = vadd.s32 %v673_v44, %v671_v50  ;;  %v659_v53 = vadd.s32 %v658_v48, %v656_v51 }
 0x48c   :  { %v700_v57 = vpop.xlane.xlu0 %699  ;;  %v685_v58 = vpop.xlane.xlu1 %684 }
 0x48d   :  { %vm751_vm14 = vcmp.eq.s32.totalorder %v10288_v1, %v659_v53  ;;  %v701_v60 = vcvt.f32.s32 %v700_v57  ;;  %v686_v61 = vcvt.f32.s32 %v685_v58  ;;  %vm752_vm15 = vcmp.eq.s32.totalorder %v10288_v1, %v674_v52 }
 0x48e   :  { %v7602_v2 = vsel %vm751_vm14, 1.0, %v10057_v62  ;;  %v7603_v15 = vsel %vm752_vm15, 1.0, %v10057_v62 }
 0x48f   :  { %v704_v3 = vadd.s32 %v703_v54, %v701_v60  ;;  %v689_v4 = vadd.s32 %v688_v59, %v686_v61  ;;  %v774_v5 = vpack.c.bf16 %v7602_v2, %v7601_v63 }
 0x490   :  { %v730_v8 = vpop.xlane.xlu0 %729  ;;  %v715_v9 = vpop.xlane.xlu1 %714 }
 0x491   :  { %vm753_vm0 = vcmp.eq.s32.totalorder %v10288_v1, %v689_v4  ;;  %v731_v11 = vcvt.f32.s32 %v730_v8  ;;  %v716_v13 = vcvt.f32.s32 %v715_v9  ;;  %8722 = vmatprep.mubr.msk.bf16.mxu1 %vm589_vm10, %v774_v5  ;;  %8738 = vmatprep.mubr.msk.bf16.mxu0 %vm589_vm10, %v774_v5  ;;  %vm754_vm2 = vcmp.eq.s32.totalorder %v10288_v1, %v704_v3 }
 0x492   :  { %v7604_v16 = vsel %vm753_vm0, 1.0, %v10057_v62  ;;  %v7605_v28 = vsel %vm754_vm2, 1.0, %v10057_v62 }
 0x493   :  { %v775_v18 = vpack.c.bf16 %v7604_v16, %v7603_v15  ;;  %v734_v20 = vadd.s32 %v733_v6, %v731_v11  ;;  %v719_v21 = vadd.s32 %v718_v7, %v716_v13 }
 0x494   :  { %v745_v25 = vpop.xlane.xlu1 %744 }
 0x495   :  { %vm755_vm3 = vcmp.eq.s32.totalorder %v10288_v1, %v719_v21  ;;  %v746_v23 = vcvt.f32.s32 %v745_v25  ;;  %8723 = vmatmul.mubr.msk.bf16.vlgmr.msra.gmra.mrb[8].mxu1 %vm589_vm10, %v775_v18  ;;  %8739 = vmatmul.mubr.msk.bf16.vlgmr.msra.gmra.mrb[16].mxu0 %vm589_vm10, %v775_v18  ;;  %vm756_vm4 = vcmp.eq.s32.totalorder %v10288_v1, %v734_v20 }
 0x496   :  { %v7606_v30 = vsel %vm755_vm3, 1.0, %v10057_v62  ;;  %8747 = vmatpush3.bf16.msra.mxu1 %v9474_v36  ;;  %v7607_v33 = vsel %vm756_vm4, 1.0, %v10057_v62  ;;  %v9475_v36 = vld [vmem:[%s10105_s3 + $0x18] sm:$0xff]  }
 0x497   :  { %v749_v31 = vadd.s32 %v748_v26, %v746_v23  ;;  %v776_v32 = vpack.c.bf16 %v7606_v30, %v7605_v28  ;;  %8748 = vmatprep.subr.bf16.mxu1 %v9475_v36 }
 0x499   :  { %vm757_vm5 = vcmp.eq.s32.totalorder %v10288_v1, %v749_v31  ;;  %8726 = vmatprep.mubr.msk.bf16.mxu1 %vm589_vm10, %v776_v32  ;;  %8742 = vmatprep.mubr.msk.bf16.mxu0 %vm589_vm10, %v776_v32 }
 0x49a   :  { %v7608_v34 = vsel %vm757_vm5, 1.0, %v10057_v62  ;;  %8749 = vmatpush3.bf16.msra.mxu1 %v9475_v36 }
 0x49b   :  { %v777_v35 = vpack.c.bf16 %v7608_v34, %v7607_v33 }
 0x49d   :  { %8727 = vmatmul.mubr.msk.bf16.gmra.mrb[12].mxu1 %vm589_vm10, %v777_v35  ;;  %8743 = vmatmul.mubr.msk.bf16.gmra.mrb[20].mxu0 %vm589_vm10, %v777_v35 }
 0x568   :  { %v8740_v37 = vpop.f32.mrb[16].mxu0 }
 0x569   :  { %v961_v38 = vpop.f32.mrb[17].mxu0  ;;  %v10386_v44 = vsub.f32 %v10258_v19, %v8740_v37 }
 0x56a   :  { %v8741_v39 = vpop.f32.mrb[18].mxu0  ;;  %v10380_v42 = vsub.f32 %v10252_v14, %v961_v38 }
 0x56b   :  { %v10377_v40 = vsub.f32 %v10256_v17, %v8741_v39  ;;  %v964_v41 = vpop.f32.mrb[19].mxu0 }
 0x56c   :  { %v10383_v43 = vsub.f32 %v10250_v12, %v964_v41 }
 0x56d   :  { %v1001_v46 = vpack.c.bf16 %v10377_v40, %v10386_v44 }
 0x56e   :  { %v1000_v45 = vpack.c.bf16 %v10383_v43, %v10380_v42 }
 0x570   :  { %v8744_v47 = vpop.f32.mrb[20].mxu0  ;;  %8750 = vmatprep.mubr.msk.bf16.mxu1 %vm329_vm1, %v1000_v45 }
 0x571   :  { %v977_v17 = vpop.f32.mrb[21].mxu0  ;;  %8751 = vmatmul.mubr.msk.bf16.vlgmr.msra.gmra.mrb[16].mxu1 %vm329_vm1, %v1001_v46  ;;  %v10404_v50 = vsub.f32 %v10272_v29, %v8744_v47 }
 0x572   :  { %v8745_v14 = vpop.f32.mrb[22].mxu0  ;;  %v10398_v19 = vsub.f32 %v10265_v24, %v977_v17  ;;  %v7636_v24 = vld [vmem:[%s10115_s14 + $0x1] ss:$0 sm:$0xff] }
 0x573   :  { %v10395_v12 = vsub.f32 %v10270_v27, %v8745_v14  ;;  %v980_v48 = vpop.f32.mrb[23].mxu0 }
 0x574   :  { %v10401_v49 = vsub.f32 %v10263_v22, %v980_v48 }
 0x575   :  { %v1003_v52 = vpack.c.bf16 %v10395_v12, %v10404_v50 }
 0x576   :  { %v1002_v51 = vpack.c.bf16 %v10401_v49, %v10398_v19 }
 0x578   :  { %8754 = vmatprep.mubr.msk.bf16.mxu1 %vm329_vm1, %v1002_v51 }
 0x579   :  { %8755 = vmatmul.mubr.msk.bf16.gmra.mrb[20].mxu1 %vm329_vm1, %v1003_v52 }
 0x644   :  { %v8752_v27 = vpop.f32.mrb[16].mxu1 }
 0x645   :  { %v1067_v53 = vpop.f32.mrb[17].mxu1  ;;  %v1102_v54 = vmul.f32 2.0, %v8752_v27 }
 0x646   :  { %v1100_v55 = vmul.f32 2.0, %v1067_v53  ;;  %v8753_v22 = vpop.f32.mrb[18].mxu1 }
 0x647   :  { %v1070_v56 = vpop.f32.mrb[19].mxu1  ;;  %v1103_v57 = vmul.f32 2.0, %v8753_v22  ;;  %v1116_v61 = vsub.f32 %v7636_v24, %v1102_v54 }
 0x648   :  { %v1101_v29 = vmul.f32 2.0, %v1070_v56  ;;  %v1114_v58 = vsub.f32 %v7636_v24, %v1100_v55 }
 0x649   :  { %v1117_v3 = vsub.f32 %v7636_v24, %v1103_v57  ;;  %v1128_v8 = vsel %vm589_vm10, %v1116_v61, inf }
 0x64a   :  { %v1122_v59 = vsel %vm589_vm10, %v1114_v58, inf  ;;  %v1115_v60 = vsub.f32 %v7636_v24, %v1101_v29 }
 0x64b   :  { %1123 = vmin.xlane.f32.xlu0 %v1122_v59  ;;  %v1131_v13 = vsel %vm589_vm10, %v1117_v3, inf }
 0x64c   :  { %v8756_v63 = vpop.f32.mrb[20].mxu1  ;;  %v1125_v2 = vsel %vm589_vm10, %v1115_v60, inf }
 0x64d   :  { %1126 = vmin.xlane.f32.xlu1 %v1125_v2  ;;  %v1083_v4 = vpop.f32.mrb[21].mxu1  ;;  %v1106_v5 = vmul.f32 2.0, %v8756_v63 }
 0x64e   :  { %v1104_v6 = vmul.f32 2.0, %v1083_v4  ;;  %v8757_v7 = vpop.f32.mrb[22].mxu1 }
 0x64f   :  { %1129 = vmin.xlane.f32.xlu0 %v1128_v8  ;;  %v1086_v9 = vpop.f32.mrb[23].mxu1  ;;  %v1107_v10 = vmul.f32 2.0, %v8757_v7  ;;  %v1120_v20 = vsub.f32 %v7636_v24, %v1106_v5  ;;  %v9476_v8 = vld [vmem:[%s10110_s8 + $0x20] sm:$0xff]  }
 0x650   :  { %v1105_v11 = vmul.f32 2.0, %v1086_v9  ;;  %v1118_v15 = vsub.f32 %v7636_v24, %v1104_v6  ;;  %v9477_v9 = vld [vmem:[%s10120_s19 + $0x20] sm:$0xff]   ;;  %8774 = vmatprep.subr.bf16.mxu0 %v9476_v8 }
 0x651   :  { %1132 = vmin.xlane.f32.xlu1 %v1131_v13  ;;  %v1121_v25 = vsub.f32 %v7636_v24, %v1107_v10  ;;  %v1140_v26 = vsel %vm589_vm10, %v1120_v20, inf  ;;  %8758 = vmatprep.subr.bf16.mxu1 %v9477_v9 }
 0x652   :  { %v1134_v16 = vsel %vm589_vm10, %v1118_v15, inf  ;;  %v1119_v18 = vsub.f32 %v7636_v24, %v1105_v11  ;;  %8775 = vmatpush3.bf16.msra.mxu0 %v9476_v8  ;;  %8759 = vmatpush3.bf16.msra.mxu1 %v9477_v9 }
 0x653   :  { %1135 = vmin.xlane.f32.xlu0 %v1134_v16  ;;  %v1143_v23 = vsel %vm589_vm10, %v1121_v25, inf }
 0x654   :  { %v1137_v21 = vsel %vm589_vm10, %v1119_v18, inf }
 0x655   :  { %1138 = vmin.xlane.f32.xlu1 %v1137_v21 }
 0x657   :  { %1141 = vmin.xlane.f32.xlu0 %v1140_v26 }
 0x659   :  { %1144 = vmin.xlane.f32.xlu1 %v1143_v23 }
 0x6d8   :  { %v1124_v28 = vpop.xlane.xlu0 %1123 }
 0x6d9   :  { %vm1146_vm6 = vcmp.le.f32.partialorder %v1114_v58, %v1124_v28 }
 0x6da   :  { %v1154_v30 = vsel %vm1146_vm6, %v10288_v1, 64  ;;  %v1127_v31 = vpop.xlane.xlu1 %1126 }
 0x6db   :  { %vm1147_vm7 = vcmp.le.f32.partialorder %v1115_v60, %v1127_v31  ;;  %v1162_v32 = vsel %vm589_vm10, %v1154_v30, 2147483647 }
 0x6dc   :  { %v1155_v33 = vsel %vm1147_vm7, %v10288_v1, 64  ;;  %v1130_v34 = vpop.xlane.xlu0 %1129  ;;  %v1164_v35 = vshra.s32 %v1162_v32, 16  ;;  %v1163_v10 = vand.u32 65535, %v1162_v32 }
 0x6dd   :  { %vm1148_vm8 = vcmp.le.f32.partialorder %v1116_v61, %v1130_v34  ;;  %v1177_v36 = vsel %vm589_vm10, %v1155_v33, 2147483647 }
 0x6de   :  { %v1156_v37 = vsel %vm1148_vm8, %v10288_v1, 64  ;;  %v1133_v38 = vpop.xlane.xlu1 %1132  ;;  %v1166_v39 = vcvt.s32.f32 %v1164_v35  ;;  %v1179_v41 = vshra.s32 %v1177_v36, 16  ;;  %v1178_v11 = vand.u32 65535, %v1177_v36 }
 0x6df   :  { %vm1149_vm9 = vcmp.le.f32.partialorder %v1117_v3, %v1133_v38  ;;  %v1192_v45 = vsel %vm589_vm10, %v1156_v37, 2147483647 }
 0x6e0   :  { %v1157_v46 = vsel %vm1149_vm9, %v10288_v1, 64  ;;  %1167 = vmin.xlane.f32.xlu0 %v1166_v39  ;;  %v1136_v47 = vpop.xlane.xlu0 %1135  ;;  %v1181_v17 = vcvt.s32.f32 %v1179_v41  ;;  %v1194_v14 = vshra.s32 %v1192_v45, 16  ;;  %v1193_v16 = vand.u32 65535, %v1192_v45 }
 0x6e1   :  { %vm1150_vm11 = vcmp.le.f32.partialorder %v1118_v15, %v1136_v47  ;;  %v1207_v48 = vsel %vm589_vm10, %v1157_v46, 2147483647  ;;  %v1165_v15 = vcvt.s32.f32 %v1163_v10  ;;  %v1180_v21 = vcvt.s32.f32 %v1178_v11 }
 0x6e2   :  { %v1158_v51 = vsel %vm1150_vm11, %v10288_v1, 64  ;;  %1182 = vmin.xlane.f32.xlu1 %v1181_v17  ;;  %v1139_v52 = vpop.xlane.xlu1 %1138  ;;  %v1196_v27 = vcvt.s32.f32 %v1194_v14  ;;  %v1209_v53 = vshra.s32 %v1207_v48, 16  ;;  %v1195_v28 = vcvt.s32.f32 %v1193_v16 }
 0x6e3   :  { %vm1151_vm12 = vcmp.le.f32.partialorder %v1119_v18, %v1139_v52  ;;  %v1222_v24 = vsel %vm589_vm10, %v1158_v51, 2147483647 }
 0x6e4   :  { %v1159_v54 = vsel %vm1151_vm12, %v10288_v1, 64  ;;  %1197 = vmin.xlane.f32.xlu0 %v1196_v27  ;;  %v1142_v55 = vpop.xlane.xlu0 %1141  ;;  %v1211_v22 = vcvt.s32.f32 %v1209_v53  ;;  %v1224_v56 = vshra.s32 %v1222_v24, 16  ;;  %v1223_v30 = vand.u32 65535, %v1222_v24  ;;  %v9478_v53 = vld [vmem:[%s10110_s8 + $0x28] sm:$0xff]  }
 0x6e5   :  { %vm1152_vm13 = vcmp.le.f32.partialorder %v1120_v20, %v1142_v55  ;;  %v1237_v57 = vsel %vm589_vm10, %v1159_v54, 2147483647  ;;  %v9479_v24 = vld [vmem:[%s10120_s19 + $0x28] sm:$0xff]   ;;  %8776 = vmatprep.subr.bf16.mxu0 %v9478_v53  ;;  %v9480_v54 = vld [vmem:[%s10110_s8 + $0x30] sm:$0xff]  }
 0x6e6   :  { %v1160_v29 = vsel %vm1152_vm13, %v10288_v1, 64  ;;  %1212 = vmin.xlane.f32.xlu1 %v1211_v22  ;;  %v1145_v58 = vpop.xlane.xlu1 %1144  ;;  %v1226_v59 = vcvt.s32.f32 %v1224_v56  ;;  %v1239_v60 = vshra.s32 %v1237_v57, 16  ;;  %v1238_v34 = vand.u32 65535, %v1237_v57  ;;  %8760 = vmatprep.subr.bf16.mxu1 %v9479_v24  ;;  %v9481_v55 = vld [vmem:[%s10120_s19 + $0x30] sm:$0xff]   ;;  %v9483_v56 = vld [vmem:[%s10120_s19 + $0x38] sm:$0xff]   ;;  %v9484_v57 = vld [vmem:[%s10105_s3 + $0x20] sm:$0xff]  }
 0x6e7   :  { %vm1153_vm14 = vcmp.le.f32.partialorder %v1121_v25, %v1145_v58  ;;  %v1252_v61 = vsel %vm589_vm10, %v1160_v29, 2147483647  ;;  %v1208_v25 = vand.u32 65535, %v1207_v48  ;;  %v1225_v37 = vcvt.s32.f32 %v1223_v30  ;;  %8777 = vmatpush3.bf16.msra.mxu0 %v9478_v53  ;;  %8761 = vmatpush3.bf16.msra.mxu1 %v9479_v24 }
 0x6e8   :  { %v1161_v63 = vsel %vm1153_vm14, %v10288_v1, 64  ;;  %1227 = vmin.xlane.f32.xlu0 %v1226_v59  ;;  %v1241_v2 = vcvt.s32.f32 %v1239_v60  ;;  %v1254_v3 = vshra.s32 %v1252_v61, 16  ;;  %v1253_v38 = vand.u32 65535, %v1252_v61  ;;  %8778 = vmatprep.subr.bf16.mxu0 %v9480_v54 }
 0x6e9   :  { %v1267_v4 = vsel %vm589_vm10, %v1161_v63, 2147483647  ;;  %v1210_v33 = vcvt.s32.f32 %v1208_v25  ;;  %v1240_v45 = vcvt.s32.f32 %v1238_v34  ;;  %8762 = vmatprep.subr.bf16.mxu1 %v9481_v55 }
 0x6ea   :  { %1242 = vmin.xlane.f32.xlu1 %v1241_v2  ;;  %v1256_v5 = vcvt.s32.f32 %v1254_v3  ;;  %v1269_v6 = vshra.s32 %v1267_v4, 16  ;;  %v1268_v46 = vand.u32 65535, %v1267_v4  ;;  %v1255_v14 = vcvt.s32.f32 %v1253_v38 }
 0x6eb   :  { %8779 = vmatpush3.bf16.msra.mxu0 %v9480_v54  ;;  %8763 = vmatpush3.bf16.msra.mxu1 %v9481_v55 }
 0x6ec   :  { %1257 = vmin.xlane.f32.xlu0 %v1256_v5  ;;  %v1271_v7 = vcvt.s32.f32 %v1269_v6  ;;  %v1270_v52 = vcvt.s32.f32 %v1268_v46  ;;  %8764 = vmatprep.subr.bf16.mxu1 %v9483_v56 }
 0x6ee   :  { %1272 = vmin.xlane.f32.xlu1 %v1271_v7 }
 0x6ef   :  { %8765 = vmatpush3.bf16.msra.mxu1 %v9483_v56 }
 0x76d   :  { %v10439_v13 = vpop.xlane.xlu0 %1167 }
 0x76e   :  { %vm1169_vm15 = vcmp.eq.f32.partialorder %v1166_v39, %v10439_v13  ;;  %v1174_v29 = vcvt.f32.s32 %v10439_v13 }
 0x76f   :  { %v10442_v18 = vpop.xlane.xlu1 %1182  ;;  %v1170_v20 = vsel %vm1169_vm15, %v1165_v15, inf }
 0x770   :  { %1171 = vmin.xlane.f32.xlu0 %v1170_v20  ;;  %vm1184_vm0 = vcmp.eq.f32.partialorder %v1181_v17, %v10442_v18  ;;  %v1189_v58 = vcvt.f32.s32 %v10442_v18  ;;  %v1175_v60 = vshll.u32 %v1174_v29, 16 }
 0x771   :  { %v10445_v26 = vpop.xlane.xlu0 %1197  ;;  %v1185_v23 = vsel %vm1184_vm0, %v1180_v21, inf }
 0x772   :  { %1186 = vmin.xlane.f32.xlu1 %v1185_v23  ;;  %vm1199_vm2 = vcmp.eq.f32.partialorder %v1196_v27, %v10445_v26  ;;  %v1204_v61 = vcvt.f32.s32 %v10445_v26  ;;  %v1190_v3 = vshll.u32 %v1189_v58, 16 }
 0x773   :  { %v10448_v31 = vpop.xlane.xlu1 %1212  ;;  %v1200_v32 = vsel %vm1199_vm2, %v1195_v28, inf }
 0x774   :  { %1201 = vmin.xlane.f32.xlu0 %v1200_v32  ;;  %vm1214_vm3 = vcmp.eq.f32.partialorder %v1211_v22, %v10448_v31  ;;  %v9482_v22 = vld [vmem:[%s10110_s8 + $0x38] sm:$0xff]   ;;  %v1219_v4 = vcvt.f32.s32 %v10448_v31  ;;  %v1205_v9 = vshll.u32 %v1204_v61, 16 }
 0x775   :  { %v10451_v35 = vpop.xlane.xlu0 %1227  ;;  %v1215_v36 = vsel %vm1214_vm3, %v1210_v33, inf  ;;  %8780 = vmatprep.subr.bf16.mxu0 %v9482_v22 }
 0x776   :  { %1216 = vmin.xlane.f32.xlu1 %v1215_v36  ;;  %vm1229_vm4 = vcmp.eq.f32.partialorder %v1226_v59, %v10451_v35  ;;  %8781 = vmatpush3.bf16.msra.mxu0 %v9482_v22  ;;  %v1220_v16 = vshll.u32 %v1219_v4, 16 }
 0x777   :  { %v10454_v39 = vpop.xlane.xlu1 %1242  ;;  %v1230_v41 = vsel %vm1229_vm4, %v1225_v37, inf  ;;  %8790 = vmatprep.subr.bf16.mxu0 %v9484_v57 }
 0x778   :  { %1231 = vmin.xlane.f32.xlu0 %v1230_v41  ;;  %vm1244_vm5 = vcmp.eq.f32.partialorder %v1241_v2, %v10454_v39  ;;  %v1249_v13 = vcvt.f32.s32 %v10454_v39 }
 0x779   :  { %v10457_v47 = vpop.xlane.xlu0 %1257  ;;  %v1245_v17 = vsel %vm1244_vm5, %v1240_v45, inf }
 0x77a   :  { %1246 = vmin.xlane.f32.xlu1 %v1245_v17  ;;  %vm1259_vm6 = vcmp.eq.f32.partialorder %v1256_v5, %v10457_v47  ;;  %v1264_v25 = vcvt.f32.s32 %v10457_v47  ;;  %v1250_v33 = vshll.u32 %v1249_v13, 16 }
 0x77b   :  { %v10460_v48 = vpop.xlane.xlu1 %1272  ;;  %v1260_v51 = vsel %vm1259_vm6, %v1255_v14, inf }
 0x77c   :  { %1261 = vmin.xlane.f32.xlu0 %v1260_v51  ;;  %vm1274_vm7 = vcmp.eq.f32.partialorder %v1271_v7, %v10460_v48  ;;  %v1234_v7 = vcvt.f32.s32 %v10451_v35  ;;  %v1279_v35 = vcvt.f32.s32 %v10460_v48  ;;  %v1265_v38 = vshll.u32 %v1264_v25, 16 }
 0x77d   :  { %v1275_v27 = vsel %vm1274_vm7, %v1270_v52, inf }
 0x77e   :  { %1276 = vmin.xlane.f32.xlu1 %v1275_v27  ;;  %v1235_v21 = vshll.u32 %v1234_v7, 16  ;;  %v1280_v48 = vshll.u32 %v1279_v35, 16 }
 0x7fd   :  { %v1172_v59 = vpop.xlane.xlu0 %1171 }
 0x7fe   :  { %v1173_v63 = vcvt.f32.s32 %v1172_v59 }
 0x7ff   :  { %v1187_v2 = vpop.xlane.xlu1 %1186 }
 0x800   :  { %v1176_v5 = vadd.s32 %v1175_v60, %v1173_v63  ;;  %v1188_v6 = vcvt.f32.s32 %v1187_v2 }
 0x801   :  { %v1202_v8 = vpop.xlane.xlu0 %1201 }
 0x802   :  { %vm1282_vm8 = vcmp.eq.s32.totalorder %v10288_v1, %v1176_v5  ;;  %v1191_v10 = vadd.s32 %v1190_v3, %v1188_v6  ;;  %v1203_v11 = vcvt.f32.s32 %v1202_v8 }
 0x803   :  { %v1217_v15 = vpop.xlane.xlu1 %1216  ;;  %v7637_v26 = vsel %vm1282_vm8, 1.0, %v10057_v62 }
 0x804   :  { %vm1283_vm9 = vcmp.eq.s32.totalorder %v10288_v1, %v1191_v10  ;;  %v1206_v18 = vadd.s32 %v1205_v9, %v1203_v11  ;;  %v1218_v20 = vcvt.f32.s32 %v1217_v15 }
 0x805   :  { %v7638_v23 = vsel %vm1283_vm9, 1.0, %v10057_v62  ;;  %v1232_v28 = vpop.xlane.xlu0 %1231 }
 0x806   :  { %vm1284_vm11 = vcmp.eq.s32.totalorder %v10288_v1, %v1206_v18  ;;  %v1221_v30 = vadd.s32 %v1220_v16, %v1218_v20  ;;  %v1233_v31 = vcvt.f32.s32 %v1232_v28  ;;  %v1306_v32 = vpack.c.bf16 %v7638_v23, %v7637_v26 }
 0x807   :  { %v1247_v34 = vpop.xlane.xlu1 %1246  ;;  %v7639_v39 = vsel %vm1284_vm11, 1.0, %v10057_v62 }
 0x808   :  { %vm1285_vm12 = vcmp.eq.s32.totalorder %v10288_v1, %v1221_v30  ;;  %v1236_v36 = vadd.s32 %v1235_v21, %v1233_v31  ;;  %v1248_v37 = vcvt.f32.s32 %v1247_v34  ;;  %8766 = vmatprep.mubr.msk.bf16.mxu1 %vm589_vm10, %v1306_v32  ;;  %8782 = vmatprep.mubr.msk.bf16.mxu0 %vm589_vm10, %v1306_v32 }
 0x809   :  { %v7640_v41 = vsel %vm1285_vm12, 1.0, %v10057_v62  ;;  %v1262_v45 = vpop.xlane.xlu0 %1261 }
 0x80a   :  { %v1307_v46 = vpack.c.bf16 %v7640_v41, %v7639_v39  ;;  %vm1286_vm13 = vcmp.eq.s32.totalorder %v10288_v1, %v1236_v36  ;;  %v1251_v47 = vadd.s32 %v1250_v33, %v1248_v37  ;;  %v1263_v17 = vcvt.f32.s32 %v1262_v45 }
 0x80b   :  { %v1277_v14 = vpop.xlane.xlu1 %1276  ;;  %v7641_v27 = vsel %vm1286_vm13, 1.0, %v10057_v62 }
 0x80c   :  { %vm1287_vm14 = vcmp.eq.s32.totalorder %v10288_v1, %v1251_v47  ;;  %v1266_v51 = vadd.s32 %v1265_v38, %v1263_v17  ;;  %v1278_v52 = vcvt.f32.s32 %v1277_v14  ;;  %8767 = vmatmul.mubr.msk.bf16.vlgmr.msra.gmra.mrb[8].mxu1 %vm589_vm10, %v1307_v46  ;;  %8783 = vmatmul.mubr.msk.bf16.vlgmr.msra.gmra.mrb[24].mxu0 %vm589_vm10, %v1307_v46 }
 0x80d   :  { %v7642_v53 = vsel %vm1287_vm14, 1.0, %v10057_v62  ;;  %8791 = vmatpush3.bf16.msra.mxu0 %v9484_v57  ;;  %v9485_v57 = vld [vmem:[%s10105_s3 + $0x28] sm:$0xff]  }
 0x80e   :  { %vm1288_vm15 = vcmp.eq.s32.totalorder %v10288_v1, %v1266_v51  ;;  %v1281_v24 = vadd.s32 %v1280_v48, %v1278_v52  ;;  %v1308_v54 = vpack.c.bf16 %v7642_v53, %v7641_v27  ;;  %8792 = vmatprep.subr.bf16.mxu0 %v9485_v57 }
 0x80f   :  { %v7643_v55 = vsel %vm1288_vm15, 1.0, %v10057_v62 }
 0x810   :  { %vm1289_vm0 = vcmp.eq.s32.totalorder %v10288_v1, %v1281_v24  ;;  %8770 = vmatprep.mubr.msk.bf16.mxu1 %vm589_vm10, %v1308_v54  ;;  %8786 = vmatprep.mubr.msk.bf16.mxu0 %vm589_vm10, %v1308_v54 }
 0x811   :  { %v7644_v22 = vsel %vm1289_vm0, 1.0, %v10057_v62  ;;  %8793 = vmatpush3.bf16.msra.mxu0 %v9485_v57 }
 0x812   :  { %v1309_v56 = vpack.c.bf16 %v7644_v22, %v7643_v55 }
 0x814   :  { %8771 = vmatmul.mubr.msk.bf16.gmra.mrb[12].mxu1 %vm589_vm10, %v1309_v56  ;;  %8787 = vmatmul.mubr.msk.bf16.gmra.mrb[28].mxu0 %vm589_vm10, %v1309_v56 }
 0x8df   :  { %v8784_v29 = vpop.f32.mrb[24].mxu0 }
 0x8e0   :  { %v1495_v58 = vpop.f32.mrb[25].mxu0  ;;  %v10513_v3 = vsub.f32 %v10386_v44, %v8784_v29 }
 0x8e1   :  { %v8785_v59 = vpop.f32.mrb[26].mxu0  ;;  %v10507_v63 = vsub.f32 %v10380_v42, %v1495_v58 }
 0x8e2   :  { %v10504_v60 = vsub.f32 %v10377_v40, %v8785_v59  ;;  %v1498_v61 = vpop.f32.mrb[27].mxu0 }
 0x8e3   :  { %v10510_v2 = vsub.f32 %v10383_v43, %v1498_v61 }
 0x8e4   :  { %v1535_v5 = vpack.c.bf16 %v10504_v60, %v10513_v3 }
 0x8e5   :  { %v1534_v4 = vpack.c.bf16 %v10510_v2, %v10507_v63 }
 0x8e7   :  { %v8788_v6 = vpop.f32.mrb[28].mxu0  ;;  %8794 = vmatprep.mubr.msk.bf16.mxu0 %vm329_vm1, %v1534_v4 }
 0x8e8   :  { %v1511_v40 = vpop.f32.mrb[29].mxu0  ;;  %8795 = vmatmul.mubr.msk.bf16.vlgmr.msra.gmra.mrb[32].mxu0 %vm329_vm1, %v1535_v5  ;;  %v10531_v9 = vsub.f32 %v10404_v50, %v8788_v6 }
 0x8e9   :  { %v8789_v42 = vpop.f32.mrb[30].mxu0  ;;  %v10525_v44 = vsub.f32 %v10398_v19, %v1511_v40  ;;  %v7688_v19 = vld [vmem:[%s10115_s14 + $0x2] ss:$0 sm:$0xff] }
 0x8ea   :  { %v10522_v43 = vsub.f32 %v10395_v12, %v8789_v42  ;;  %v1514_v7 = vpop.f32.mrb[31].mxu0 }
 0x8eb   :  { %v10528_v8 = vsub.f32 %v10401_v49, %v1514_v7 }
 0x8ec   :  { %v1537_v11 = vpack.c.bf16 %v10522_v43, %v10531_v9 }
 0x8ed   :  { %v1536_v10 = vpack.c.bf16 %v10528_v8, %v10525_v44 }
 0x8ef   :  { %8798 = vmatprep.mubr.msk.bf16.mxu0 %vm329_vm1, %v1536_v10 }
 0x8f0   :  { %8799 = vmatmul.mubr.msk.bf16.gmra.mrb[36].mxu0 %vm329_vm1, %v1537_v11 }
 0x9bb   :  { %v8796_v12 = vpop.f32.mrb[32].mxu0 }
 0x9bc   :  { %v1601_v13 = vpop.f32.mrb[33].mxu0  ;;  %v1636_v15 = vmul.f32 2.0, %v8796_v12 }
 0x9bd   :  { %v1634_v16 = vmul.f32 2.0, %v1601_v13  ;;  %v8797_v49 = vpop.f32.mrb[34].mxu0 }
 0x9be   :  { %v1604_v18 = vpop.f32.mrb[35].mxu0  ;;  %v1637_v20 = vmul.f32 2.0, %v8797_v49  ;;  %v1650_v23 = vsub.f32 %v7688_v19, %v1636_v15 }
 0x9bf   :  { %v1635_v50 = vmul.f32 2.0, %v1604_v18  ;;  %v1648_v21 = vsub.f32 %v7688_v19, %v1634_v16 }
 0x9c0   :  { %v1651_v31 = vsub.f32 %v7688_v19, %v1637_v20  ;;  %v1662_v36 = vsel %vm589_vm10, %v1650_v23, inf }
 0x9c1   :  { %v1656_v25 = vsel %vm589_vm10, %v1648_v21, inf  ;;  %v1649_v26 = vsub.f32 %v7688_v19, %v1635_v50 }
 0x9c2   :  { %1657 = vmin.xlane.f32.xlu0 %v1656_v25  ;;  %v1665_v41 = vsel %vm589_vm10, %v1651_v31, inf }
 0x9c3   :  { %v8800_v28 = vpop.f32.mrb[36].mxu0  ;;  %v1659_v30 = vsel %vm589_vm10, %v1649_v26, inf }
 0x9c4   :  { %1660 = vmin.xlane.f32.xlu1 %v1659_v30  ;;  %v1617_v32 = vpop.f32.mrb[37].mxu0  ;;  %v1640_v33 = vmul.f32 2.0, %v8800_v28 }
 0x9c5   :  { %v1638_v34 = vmul.f32 2.0, %v1617_v32  ;;  %v8801_v35 = vpop.f32.mrb[38].mxu0 }
 0x9c6   :  { %1663 = vmin.xlane.f32.xlu0 %v1662_v36  ;;  %v1620_v37 = vpop.f32.mrb[39].mxu0  ;;  %v1641_v38 = vmul.f32 2.0, %v8801_v35  ;;  %v1654_v17 = vsub.f32 %v7688_v19, %v1640_v33  ;;  %v9486_v36 = vld [vmem:[%s10110_s8 + $0x40] sm:$0xff]  }
 0x9c7   :  { %v1639_v39 = vmul.f32 2.0, %v1620_v37  ;;  %v1652_v45 = vsub.f32 %v7688_v19, %v1638_v34  ;;  %v9487_v37 = vld [vmem:[%s10120_s19 + $0x40] sm:$0xff]   ;;  %8818 = vmatprep.subr.bf16.mxu0 %v9486_v36 }
 0x9c8   :  { %1666 = vmin.xlane.f32.xlu1 %v1665_v41  ;;  %v1655_v48 = vsub.f32 %v7688_v19, %v1641_v38  ;;  %v1674_v51 = vsel %vm589_vm10, %v1654_v17, inf  ;;  %8802 = vmatprep.subr.bf16.mxu1 %v9487_v37 }
 0x9c9   :  { %v1668_v46 = vsel %vm589_vm10, %v1652_v45, inf  ;;  %v1653_v47 = vsub.f32 %v7688_v19, %v1639_v39  ;;  %8819 = vmatpush3.bf16.msra.mxu0 %v9486_v36  ;;  %8803 = vmatpush3.bf16.msra.mxu1 %v9487_v37 }
 0x9ca   :  { %1669 = vmin.xlane.f32.xlu0 %v1668_v46  ;;  %v1677_v52 = vsel %vm589_vm10, %v1655_v48, inf }
 0x9cb   :  { %v1671_v14 = vsel %vm589_vm10, %v1653_v47, inf }
 0x9cc   :  { %1672 = vmin.xlane.f32.xlu1 %v1671_v14 }
 0x9ce   :  { %1675 = vmin.xlane.f32.xlu0 %v1674_v51 }
 0x9d0   :  { %1678 = vmin.xlane.f32.xlu1 %v1677_v52 }
 0xa4f   :  { %v1658_v27 = vpop.xlane.xlu0 %1657 }
 0xa50   :  { %vm1680_vm2 = vcmp.le.f32.partialorder %v1648_v21, %v1658_v27 }
 0xa51   :  { %v1688_v53 = vsel %vm1680_vm2, %v10288_v1, 64  ;;  %v1661_v24 = vpop.xlane.xlu1 %1660 }
 0xa52   :  { %vm1681_vm3 = vcmp.le.f32.partialorder %v1649_v26, %v1661_v24  ;;  %v1696_v54 = vsel %vm589_vm10, %v1688_v53, 2147483647 }
 0xa53   :  { %v1689_v55 = vsel %vm1681_vm3, %v10288_v1, 64  ;;  %v1664_v22 = vpop.xlane.xlu0 %1663  ;;  %v1698_v56 = vshra.s32 %v1696_v54, 16  ;;  %v1697_v38 = vand.u32 65535, %v1696_v54 }
 0xa54   :  { %vm1682_vm4 = vcmp.le.f32.partialorder %v1650_v23, %v1664_v22  ;;  %v1711_v57 = vsel %vm589_vm10, %v1689_v55, 2147483647 }
 0xa55   :  { %v1690_v29 = vsel %vm1682_vm4, %v10288_v1, 64  ;;  %v1667_v58 = vpop.xlane.xlu1 %1666  ;;  %v1700_v59 = vcvt.s32.f32 %v1698_v56  ;;  %v1713_v61 = vshra.s32 %v1711_v57, 16  ;;  %v1712_v39 = vand.u32 65535, %v1711_v57 }
 0xa56   :  { %vm1683_vm5 = vcmp.le.f32.partialorder %v1651_v31, %v1667_v58  ;;  %v1726_v4 = vsel %vm589_vm10, %v1690_v29, 2147483647 }
 0xa57   :  { %v1691_v5 = vsel %vm1683_vm5, %v10288_v1, 64  ;;  %1701 = vmin.xlane.f32.xlu0 %v1700_v59  ;;  %v1670_v6 = vpop.xlane.xlu0 %1669  ;;  %v1715_v40 = vcvt.s32.f32 %v1713_v61  ;;  %v1728_v42 = vshra.s32 %v1726_v4, 16  ;;  %v1727_v46 = vand.u32 65535, %v1726_v4 }
 0xa58   :  { %vm1684_vm6 = vcmp.le.f32.partialorder %v1652_v45, %v1670_v6  ;;  %v1741_v7 = vsel %vm589_vm10, %v1691_v5, 2147483647  ;;  %v1699_v45 = vcvt.s32.f32 %v1697_v38  ;;  %v1714_v14 = vcvt.s32.f32 %v1712_v39 }
 0xa59   :  { %v1692_v10 = vsel %vm1684_vm6, %v10288_v1, 64  ;;  %1716 = vmin.xlane.f32.xlu1 %v1715_v40  ;;  %v1673_v11 = vpop.xlane.xlu1 %1672  ;;  %v1730_v12 = vcvt.s32.f32 %v1728_v42  ;;  %v1743_v13 = vshra.s32 %v1741_v7, 16  ;;  %v1729_v27 = vcvt.s32.f32 %v1727_v46 }
 0xa5a   :  { %vm1685_vm7 = vcmp.le.f32.partialorder %v1653_v47, %v1673_v11  ;;  %v1756_v19 = vsel %vm589_vm10, %v1692_v10, 2147483647 }
 0xa5b   :  { %v1693_v15 = vsel %vm1685_vm7, %v10288_v1, 64  ;;  %1731 = vmin.xlane.f32.xlu0 %v1730_v12  ;;  %v1676_v16 = vpop.xlane.xlu0 %1675  ;;  %v1745_v49 = vcvt.s32.f32 %v1743_v13  ;;  %v1758_v18 = vshra.s32 %v1756_v19, 16  ;;  %v1757_v53 = vand.u32 65535, %v1756_v19  ;;  %v9488_v13 = vld [vmem:[%s10110_s8 + $0x48] sm:$0xff]  }
 0xa5c   :  { %vm1686_vm8 = vcmp.le.f32.partialorder %v1654_v17, %v1676_v16  ;;  %v1771_v20 = vsel %vm589_vm10, %v1693_v15, 2147483647  ;;  %v9489_v19 = vld [vmem:[%s10120_s19 + $0x48] sm:$0xff]   ;;  %8820 = vmatprep.subr.bf16.mxu0 %v9488_v13  ;;  %v9490_v15 = vld [vmem:[%s10110_s8 + $0x50] sm:$0xff]  }
 0xa5d   :  { %v1694_v50 = vsel %vm1686_vm8, %v10288_v1, 64  ;;  %1746 = vmin.xlane.f32.xlu1 %v1745_v49  ;;  %v1679_v21 = vpop.xlane.xlu1 %1678  ;;  %v1760_v25 = vcvt.s32.f32 %v1758_v18  ;;  %v1773_v26 = vshra.s32 %v1771_v20, 16  ;;  %v1772_v22 = vand.u32 65535, %v1771_v20  ;;  %8804 = vmatprep.subr.bf16.mxu1 %v9489_v19  ;;  %v9491_v16 = vld [vmem:[%s10120_s19 + $0x50] sm:$0xff]   ;;  %v9493_v18 = vld [vmem:[%s10120_s19 + $0x58] sm:$0xff]  }
 0xa5e   :  { %vm1687_vm9 = vcmp.le.f32.partialorder %v1655_v48, %v1679_v21  ;;  %v1786_v23 = vsel %vm589_vm10, %v1694_v50, 2147483647  ;;  %v1742_v48 = vand.u32 65535, %v1741_v7  ;;  %v1759_v29 = vcvt.s32.f32 %v1757_v53  ;;  %8821 = vmatpush3.bf16.msra.mxu0 %v9488_v13  ;;  %8805 = vmatpush3.bf16.msra.mxu1 %v9489_v19  ;;  %v9494_v20 = vld [vmem:[%s10105_s3 + $0x30] sm:$0xff]  }
 0xa5f   :  { %v1695_v28 = vsel %vm1687_vm9, %v10288_v1, 64  ;;  %1761 = vmin.xlane.f32.xlu0 %v1760_v25  ;;  %v1775_v30 = vcvt.s32.f32 %v1773_v26  ;;  %v1788_v31 = vshra.s32 %v1786_v23, 16  ;;  %v1787_v58 = vand.u32 65535, %v1786_v23  ;;  %8822 = vmatprep.subr.bf16.mxu0 %v9490_v15 }
 0xa60   :  { %v1801_v32 = vsel %vm589_vm10, %v1695_v28, 2147483647  ;;  %v1744_v55 = vcvt.s32.f32 %v1742_v48  ;;  %v1774_v4 = vcvt.s32.f32 %v1772_v22  ;;  %8806 = vmatprep.subr.bf16.mxu1 %v9491_v16 }
 0xa61   :  { %1776 = vmin.xlane.f32.xlu1 %v1775_v30  ;;  %v1790_v33 = vcvt.s32.f32 %v1788_v31  ;;  %v1803_v34 = vshra.s32 %v1801_v32, 16  ;;  %v1802_v5 = vand.u32 65535, %v1801_v32  ;;  %v1789_v42 = vcvt.s32.f32 %v1787_v58 }
 0xa62   :  { %8823 = vmatpush3.bf16.msra.mxu0 %v9490_v15  ;;  %8807 = vmatpush3.bf16.msra.mxu1 %v9491_v16 }
 0xa63   :  { %1791 = vmin.xlane.f32.xlu0 %v1790_v33  ;;  %v1805_v35 = vcvt.s32.f32 %v1803_v34  ;;  %v1804_v11 = vcvt.s32.f32 %v1802_v5  ;;  %8808 = vmatprep.subr.bf16.mxu1 %v9493_v18 }
 0xa65   :  { %1806 = vmin.xlane.f32.xlu1 %v1805_v35 }
 0xa66   :  { %8809 = vmatpush3.bf16.msra.mxu1 %v9493_v18 }
 0xa67   :  { %8834 = vmatprep.subr.bf16.mxu1 %v9494_v20 }
 0xae4   :  { %v10566_v41 = vpop.xlane.xlu0 %1701 }
 0xae5   :  { %vm1703_vm11 = vcmp.eq.f32.partialorder %v1700_v59, %v10566_v41  ;;  %v1708_v50 = vcvt.f32.s32 %v10566_v41 }
 0xae6   :  { %v10569_v47 = vpop.xlane.xlu1 %1716  ;;  %v1704_v17 = vsel %vm1703_vm11, %v1699_v45, inf }
 0xae7   :  { %1705 = vmin.xlane.f32.xlu0 %v1704_v17  ;;  %vm1718_vm12 = vcmp.eq.f32.partialorder %v1715_v40, %v10569_v47  ;;  %v1723_v21 = vcvt.f32.s32 %v10569_v47  ;;  %v1709_v26 = vshll.u32 %v1708_v50, 16 }
 0xae8   :  { %v10572_v51 = vpop.xlane.xlu0 %1731  ;;  %v1719_v52 = vsel %vm1718_vm12, %v1714_v14, inf }
 0xae9   :  { %1720 = vmin.xlane.f32.xlu1 %v1719_v52  ;;  %vm1733_vm13 = vcmp.eq.f32.partialorder %v1730_v12, %v10572_v51  ;;  %v1738_v23 = vcvt.f32.s32 %v10572_v51  ;;  %v1724_v31 = vshll.u32 %v1723_v21, 16 }
 0xaea   :  { %v10575_v24 = vpop.xlane.xlu1 %1746  ;;  %v1734_v54 = vsel %vm1733_vm13, %v1729_v27, inf }
 0xaeb   :  { %1735 = vmin.xlane.f32.xlu0 %v1734_v54  ;;  %vm1748_vm14 = vcmp.eq.f32.partialorder %v1745_v49, %v10575_v24  ;;  %v9492_v49 = vld [vmem:[%s10110_s8 + $0x58] sm:$0xff]   ;;  %v1753_v32 = vcvt.f32.s32 %v10575_v24  ;;  %v1739_v37 = vshll.u32 %v1738_v23, 16  ;;  %s11945_s8 = sld [smem:[#allocation12_spill]] }
 0xaec   :  { %v10578_v56 = vpop.xlane.xlu0 %1761  ;;  %v1749_v57 = vsel %vm1748_vm14, %v1744_v55, inf  ;;  %8824 = vmatprep.subr.bf16.mxu0 %v9492_v49 }
 0xaed   :  { %1750 = vmin.xlane.f32.xlu1 %v1749_v57  ;;  %vm1763_vm15 = vcmp.eq.f32.partialorder %v1760_v25, %v10578_v56  ;;  %8825 = vmatpush3.bf16.msra.mxu0 %v9492_v49  ;;  %v1754_v46 = vshll.u32 %v1753_v32, 16 }
 0xaee   :  { %v10581_v59 = vpop.xlane.xlu1 %1776  ;;  %v1764_v61 = vsel %vm1763_vm15, %v1759_v29, inf }
 0xaef   :  { %1765 = vmin.xlane.f32.xlu0 %v1764_v61  ;;  %vm1778_vm0 = vcmp.eq.f32.partialorder %v1775_v30, %v10581_v59  ;;  %v1783_v41 = vcvt.f32.s32 %v10581_v59 }
 0xaf0   :  { %v10584_v6 = vpop.xlane.xlu0 %1791  ;;  %v1779_v40 = vsel %vm1778_vm0, %v1774_v4, inf }
 0xaf1   :  { %1780 = vmin.xlane.f32.xlu1 %v1779_v40  ;;  %vm1793_vm2 = vcmp.eq.f32.partialorder %v1790_v33, %v10584_v6  ;;  %v1798_v48 = vcvt.f32.s32 %v10584_v6  ;;  %v1784_v55 = vshll.u32 %v1783_v41, 16 }
 0xaf2   :  { %v10587_v7 = vpop.xlane.xlu1 %1806  ;;  %v1794_v10 = vsel %vm1793_vm2, %v1789_v42, inf }
 0xaf3   :  { %1795 = vmin.xlane.f32.xlu0 %v1794_v10  ;;  %vm1808_vm3 = vcmp.eq.f32.partialorder %v1805_v35, %v10587_v7  ;;  %v1768_v35 = vcvt.f32.s32 %v10578_v56  ;;  %v1813_v56 = vcvt.f32.s32 %v10587_v7  ;;  %v1799_v58 = vshll.u32 %v1798_v48, 16 }
 0xaf4   :  { %v1809_v12 = vsel %vm1808_vm3, %v1804_v11, inf }
 0xaf5   :  { %1810 = vmin.xlane.f32.xlu1 %v1809_v12  ;;  %v1769_v14 = vshll.u32 %v1768_v35, 16  ;;  %v1814_v7 = vshll.u32 %v1813_v56, 16 }
 0xb74   :  { %v1706_v25 = vpop.xlane.xlu0 %1705 }
 0xb75   :  { %v1707_v28 = vcvt.f32.s32 %v1706_v25 }
 0xb76   :  { %v1721_v30 = vpop.xlane.xlu1 %1720 }
 0xb77   :  { %v1710_v33 = vadd.s32 %v1709_v26, %v1707_v28  ;;  %v1722_v34 = vcvt.f32.s32 %v1721_v30 }
 0xb78   :  { %v1736_v36 = vpop.xlane.xlu0 %1735 }
 0xb79   :  { %vm1816_vm4 = vcmp.eq.s32.totalorder %v10288_v1, %v1710_v33  ;;  %v1725_v38 = vadd.s32 %v1724_v31, %v1722_v34  ;;  %v1737_v39 = vcvt.f32.s32 %v1736_v36 }
 0xb7a   :  { %v1751_v45 = vpop.xlane.xlu1 %1750  ;;  %v7689_v51 = vsel %vm1816_vm4, 1.0, %v10057_v62 }
 0xb7b   :  { %vm1817_vm5 = vcmp.eq.s32.totalorder %v10288_v1, %v1725_v38  ;;  %v1740_v47 = vadd.s32 %v1739_v37, %v1737_v39  ;;  %v1752_v17 = vcvt.f32.s32 %v1751_v45 }
 0xb7c   :  { %v7690_v52 = vsel %vm1817_vm5, 1.0, %v10057_v62  ;;  %v1766_v27 = vpop.xlane.xlu0 %1765 }
 0xb7d   :  { %vm1818_vm6 = vcmp.eq.s32.totalorder %v10288_v1, %v1740_v47  ;;  %v1755_v53 = vadd.s32 %v1754_v46, %v1752_v17  ;;  %v1767_v24 = vcvt.f32.s32 %v1766_v27  ;;  %v1840_v54 = vpack.c.bf16 %v7690_v52, %v7689_v51  ;;  %v7740_v46 = vld [vmem:[%s10115_s14 + $0x3] ss:$0 sm:$0xff]  ;;  %s11946_s14 = sld [smem:[#allocation13_spill]] }
 0xb7e   :  { %v1781_v22 = vpop.xlane.xlu1 %1780  ;;  %v7691_v59 = vsel %vm1818_vm6, 1.0, %v10057_v62 }
 0xb7f   :  { %vm1819_vm7 = vcmp.eq.s32.totalorder %v10288_v1, %v1755_v53  ;;  %v1770_v57 = vadd.s32 %v1769_v14, %v1767_v24  ;;  %v1782_v29 = vcvt.f32.s32 %v1781_v22  ;;  %8810 = vmatprep.mubr.msk.bf16.mxu1 %vm589_vm10, %v1840_v54  ;;  %8826 = vmatprep.mubr.msk.bf16.mxu0 %vm589_vm10, %v1840_v54 }
 0xb80   :  { %v7692_v61 = vsel %vm1819_vm7, 1.0, %v10057_v62  ;;  %v1796_v4 = vpop.xlane.xlu0 %1795 }
 0xb81   :  { %v1841_v5 = vpack.c.bf16 %v7692_v61, %v7691_v59  ;;  %vm1820_vm8 = vcmp.eq.s32.totalorder %v10288_v1, %v1770_v57  ;;  %v1785_v6 = vadd.s32 %v1784_v55, %v1782_v29  ;;  %v1797_v40 = vcvt.f32.s32 %v1796_v4 }
 0xb82   :  { %v1811_v42 = vpop.xlane.xlu1 %1810  ;;  %v7693_v12 = vsel %vm1820_vm8, 1.0, %v10057_v62 }
 0xb83   :  { %vm1821_vm9 = vcmp.eq.s32.totalorder %v10288_v1, %v1785_v6  ;;  %v1800_v10 = vadd.s32 %v1799_v58, %v1797_v40  ;;  %v1812_v11 = vcvt.f32.s32 %v1811_v42  ;;  %8811 = vmatmul.mubr.msk.bf16.vlgmr.msra.gmra.mrb[8].mxu1 %vm589_vm10, %v1841_v5  ;;  %8827 = vmatmul.mubr.msk.bf16.vlgmr.msra.gmra.mrb[40].mxu0 %vm589_vm10, %v1841_v5 }
 0xb84   :  { %v7694_v13 = vsel %vm1821_vm9, 1.0, %v10057_v62  ;;  %8835 = vmatpush3.bf16.msra.mxu1 %v9494_v20  ;;  %v9495_v20 = vld [vmem:[%s10105_s3 + $0x38] sm:$0xff]   ;;  %s11944_s3 = sld [smem:[#allocation14_spill]] }
 0xb85   :  { %vm1822_vm11 = vcmp.eq.s32.totalorder %v10288_v1, %v1800_v10  ;;  %v1815_v19 = vadd.s32 %v1814_v7, %v1812_v11  ;;  %v1842_v15 = vpack.c.bf16 %v7694_v13, %v7693_v12  ;;  %8836 = vmatprep.subr.bf16.mxu1 %v9495_v20 }
 0xb86   :  { %v7695_v16 = vsel %vm1822_vm11, 1.0, %v10057_v62 }
 0xb87   :  { %vm1823_vm12 = vcmp.eq.s32.totalorder %v10288_v1, %v1815_v19  ;;  %8814 = vmatprep.mubr.msk.bf16.mxu1 %vm589_vm10, %v1842_v15  ;;  %8830 = vmatprep.mubr.msk.bf16.mxu0 %vm589_vm10, %v1842_v15 }
 0xb88   :  { %v7696_v49 = vsel %vm1823_vm12, 1.0, %v10057_v62  ;;  %8837 = vmatpush3.bf16.msra.mxu1 %v9495_v20 }
 0xb89   :  { %v1843_v18 = vpack.c.bf16 %v7696_v49, %v7695_v16 }
 0xb8b   :  { %8815 = vmatmul.mubr.msk.bf16.gmra.mrb[12].mxu1 %vm589_vm10, %v1843_v18  ;;  %8831 = vmatmul.mubr.msk.bf16.gmra.mrb[44].mxu0 %vm589_vm10, %v1843_v18 }
 0xc56   :  { %v8828_v50 = vpop.f32.mrb[40].mxu0 }
 0xc57   :  { %v2029_v21 = vpop.f32.mrb[41].mxu0  ;;  %v2062_v26 = vsub.f32 %v10513_v3, %v8828_v50 }
 0xc58   :  { %v8829_v25 = vpop.f32.mrb[42].mxu0  ;;  %v2060_v30 = vsub.f32 %v10507_v63, %v2029_v21 }
 0xc59   :  { %v2063_v23 = vsub.f32 %v10504_v60, %v8829_v25  ;;  %v2032_v28 = vpop.f32.mrb[43].mxu0 }
 0xc5a   :  { %v2061_v31 = vsub.f32 %v10510_v2, %v2032_v28 }
 0xc5b   :  { %v2069_v32 = vpack.c.bf16 %v2063_v23, %v2062_v26 }
 0xc5c   :  { %v2068_v33 = vpack.c.bf16 %v2061_v31, %v2060_v30 }
 0xc5e   :  { %v8832_v34 = vpop.f32.mrb[44].mxu0  ;;  %8838 = vmatprep.mubr.msk.bf16.mxu1 %vm329_vm1, %v2068_v33 }
 0xc5f   :  { %v2045_v35 = vpop.f32.mrb[45].mxu0  ;;  %8839 = vmatmul.mubr.msk.bf16.vlgmr.msra.gmra.mrb[24].mxu1 %vm329_vm1, %v2069_v32  ;;  %v2066_v37 = vsub.f32 %v10531_v9, %v8832_v34 }
 0xc60   :  { %v8833_v36 = vpop.f32.mrb[46].mxu0  ;;  %v2064_v38 = vsub.f32 %v10525_v44, %v2045_v35 }
 0xc61   :  { %v2067_v3 = vsub.f32 %v10522_v43, %v8833_v36  ;;  %v2048_v60 = vpop.f32.mrb[47].mxu0 }
 0xc62   :  { %v2065_v63 = vsub.f32 %v10528_v8, %v2048_v60 }
 0xc63   :  { %v2071_v2 = vpack.c.bf16 %v2067_v3, %v2066_v37 }
 0xc64   :  { %v2070_v39 = vpack.c.bf16 %v2065_v63, %v2064_v38 }
 0xc66   :  { %8842 = vmatprep.mubr.msk.bf16.mxu1 %vm329_vm1, %v2070_v39 }
 0xc67   :  { %8843 = vmatmul.mubr.msk.bf16.gmra.mrb[28].mxu1 %vm329_vm1, %v2071_v2 }
 0xd32   :  { %v8840_v41 = vpop.f32.mrb[24].mxu1 }
 0xd33   :  { %v2135_v45 = vpop.f32.mrb[25].mxu1  ;;  %v2170_v47 = vmul.f32 2.0, %v8840_v41 }
 0xd34   :  { %v2168_v17 = vmul.f32 2.0, %v2135_v45  ;;  %v8841_v14 = vpop.f32.mrb[26].mxu1 }
 0xd35   :  { %v2138_v9 = vpop.f32.mrb[27].mxu1  ;;  %v2171_v48 = vmul.f32 2.0, %v8841_v14  ;;  %v2184_v8 = vsub.f32 %v7740_v46, %v2170_v47 }
 0xd36   :  { %v2169_v43 = vmul.f32 2.0, %v2138_v9  ;;  %v2182_v51 = vsub.f32 %v7740_v46, %v2168_v17 }
 0xd37   :  { %v2185_v24 = vsub.f32 %v7740_v46, %v2171_v48  ;;  %v2196_v57 = vsel %vm589_vm10, %v2184_v8, inf }
 0xd38   :  { %v2190_v44 = vsel %vm589_vm10, %v2182_v51, inf  ;;  %v2183_v52 = vsub.f32 %v7740_v46, %v2169_v43 }
 0xd39   :  { %2191 = vmin.xlane.f32.xlu0 %v2190_v44  ;;  %v2199_v61 = vsel %vm589_vm10, %v2185_v24, inf }
 0xd3a   :  { %v8844_v27 = vpop.f32.mrb[28].mxu1  ;;  %v2193_v53 = vsel %vm589_vm10, %v2183_v52, inf }
 0xd3b   :  { %2194 = vmin.xlane.f32.xlu1 %v2193_v53  ;;  %v2151_v54 = vpop.f32.mrb[29].mxu1  ;;  %v2174_v55 = vmul.f32 2.0, %v8844_v27 }
 0xd3c   :  { %v2172_v22 = vmul.f32 2.0, %v2151_v54  ;;  %v8845_v56 = vpop.f32.mrb[30].mxu1 }
 0xd3d   :  { %2197 = vmin.xlane.f32.xlu0 %v2196_v57  ;;  %v2154_v29 = vpop.f32.mrb[31].mxu1  ;;  %v2175_v58 = vmul.f32 2.0, %v8845_v56  ;;  %v2188_v40 = vsub.f32 %v7740_v46, %v2174_v55 }
 0xd3e   :  { %v2173_v59 = vmul.f32 2.0, %v2154_v29  ;;  %v2186_v4 = vsub.f32 %v7740_v46, %v2172_v22 }
 0xd3f   :  { %2200 = vmin.xlane.f32.xlu1 %v2199_v61  ;;  %v2189_v7 = vsub.f32 %v7740_v46, %v2175_v58  ;;  %v2208_v10 = vsel %vm589_vm10, %v2188_v40, inf }
 0xd40   :  { %v2202_v5 = vsel %vm589_vm10, %v2186_v4, inf  ;;  %v2187_v6 = vsub.f32 %v7740_v46, %v2173_v59 }
 0xd41   :  { %2203 = vmin.xlane.f32.xlu0 %v2202_v5  ;;  %v2211_v11 = vsel %vm589_vm10, %v2189_v7, inf }
 0xd42   :  { %v2205_v42 = vsel %vm589_vm10, %v2187_v6, inf }
 0xd43   :  { %2206 = vmin.xlane.f32.xlu1 %v2205_v42 }
 0xd45   :  { %2209 = vmin.xlane.f32.xlu0 %v2208_v10 }
 0xd47   :  { %2212 = vmin.xlane.f32.xlu1 %v2211_v11 }
 0xdc6   :  { %v2192_v12 = vpop.xlane.xlu0 %2191 }
 0xdc7   :  { %vm2214_vm1 = vcmp.le.f32.partialorder %v2182_v51, %v2192_v12 }
 0xdc8   :  { %v2222_v13 = vsel %vm2214_vm1, %v10288_v1, 64  ;;  %v2195_v19 = vpop.xlane.xlu1 %2194 }
 0xdc9   :  { %vm2215_vm13 = vcmp.le.f32.partialorder %v2183_v52, %v2195_v19  ;;  %v2230_v15 = vsel %vm589_vm10, %v2222_v13, 2147483647 }
 0xdca   :  { %v2223_v16 = vsel %vm2215_vm13, %v10288_v1, 64  ;;  %v2198_v49 = vpop.xlane.xlu0 %2197  ;;  %v2232_v18 = vshra.s32 %v2230_v15, 16  ;;  %v2231_v27 = vand.u32 65535, %v2230_v15 }
 0xdcb   :  { %vm2216_vm14 = vcmp.le.f32.partialorder %v2184_v8, %v2198_v49  ;;  %v2245_v20 = vsel %vm589_vm10, %v2223_v16, 2147483647  ;;  %v9496_v8 = vld [vmem:[%s10120_s19 + $0x60] sm:$0xff]  }
 0xdcc   :  { %v2224_v50 = vsel %vm2216_vm14, %v10288_v1, 64  ;;  %v2201_v21 = vpop.xlane.xlu1 %2200  ;;  %v2234_v25 = vcvt.s32.f32 %v2232_v18  ;;  %v2247_v26 = vshra.s32 %v2245_v20, 16  ;;  %8846 = vmatprep.subr.bf16.mxu1 %v9496_v8  ;;  %v2246_v53 = vand.u32 65535, %v2245_v20 }
 0xdcd   :  { %vm2217_vm15 = vcmp.le.f32.partialorder %v2185_v24, %v2201_v21  ;;  %v2260_v23 = vsel %vm589_vm10, %v2224_v50, 2147483647  ;;  %8847 = vmatpush3.bf16.msra.mxu1 %v9496_v8  ;;  %v2233_v54 = vcvt.s32.f32 %v2231_v27 }
 0xdce   :  { %v2225_v28 = vsel %vm2217_vm15, %v10288_v1, 64  ;;  %2235 = vmin.xlane.f32.xlu0 %v2234_v25  ;;  %v2204_v30 = vpop.xlane.xlu0 %2203  ;;  %v2249_v31 = vcvt.s32.f32 %v2247_v26  ;;  %v2262_v32 = vshra.s32 %v2260_v23, 16  ;;  %v2261_v55 = vand.u32 65535, %v2260_v23  ;;  %v9497_v23 = vld [vmem:[%s10120_s19 + $0x68] sm:$0xff]  }
 0xdcf   :  { %vm2218_vm0 = vcmp.le.f32.partialorder %v2186_v4, %v2204_v30  ;;  %v2275_v33 = vsel %vm589_vm10, %v2225_v28, 2147483647  ;;  %v2248_v57 = vcvt.s32.f32 %v2246_v53  ;;  %8848 = vmatprep.subr.bf16.mxu1 %v9497_v23  ;;  %v9498_v28 = vld [vmem:[%s10120_s19 + $0x70] sm:$0xff]   ;;  %v9499_v30 = vld [vmem:[%s10120_s19 + $0x78] sm:$0xff]   ;;  %s11947_s19 = sld [smem:[#allocation16_spill]] }
 0xdd0   :  { %v2226_v34 = vsel %vm2218_vm0, %v10288_v1, 64  ;;  %2250 = vmin.xlane.f32.xlu1 %v2249_v31  ;;  %v2207_v35 = vpop.xlane.xlu1 %2206  ;;  %v2264_v36 = vcvt.s32.f32 %v2262_v32  ;;  %v2277_v37 = vshra.s32 %v2275_v33, 16  ;;  %v2276_v29 = vand.u32 65535, %v2275_v33 }
 0xdd1   :  { %vm2219_vm2 = vcmp.le.f32.partialorder %v2187_v6, %v2207_v35  ;;  %v2290_v3 = vsel %vm589_vm10, %v2226_v34, 2147483647  ;;  %v2263_v61 = vcvt.s32.f32 %v2261_v55  ;;  %8849 = vmatpush3.bf16.msra.mxu1 %v9497_v23  ;;  %v462_v23 = vld [vmem:[%s10080_s13 + $0x8] sm:$0xff] }
 0xdd2   :  { %v2227_v60 = vsel %vm2219_vm2, %v10288_v1, 64  ;;  %2265 = vmin.xlane.f32.xlu0 %v2264_v36  ;;  %v2210_v38 = vpop.xlane.xlu0 %2209  ;;  %v2279_v63 = vcvt.s32.f32 %v2277_v37  ;;  %v2292_v2 = vshra.s32 %v2290_v3, 16  ;;  %v2291_v4 = vand.u32 65535, %v2290_v3  ;;  %8850 = vmatprep.subr.bf16.mxu1 %v9498_v28 }
 0xdd3   :  { %vm2220_vm3 = vcmp.le.f32.partialorder %v2188_v40, %v2210_v38  ;;  %v2305_v39 = vsel %vm589_vm10, %v2227_v60, 2147483647  ;;  %v2278_v40 = vcvt.s32.f32 %v2276_v29 }
 0xdd4   :  { %v2228_v41 = vsel %vm2220_vm3, %v10288_v1, 64  ;;  %2280 = vmin.xlane.f32.xlu1 %v2279_v63  ;;  %v2213_v45 = vpop.xlane.xlu1 %2212  ;;  %v2294_v46 = vcvt.s32.f32 %v2292_v2  ;;  %v2307_v47 = vshra.s32 %v2305_v39, 16  ;;  %v2306_v42 = vand.u32 65535, %v2305_v39 }
 0xdd5   :  { %vm2221_vm4 = vcmp.le.f32.partialorder %v2189_v7, %v2213_v45  ;;  %v2320_v17 = vsel %vm589_vm10, %v2228_v41, 2147483647  ;;  %v2293_v11 = vcvt.s32.f32 %v2291_v4  ;;  %8851 = vmatpush3.bf16.msra.mxu1 %v9498_v28 }
 0xdd6   :  { %v2229_v14 = vsel %vm2221_vm4, %v10288_v1, 64  ;;  %2295 = vmin.xlane.f32.xlu0 %v2294_v46  ;;  %v2309_v9 = vcvt.s32.f32 %v2307_v47  ;;  %v2322_v48 = vshra.s32 %v2320_v17, 16  ;;  %v2321_v12 = vand.u32 65535, %v2320_v17  ;;  %8852 = vmatprep.subr.bf16.mxu1 %v9499_v30 }
 0xdd7   :  { %v2335_v43 = vsel %vm589_vm10, %v2229_v14, 2147483647  ;;  %v2308_v15 = vcvt.s32.f32 %v2306_v42 }
 0xdd8   :  { %2310 = vmin.xlane.f32.xlu1 %v2309_v9  ;;  %v2324_v51 = vcvt.s32.f32 %v2322_v48  ;;  %v2337_v44 = vshra.s32 %v2335_v43, 16  ;;  %v2336_v16 = vand.u32 65535, %v2335_v43  ;;  %v2323_v20 = vcvt.s32.f32 %v2321_v12 }
 0xdd9   :  { %8853 = vmatpush3.bf16.msra.mxu1 %v9499_v30 }
 0xdda   :  { %2325 = vmin.xlane.f32.xlu0 %v2324_v51  ;;  %v2339_v52 = vcvt.s32.f32 %v2337_v44 }
 0xddc   :  { %2340 = vmin.xlane.f32.xlu1 %v2339_v52 }
 0xe5b   :  { %v2236_v24 = vpop.xlane.xlu0 %2235 }
 0xe5c   :  { %vm2237_vm5 = vcmp.eq.f32.partialorder %v2234_v25, %v2236_v24  ;;  %v2338_v25 = vcvt.s32.f32 %v2336_v16 }
 0xe5d   :  { %v2251_v22 = vpop.xlane.xlu1 %2250  ;;  %v2238_v56 = vsel %vm2237_vm5, %v2233_v54, inf }
 0xe5e   :  { %2239 = vmin.xlane.f32.xlu0 %v2238_v56  ;;  %vm2252_vm6 = vcmp.eq.f32.partialorder %v2249_v31, %v2251_v22  ;;  %v2242_v31 = vcvt.f32.s32 %v2236_v24  ;;  %v2257_v32 = vcvt.f32.s32 %v2251_v22 }
 0xe5f   :  { %v2266_v58 = vpop.xlane.xlu0 %2265  ;;  %v2253_v59 = vsel %vm2252_vm6, %v2248_v57, inf }
 0xe60   :  { %2254 = vmin.xlane.f32.xlu1 %v2253_v59  ;;  %vm2267_vm7 = vcmp.eq.f32.partialorder %v2264_v36, %v2266_v58  ;;  %v2243_v34 = vshll.u32 %v2242_v31, 16  ;;  %v2272_v35 = vcvt.f32.s32 %v2266_v58  ;;  %v2258_v3 = vshll.u32 %v2257_v32, 16  ;;  %v467_v32 = vld [vmem:[%s10080_s13 + $0x30] sm:$0xff] }
 0xe61   :  { %v2281_v5 = vpop.xlane.xlu1 %2280  ;;  %v2268_v6 = vsel %vm2267_vm7, %v2263_v61, inf }
 0xe62   :  { %2269 = vmin.xlane.f32.xlu0 %v2268_v6  ;;  %vm2282_vm8 = vcmp.eq.f32.partialorder %v2279_v63, %v2281_v5  ;;  %v2287_v60 = vcvt.f32.s32 %v2281_v5  ;;  %v2273_v41 = vshll.u32 %v2272_v35, 16  ;;  %v468_v35 = vld [vmem:[%s10080_s13 + $0x38] sm:$0xff] }
 0xe63   :  { %v2296_v7 = vpop.xlane.xlu0 %2295  ;;  %v2283_v10 = vsel %vm2282_vm8, %v2278_v40, inf }
 0xe64   :  { %2284 = vmin.xlane.f32.xlu1 %v2283_v10  ;;  %vm2297_vm9 = vcmp.eq.f32.partialorder %v2294_v46, %v2296_v7  ;;  %v2302_v2 = vcvt.f32.s32 %v2296_v7  ;;  %v2288_v14 = vshll.u32 %v2287_v60, 16 }
 0xe65   :  { %v2311_v13 = vpop.xlane.xlu1 %2310  ;;  %v2298_v19 = vsel %vm2297_vm9, %v2293_v11, inf }
 0xe66   :  { %2299 = vmin.xlane.f32.xlu0 %v2298_v19  ;;  %vm2312_vm11 = vcmp.eq.f32.partialorder %v2309_v9, %v2311_v13  ;;  %v2317_v47 = vcvt.f32.s32 %v2311_v13  ;;  %v2303_v43 = vshll.u32 %v2302_v2, 16 }
 0xe67   :  { %v2326_v49 = vpop.xlane.xlu0 %2325  ;;  %v2313_v18 = vsel %vm2312_vm11, %v2308_v15, inf }
 0xe68   :  { %2314 = vmin.xlane.f32.xlu1 %v2313_v18  ;;  %vm2327_vm12 = vcmp.eq.f32.partialorder %v2324_v51, %v2326_v49  ;;  %v2332_v51 = vcvt.f32.s32 %v2326_v49  ;;  %v2318_v54 = vshll.u32 %v2317_v47, 16  ;;  %v463_v18 = vld [vmem:[%s10080_s13 + $0x10] sm:$0xff] }
 0xe69   :  { %v10668_v50 = vpop.xlane.xlu1 %2340  ;;  %v2328_v21 = vsel %vm2327_vm12, %v2323_v20, inf  ;;  %v461_v20 = vld [vmem:[%s10080_s13] sm:$0xff] }
 0xe6a   :  { %2329 = vmin.xlane.f32.xlu0 %v2328_v21  ;;  %vm2342_vm1 = vcmp.eq.f32.partialorder %v2339_v52, %v10668_v50  ;;  %v2347_v22 = vcvt.f32.s32 %v10668_v50  ;;  %v2333_v29 = vshll.u32 %v2332_v51, 16  ;;  %v464_v21 = vld [vmem:[%s10080_s13 + $0x18] sm:$0xff] }
 0xe6b   :  { %v2343_v26 = vsel %vm2342_vm1, %v2338_v25, inf }
 0xe6c   :  { %2344 = vmin.xlane.f32.xlu1 %v2343_v26  ;;  %v2348_v42 = vshll.u32 %v2347_v22, 16 }
 0xeeb   :  { %v2240_v33 = vpop.xlane.xlu0 %2239 }
 0xeec   :  { %v2241_v36 = vcvt.f32.s32 %v2240_v33  ;;  %v465_v33 = vld [vmem:[%s10080_s13 + $0x20] sm:$0xff] }
 0xeed   :  { %v2255_v37 = vpop.xlane.xlu1 %2254 }
 0xeee   :  { %v2244_v38 = vadd.s32 %v2243_v34, %v2241_v36  ;;  %v2256_v63 = vcvt.f32.s32 %v2255_v37 }
 0xeef   :  { %v2270_v39 = vpop.xlane.xlu0 %2269 }
 0xef0   :  { %vm2350_vm13 = vcmp.eq.s32.totalorder %v10288_v1, %v2244_v38  ;;  %v2259_v45 = vadd.s32 %v2258_v3, %v2256_v63  ;;  %v2271_v46 = vcvt.f32.s32 %v2270_v39  ;;  %v466_v3 = vld [vmem:[%s10080_s13 + $0x28] sm:$0xff]  ;;  %s11939_s13 = sld [smem:[#allocation8_spill]] }
 0xef1   :  { %v2285_v17 = vpop.xlane.xlu1 %2284  ;;  %v7741_v44 = vsel %vm2350_vm13, 1.0, %v10057_v62 }
 0xef2   :  { %vm2351_vm14 = vcmp.eq.s32.totalorder %v10288_v1, %v2259_v45  ;;  %v2274_v9 = vadd.s32 %v2273_v41, %v2271_v46  ;;  %v2286_v48 = vcvt.f32.s32 %v2285_v17  ;;  %v9500_v41 = vld [vmem:[%s10135_s6] sm:$0xff]  }
 0xef3   :  { %v7742_v52 = vsel %vm2351_vm14, 1.0, %v10057_v62  ;;  %v2300_v8 = vpop.xlane.xlu0 %2299  ;;  %v9501_v45 = vld [vmem:[%s10140_s12] sm:$0xff]   ;;  %8862 = vmatprep.subr.bf16.mxu0 %v9500_v41 }
 0xef4   :  { %vm2352_vm15 = vcmp.eq.s32.totalorder %v10288_v1, %v2274_v9  ;;  %v2289_v27 = vadd.s32 %v2288_v14, %v2286_v48  ;;  %v2301_v53 = vcvt.f32.s32 %v2300_v8  ;;  %v2374_v24 = vpack.c.bf16 %v7742_v52, %v7741_v44  ;;  %8886 = vmatprep.subr.bf16.mxu1 %v9501_v45  ;;  %8863 = vmatpush3.bf16.msra.mxu0 %v9500_v41 }
 0xef5   :  { %v2315_v55 = vpop.xlane.xlu1 %2314  ;;  %v7743_v58 = vsel %vm2352_vm15, 1.0, %v10057_v62 }
 0xef6   :  { %vm2353_vm0 = vcmp.eq.s32.totalorder %v10288_v1, %v2289_v27  ;;  %v2304_v56 = vadd.s32 %v2303_v43, %v2301_v53  ;;  %v2316_v57 = vcvt.f32.s32 %v2315_v55  ;;  %8854 = vmatprep.mubr.msk.bf16.mxu1 %vm589_vm10, %v2374_v24 }
 0xef7   :  { %v7744_v59 = vsel %vm2353_vm0, 1.0, %v10057_v62  ;;  %v2330_v61 = vpop.xlane.xlu0 %2329 }
 0xef8   :  { %v2375_v4 = vpack.c.bf16 %v7744_v59, %v7743_v58  ;;  %vm2354_vm2 = vcmp.eq.s32.totalorder %v10288_v1, %v2304_v56  ;;  %v2319_v5 = vadd.s32 %v2318_v54, %v2316_v57  ;;  %v2331_v6 = vcvt.f32.s32 %v2330_v61 }
 0xef9   :  { %v2345_v40 = vpop.xlane.xlu1 %2344  ;;  %v7745_v11 = vsel %vm2354_vm2, 1.0, %v10057_v62 }
 0xefa   :  { %vm2355_vm3 = vcmp.eq.s32.totalorder %v10288_v1, %v2319_v5  ;;  %v2334_v7 = vadd.s32 %v2333_v29, %v2331_v6  ;;  %v2346_v10 = vcvt.f32.s32 %v2345_v40  ;;  %8855 = vmatmul.mubr.msk.bf16.vlgmr.msra.gmra.mrb[8].mxu1 %vm589_vm10, %v2375_v4 }
 0xefb   :  { %v7746_v12 = vsel %vm2355_vm3, 1.0, %v10057_v62  ;;  %8887 = vmatpush3.bf16.msra.mxu1 %v9501_v45 }
 0xefc   :  { %vm2356_vm4 = vcmp.eq.s32.totalorder %v10288_v1, %v2334_v7  ;;  %v2349_v13 = vadd.s32 %v2348_v42, %v2346_v10  ;;  %v2376_v19 = vpack.c.bf16 %v7746_v12, %v7745_v11 }
 0xefd   :  { %v7747_v15 = vsel %vm2356_vm4, 1.0, %v10057_v62 }
 0xefe   :  { %vm2357_vm5 = vcmp.eq.s32.totalorder %v10288_v1, %v2349_v13  ;;  %8858 = vmatprep.mubr.msk.bf16.mxu1 %vm589_vm10, %v2376_v19  ;;  %v9502_v13 = vld [vmem:[%s10135_s6 + $0x8] sm:$0xff]  }
 0xeff   :  { %v7748_v16 = vsel %vm2357_vm5, 1.0, %v10057_v62  ;;  %v9503_v19 = vld [vmem:[%s10140_s12 + $0x8] sm:$0xff]   ;;  %8864 = vmatprep.subr.bf16.mxu0 %v9502_v13 }
 0xf00   :  { %v2377_v49 = vpack.c.bf16 %v7748_v16, %v7747_v15  ;;  %8865 = vmatpush3.bf16.msra.mxu0 %v9502_v13  ;;  %8888 = vmatprep.subr.bf16.mxu1 %v9503_v19  ;;  %v9504_v15 = vld [vmem:[%s10135_s6 + $0x10] sm:$0xff]  }
 0xf01   :  { %8889 = vmatpush3.bf16.msra.mxu1 %v9503_v19  ;;  %v9505_v16 = vld [vmem:[%s10140_s12 + $0x10] sm:$0xff]   ;;  %8866 = vmatprep.subr.bf16.mxu0 %v9504_v15 }
 0xf02   :  { %8859 = vmatmul.mubr.msk.bf16.gmra.mrb[12].mxu1 %vm589_vm10, %v2377_v49  ;;  %8890 = vmatprep.subr.bf16.mxu1 %v9505_v16  ;;  %v9506_v49 = vld [vmem:[%s10135_s6 + $0x18] sm:$0xff]  }
 0xf04   :  { %8867 = vmatpush3.bf16.msra.mxu0 %v9504_v15 }
 0xf05   :  { %8891 = vmatpush3.bf16.msra.mxu1 %v9505_v16  ;;  %8868 = vmatprep.subr.bf16.mxu0 %v9506_v49 }
 0xf08   :  { %8869 = vmatpush3.bf16.msra.mxu0 %v9506_v49 }
 0xfcd   :  { %v8856_v50 = vpop.f32.mrb[8].mxu1 }
 0xfce   :  { %v9366_v25 = vadd.f32 %v8856_v50, %v463_v18  ;;  %v2457_v26 = vpop.f32.mrb[9].mxu1  ;;  %v9507_v18 = vld [vmem:[%s10140_s12 + $0x18] sm:$0xff]   ;;  %v9509_v50 = vld [vmem:[%s10140_s12 + $0x20] sm:$0xff]  }
 0xfcf   :  { %v9367_v1 = vadd.f32 %v2457_v26, %v461_v20  ;;  %v8857_v28 = vpop.f32.mrb[10].mxu1  ;;  %8892 = vmatprep.subr.bf16.mxu1 %v9507_v18  ;;  %v9508_v20 = vld [vmem:[%s10135_s6 + $0x20] sm:$0xff]   ;;  %v9512_v26 = vld [vmem:[%s10135_s6 + $0x30] sm:$0xff]  }
 0xfd0   :  { %2498 = vst [vmem:[#allocation2 + $0x10] sm:$0xff] %v9366_v25  ;;  %v9368_v30 = vadd.f32 %v8857_v28, %v464_v21  ;;  %v2460_v31 = vpop.f32.mrb[11].mxu1  ;;  %8893 = vmatpush3.bf16.msra.mxu1 %v9507_v18  ;;  %8870 = vmatprep.subr.bf16.mxu0 %v9508_v20  ;;  %v9510_v21 = vld [vmem:[%s10135_s6 + $0x28] sm:$0xff]   ;;  %v9515_v28 = vld [vmem:[%s10140_s12 + $0x38] sm:$0xff]  }
 0xfd1   :  { %2496 = vst [vmem:[#allocation2] sm:$0xff] %v9367_v1  ;;  %v9369_v62 = vadd.f32 %v2460_v31, %v462_v23  ;;  %2514 = vadd.xlane.f32.xlu0 %v9367_v1  ;;  %8871 = vmatpush3.bf16.msra.mxu0 %v9508_v20  ;;  %v9513_v23 = vld [vmem:[%s10140_s12 + $0x30] sm:$0xff]  }
 0xfd2   :  { %2499 = vst [vmem:[#allocation2 + $0x18] sm:$0xff] %v9368_v30  ;;  %8894 = vmatprep.subr.bf16.mxu1 %v9509_v50  ;;  %8872 = vmatprep.subr.bf16.mxu0 %v9510_v21 }
 0xfd3   :  { %2497 = vst [vmem:[#allocation2 + $0x8] sm:$0xff] %v9369_v62  ;;  %2516 = vadd.xlane.f32.xlu1 %v9369_v62 }
 0xfd4   :  { %8895 = vmatpush3.bf16.msra.mxu1 %v9509_v50 }
 0xfd5   :  { %2518 = vadd.xlane.f32.xlu0 %v9366_v25  ;;  %v8860_v34 = vpop.f32.mrb[12].mxu1  ;;  %8873 = vmatpush3.bf16.msra.mxu0 %v9510_v21 }
 0xfd6   :  { %v9370_v36 = vadd.f32 %v8860_v34, %v467_v32  ;;  %v2473_v37 = vpop.f32.mrb[13].mxu1  ;;  %8874 = vmatprep.subr.bf16.mxu0 %v9512_v26 }
 0xfd7   :  { %v9371_v60 = vadd.f32 %v2473_v37, %v465_v33  ;;  %2520 = vadd.xlane.f32.xlu1 %v9368_v30  ;;  %v8861_v38 = vpop.f32.mrb[14].mxu1 }
 0xfd8   :  { %2502 = vst [vmem:[#allocation2 + $0x30] sm:$0xff] %v9370_v36  ;;  %v9372_v63 = vadd.f32 %v8861_v38, %v468_v35  ;;  %v2476_v2 = vpop.f32.mrb[15].mxu1 }
 0xfd9   :  { %2500 = vst [vmem:[#allocation2 + $0x20] sm:$0xff] %v9371_v60  ;;  %v9373_v39 = vadd.f32 %v2476_v2, %v466_v3  ;;  %2522 = vadd.xlane.f32.xlu0 %v9371_v60  ;;  %8875 = vmatpush3.bf16.msra.mxu0 %v9512_v26 }
 0xfda   :  { %2503 = vst [vmem:[#allocation2 + $0x38] sm:$0xff] %v9372_v63 }
 0xfdb   :  { %2501 = vst [vmem:[#allocation2 + $0x28] sm:$0xff] %v9373_v39  ;;  %2524 = vadd.xlane.f32.xlu1 %v9373_v39 }
 0xfdd   :  { %2526 = vadd.xlane.f32.xlu0 %v9370_v36 }
 0xfdf   :  { %2528 = vadd.xlane.f32.xlu1 %v9372_v63 }
0x105e   :  { %v2515_v46 = vpop.xlane.xlu0 %2514 }
0x105f   :  { %v2531_v47 = vmul.f32 0.0078125, %v2515_v46 }
0x1060   :  { %v2517_v17 = vpop.xlane.xlu1 %2516 }
0x1061   :  { %v10705_v14 = vsub.f32 %v9367_v1, %v2531_v47  ;;  %v2532_v9 = vmul.f32 0.0078125, %v2517_v17  ;;  %v9514_v1 = vld [vmem:[%s10135_s6 + $0x38] sm:$0xff]  }
0x1062   :  { %v2519_v48 = vpop.xlane.xlu0 %2518  ;;  %8876 = vmatprep.subr.bf16.mxu0 %v9514_v1 }
0x1063   :  { %v10707_v43 = vsub.f32 %v9369_v62, %v2532_v9  ;;  %v2533_v51 = vmul.f32 0.0078125, %v2519_v48  ;;  %v2547_v44 = vmul.f32 %v10705_v14, %v10705_v14  ;;  %8877 = vmatpush3.bf16.msra.mxu0 %v9514_v1 }
0x1064   :  { %v2521_v52 = vpop.xlane.xlu1 %2520 }
0x1065   :  { %v10711_v8 = vsub.f32 %v9366_v25, %v2533_v51  ;;  %v2534_v27 = vmul.f32 0.0078125, %v2521_v52  ;;  %2555 = vadd.xlane.f32.xlu0 %v2547_v44  ;;  %v2548_v53 = vmul.f32 %v10707_v43, %v10707_v43  ;;  %v9511_v25 = vld [vmem:[%s10140_s12 + $0x28] sm:$0xff]   ;;  %v7765_v44 = vld [vmem:[%s10125_s24] ss:$0 sm:$0xff] }
0x1066   :  { %v2523_v24 = vpop.xlane.xlu0 %2522  ;;  %8896 = vmatprep.subr.bf16.mxu1 %v9511_v25 }
0x1067   :  { %v10715_v54 = vsub.f32 %v9368_v30, %v2534_v27  ;;  %v2535_v55 = vmul.f32 0.0078125, %v2523_v24  ;;  %2557 = vadd.xlane.f32.xlu1 %v2548_v53  ;;  %v2549_v22 = vmul.f32 %v10711_v8, %v10711_v8  ;;  %8897 = vmatpush3.bf16.msra.mxu1 %v9511_v25  ;;  %v10752_v30 = vld [vmem:[%s10145_s20] sm:$0xff]  }
0x1068   :  { %v2525_v56 = vpop.xlane.xlu1 %2524  ;;  %8898 = vmatprep.subr.bf16.mxu1 %v9513_v23  ;;  %8910 = vmatprep.subr.bf16.mxu0 %v10752_v30 }
0x1069   :  { %v10719_v57 = vsub.f32 %v9371_v60, %v2535_v55  ;;  %v2536_v29 = vmul.f32 0.0078125, %v2525_v56  ;;  %2559 = vadd.xlane.f32.xlu0 %v2549_v22  ;;  %v2550_v58 = vmul.f32 %v10715_v54, %v10715_v54 }
0x106a   :  { %v2527_v59 = vpop.xlane.xlu0 %2526 }
0x106b   :  { %v10723_v61 = vsub.f32 %v9373_v39, %v2536_v29  ;;  %v2537_v4 = vmul.f32 0.0078125, %v2527_v59  ;;  %2561 = vadd.xlane.f32.xlu1 %v2550_v58  ;;  %v2551_v5 = vmul.f32 %v10719_v57, %v10719_v57  ;;  %8899 = vmatpush3.bf16.msra.mxu1 %v9513_v23  ;;  %v7766_v58 = vld [vmem:[%s11937_s0] ss:$0 sm:$0xff] }
0x106c   :  { %v2529_v6 = vpop.xlane.xlu1 %2528  ;;  %8900 = vmatprep.subr.bf16.mxu1 %v9515_v28 }
0x106d   :  { %v10727_v40 = vsub.f32 %v9370_v36, %v2537_v4  ;;  %v2538_v42 = vmul.f32 0.0078125, %v2529_v6  ;;  %2563 = vadd.xlane.f32.xlu0 %v2551_v5  ;;  %v2552_v7 = vmul.f32 %v10723_v61, %v10723_v61 }
0x106f   :  { %v10731_v10 = vsub.f32 %v9372_v63, %v2538_v42  ;;  %2565 = vadd.xlane.f32.xlu1 %v2552_v7  ;;  %v2553_v11 = vmul.f32 %v10727_v40, %v10727_v40  ;;  %8901 = vmatpush3.bf16.msra.mxu1 %v9515_v28  ;;  %v9518_v28 = vld [vmem:[%s10145_s20 + $0x10] sm:$0xff]  }
0x1071   :  { %2567 = vadd.xlane.f32.xlu0 %v2553_v11  ;;  %v2554_v12 = vmul.f32 %v10731_v10, %v10731_v10 }
0x1073   :  { %2569 = vadd.xlane.f32.xlu1 %v2554_v12 }
0x10f2   :  { %v2556_v31 = vpop.xlane.xlu0 %2555 }
0x10f3   :  { %v2571_v62 = vmul.f32 0.0078125, %v2556_v31 }
0x10f4   :  { %v2558_v32 = vpop.xlane.xlu1 %2557 }
0x10f5   :  { %v2579_v33 = vadd.f32 1e-05, %v2571_v62  ;;  %v2572_v34 = vmul.f32 0.0078125, %v2558_v32  ;;  %v9520_v32 = vld [vmem:[%s10145_s20 + $0x20] sm:$0xff]  }
0x10f6   :  { %v2560_v35 = vpop.xlane.xlu0 %2559 }
0x10f7   :  { %9708 = vrsqrt.f32 %v2579_v33  ;;  %v2580_v36 = vadd.f32 1e-05, %v2572_v34  ;;  %v2573_v37 = vmul.f32 0.0078125, %v2560_v35  ;;  %v9521_v33 = vld [vmem:[%s10145_s20 + $0x28] sm:$0xff]   ;;  %v9522_v34 = vld [vmem:[%s10145_s20 + $0x30] sm:$0xff]   ;;  %v9523_v35 = vld [vmem:[%s10145_s20 + $0x38] sm:$0xff]  }
0x10f8   :  { %v2562_v3 = vpop.xlane.xlu1 %2561 }
0x10f9   :  { %9710 = vrsqrt.f32 %v2580_v36  ;;  %v2581_v60 = vadd.f32 1e-05, %v2573_v37  ;;  %v2574_v38 = vmul.f32 0.0078125, %v2562_v3  ;;  %v7767_v37 = vld [vmem:[%s11938_s5] ss:$0 sm:$0xff] }
0x10fa   :  { %v2564_v63 = vpop.xlane.xlu0 %2563 }
0x10fb   :  { %9712 = vrsqrt.f32 %v2581_v60  ;;  %v2582_v2 = vadd.f32 1e-05, %v2574_v38  ;;  %v2575_v39 = vmul.f32 0.0078125, %v2564_v63  ;;  %v7776_v60 = vld [vmem:[%s11939_s13] ss:$0 sm:$0xff] }
0x10fc   :  { %v2566_v41 = vpop.xlane.xlu1 %2565 }
0x10fd   :  { %9714 = vrsqrt.f32 %v2582_v2  ;;  %v2583_v45 = vadd.f32 1e-05, %v2575_v39  ;;  %v2576_v46 = vmul.f32 0.0078125, %v2566_v41 }
0x10fe   :  { %v2568_v47 = vpop.xlane.xlu0 %2567 }
0x10ff   :  { %9716 = vrsqrt.f32 %v2583_v45  ;;  %v2584_v17 = vadd.f32 1e-05, %v2576_v46  ;;  %v2577_v9 = vmul.f32 0.0078125, %v2568_v47 }
0x1100   :  { %v2570_v48 = vpop.xlane.xlu1 %2569 }
0x1101   :  { %v9709_v51 = vpop.eup %9708  ;;  %9718 = vrsqrt.f32 %v2584_v17  ;;  %v2585_v52 = vadd.f32 1e-05, %v2577_v9  ;;  %v2578_v27 = vmul.f32 0.0078125, %v2570_v48 }
0x1102   :  { %v2595_v53 = vmul.f32 %v9709_v51, %v10705_v14 }
0x1103   :  { %v9711_v24 = vpop.eup %9710  ;;  %9720 = vrsqrt.f32 %v2585_v52  ;;  %v2586_v55 = vadd.f32 1e-05, %v2578_v27 }
0x1104   :  { %v2609_v22 = vmul.f32 %v7765_v44, %v2595_v53  ;;  %v2596_v56 = vmul.f32 %v9711_v24, %v10707_v43 }
0x1105   :  { %v9713_v29 = vpop.eup %9712  ;;  %9722 = vrsqrt.f32 %v2586_v55 }
0x1106   :  { %v2610_v59 = vmul.f32 %v7765_v44, %v2596_v56  ;;  %v2597_v4 = vmul.f32 %v9713_v29, %v10711_v8  ;;  %v2623_v6 = vadd.f32 %v7766_v58, %v2609_v22 }
0x1107   :  { %v9715_v5 = vpop.eup %9714 }
0x1108   :  { %v2624_v42 = vadd.f32 %v7766_v58, %v2610_v59  ;;  %v2611_v7 = vmul.f32 %v7765_v44, %v2597_v4  ;;  %v2598_v11 = vmul.f32 %v9715_v5, %v10715_v54 }
0x1109   :  { %v9717_v14 = vpop.eup %9716 }
0x110a   :  { %v2612_v12 = vmul.f32 %v7765_v44, %v2598_v11  ;;  %v2599_v13 = vmul.f32 %v9717_v14, %v10719_v57  ;;  %v10762_v19 = vpack.c.bf16 %v2624_v42, %v2623_v6  ;;  %v2625_v15 = vadd.f32 %v7766_v58, %v2611_v7  ;;  %v9517_v57 = vld [vmem:[%s10145_s20 + $0x8] sm:$0xff]  }
0x110b   :  { %v9719_v43 = vpop.eup %9718 }
0x110c   :  { %v2626_v16 = vadd.f32 %v7766_v58, %v2612_v12  ;;  %v2613_v49 = vmul.f32 %v7765_v44, %v2599_v13  ;;  %v2600_v18 = vmul.f32 %v9719_v43, %v10723_v61  ;;  %8878 = vmatprep.mubr.bf16.mxu0 %v10762_v19  ;;  %8902 = vmatprep.mubr.bf16.mxu1 %v10762_v19 }
0x110d   :  { %v9721_v8 = vpop.eup %9720 }
0x110e   :  { %v2614_v54 = vmul.f32 %v7765_v44, %v2600_v18  ;;  %v2601_v20 = vmul.f32 %v9721_v8, %v10727_v40  ;;  %v10768_v50 = vpack.c.bf16 %v2626_v16, %v2625_v15  ;;  %v2627_v25 = vadd.f32 %v7766_v58, %v2613_v49 }
0x110f   :  { %v9723_v21 = vpop.eup %9722 }
0x1110   :  { %v2628_v26 = vadd.f32 %v7766_v58, %v2614_v54  ;;  %v2615_v23 = vmul.f32 %v7765_v44, %v2601_v20  ;;  %v2602_v1 = vmul.f32 %v9723_v21, %v10731_v10  ;;  %8879 = vmatmul.mubr.bf16.vlgmr.msra.gmra.mrb[48].mxu0 %v10768_v50  ;;  %8903 = vmatmul.mubr.bf16.vlgmr.msra.gmra.mrb[32].mxu1 %v10768_v50  ;;  %v9524_v21 = vld [vmem:[%s10140_s12 + $0x40] sm:$0xff]  }
0x1111   :  { %8911 = vmatpush3.bf16.msra.mxu0 %v10752_v30  ;;  %v9519_v30 = vld [vmem:[%s10145_s20 + $0x18] sm:$0xff]  }
0x1112   :  { %v2616_v61 = vmul.f32 %v7765_v44, %v2602_v1  ;;  %8912 = vmatprep.subr.bf16.mxu0 %v9517_v57  ;;  %v10775_v40 = vpack.c.bf16 %v2628_v26, %v2627_v25  ;;  %v2629_v31 = vadd.f32 %v7766_v58, %v2615_v23  ;;  %v7785_v26 = vld [vmem:[%s11940_s17] ss:$0 sm:$0xff] }
0x1114   :  { %v2630_v62 = vadd.f32 %v7766_v58, %v2616_v61  ;;  %8882 = vmatprep.mubr.bf16.mxu0 %v10775_v40  ;;  %8906 = vmatprep.mubr.bf16.mxu1 %v10775_v40 }
0x1115   :  { %8913 = vmatpush3.bf16.msra.mxu0 %v9517_v57 }
0x1116   :  { %8914 = vmatprep.subr.bf16.mxu0 %v9518_v28  ;;  %v10780_v10 = vpack.c.bf16 %v2630_v62, %v2629_v31 }
0x1118   :  { %8883 = vmatmul.mubr.bf16.gmra.mrb[52].mxu0 %v10780_v10  ;;  %8907 = vmatmul.mubr.bf16.gmra.mrb[36].mxu1 %v10780_v10 }
0x1119   :  { %8915 = vmatpush3.bf16.msra.mxu0 %v9518_v28  ;;  %8926 = vmatprep.mubr.bf16.mxu0 %v10762_v19 }
0x111a   :  { %8916 = vmatprep.subr.bf16.mxu0 %v9519_v30 }
0x111d   :  { %8917 = vmatpush3.bf16.msra.mxu0 %v9519_v30 }
0x111e   :  { %8918 = vmatprep.subr.bf16.mxu0 %v9520_v32 }
0x1121   :  { %8919 = vmatpush3.bf16.msra.mxu0 %v9520_v32 }
0x1122   :  { %8920 = vmatprep.subr.bf16.mxu0 %v9521_v33 }
0x1125   :  { %8921 = vmatpush3.bf16.msra.mxu0 %v9521_v33 }
0x1126   :  { %8922 = vmatprep.subr.bf16.mxu0 %v9522_v34 }
0x1129   :  { %8923 = vmatpush3.bf16.msra.mxu0 %v9522_v34 }
0x112a   :  { %8924 = vmatprep.subr.bf16.mxu0 %v9523_v35 }
0x112d   :  { %8925 = vmatpush3.bf16.msra.mxu0 %v9523_v35  ;;  %v9525_v35 = vld [vmem:[%s10140_s12 + $0x48] sm:$0xff]  }
0x1130   :  { %8927 = vmatmul.mubr.bf16.vlgmr.msra.gmra.mrb[56].mxu0 %v10768_v50 }
0x1131   :  { %8930 = vmatprep.mubr.bf16.mxu0 %v10775_v40 }
0x1138   :  { %8931 = vmatmul.mubr.bf16.gmra.mrb[60].mxu0 %v10780_v10 }
0x11e3   :  { %v8880_v36 = vpop.f32.mrb[48].mxu0  ;;  %v8904_v3 = vpop.f32.mrb[32].mxu1 }
0x11e4   :  { %v2740_v38 = vpop.f32.mrb[49].mxu0  ;;  %v2876_v63 = vpop.f32.mrb[33].mxu1  ;;  %v10795_v41 = vadd.f32 %v8880_v36, %v7767_v37  ;;  %v2885_v45 = vadd.f32 %v8904_v3, %v7776_v60 }
0x11e5   :  { %v8881_v2 = vpop.f32.mrb[50].mxu0  ;;  %v8905_v39 = vpop.f32.mrb[34].mxu1  ;;  %v2741_v48 = vadd.f32 %v7767_v37, %v2740_v38  ;;  %v2877_v51 = vadd.f32 %v7776_v60, %v2876_v63 }
0x11e6   :  { %v2752_v46 = vadd.f32 %v8881_v2, %v7767_v37  ;;  %v2888_v47 = vadd.f32 %v8905_v39, %v7776_v60  ;;  %v2743_v17 = vpop.f32.mrb[51].mxu0  ;;  %v2879_v9 = vpop.f32.mrb[35].mxu1  ;;  %v9526_v2 = vld [vmem:[%s10140_s12 + $0x50] sm:$0xff]  }
0x11e7   :  { %v2744_v44 = vadd.f32 %v7767_v37, %v2743_v17  ;;  %v2880_v52 = vadd.f32 %v7776_v60, %v2879_v9  ;;  %v9528_v17 = vld [vmem:[%s10140_s12 + $0x60] sm:$0xff]   ;;  %v9529_v9 = vld [vmem:[%s10140_s12 + $0x68] sm:$0xff]  }
0x11e8   :  { %v3044_v27 = vpack.c.bf16 %v2752_v46, %v10795_v41  ;;  %v3048_v53 = vpack.c.bf16 %v2888_v47, %v2885_v45  ;;  %v9527_v47 = vld [vmem:[%s10140_s12 + $0x58] sm:$0xff]  }
0x11e9   :  { %v3043_v24 = vpack.c.bf16 %v2744_v44, %v2741_v48  ;;  %v3047_v55 = vpack.c.bf16 %v2880_v52, %v2877_v51  ;;  %v9530_v48 = vld [vmem:[%s10140_s12 + $0x70] sm:$0xff]   ;;  %v9531_v51 = vld [vmem:[%s10140_s12 + $0x78] sm:$0xff]   ;;  %v10824_v52 = vld [vmem:[%s11941_s21] sm:$0xff] }
0x11ea   :  { %v3067_v20 = vsel %vm589_vm10, %v3048_v53, 0 }
0x11eb   :  { %v8884_v22 = vpop.f32.mrb[52].mxu0  ;;  %v8908_v56 = vpop.f32.mrb[36].mxu1  ;;  %9414 = vmatprep.subr.msk.bf16.mxu1 %vm589_vm10, %v3047_v55  ;;  %8942 = vmatprep.mubr.msk.bf16.mxu1 %vm589_vm10, %v3043_v24  ;;  %v3064_v29 = vsel %vm589_vm10, %v3047_v55, 0 }
0x11ec   :  { %v2756_v58 = vpop.f32.mrb[53].mxu0  ;;  %v2892_v59 = vpop.f32.mrb[37].mxu1  ;;  %8935 = vmatpush3.bf16.xpose.msra.mxu1 %v3064_v29  ;;  %v2765_v6 = vadd.f32 %v8884_v22, %v7767_v37  ;;  %v2901_v42 = vadd.f32 %v8908_v56, %v7776_v60  ;;  %v10827_v22 = vld [vmem:[%s11941_s21 + $0x10] sm:$0xff]  ;;  %v10830_v56 = vld [vmem:[%s11941_s21 + $0x8] sm:$0xff] }
0x11ed   :  { %v8885_v4 = vpop.f32.mrb[54].mxu0  ;;  %v8909_v5 = vpop.f32.mrb[38].mxu1  ;;  %9415 = vmatprep.subr.msk.bf16.mxu1 %vm589_vm10, %v3048_v53  ;;  %v2757_v13 = vadd.f32 %v7767_v37, %v2756_v58  ;;  %v2893_v43 = vadd.f32 %v7776_v60, %v2892_v59 }
0x11ee   :  { %v2768_v7 = vadd.f32 %v8885_v4, %v7767_v37  ;;  %v2904_v11 = vadd.f32 %v8909_v5, %v7776_v60  ;;  %v2759_v14 = vpop.f32.mrb[55].mxu0  ;;  %v2895_v12 = vpop.f32.mrb[39].mxu1  ;;  %v10836_v5 = vld [vmem:[%s11941_s21 + $0x18] sm:$0xff] }
0x11ef   :  { %v2760_v15 = vadd.f32 %v7767_v37, %v2759_v14  ;;  %v2896_v16 = vadd.f32 %v7776_v60, %v2895_v12 }
0x11f0   :  { %v3046_v49 = vpack.c.bf16 %v2768_v7, %v2765_v6  ;;  %v3050_v18 = vpack.c.bf16 %v2904_v11, %v2901_v42 }
0x11f1   :  { %v3045_v8 = vpack.c.bf16 %v2760_v15, %v2757_v13  ;;  %v3049_v54 = vpack.c.bf16 %v2896_v16, %v2893_v43  ;;  %v10852_v13 = vld [vmem:[%s11941_s21 + $0x20] sm:$0xff] }
0x11f2   :  { %v3073_v23 = vsel %vm589_vm10, %v3050_v18, 0 }
0x11f3   :  { %v3070_v57 = vsel %vm589_vm10, %v3049_v54, 0 }
0x11f4   :  { %8937 = vmatpush3.bf16.xpose.msra.mxu1 %v3067_v20 }
0x11f5   :  { %9416 = vmatprep.subr.msk.bf16.mxu1 %vm589_vm10, %v3049_v54  ;;  %v10860_v54 = vld [vmem:[%s11941_s21 + $0x28] sm:$0xff] }
0x11fc   :  { %8939 = vmatpush3.bf16.xpose.msra.mxu1 %v3070_v57 }
0x11fd   :  { %9417 = vmatprep.subr.msk.bf16.mxu1 %vm589_vm10, %v3050_v18 }
0x1203   :  { %v8928_v25 = vpop.f32.mrb[56].mxu0 }
0x1204   :  { %v3012_v1 = vpop.f32.mrb[57].mxu0  ;;  %8941 = vmatpush3.bf16.xpose.msra.mxu1 %v3073_v23  ;;  %v3021_v28 = vadd.f32 %v8928_v25, %v7785_v26  ;;  %v10868_v23 = vld [vmem:[%s11941_s21 + $0x38] sm:$0xff] }
0x1205   :  { %v8929_v61 = vpop.f32.mrb[58].mxu0  ;;  %8990 = vmatprep.subr.bf16.mxu1 %v9524_v21  ;;  %v3013_v30 = vadd.f32 %v7785_v26, %v3012_v1 }
0x1206   :  { %v3024_v31 = vadd.f32 %v8929_v61, %v7785_v26  ;;  %v3015_v62 = vpop.f32.mrb[59].mxu0 }
0x1207   :  { %v3016_v32 = vadd.f32 %v7785_v26, %v3015_v62 }
0x1208   :  { %v3249_v33 = vpack.c.bf16 %v3024_v31, %v3021_v28 }
0x1209   :  { %v3248_v34 = vpack.c.bf16 %v3016_v32, %v3013_v30 }
0x120b   :  { %v8932_v36 = vpop.f32.mrb[60].mxu0  ;;  %8950 = vmatprep.subr.bf16.mxu0 %v3248_v34  ;;  %8943 = vmatmul.mubr.msk.bf16.vlgmr.msra.gmra.mrb[40].mxu1 %vm589_vm10, %v3044_v27 }
0x120c   :  { %v3028_v37 = vpop.f32.mrb[61].mxu0  ;;  %8951 = vmatpush3.bf16.msra.mxu0 %v3248_v34  ;;  %8946 = vmatprep.mubr.msk.bf16.mxu1 %vm589_vm10, %v3045_v8  ;;  %v3037_v60 = vadd.f32 %v8932_v36, %v7785_v26  ;;  %v10857_v8 = vld [vmem:[%s11941_s21 + $0x30] sm:$0xff]  ;;  %v7845_v34 = vld [vmem:[%s11939_s13 + $0x1] ss:$0 sm:$0xff] }
0x120d   :  { %v8933_v3 = vpop.f32.mrb[62].mxu0  ;;  %8952 = vmatprep.subr.bf16.mxu0 %v3249_v33  ;;  %8991 = vmatpush3.bf16.msra.mxu1 %v9524_v21  ;;  %v3029_v39 = vadd.f32 %v7785_v26, %v3028_v37 }
0x120e   :  { %v3040_v38 = vadd.f32 %v8933_v3, %v7785_v26  ;;  %v3031_v63 = vpop.f32.mrb[63].mxu0  ;;  %8992 = vmatprep.subr.bf16.mxu1 %v9525_v35 }
0x120f   :  { %v3032_v41 = vadd.f32 %v7785_v26, %v3031_v63 }
0x1210   :  { %v3251_v45 = vpack.c.bf16 %v3040_v38, %v3037_v60  ;;  %8953 = vmatpush3.bf16.msra.mxu0 %v3249_v33 }
0x1211   :  { %v3250_v46 = vpack.c.bf16 %v3032_v41, %v3029_v39  ;;  %8993 = vmatpush3.bf16.msra.mxu1 %v9525_v35 }
0x1212   :  { %8994 = vmatprep.subr.bf16.mxu1 %v9526_v2 }
0x1213   :  { %8954 = vmatprep.subr.bf16.mxu0 %v3250_v46  ;;  %8947 = vmatmul.mubr.msk.bf16.gmra.mrb[44].mxu1 %vm589_vm10, %v3046_v49 }
0x1214   :  { %8955 = vmatpush3.bf16.msra.mxu0 %v3250_v46  ;;  %9006 = vmatprep.mubr.bf16.mxu1 %v10762_v19 }
0x1215   :  { %8956 = vmatprep.subr.bf16.mxu0 %v3251_v45  ;;  %8995 = vmatpush3.bf16.msra.mxu1 %v9526_v2 }
0x1216   :  { %8996 = vmatprep.subr.bf16.mxu1 %v9527_v47 }
0x1218   :  { %8957 = vmatpush3.bf16.msra.mxu0 %v3251_v45 }
0x1219   :  { %8997 = vmatpush3.bf16.msra.mxu1 %v9527_v47 }
0x121a   :  { %8998 = vmatprep.subr.bf16.mxu1 %v9528_v17 }
0x121d   :  { %8999 = vmatpush3.bf16.msra.mxu1 %v9528_v17 }
0x121e   :  { %9000 = vmatprep.subr.bf16.mxu1 %v9529_v9 }
0x1221   :  { %9001 = vmatpush3.bf16.msra.mxu1 %v9529_v9 }
0x1222   :  { %9002 = vmatprep.subr.bf16.mxu1 %v9530_v48 }
0x1225   :  { %9003 = vmatpush3.bf16.msra.mxu1 %v9530_v48 }
0x1226   :  { %9004 = vmatprep.subr.bf16.mxu1 %v9531_v51 }
0x1229   :  { %9005 = vmatpush3.bf16.msra.mxu1 %v9531_v51 }
0x122c   :  { %9007 = vmatmul.mubr.bf16.vlgmr.msra.gmra.mrb[48].mxu1 %v10768_v50 }
0x122d   :  { %9010 = vmatprep.mubr.bf16.mxu1 %v10775_v40 }
0x1234   :  { %9011 = vmatmul.mubr.bf16.gmra.mrb[52].mxu1 %v10780_v10 }
0x12de   :  { %v8944_v44 = vpop.f32.mrb[40].mxu1 }
0x12df   :  { %v3109_v27 = vpop.f32.mrb[41].mxu1  ;;  %v3142_v53 = vmul.f32 0.125, %v8944_v44 }
0x12e0   :  { %v3140_v24 = vmul.f32 0.125, %v3109_v27  ;;  %v8945_v55 = vpop.f32.mrb[42].mxu1 }
0x12e1   :  { %v3112_v29 = vpop.f32.mrb[43].mxu1  ;;  %v3143_v59 = vmul.f32 0.125, %v8945_v55  ;;  %v10839_v6 = vadd.f32 %v3142_v53, %v10827_v22 }
0x12e2   :  { %v10833_v58 = vadd.f32 %v3140_v24, %v10824_v52  ;;  %v3141_v4 = vmul.f32 0.125, %v3112_v29 }
0x12e3   :  { %v10847_v11 = vadd.f32 %v3143_v59, %v10836_v5  ;;  %v3162_v18 = vsel %vm589_vm10, %v10839_v6, -inf }
0x12e4   :  { %v10842_v42 = vadd.f32 %v3141_v4, %v10830_v56  ;;  %v3156_v7 = vsel %vm589_vm10, %v10833_v58, -inf }
0x12e5   :  { %3157 = vmax.xlane.f32.xlu0 %v3156_v7  ;;  %v3165_v26 = vsel %vm589_vm10, %v10847_v11, -inf }
0x12e6   :  { %v8948_v14 = vpop.f32.mrb[44].mxu1  ;;  %v3159_v12 = vsel %vm589_vm10, %v10842_v42, -inf }
0x12e7   :  { %3160 = vmax.xlane.f32.xlu1 %v3159_v12  ;;  %v3125_v43 = vpop.f32.mrb[45].mxu1  ;;  %v3146_v15 = vmul.f32 0.125, %v8948_v14 }
0x12e8   :  { %v3144_v16 = vmul.f32 0.125, %v3125_v43  ;;  %v8949_v49 = vpop.f32.mrb[46].mxu1 }
0x12e9   :  { %3163 = vmax.xlane.f32.xlu0 %v3162_v18  ;;  %v3128_v20 = vpop.f32.mrb[47].mxu1  ;;  %v3147_v21 = vmul.f32 0.125, %v8949_v49  ;;  %v10871_v1 = vadd.f32 %v3146_v15, %v10857_v8 }
0x12ea   :  { %v10863_v57 = vadd.f32 %v3144_v16, %v10852_v13  ;;  %v3145_v25 = vmul.f32 0.125, %v3128_v20 }
0x12eb   :  { %3166 = vmax.xlane.f32.xlu1 %v3165_v26  ;;  %v10879_v31 = vadd.f32 %v3147_v21, %v10868_v23  ;;  %v3174_v30 = vsel %vm589_vm10, %v10871_v1, -inf }
0x12ec   :  { %v10874_v61 = vadd.f32 %v3145_v25, %v10860_v54  ;;  %v3168_v28 = vsel %vm589_vm10, %v10863_v57, -inf }
0x12ed   :  { %3169 = vmax.xlane.f32.xlu0 %v3168_v28  ;;  %v3177_v32 = vsel %vm589_vm10, %v10879_v31, -inf }
0x12ee   :  { %v3171_v62 = vsel %vm589_vm10, %v10874_v61, -inf }
0x12ef   :  { %3172 = vmax.xlane.f32.xlu1 %v3171_v62 }
0x12f1   :  { %3175 = vmax.xlane.f32.xlu0 %v3174_v30 }
0x12f3   :  { %3178 = vmax.xlane.f32.xlu1 %v3177_v32 }
0x12ff   :  { %v9008_v33 = vpop.f32.mrb[48].mxu1 }
0x1300   :  { %v3586_v35 = vpop.f32.mrb[49].mxu1  ;;  %v3595_v37 = vadd.f32 %v9008_v33, %v7845_v34 }
0x1301   :  { %v9009_v36 = vpop.f32.mrb[50].mxu1  ;;  %v3587_v38 = vadd.f32 %v7845_v34, %v3586_v35 }
0x1302   :  { %v3598_v3 = vadd.f32 %v9009_v36, %v7845_v34  ;;  %v3589_v60 = vpop.f32.mrb[51].mxu1 }
0x1303   :  { %v3590_v63 = vadd.f32 %v7845_v34, %v3589_v60 }
0x1304   :  { %v3760_v2 = vpack.c.bf16 %v3598_v3, %v3595_v37 }
0x1305   :  { %v3759_v39 = vpack.c.bf16 %v3590_v63, %v3587_v38 }
0x1306   :  { %v3779_v24 = vsel %vm589_vm10, %v3760_v2, 0 }
0x1307   :  { %v9012_v41 = vpop.f32.mrb[52].mxu1  ;;  %9418 = vmatprep.subr.msk.bf16.mxu1 %vm589_vm10, %v3759_v39  ;;  %v3776_v45 = vsel %vm589_vm10, %v3759_v39, 0 }
0x1308   :  { %v3602_v46 = vpop.f32.mrb[53].mxu1  ;;  %9039 = vmatpush3.bf16.xpose.msra.mxu1 %v3776_v45  ;;  %v3611_v17 = vadd.f32 %v9012_v41, %v7845_v34 }
0x1309   :  { %v9013_v47 = vpop.f32.mrb[54].mxu1  ;;  %9419 = vmatprep.subr.msk.bf16.mxu1 %vm589_vm10, %v3760_v2  ;;  %v3603_v51 = vadd.f32 %v7845_v34, %v3602_v46 }
0x130a   :  { %v3614_v9 = vadd.f32 %v9013_v47, %v7845_v34  ;;  %v3605_v48 = vpop.f32.mrb[55].mxu1  ;;  %v9532_v47 = vld [vmem:[%s10135_s6 + $0x40] sm:$0xff]  }
0x130b   :  { %v3606_v44 = vadd.f32 %v7845_v34, %v3605_v48  ;;  %8966 = vmatprep.subr.bf16.mxu0 %v9532_v47 }
0x130c   :  { %v3762_v27 = vpack.c.bf16 %v3614_v9, %v3611_v17 }
0x130d   :  { %v3761_v53 = vpack.c.bf16 %v3606_v44, %v3603_v51 }
0x130e   :  { %v3785_v29 = vsel %vm589_vm10, %v3762_v27, 0 }
0x130f   :  { %v3782_v55 = vsel %vm589_vm10, %v3761_v53, 0 }
0x1310   :  { %9041 = vmatpush3.bf16.xpose.msra.mxu1 %v3779_v24 }
0x1311   :  { %9420 = vmatprep.subr.msk.bf16.mxu1 %vm589_vm10, %v3761_v53 }
0x1318   :  { %9043 = vmatpush3.bf16.xpose.msra.mxu1 %v3782_v55 }
0x1319   :  { %9421 = vmatprep.subr.msk.bf16.mxu1 %vm589_vm10, %v3762_v27 }
0x1320   :  { %9045 = vmatpush3.bf16.xpose.msra.mxu1 %v3785_v29 }
0x1372   :  { %v3158_v59 = vpop.xlane.xlu0 %3157 }
0x1373   :  { %v3180_v4 = vsub.f32 %v10833_v58, %v3158_v59 }
0x1374   :  { %v3161_v7 = vpop.xlane.xlu1 %3160 }
0x1375   :  { %v3188_v14 = vmul.f32 1.442695, %v3180_v4  ;;  %v3181_v12 = vsub.f32 %v10842_v42, %v3161_v7 }
0x1376   :  { %v3164_v43 = vpop.xlane.xlu0 %3163 }
0x1377   :  { %9724 = vpow2.f32 %v3188_v14  ;;  %v3190_v15 = vmul.f32 1.442695, %v3181_v12  ;;  %v3182_v16 = vsub.f32 %v10839_v6, %v3164_v43 }
0x1378   :  { %v3167_v49 = vpop.xlane.xlu1 %3166 }
0x1379   :  { %9726 = vpow2.f32 %v3190_v15  ;;  %v3192_v18 = vmul.f32 1.442695, %v3182_v16  ;;  %v3183_v20 = vsub.f32 %v10847_v11, %v3167_v49 }
0x137a   :  { %v3170_v21 = vpop.xlane.xlu0 %3169 }
0x137b   :  { %9728 = vpow2.f32 %v3192_v18  ;;  %v3194_v25 = vmul.f32 1.442695, %v3183_v20  ;;  %v3184_v26 = vsub.f32 %v10863_v57, %v3170_v21  ;;  %v9533_v18 = vld [vmem:[%s10135_s6 + $0x48] sm:$0xff]  }
0x137c   :  { %v3173_v58 = vpop.xlane.xlu1 %3172 }
0x137d   :  { %9730 = vpow2.f32 %v3194_v25  ;;  %v3196_v28 = vmul.f32 1.442695, %v3184_v26  ;;  %v3185_v42 = vsub.f32 %v10874_v61, %v3173_v58 }
0x137e   :  { %v3176_v62 = vpop.xlane.xlu0 %3175 }
0x137f   :  { %9732 = vpow2.f32 %v3196_v28  ;;  %v3198_v30 = vmul.f32 1.442695, %v3185_v42  ;;  %v3186_v6 = vsub.f32 %v10871_v1, %v3176_v62  ;;  %v9534_v28 = vld [vmem:[%s10135_s6 + $0x50] sm:$0xff]  }
0x1380   :  { %v3179_v32 = vpop.xlane.xlu1 %3178 }
0x1381   :  { %v9725_v33 = vpop.eup %9724  ;;  %9734 = vpow2.f32 %v3198_v30  ;;  %v3200_v34 = vmul.f32 1.442695, %v3186_v6  ;;  %v3187_v11 = vsub.f32 %v10879_v31, %v3179_v32  ;;  %v9535_v32 = vld [vmem:[%s10135_s6 + $0x58] sm:$0xff]  }
0x1382   :  { %v3204_v35 = vsel %vm589_vm10, %v9725_v33, 0.0 }
0x1383   :  { %v9727_v36 = vpop.eup %9726  ;;  %9736 = vpow2.f32 %v3200_v34  ;;  %v3202_v57 = vmul.f32 1.442695, %v3187_v11  ;;  %3205 = vadd.xlane.f32.xlu0 %v3204_v35  ;;  %v9537_v34 = vld [vmem:[%s10135_s6 + $0x68] sm:$0xff]   ;;  %v9538_v11 = vld [vmem:[%s10135_s6 + $0x70] sm:$0xff]   ;;  %v9539_v35 = vld [vmem:[%s10135_s6 + $0x78] sm:$0xff]  }
0x1384   :  { %v3207_v37 = vsel %vm589_vm10, %v9727_v36, 0.0 }
0x1385   :  { %v9729_v61 = vpop.eup %9728  ;;  %9738 = vpow2.f32 %v3202_v57  ;;  %3208 = vadd.xlane.f32.xlu1 %v3207_v37  ;;  %v9541_v57 = vld [vmem:[%s10145_s20 + $0x48] sm:$0xff]   ;;  %v9542_v37 = vld [vmem:[%s10145_s20 + $0x50] sm:$0xff]  }
0x1386   :  { %v3210_v3 = vsel %vm589_vm10, %v9729_v61, 0.0 }
0x1387   :  { %v9731_v1 = vpop.eup %9730  ;;  %3211 = vadd.xlane.f32.xlu0 %v3210_v3  ;;  %v9544_v3 = vld [vmem:[%s10145_s20 + $0x60] sm:$0xff]  }
0x1388   :  { %v3213_v60 = vsel %vm589_vm10, %v9731_v1, 0.0 }
0x1389   :  { %v9733_v38 = vpop.eup %9732  ;;  %3214 = vadd.xlane.f32.xlu1 %v3213_v60  ;;  %v9546_v60 = vld [vmem:[%s10145_s20 + $0x70] sm:$0xff]  }
0x138a   :  { %v3216_v31 = vsel %vm589_vm10, %v9733_v38, 0.0 }
0x138b   :  { %v9735_v63 = vpop.eup %9734  ;;  %3217 = vadd.xlane.f32.xlu0 %v3216_v31 }
0x138c   :  { %v3219_v2 = vsel %vm589_vm10, %v9735_v63, 0.0 }
0x138d   :  { %v9737_v39 = vpop.eup %9736  ;;  %3220 = vadd.xlane.f32.xlu1 %v3219_v2 }
0x138e   :  { %v3222_v41 = vsel %vm589_vm10, %v9737_v39, 0.0 }
0x138f   :  { %v9739_v45 = vpop.eup %9738  ;;  %3223 = vadd.xlane.f32.xlu0 %v3222_v41 }
0x1390   :  { %v3225_v46 = vsel %vm589_vm10, %v9739_v45, 0.0 }
0x1391   :  { %3226 = vadd.xlane.f32.xlu1 %v3225_v46 }
0x1410   :  { %v3206_v17 = vpop.xlane.xlu0 %3205 }
0x1411   :  { %9740 = vrcp.f32 %v3206_v17 }
0x1412   :  { %v3209_v9 = vpop.xlane.xlu1 %3208 }
0x1413   :  { %9742 = vrcp.f32 %v3209_v9  ;;  %v7819_v9 = vld [vmem:[%s11938_s5 + $0x1] ss:$0 sm:$0xff] }
0x1414   :  { %v3212_v48 = vpop.xlane.xlu0 %3211 }
0x1415   :  { %9744 = vrcp.f32 %v3212_v48 }
0x1416   :  { %v3215_v51 = vpop.xlane.xlu1 %3214 }
0x1417   :  { %9746 = vrcp.f32 %v3215_v51 }
0x1418   :  { %v3218_v44 = vpop.xlane.xlu0 %3217 }
0x1419   :  { %9748 = vrcp.f32 %v3218_v44 }
0x141a   :  { %v3221_v27 = vpop.xlane.xlu1 %3220 }
0x141b   :  { %v9741_v53 = vpop.eup %9740  ;;  %9750 = vrcp.f32 %v3221_v27 }
0x141c   :  { %v3224_v24 = vpop.xlane.xlu0 %3223  ;;  %v3229_v59 = vmul.f32 %v9741_v53, %v9725_v33  ;;  %v9536_v33 = vld [vmem:[%s10135_s6 + $0x60] sm:$0xff]  }
0x141d   :  { %v9743_v55 = vpop.eup %9742  ;;  %9752 = vrcp.f32 %v3224_v24 }
0x141e   :  { %v3227_v29 = vpop.xlane.xlu1 %3226  ;;  %v3231_v4 = vmul.f32 %v9743_v55, %v9727_v36  ;;  %v9540_v36 = vld [vmem:[%s10145_s20 + $0x40] sm:$0xff]  }
0x141f   :  { %v9745_v7 = vpop.eup %9744  ;;  %9754 = vrcp.f32 %v3227_v29 }
0x1420   :  { %v3244_v14 = vpack.c.bf16 %v3231_v4, %v3229_v59  ;;  %v3233_v43 = vmul.f32 %v9745_v7, %v9729_v61  ;;  %v9543_v61 = vld [vmem:[%s10145_s20 + $0x58] sm:$0xff]  }
0x1421   :  { %v9747_v12 = vpop.eup %9746 }
0x1422   :  { %v3235_v15 = vmul.f32 %v9747_v12, %v9731_v1  ;;  %8958 = vmatprep.mubr.msk.bf16.mxu0 %vm589_vm10, %v3244_v14  ;;  %v9545_v1 = vld [vmem:[%s10145_s20 + $0x68] sm:$0xff]  }
0x1423   :  { %v9749_v16 = vpop.eup %9748 }
0x1424   :  { %v3245_v49 = vpack.c.bf16 %v3235_v15, %v3233_v43  ;;  %v3237_v21 = vmul.f32 %v9749_v16, %v9733_v38  ;;  %v9547_v38 = vld [vmem:[%s10145_s20 + $0x78] sm:$0xff]  }
0x1425   :  { %v9751_v20 = vpop.eup %9750 }
0x1426   :  { %8959 = vmatmul.mubr.msk.bf16.vlgmr.msra.gmra.mrb[64].mxu0 %vm589_vm10, %v3245_v49  ;;  %v3239_v25 = vmul.f32 %v9751_v20, %v9735_v63 }
0x1427   :  { %v9753_v26 = vpop.eup %9752  ;;  %8967 = vmatpush3.bf16.msra.mxu0 %v9532_v47 }
0x1428   :  { %8968 = vmatprep.subr.bf16.mxu0 %v9533_v18  ;;  %v3246_v58 = vpack.c.bf16 %v3239_v25, %v3237_v21  ;;  %v3241_v62 = vmul.f32 %v9753_v26, %v9737_v39  ;;  %v7871_v25 = vld [vmem:[%s11940_s17 + $0x1] ss:$0 sm:$0xff] }
0x1429   :  { %v9755_v42 = vpop.eup %9754 }
0x142a   :  { %8962 = vmatprep.mubr.msk.bf16.mxu0 %vm589_vm10, %v3246_v58  ;;  %v3243_v30 = vmul.f32 %v9755_v42, %v9739_v45 }
0x142b   :  { %8969 = vmatpush3.bf16.msra.mxu0 %v9533_v18 }
0x142c   :  { %8970 = vmatprep.subr.bf16.mxu0 %v9534_v28  ;;  %v3247_v6 = vpack.c.bf16 %v3243_v30, %v3241_v62 }
0x142e   :  { %8963 = vmatmul.mubr.msk.bf16.gmra.mrb[68].mxu0 %vm589_vm10, %v3247_v6 }
0x142f   :  { %8971 = vmatpush3.bf16.msra.mxu0 %v9534_v28  ;;  %8982 = vmatprep.mubr.bf16.mxu0 %v10762_v19 }
0x1430   :  { %8972 = vmatprep.subr.bf16.mxu0 %v9535_v32 }
0x1433   :  { %8973 = vmatpush3.bf16.msra.mxu0 %v9535_v32 }
0x1434   :  { %8974 = vmatprep.subr.bf16.mxu0 %v9536_v33 }
0x1437   :  { %8975 = vmatpush3.bf16.msra.mxu0 %v9536_v33 }
0x1438   :  { %8976 = vmatprep.subr.bf16.mxu0 %v9537_v34 }
0x143b   :  { %8977 = vmatpush3.bf16.msra.mxu0 %v9537_v34 }
0x143c   :  { %8978 = vmatprep.subr.bf16.mxu0 %v9538_v11 }
0x143f   :  { %8979 = vmatpush3.bf16.msra.mxu0 %v9538_v11 }
0x1440   :  { %8980 = vmatprep.subr.bf16.mxu0 %v9539_v35 }
0x1443   :  { %8981 = vmatpush3.bf16.msra.mxu0 %v9539_v35 }
0x1444   :  { %9014 = vmatprep.subr.bf16.mxu0 %v9540_v36 }
0x1446   :  { %8983 = vmatmul.mubr.bf16.vlgmr.msra.gmra.mrb[72].mxu0 %v10768_v50 }
0x1447   :  { %8986 = vmatprep.mubr.bf16.mxu0 %v10775_v40  ;;  %9015 = vmatpush3.bf16.msra.mxu0 %v9540_v36 }
0x1448   :  { %9016 = vmatprep.subr.bf16.mxu0 %v9541_v57 }
0x144b   :  { %9017 = vmatpush3.bf16.msra.mxu0 %v9541_v57 }
0x144c   :  { %9018 = vmatprep.subr.bf16.mxu0 %v9542_v37 }
0x144e   :  { %8987 = vmatmul.mubr.bf16.gmra.mrb[76].mxu0 %v10780_v10 }
0x144f   :  { %9019 = vmatpush3.bf16.msra.mxu0 %v9542_v37  ;;  %9030 = vmatprep.mubr.bf16.mxu0 %v10762_v19 }
0x1450   :  { %9020 = vmatprep.subr.bf16.mxu0 %v9543_v61 }
0x1453   :  { %9021 = vmatpush3.bf16.msra.mxu0 %v9543_v61 }
0x1454   :  { %9022 = vmatprep.subr.bf16.mxu0 %v9544_v3 }
0x1457   :  { %9023 = vmatpush3.bf16.msra.mxu0 %v9544_v3 }
0x1458   :  { %9024 = vmatprep.subr.bf16.mxu0 %v9545_v1 }
0x145b   :  { %9025 = vmatpush3.bf16.msra.mxu0 %v9545_v1 }
0x145c   :  { %9026 = vmatprep.subr.bf16.mxu0 %v9546_v60 }
0x145f   :  { %9027 = vmatpush3.bf16.msra.mxu0 %v9546_v60 }
0x1460   :  { %9028 = vmatprep.subr.bf16.mxu0 %v9547_v38 }
0x1463   :  { %9029 = vmatpush3.bf16.msra.mxu0 %v9547_v38 }
0x1466   :  { %9031 = vmatmul.mubr.bf16.vlgmr.msra.gmra.mrb[80].mxu0 %v10768_v50 }
0x1467   :  { %9034 = vmatprep.mubr.bf16.mxu0 %v10775_v40 }
0x146e   :  { %9035 = vmatmul.mubr.bf16.gmra.mrb[84].mxu0 %v10780_v10 }
0x14f9   :  { %v10940_v19 = vpop.f32.mrb[64].mxu0 }
0x14fa   :  { %v10942_v31 = vpop.f32.mrb[65].mxu0 }
0x14fb   :  { %v10944_v63 = vpop.f32.mrb[66].mxu0 }
0x14fc   :  { %v3330_v2 = vpack.c.bf16 %v10944_v63, %v10940_v19  ;;  %v10948_v39 = vpop.f32.mrb[67].mxu0  ;;  %v9981_v19 = vld [vmem:[#allocation2 + $0x10] sm:$0xff] }
0x14fd   :  { %v3329_v41 = vpack.c.bf16 %v10948_v39, %v10942_v31  ;;  %v7912_v39 = vld [vmem:[%s11943_s29] ss:$0 sm:$0xff] }
0x1501   :  { %v10952_v50 = vpop.f32.mrb[68].mxu0 }
0x1502   :  { %v10954_v45 = vpop.f32.mrb[69].mxu0 }
0x1503   :  { %v10956_v40 = vpop.f32.mrb[70].mxu0 }
0x1504   :  { %v3332_v10 = vpack.c.bf16 %v10956_v40, %v10952_v50  ;;  %v10960_v46 = vpop.f32.mrb[71].mxu0 }
0x1505   :  { %v3331_v47 = vpack.c.bf16 %v10960_v46, %v10954_v45  ;;  %v9983_v46 = vld [vmem:[#allocation2 + $0x18] sm:$0xff] }
0x1519   :  { %v8984_v17 = vpop.f32.mrb[72].mxu0 }
0x151a   :  { %v3448_v48 = vpop.f32.mrb[73].mxu0  ;;  %v3457_v44 = vadd.f32 %v8984_v17, %v7819_v9 }
0x151b   :  { %v8985_v51 = vpop.f32.mrb[74].mxu0  ;;  %v3449_v24 = vadd.f32 %v7819_v9, %v3448_v48 }
0x151c   :  { %v3460_v27 = vadd.f32 %v8985_v51, %v7819_v9  ;;  %v3451_v53 = vpop.f32.mrb[75].mxu0 }
0x151d   :  { %v3452_v55 = vadd.f32 %v7819_v9, %v3451_v53 }
0x151e   :  { %v3756_v29 = vpack.c.bf16 %v3460_v27, %v3457_v44 }
0x151f   :  { %v3755_v59 = vpack.c.bf16 %v3452_v55, %v3449_v24 }
0x1521   :  { %v8988_v4 = vpop.f32.mrb[76].mxu0  ;;  %9046 = vmatprep.mubr.msk.bf16.mxu1 %vm589_vm10, %v3755_v59 }
0x1522   :  { %v3464_v7 = vpop.f32.mrb[77].mxu0  ;;  %9047 = vmatmul.mubr.msk.bf16.vlgmr.msra.gmra.mrb[56].mxu1 %vm589_vm10, %v3756_v29  ;;  %v3473_v12 = vadd.f32 %v8988_v4, %v7819_v9 }
0x1523   :  { %v8989_v14 = vpop.f32.mrb[78].mxu0  ;;  %v3465_v16 = vadd.f32 %v7819_v9, %v3464_v7 }
0x1524   :  { %v3476_v43 = vadd.f32 %v8989_v14, %v7819_v9  ;;  %v3467_v15 = vpop.f32.mrb[79].mxu0 }
0x1525   :  { %v3468_v49 = vadd.f32 %v7819_v9, %v3467_v15 }
0x1526   :  { %v3758_v18 = vpack.c.bf16 %v3476_v43, %v3473_v12 }
0x1527   :  { %v3757_v20 = vpack.c.bf16 %v3468_v49, %v3465_v16 }
0x1529   :  { %9050 = vmatprep.mubr.msk.bf16.mxu1 %vm589_vm10, %v3757_v20 }
0x152a   :  { %9051 = vmatmul.mubr.msk.bf16.gmra.mrb[60].mxu1 %vm589_vm10, %v3758_v18 }
0x1539   :  { %v9032_v21 = vpop.f32.mrb[80].mxu0 }
0x153a   :  { %v3724_v26 = vpop.f32.mrb[81].mxu0  ;;  %v3733_v28 = vadd.f32 %v9032_v21, %v7871_v25 }
0x153b   :  { %v9033_v58 = vpop.f32.mrb[82].mxu0  ;;  %v3725_v30 = vadd.f32 %v7871_v25, %v3724_v26 }
0x153c   :  { %v3736_v42 = vadd.f32 %v9033_v58, %v7871_v25  ;;  %v3727_v62 = vpop.f32.mrb[83].mxu0 }
0x153d   :  { %v3728_v6 = vadd.f32 %v7871_v25, %v3727_v62 }
0x153e   :  { %v3961_v32 = vpack.c.bf16 %v3736_v42, %v3733_v28 }
0x153f   :  { %v3960_v33 = vpack.c.bf16 %v3728_v6, %v3725_v30 }
0x1541   :  { %v9036_v34 = vpop.f32.mrb[84].mxu0  ;;  %9054 = vmatprep.subr.bf16.mxu0 %v3960_v33 }
0x1542   :  { %v3740_v11 = vpop.f32.mrb[85].mxu0  ;;  %9055 = vmatpush3.bf16.msra.mxu0 %v3960_v33  ;;  %v3749_v36 = vadd.f32 %v9036_v34, %v7871_v25 }
0x1543   :  { %v9037_v35 = vpop.f32.mrb[86].mxu0  ;;  %9056 = vmatprep.subr.bf16.mxu0 %v3961_v32  ;;  %v3741_v61 = vadd.f32 %v7871_v25, %v3740_v11 }
0x1544   :  { %v3752_v57 = vadd.f32 %v9037_v35, %v7871_v25  ;;  %v3743_v37 = vpop.f32.mrb[87].mxu0 }
0x1545   :  { %v3744_v3 = vadd.f32 %v7871_v25, %v3743_v37 }
0x1546   :  { %v3963_v1 = vpack.c.bf16 %v3752_v57, %v3749_v36  ;;  %9057 = vmatpush3.bf16.msra.mxu0 %v3961_v32 }
0x1547   :  { %v3962_v60 = vpack.c.bf16 %v3744_v3, %v3741_v61 }
0x1549   :  { %9058 = vmatprep.subr.bf16.mxu0 %v3962_v60 }
0x154a   :  { %9059 = vmatpush3.bf16.msra.mxu0 %v3962_v60 }
0x154b   :  { %9060 = vmatprep.subr.bf16.mxu0 %v3963_v1 }
0x154e   :  { %9061 = vmatpush3.bf16.msra.mxu0 %v3963_v1 }
0x15f5   :  { %v9048_v38 = vpop.f32.mrb[56].mxu1 }
0x15f6   :  { %v3821_v17 = vpop.f32.mrb[57].mxu1  ;;  %v3854_v9 = vmul.f32 0.125, %v9048_v38 }
0x15f7   :  { %v3852_v48 = vmul.f32 0.125, %v3821_v17  ;;  %v9049_v51 = vpop.f32.mrb[58].mxu1 }
0x15f8   :  { %v3824_v44 = vpop.f32.mrb[59].mxu1  ;;  %v3855_v53 = vmul.f32 0.125, %v9049_v51  ;;  %v3862_v55 = vadd.f32 %v3854_v9, %v10827_v22 }
0x15f9   :  { %v3860_v27 = vadd.f32 %v3852_v48, %v10824_v52  ;;  %v3853_v24 = vmul.f32 0.125, %v3824_v44 }
0x15fa   :  { %v3863_v4 = vadd.f32 %v3855_v53, %v10836_v5  ;;  %v3874_v52 = vsel %vm589_vm10, %v3862_v55, -inf }
0x15fb   :  { %v3861_v29 = vadd.f32 %v3853_v24, %v10830_v56  ;;  %v3868_v59 = vsel %vm589_vm10, %v3860_v27, -inf }
0x15fc   :  { %3869 = vmax.xlane.f32.xlu0 %v3868_v59  ;;  %v3877_v20 = vsel %vm589_vm10, %v3863_v4, -inf }
0x15fd   :  { %v9052_v7 = vpop.f32.mrb[60].mxu1  ;;  %v3871_v14 = vsel %vm589_vm10, %v3861_v29, -inf }
0x15fe   :  { %3872 = vmax.xlane.f32.xlu1 %v3871_v14  ;;  %v3837_v12 = vpop.f32.mrb[61].mxu1  ;;  %v3858_v43 = vmul.f32 0.125, %v9052_v7 }
0x15ff   :  { %v3856_v15 = vmul.f32 0.125, %v3837_v12  ;;  %v9053_v16 = vpop.f32.mrb[62].mxu1 }
0x1600   :  { %3875 = vmax.xlane.f32.xlu0 %v3874_v52  ;;  %v3840_v49 = vpop.f32.mrb[63].mxu1  ;;  %v3859_v56 = vmul.f32 0.125, %v9053_v16  ;;  %v3866_v5 = vadd.f32 %v3858_v43, %v10857_v8 }
0x1601   :  { %v3864_v22 = vadd.f32 %v3856_v15, %v10852_v13  ;;  %v3857_v18 = vmul.f32 0.125, %v3840_v49 }
0x1602   :  { %3878 = vmax.xlane.f32.xlu1 %v3877_v20  ;;  %v3867_v26 = vadd.f32 %v3859_v56, %v10868_v23  ;;  %v3886_v28 = vsel %vm589_vm10, %v3866_v5, -inf  ;;  %v9549_v56 = vld [vmem:[%s11942_s25 + $0x28] sm:$0xff]  }
0x1603   :  { %v3865_v21 = vadd.f32 %v3857_v18, %v10860_v54  ;;  %v3880_v25 = vsel %vm589_vm10, %v3864_v22, -inf  ;;  %v9550_v18 = vld [vmem:[%s11942_s25 + $0x30] sm:$0xff]  }
0x1604   :  { %3881 = vmax.xlane.f32.xlu0 %v3880_v25  ;;  %v3889_v13 = vsel %vm589_vm10, %v3867_v26, -inf }
0x1605   :  { %v3883_v58 = vsel %vm589_vm10, %v3865_v21, -inf }
0x1606   :  { %3884 = vmax.xlane.f32.xlu1 %v3883_v58 }
0x1608   :  { %3887 = vmax.xlane.f32.xlu0 %v3886_v28 }
0x160a   :  { %3890 = vmax.xlane.f32.xlu1 %v3889_v13 }
0x1689   :  { %v3870_v42 = vpop.xlane.xlu0 %3869 }
0x168a   :  { %v3892_v62 = vsub.f32 %v3860_v27, %v3870_v42 }
0x168b   :  { %v3873_v30 = vpop.xlane.xlu1 %3872 }
0x168c   :  { %v3900_v8 = vmul.f32 1.442695, %v3892_v62  ;;  %v3893_v6 = vsub.f32 %v3861_v29, %v3873_v30 }
0x168d   :  { %v3876_v54 = vpop.xlane.xlu0 %3875 }
0x168e   :  { %9756 = vpow2.f32 %v3900_v8  ;;  %v3902_v32 = vmul.f32 1.442695, %v3893_v6  ;;  %v3894_v33 = vsub.f32 %v3862_v55, %v3876_v54 }
0x168f   :  { %v3879_v34 = vpop.xlane.xlu1 %3878 }
0x1690   :  { %9758 = vpow2.f32 %v3902_v32  ;;  %v3904_v23 = vmul.f32 1.442695, %v3894_v33  ;;  %v3895_v11 = vsub.f32 %v3863_v4, %v3879_v34 }
0x1691   :  { %v3882_v35 = vpop.xlane.xlu0 %3881 }
0x1692   :  { %9760 = vpow2.f32 %v3904_v23  ;;  %v3906_v36 = vmul.f32 1.442695, %v3895_v11  ;;  %v3896_v57 = vsub.f32 %v3864_v22, %v3882_v35  ;;  %v9548_v22 = vld [vmem:[%s11942_s25 + $0x20] sm:$0xff]  }
0x1693   :  { %v3885_v37 = vpop.xlane.xlu1 %3884  ;;  %9070 = vmatprep.subr.bf16.mxu1 %v9548_v22 }
0x1694   :  { %9762 = vpow2.f32 %v3906_v36  ;;  %v3908_v61 = vmul.f32 1.442695, %v3896_v57  ;;  %v3897_v3 = vsub.f32 %v3865_v21, %v3885_v37  ;;  %9071 = vmatpush3.bf16.msra.mxu1 %v9548_v22 }
0x1695   :  { %v3888_v1 = vpop.xlane.xlu0 %3887  ;;  %9072 = vmatprep.subr.bf16.mxu1 %v9549_v56 }
0x1696   :  { %9764 = vpow2.f32 %v3908_v61  ;;  %v3910_v60 = vmul.f32 1.442695, %v3897_v3  ;;  %v3898_v38 = vsub.f32 %v3866_v5, %v3888_v1 }
0x1697   :  { %v3891_v17 = vpop.xlane.xlu1 %3890 }
0x1698   :  { %v9757_v9 = vpop.eup %9756  ;;  %9766 = vpow2.f32 %v3910_v60  ;;  %v3912_v48 = vmul.f32 1.442695, %v3898_v38  ;;  %v3899_v51 = vsub.f32 %v3867_v26, %v3891_v17  ;;  %9073 = vmatpush3.bf16.msra.mxu1 %v9549_v56  ;;  %v9551_v17 = vld [vmem:[%s11942_s25 + $0x38] sm:$0xff]   ;;  %v9982_v56 = vld [vmem:[#allocation2 + $0x8] sm:$0xff] }
0x1699   :  { %v3916_v44 = vsel %vm589_vm10, %v9757_v9, 0.0  ;;  %9074 = vmatprep.subr.bf16.mxu1 %v9550_v18 }
0x169a   :  { %v9759_v27 = vpop.eup %9758  ;;  %9768 = vpow2.f32 %v3912_v48  ;;  %v3914_v53 = vmul.f32 1.442695, %v3899_v51  ;;  %3917 = vadd.xlane.f32.xlu0 %v3916_v44 }
0x169b   :  { %v3919_v24 = vsel %vm589_vm10, %v9759_v27, 0.0 }
0x169c   :  { %v9761_v55 = vpop.eup %9760  ;;  %9770 = vpow2.f32 %v3914_v53  ;;  %3920 = vadd.xlane.f32.xlu1 %v3919_v24  ;;  %9075 = vmatpush3.bf16.msra.mxu1 %v9550_v18 }
0x169d   :  { %v3922_v29 = vsel %vm589_vm10, %v9761_v55, 0.0  ;;  %9076 = vmatprep.subr.bf16.mxu1 %v9551_v17 }
0x169e   :  { %v9763_v59 = vpop.eup %9762  ;;  %3923 = vadd.xlane.f32.xlu0 %v3922_v29 }
0x169f   :  { %v3925_v4 = vsel %vm589_vm10, %v9763_v59, 0.0 }
0x16a0   :  { %v9765_v7 = vpop.eup %9764  ;;  %3926 = vadd.xlane.f32.xlu1 %v3925_v4  ;;  %9077 = vmatpush3.bf16.msra.mxu1 %v9551_v17  ;;  %v9554_v4 = vld [vmem:[%s11942_s25 + $0x10] sm:$0xff]  }
0x16a1   :  { %v3928_v14 = vsel %vm589_vm10, %v9765_v7, 0.0 }
0x16a2   :  { %v9767_v12 = vpop.eup %9766  ;;  %3929 = vadd.xlane.f32.xlu0 %v3928_v14 }
0x16a3   :  { %v3931_v43 = vsel %vm589_vm10, %v9767_v12, 0.0 }
0x16a4   :  { %v9769_v15 = vpop.eup %9768  ;;  %3932 = vadd.xlane.f32.xlu1 %v3931_v43 }
0x16a5   :  { %v3934_v16 = vsel %vm589_vm10, %v9769_v15, 0.0 }
0x16a6   :  { %v9771_v52 = vpop.eup %9770  ;;  %3935 = vadd.xlane.f32.xlu0 %v3934_v16  ;;  %v9980_v16 = vld [vmem:[#allocation2] sm:$0xff] }
0x16a7   :  { %v3937_v49 = vsel %vm589_vm10, %v9771_v52, 0.0 }
0x16a8   :  { %3938 = vadd.xlane.f32.xlu1 %v3937_v49 }
0x1727   :  { %v3918_v20 = vpop.xlane.xlu0 %3917 }
0x1728   :  { %9772 = vrcp.f32 %v3918_v20 }
0x1729   :  { %v3921_v5 = vpop.xlane.xlu1 %3920 }
0x172a   :  { %9774 = vrcp.f32 %v3921_v5  ;;  %v9984_v5 = vld [vmem:[#allocation2 + $0x20] sm:$0xff] }
0x172b   :  { %v3924_v21 = vpop.xlane.xlu0 %3923 }
0x172c   :  { %9776 = vrcp.f32 %v3924_v21 }
0x172d   :  { %v3927_v25 = vpop.xlane.xlu1 %3926 }
0x172e   :  { %9778 = vrcp.f32 %v3927_v25 }
0x172f   :  { %v3930_v26 = vpop.xlane.xlu0 %3929 }
0x1730   :  { %9780 = vrcp.f32 %v3930_v26 }
0x1731   :  { %v3933_v58 = vpop.xlane.xlu1 %3932 }
0x1732   :  { %v9773_v28 = vpop.eup %9772  ;;  %9782 = vrcp.f32 %v3933_v58  ;;  %v9985_v58 = vld [vmem:[#allocation2 + $0x30] sm:$0xff] }
0x1733   :  { %v3936_v13 = vpop.xlane.xlu0 %3935  ;;  %v3941_v30 = vmul.f32 %v9773_v28, %v9757_v9  ;;  %v9552_v9 = vld [vmem:[%s11942_s25] sm:$0xff]  }
0x1734   :  { %v9775_v42 = vpop.eup %9774  ;;  %9784 = vrcp.f32 %v3936_v13  ;;  %9086 = vmatprep.subr.bf16.mxu1 %v9552_v9 }
0x1735   :  { %v3939_v62 = vpop.xlane.xlu1 %3938  ;;  %v3943_v8 = vmul.f32 %v9775_v42, %v9759_v27  ;;  %v9986_v42 = vld [vmem:[#allocation2 + $0x28] sm:$0xff] }
0x1736   :  { %v9777_v6 = vpop.eup %9776  ;;  %9786 = vrcp.f32 %v3939_v62 }
0x1737   :  { %v3956_v54 = vpack.c.bf16 %v3943_v8, %v3941_v30  ;;  %v3945_v33 = vmul.f32 %v9777_v6, %v9761_v55  ;;  %v9553_v55 = vld [vmem:[%s11942_s25 + $0x8] sm:$0xff]   ;;  %v9987_v30 = vld [vmem:[#allocation2 + $0x38] sm:$0xff] }
0x1738   :  { %v9779_v32 = vpop.eup %9778 }
0x1739   :  { %v3947_v34 = vmul.f32 %v9779_v32, %v9763_v59  ;;  %9062 = vmatprep.mubr.msk.bf16.mxu0 %vm589_vm10, %v3956_v54 }
0x173a   :  { %v9781_v23 = vpop.eup %9780 }
0x173b   :  { %v3957_v11 = vpack.c.bf16 %v3947_v34, %v3945_v33  ;;  %v3949_v36 = vmul.f32 %v9781_v23, %v9765_v7  ;;  %v9556_v33 = vld [vmem:[%s11944_s3] ss:$8 sps:$4 sm:$0xff]   ;;  %v9558_v34 = vld [vmem:[%s11944_s3 + $0x4] ss:$8 sps:$4 sm:$0xff]   ;;  %v9561_v23 = vld [vmem:[%s11944_s3 + $0x14] ss:$8 sps:$4 sm:$0xff]  }
0x173c   :  { %v9783_v35 = vpop.eup %9782  ;;  %4509 = vmatprep.subr.bf16.mxu0 %v9558_v34 }
0x173d   :  { %9063 = vmatmul.mubr.msk.bf16.vlgmr.msra.gmra.mrb[88].mxu0 %vm589_vm10, %v3957_v11  ;;  %v3951_v57 = vmul.f32 %v9783_v35, %v9767_v12  ;;  %v9559_v11 = vld [vmem:[%s11944_s3 + $0x10] ss:$8 sps:$4 sm:$0xff]  }
0x173e   :  { %v9785_v37 = vpop.eup %9784  ;;  %4510 = vmatpush1.bf16.msra.mxu0 %v9556_v33 }
0x173f   :  { %v3958_v61 = vpack.c.bf16 %v3951_v57, %v3949_v36  ;;  %v3953_v1 = vmul.f32 %v9785_v37, %v9769_v15  ;;  %v9555_v15 = vld [vmem:[%s11942_s25 + $0x18] sm:$0xff]   ;;  %4511 = vmatprep.subr.bf16.mxu0 %v9561_v23 }
0x1740   :  { %v9787_v3 = vpop.eup %9786 }
0x1741   :  { %9066 = vmatprep.mubr.msk.bf16.mxu0 %vm589_vm10, %v3958_v61  ;;  %v3955_v60 = vmul.f32 %v9787_v3, %v9771_v52 }
0x1742   :  { %4512 = vmatpush1.bf16.msra.mxu0 %v9559_v11 }
0x1743   :  { %v3959_v38 = vpack.c.bf16 %v3955_v60, %v3953_v1 }
0x1745   :  { %9067 = vmatmul.mubr.msk.bf16.gmra.mrb[92].mxu0 %vm589_vm10, %v3959_v38 }
0x1810   :  { %v9064_v48 = vpop.f32.mrb[88].mxu0 }
0x1811   :  { %v4010_v51 = vpop.f32.mrb[89].mxu0 }
0x1812   :  { %v9065_v44 = vpop.f32.mrb[90].mxu0 }
0x1813   :  { %v4042_v27 = vpack.c.bf16 %v9065_v44, %v9064_v48  ;;  %v4013_v53 = vpop.f32.mrb[91].mxu0 }
0x1814   :  { %v4041_v24 = vpack.c.bf16 %v4013_v53, %v4010_v51 }
0x1816   :  { %9078 = vmatprep.mubr.msk.bf16.mxu1 %vm589_vm10, %v4041_v24 }
0x1817   :  { %9079 = vmatmul.mubr.msk.bf16.vlgmr.msra.gmra.mrb[64].mxu1 %vm589_vm10, %v4042_v27 }
0x1818   :  { %9087 = vmatpush3.bf16.msra.mxu1 %v9552_v9  ;;  %v9068_v29 = vpop.f32.mrb[92].mxu0 }
0x1819   :  { %v4026_v59 = vpop.f32.mrb[93].mxu0  ;;  %9088 = vmatprep.subr.bf16.mxu1 %v9553_v55 }
0x181a   :  { %v9069_v7 = vpop.f32.mrb[94].mxu0 }
0x181b   :  { %v4044_v14 = vpack.c.bf16 %v9069_v7, %v9068_v29  ;;  %v4029_v12 = vpop.f32.mrb[95].mxu0 }
0x181c   :  { %v4043_v43 = vpack.c.bf16 %v4029_v12, %v4026_v59  ;;  %9089 = vmatpush3.bf16.msra.mxu1 %v9553_v55 }
0x181d   :  { %9090 = vmatprep.subr.bf16.mxu1 %v9554_v4 }
0x181e   :  { %9082 = vmatprep.mubr.msk.bf16.mxu1 %vm589_vm10, %v4043_v43 }
0x181f   :  { %9083 = vmatmul.mubr.msk.bf16.gmra.mrb[68].mxu1 %vm589_vm10, %v4044_v14 }
0x1820   :  { %9091 = vmatpush3.bf16.msra.mxu1 %v9554_v4  ;;  %9094 = vmatprep.mubr.msk.bf16.mxu1 %vm589_vm10, %v3329_v41 }
0x1821   :  { %9092 = vmatprep.subr.bf16.mxu1 %v9555_v15 }
0x1824   :  { %9093 = vmatpush3.bf16.msra.mxu1 %v9555_v15 }
0x1827   :  { %9095 = vmatmul.mubr.msk.bf16.vlgmr.msra.gmra.mrb[64].mxu1 %vm589_vm10, %v3330_v2 }
0x1828   :  { %9098 = vmatprep.mubr.msk.bf16.mxu1 %vm589_vm10, %v3331_v47 }
0x182f   :  { %9099 = vmatmul.mubr.msk.bf16.gmra.mrb[68].mxu1 %vm589_vm10, %v3332_v10 }
0x18fa   :  { %v9096_v31 = vpop.f32.mrb[64].mxu1 }
0x18fb   :  { %v4225_v41 = vpop.f32.mrb[65].mxu1  ;;  %v4258_v63 = vadd.f32 %v9981_v19, %v9096_v31  ;;  %v9562_v19 = vld [vmem:[%s11944_s3 + $0x20] ss:$8 sps:$4 sm:$0xff]  }
0x18fc   :  { %v4256_v52 = vadd.f32 %v9980_v16, %v4225_v41  ;;  %v9097_v49 = vpop.f32.mrb[66].mxu1 }
0x18fd   :  { %v4228_v22 = vpop.f32.mrb[67].mxu1  ;;  %v4259_v47 = vadd.f32 %v9983_v46, %v9097_v49  ;;  %v11032_v50 = vadd.f32 %v7912_v39, %v4258_v63  ;;  %v9567_v63 = vld [vmem:[%s11944_s3 + $0x34] ss:$8 sps:$4 sm:$0xff]   ;;  %v9568_v46 = vld [vmem:[%s11944_s3 + $0x40] ss:$8 sps:$4 sm:$0xff]  }
0x18fe   :  { %v11027_v2 = vadd.f32 %v7912_v39, %v4256_v52  ;;  %v4257_v45 = vadd.f32 %v9982_v56, %v4228_v22  ;;  %v9564_v22 = vld [vmem:[%s11944_s3 + $0x24] ss:$8 sps:$4 sm:$0xff]   ;;  %v9565_v56 = vld [vmem:[%s11944_s3 + $0x30] ss:$8 sps:$4 sm:$0xff]  }
0x18ff   :  { %v11035_v20 = vadd.f32 %v7912_v39, %v4259_v47  ;;  %4513 = vmatprep.subr.bf16.mxu0 %v9564_v22  ;;  %v9573_v47 = vld [vmem:[%s11944_s3 + $0x54] ss:$8 sps:$4 sm:$0xff]  }
0x1900   :  { %v11029_v18 = vadd.f32 %v7912_v39, %v4257_v45  ;;  %4281 = vadd.xlane.f32.xlu0 %v11027_v2  ;;  %4514 = vmatpush1.bf16.msra.mxu0 %v9562_v19  ;;  %v9570_v45 = vld [vmem:[%s11944_s3 + $0x44] ss:$8 sps:$4 sm:$0xff]  }
0x1901   :  { %4515 = vmatprep.subr.bf16.mxu0 %v9567_v63 }
0x1902   :  { %4283 = vadd.xlane.f32.xlu1 %v11029_v18  ;;  %v9100_v40 = vpop.f32.mrb[68].mxu1 }
0x1903   :  { %v4241_v10 = vpop.f32.mrb[69].mxu1  ;;  %v4262_v28 = vadd.f32 %v9985_v58, %v9100_v40  ;;  %v9571_v40 = vld [vmem:[%s11944_s3 + $0x50] ss:$8 sps:$4 sm:$0xff]  }
0x1904   :  { %v4260_v21 = vadd.f32 %v9984_v5, %v4241_v10  ;;  %4285 = vadd.xlane.f32.xlu0 %v11032_v50  ;;  %v9101_v25 = vpop.f32.mrb[70].mxu1  ;;  %4516 = vmatpush1.bf16.msra.mxu0 %v9565_v56  ;;  %v9576_v10 = vld [vmem:[%s11944_s3 + $0x64] ss:$8 sps:$4 sm:$0xff]   ;;  %v9574_v5 = vld [vmem:[%s11944_s3 + $0x60] ss:$8 sps:$4 sm:$0xff]  }
0x1905   :  { %v4244_v26 = vpop.f32.mrb[71].mxu1  ;;  %v4263_v8 = vadd.f32 %v9987_v30, %v9101_v25  ;;  %v11044_v54 = vadd.f32 %v7912_v39, %v4262_v28  ;;  %4517 = vmatprep.subr.bf16.mxu0 %v9570_v45  ;;  %v9579_v25 = vld [vmem:[%s11944_s3 + $0x74] ss:$8 sps:$4 sm:$0xff]  }
0x1906   :  { %v11038_v13 = vadd.f32 %v7912_v39, %v4260_v21  ;;  %v4261_v62 = vadd.f32 %v9986_v42, %v4244_v26  ;;  %4287 = vadd.xlane.f32.xlu1 %v11035_v20  ;;  %v9577_v21 = vld [vmem:[%s11944_s3 + $0x70] ss:$8 sps:$4 sm:$0xff]   ;;  %v10058_v26 = vmov 0  }
0x1907   :  { %v11047_v32 = vadd.f32 %v7912_v39, %v4263_v8  ;;  %4541 = vmatprep.mubr.bf16.mxu0 %v10058_v26 }
0x1908   :  { %v11041_v6 = vadd.f32 %v7912_v39, %v4261_v62  ;;  %4289 = vadd.xlane.f32.xlu0 %v11038_v13  ;;  %4518 = vmatpush1.bf16.msra.mxu0 %v9568_v46 }
0x1909   :  { %4519 = vmatprep.subr.bf16.mxu0 %v9573_v47 }
0x190a   :  { %4291 = vadd.xlane.f32.xlu1 %v11041_v6 }
0x190c   :  { %4293 = vadd.xlane.f32.xlu0 %v11044_v54  ;;  %4520 = vmatpush1.bf16.msra.mxu0 %v9571_v40 }
0x190d   :  { %4521 = vmatprep.subr.bf16.mxu0 %v9576_v10 }
0x190e   :  { %4295 = vadd.xlane.f32.xlu1 %v11047_v32 }
0x1910   :  { %4522 = vmatpush1.bf16.msra.mxu0 %v9574_v5 }
0x1911   :  { %4523 = vmatprep.subr.bf16.mxu0 %v9579_v25 }
0x1914   :  { %4524 = vmatpush1.bf16.msra.mxu0 %v9577_v21 }
0x198d   :  { %v4282_v35 = vpop.xlane.xlu0 %4281 }
0x198e   :  { %v4297_v36 = vmul.f32 0.0078125, %v4282_v35 }
0x198f   :  { %v4284_v57 = vpop.xlane.xlu1 %4283 }
0x1990   :  { %v11056_v37 = vsub.f32 %v11027_v2, %v4297_v36  ;;  %v4298_v61 = vmul.f32 0.0078125, %v4284_v57 }
0x1991   :  { %v4286_v3 = vpop.xlane.xlu0 %4285 }
0x1992   :  { %v11059_v1 = vsub.f32 %v11029_v18, %v4298_v61  ;;  %v4299_v60 = vmul.f32 0.0078125, %v4286_v3  ;;  %v4313_v38 = vmul.f32 %v11056_v37, %v11056_v37 }
0x1993   :  { %v4288_v17 = vpop.xlane.xlu1 %4287 }
0x1994   :  { %v11064_v9 = vsub.f32 %v11032_v50, %v4299_v60  ;;  %v4300_v48 = vmul.f32 0.0078125, %v4288_v17  ;;  %4321 = vadd.xlane.f32.xlu0 %v4313_v38  ;;  %v4314_v51 = vmul.f32 %v11059_v1, %v11059_v1 }
0x1995   :  { %v4290_v44 = vpop.xlane.xlu0 %4289 }
0x1996   :  { %v11069_v27 = vsub.f32 %v11035_v20, %v4300_v48  ;;  %v4301_v53 = vmul.f32 0.0078125, %v4290_v44  ;;  %4323 = vadd.xlane.f32.xlu1 %v4314_v51  ;;  %v4315_v24 = vmul.f32 %v11064_v9, %v11064_v9 }
0x1997   :  { %v4292_v55 = vpop.xlane.xlu1 %4291 }
0x1998   :  { %v11074_v29 = vsub.f32 %v11038_v13, %v4301_v53  ;;  %v4302_v59 = vmul.f32 0.0078125, %v4292_v55  ;;  %4325 = vadd.xlane.f32.xlu0 %v4315_v24  ;;  %v4316_v4 = vmul.f32 %v11069_v27, %v11069_v27  ;;  %v7913_v53 = vld [vmem:[%s11945_s8] ss:$0 sm:$0xff] }
0x1999   :  { %v4294_v7 = vpop.xlane.xlu0 %4293 }
0x199a   :  { %v11079_v14 = vsub.f32 %v11041_v6, %v4302_v59  ;;  %v4303_v12 = vmul.f32 0.0078125, %v4294_v7  ;;  %4327 = vadd.xlane.f32.xlu1 %v4316_v4  ;;  %v4317_v43 = vmul.f32 %v11074_v29, %v11074_v29 }
0x199b   :  { %v4296_v15 = vpop.xlane.xlu1 %4295 }
0x199c   :  { %v11084_v31 = vsub.f32 %v11044_v54, %v4303_v12  ;;  %v4304_v39 = vmul.f32 0.0078125, %v4296_v15  ;;  %4329 = vadd.xlane.f32.xlu0 %v4317_v43  ;;  %v4318_v41 = vmul.f32 %v11079_v14, %v11079_v14 }
0x199e   :  { %v11089_v16 = vsub.f32 %v11047_v32, %v4304_v39  ;;  %4331 = vadd.xlane.f32.xlu1 %v4318_v41  ;;  %v4319_v52 = vmul.f32 %v11084_v31, %v11084_v31  ;;  %v7914_v39 = vld [vmem:[%s11946_s14] ss:$0 sm:$0xff] }
0x19a0   :  { %4333 = vadd.xlane.f32.xlu0 %v4319_v52  ;;  %v4320_v49 = vmul.f32 %v11089_v16, %v11089_v16 }
0x19a2   :  { %4335 = vadd.xlane.f32.xlu1 %v4320_v49 }
0x1a21   :  { %v4322_v58 = vpop.xlane.xlu0 %4321 }
0x1a22   :  { %v4337_v28 = vmul.f32 0.0078125, %v4322_v58 }
0x1a23   :  { %v4324_v42 = vpop.xlane.xlu1 %4323 }
0x1a24   :  { %v4345_v62 = vadd.f32 1e-05, %v4337_v28  ;;  %v4338_v30 = vmul.f32 0.0078125, %v4324_v42 }
0x1a25   :  { %v4326_v8 = vpop.xlane.xlu0 %4325 }
0x1a26   :  { %9788 = vrsqrt.f32 %v4345_v62  ;;  %v4346_v33 = vadd.f32 1e-05, %v4338_v30  ;;  %v4339_v34 = vmul.f32 0.0078125, %v4326_v8 }
0x1a27   :  { %v4328_v23 = vpop.xlane.xlu1 %4327 }
0x1a28   :  { %9790 = vrsqrt.f32 %v4346_v33  ;;  %v4347_v11 = vadd.f32 1e-05, %v4339_v34  ;;  %v4340_v35 = vmul.f32 0.0078125, %v4328_v23 }
0x1a29   :  { %v4330_v36 = vpop.xlane.xlu0 %4329 }
0x1a2a   :  { %9792 = vrsqrt.f32 %v4347_v11  ;;  %v4348_v57 = vadd.f32 1e-05, %v4340_v35  ;;  %v4341_v61 = vmul.f32 0.0078125, %v4330_v36  ;;  %v9581_v35 = vld [vmem:[%s11947_s19] sm:$0xff]   ;;  %v9583_v36 = vld [vmem:[%s11947_s19 + $0x8] sm:$0xff]  }
0x1a2b   :  { %v4332_v3 = vpop.xlane.xlu1 %4331 }
0x1a2c   :  { %9794 = vrsqrt.f32 %v4348_v57  ;;  %v4342_v60 = vmul.f32 0.0078125, %v4332_v3  ;;  %v4349_v38 = vadd.f32 1e-05, %v4341_v61  ;;  %v9584_v57 = vld [vmem:[%s11947_s19 + $0x50] sm:$0xff]   ;;  %v9586_v3 = vld [vmem:[%s11947_s19 + $0x58] sm:$0xff]  }
0x1a2d   :  { %v4334_v48 = vpop.xlane.xlu0 %4333  ;;  %v9585_v61 = vld [vmem:[%s11947_s19 + $0x10] sm:$0xff]  }
0x1a2e   :  { %v4350_v17 = vadd.f32 1e-05, %v4342_v60  ;;  %v4343_v4 = vmul.f32 0.0078125, %v4334_v48  ;;  %v9587_v60 = vld [vmem:[%s11947_s19 + $0x18] sm:$0xff]   ;;  %v9590_v48 = vld [vmem:[%s11947_s19 + $0x68] sm:$0xff]  }
0x1a2f   :  { %v4336_v51 = vpop.xlane.xlu1 %4335 }
0x1a30   :  { %v9789_v44 = vpop.eup %9788  ;;  %9796 = vrsqrt.f32 %v4350_v17  ;;  %v4344_v24 = vmul.f32 0.0078125, %v4336_v51  ;;  %v4351_v49 = vadd.f32 1e-05, %v4343_v4  ;;  %v9589_v17 = vld [vmem:[%s11947_s19 + $0x20] sm:$0xff]   ;;  %v9591_v51 = vld [vmem:[%s11947_s19 + $0x28] sm:$0xff]  }
0x1a31   :  { %v4361_v55 = vmul.f32 %v9789_v44, %v11056_v37  ;;  %9798 = vrsqrt.f32 %v4349_v38  ;;  %v9588_v38 = vld [vmem:[%s11947_s19 + $0x60] sm:$0xff]   ;;  %v9592_v44 = vld [vmem:[%s11947_s19 + $0x70] sm:$0xff]  }
0x1a32   :  { %v9791_v59 = vpop.eup %9790  ;;  %v4352_v15 = vadd.f32 1e-05, %v4344_v24  ;;  %v9594_v24 = vld [vmem:[%s11947_s19 + $0x78] sm:$0xff]  }
0x1a33   :  { %v4375_v7 = vmul.f32 %v7913_v53, %v4361_v55  ;;  %v4362_v12 = vmul.f32 %v9791_v59, %v11059_v1  ;;  %v9595_v55 = vld [vmem:[%s11947_s19 + $0x38] sm:$0xff]   ;;  %v11138_v59 = vshrl.u32 %v459_v0, 7 }
0x1a34   :  { %v9793_v43 = vpop.eup %9792  ;;  %9800 = vrsqrt.f32 %v4352_v15 }
0x1a35   :  { %v4376_v41 = vmul.f32 %v7913_v53, %v4362_v12  ;;  %v4389_v22 = vadd.f32 %v7914_v39, %v4375_v7  ;;  %v4363_v63 = vmul.f32 %v9793_v43, %v11064_v9  ;;  %9802 = vrsqrt.f32 %v4351_v49  ;;  %v4417_v7 = vld [vmem:[%s11948_s7] sm:$0x3] }
0x1a36   :  { %v9795_v52 = vpop.eup %9794  ;;  %v4421_v4 = vsub.s32 0, %v11138_v59  ;;  %v4425_v12 = vsub.s32 1, %v11138_v59 }
0x1a37   :  { %v4390_v19 = vadd.f32 %v7914_v39, %v4376_v41  ;;  %v4364_v56 = vmul.f32 %v9795_v52, %v11069_v27  ;;  %v4377_v47 = vmul.f32 %v7913_v53, %v4363_v63 }
0x1a38   :  { %v11145_v43 = vrot.slane %v4417_v7, %v4421_v4  ;;  %v11149_v15 = vrot.slane %v4417_v7, %v4425_v12 }
0x1a39   :  { %v4397_v37 = vpack.c.bf16 %v4390_v19, %v4389_v22  ;;  %v4378_v45 = vmul.f32 %v7913_v53, %v4364_v56  ;;  %v4391_v5 = vadd.f32 %v7914_v39, %v4377_v47 }
0x1a3a   :  { %v9797_v46 = vpop.eup %9796 }
0x1a3b   :  { %4542 = vmatmul.mubr.bf16.vlgmr.msra.gmra.mrb[96].mxu0 %v4397_v37  ;;  %v9799_v1 = vpop.eup %9798  ;;  %v4392_v40 = vadd.f32 %v7914_v39, %v4378_v45  ;;  %v4366_v10 = vmul.f32 %v9797_v46, %v11079_v14 }
0x1a3c   :  { %4551 = vmatprep.mubr.bf16.mxu0 %v10058_v26  ;;  %v4365_v21 = vmul.f32 %v9799_v1, %v11074_v29 }
0x1a3d   :  { %v4398_v25 = vpack.c.bf16 %v4392_v40, %v4391_v5  ;;  %v4380_v9 = vmul.f32 %v7913_v53, %v4366_v10 }
0x1a3e   :  { %v9801_v58 = vpop.eup %9800  ;;  %v4379_v27 = vmul.f32 %v7913_v53, %v4365_v21 }
0x1a3f   :  { %v9803_v28 = vpop.eup %9802  ;;  %v4394_v42 = vadd.f32 %v7914_v39, %v4380_v9  ;;  %v4368_v62 = vmul.f32 %v9801_v58, %v11089_v16  ;;  %v9580_v16 = vld [vmem:[%s11947_s19 + $0x40] sm:$0xff]  }
0x1a40   :  { %v4393_v30 = vadd.f32 %v7914_v39, %v4379_v27  ;;  %v4367_v14 = vmul.f32 %v9803_v28, %v11084_v31  ;;  %8468 = vmatprep.subr.bf16.mxu1 %v9580_v16  ;;  %v9582_v31 = vld [vmem:[%s11947_s19 + $0x48] sm:$0xff]  }
0x1a41   :  { %v4382_v29 = vmul.f32 %v7913_v53, %v4368_v62  ;;  %8469 = vmatpush3.bf16.msra.mxu1 %v9581_v35 }
0x1a42   :  { %v4399_v8 = vpack.c.bf16 %v4394_v42, %v4393_v30  ;;  %v4381_v33 = vmul.f32 %v7913_v53, %v4367_v14  ;;  %8470 = vmatprep.subr.bf16.mxu1 %v9582_v31  ;;  %v9593_v53 = vld [vmem:[%s11947_s19 + $0x30] sm:$0xff]  }
0x1a43   :  { %4552 = vmatmul.mubr.bf16.gmra.mrb[100].mxu0 %v4398_v25  ;;  %v4396_v34 = vadd.f32 %v7914_v39, %v4382_v29 }
0x1a44   :  { %4561 = vmatprep.mubr.bf16.mxu0 %v10058_v26  ;;  %v4395_v23 = vadd.f32 %v7914_v39, %v4381_v33 }
0x1a45   :  { %8471 = vmatpush3.bf16.msra.mxu1 %v9583_v36 }
0x1a46   :  { %v4400_v11 = vpack.c.bf16 %v4396_v34, %v4395_v23  ;;  %8472 = vmatprep.subr.bf16.mxu1 %v9584_v57 }
0x1a49   :  { %8473 = vmatpush3.bf16.msra.mxu1 %v9585_v61 }
0x1a4a   :  { %8474 = vmatprep.subr.bf16.mxu1 %v9586_v3 }
0x1a4b   :  { %4562 = vmatmul.mubr.bf16.gmra.mrb[104].mxu0 %v4399_v8 }
0x1a4c   :  { %4571 = vmatprep.mubr.bf16.mxu0 %v10058_v26 }
0x1a4d   :  { %8475 = vmatpush3.bf16.msra.mxu1 %v9587_v60 }
0x1a4e   :  { %8476 = vmatprep.subr.bf16.mxu1 %v9588_v38 }
0x1a51   :  { %8477 = vmatpush3.bf16.msra.mxu1 %v9589_v17 }
0x1a52   :  { %8478 = vmatprep.subr.bf16.mxu1 %v9590_v48 }
0x1a53   :  { %4572 = vmatmul.mubr.bf16.gmra.mrb[108].mxu0 %v4400_v11 }
0x1a55   :  { %8479 = vmatpush3.bf16.msra.mxu1 %v9591_v51 }
0x1a56   :  { %8480 = vmatprep.subr.bf16.mxu1 %v9592_v44 }
0x1a59   :  { %8481 = vmatpush3.bf16.msra.mxu1 %v9593_v53 }
0x1a5a   :  { %8482 = vmatprep.subr.bf16.mxu1 %v9594_v24 }
0x1a5d   :  { %8483 = vmatpush3.bf16.msra.mxu1 %v9595_v55 }
0x1b0e   :  { %v4543_v39 = vpop.f32.mrb[96].mxu0 }
0x1b0f   :  { %v11152_v41 = vadd.f32 %v4543_v39, %v11145_v43  ;;  %v4545_v52 = vpop.f32.mrb[97].mxu0 }
0x1b10   :  { %v11155_v0 = vadd.f32 %v4545_v52, %v11149_v15  ;;  %v4547_v49 = vpop.f32.mrb[98].mxu0 }
0x1b11   :  { %v4582_v22 = vmul.f32 %v11152_v41, %v11152_v41  ;;  %v11160_v19 = vadd.f32 %v4547_v49, %v11145_v43  ;;  %v4549_v63 = vpop.f32.mrb[99].mxu0 }
0x1b12   :  { %v4583_v56 = vmul.f32 %v11155_v0, %v11155_v0  ;;  %v11165_v37 = vadd.f32 %v4549_v63, %v11149_v15 }
0x1b13   :  { %v4598_v45 = vmul.f32 %v4582_v22, %v11152_v41  ;;  %v4584_v46 = vmul.f32 %v11160_v19, %v11160_v19 }
0x1b14   :  { %v4599_v47 = vmul.f32 %v4583_v56, %v11155_v0  ;;  %v4585_v1 = vmul.f32 %v11165_v37, %v11165_v37 }
0x1b15   :  { %v4614_v40 = vmul.f32 0.044715, %v4598_v45  ;;  %v4600_v10 = vmul.f32 %v4584_v46, %v11160_v19 }
0x1b16   :  { %v4615_v5 = vmul.f32 0.044715, %v4599_v47  ;;  %v4601_v21 = vmul.f32 %v4585_v1, %v11165_v37  ;;  %v4553_v25 = vpop.f32.mrb[100].mxu0 }
0x1b17   :  { %v4630_v9 = vadd.f32 %v4614_v40, %v11152_v41  ;;  %v4616_v58 = vmul.f32 0.044715, %v4600_v10  ;;  %v11177_v27 = vadd.f32 %v4553_v25, %v11145_v43  ;;  %v4555_v28 = vpop.f32.mrb[101].mxu0 }
0x1b18   :  { %v4631_v42 = vadd.f32 %v4615_v5, %v11155_v0  ;;  %v4617_v62 = vmul.f32 0.044715, %v4601_v21  ;;  %v11181_v30 = vadd.f32 %v4555_v28, %v11149_v15  ;;  %v4557_v14 = vpop.f32.mrb[102].mxu0 }
0x1b19   :  { %v4646_v8 = vmul.f32 0.7978846, %v4630_v9  ;;  %v4632_v29 = vadd.f32 %v4616_v58, %v11160_v19  ;;  %v4586_v33 = vmul.f32 %v11177_v27, %v11177_v27  ;;  %v11187_v34 = vadd.f32 %v4557_v14, %v11145_v43  ;;  %v4559_v23 = vpop.f32.mrb[103].mxu0 }
0x1b1a   :  { %v4647_v11 = vmul.f32 0.7978846, %v4631_v42  ;;  %v4633_v16 = vadd.f32 %v4617_v62, %v11165_v37  ;;  %v4587_v35 = vmul.f32 %v11181_v30, %v11181_v30  ;;  %v11193_v31 = vadd.f32 %v4559_v23, %v11149_v15 }
0x1b1b   :  { %9804 = vtanh.f32 %v4646_v8  ;;  %v4648_v36 = vmul.f32 0.7978846, %v4632_v29  ;;  %v4602_v57 = vmul.f32 %v4586_v33, %v11177_v27  ;;  %v4588_v61 = vmul.f32 %v11187_v34, %v11187_v34 }
0x1b1c   :  { %9806 = vtanh.f32 %v4647_v11  ;;  %v4649_v3 = vmul.f32 0.7978846, %v4633_v16  ;;  %v4603_v60 = vmul.f32 %v4587_v35, %v11181_v30  ;;  %v4589_v38 = vmul.f32 %v11193_v31, %v11193_v31 }
0x1b1d   :  { %9808 = vtanh.f32 %v4648_v36  ;;  %v4618_v17 = vmul.f32 0.044715, %v4602_v57  ;;  %v4604_v48 = vmul.f32 %v4588_v61, %v11187_v34 }
0x1b1e   :  { %v4619_v51 = vmul.f32 0.044715, %v4603_v60  ;;  %v4605_v44 = vmul.f32 %v4589_v38, %v11193_v31  ;;  %v4563_v53 = vpop.f32.mrb[104].mxu0  ;;  %9810 = vtanh.f32 %v4649_v3 }
0x1b1f   :  { %v4634_v24 = vadd.f32 %v4618_v17, %v11177_v27  ;;  %v4620_v55 = vmul.f32 0.044715, %v4604_v48  ;;  %v11205_v7 = vadd.f32 %v4563_v53, %v11145_v43  ;;  %v4565_v39 = vpop.f32.mrb[105].mxu0 }
0x1b20   :  { %v4635_v52 = vadd.f32 %v4619_v51, %v11181_v30  ;;  %v4621_v49 = vmul.f32 0.044715, %v4605_v44  ;;  %v11209_v22 = vadd.f32 %v4565_v39, %v11149_v15  ;;  %v4567_v63 = vpop.f32.mrb[106].mxu0 }
0x1b21   :  { %v4650_v56 = vmul.f32 0.7978846, %v4634_v24  ;;  %v4636_v45 = vadd.f32 %v4620_v55, %v11187_v34  ;;  %v4590_v46 = vmul.f32 %v11205_v7, %v11205_v7  ;;  %v11215_v47 = vadd.f32 %v4567_v63, %v11145_v43  ;;  %v4569_v1 = vpop.f32.mrb[107].mxu0 }
0x1b22   :  { %v4651_v40 = vmul.f32 0.7978846, %v4635_v52  ;;  %v4637_v10 = vadd.f32 %v4621_v49, %v11193_v31  ;;  %v4591_v5 = vmul.f32 %v11209_v22, %v11209_v22  ;;  %v11221_v21 = vadd.f32 %v4569_v1, %v11149_v15 }
0x1b23   :  { %9812 = vtanh.f32 %v4650_v56  ;;  %v4652_v25 = vmul.f32 0.7978846, %v4636_v45  ;;  %v4606_v9 = vmul.f32 %v4590_v46, %v11205_v7  ;;  %v4592_v58 = vmul.f32 %v11215_v47, %v11215_v47 }
0x1b24   :  { %9814 = vtanh.f32 %v4651_v40  ;;  %v4653_v28 = vmul.f32 0.7978846, %v4637_v10  ;;  %v4607_v42 = vmul.f32 %v4591_v5, %v11209_v22  ;;  %v4593_v62 = vmul.f32 %v11221_v21, %v11221_v21 }
0x1b25   :  { %v9805_v14 = vpop.eup %9804  ;;  %9816 = vtanh.f32 %v4652_v25  ;;  %v4622_v8 = vmul.f32 0.044715, %v4606_v9  ;;  %v4608_v29 = vmul.f32 %v4592_v58, %v11215_v47 }
0x1b26   :  { %v9807_v33 = vpop.eup %9806  ;;  %v4678_v23 = vadd.f32 1.0, %v9805_v14  ;;  %9818 = vtanh.f32 %v4653_v28  ;;  %v4623_v11 = vmul.f32 0.044715, %v4607_v42  ;;  %v4609_v16 = vmul.f32 %v4593_v62, %v11221_v21  ;;  %v4573_v35 = vpop.f32.mrb[108].mxu0 }
0x1b27   :  { %v9809_v36 = vpop.eup %9808  ;;  %v4638_v57 = vadd.f32 %v4622_v8, %v11205_v7  ;;  %v4624_v61 = vmul.f32 0.044715, %v4608_v29  ;;  %v11233_v3 = vadd.f32 %v4573_v35, %v11145_v43  ;;  %v4575_v60 = vpop.f32.mrb[109].mxu0  ;;  %v4679_v38 = vadd.f32 1.0, %v9807_v33 }
0x1b28   :  { %v4694_v17 = vmul.f32 0.5, %v4678_v23  ;;  %v4680_v48 = vadd.f32 1.0, %v9809_v36  ;;  %v4639_v51 = vadd.f32 %v4623_v11, %v11209_v22  ;;  %v4625_v44 = vmul.f32 0.044715, %v4609_v16  ;;  %v4577_v53 = vpop.f32.mrb[110].mxu0  ;;  %v9811_v63 = vpop.eup %9810 }
0x1b29   :  { %v4654_v24 = vmul.f32 0.7978846, %v4638_v57  ;;  %v4640_v55 = vadd.f32 %v4624_v61, %v11215_v47  ;;  %v4594_v39 = vmul.f32 %v11233_v3, %v11233_v3  ;;  %v11240_v52 = vadd.f32 %v4575_v60, %v11149_v15  ;;  %v4579_v49 = vpop.f32.mrb[111].mxu0 }
0x1b2a   :  { %v4710_v56 = vmul.f32 %v4694_v17, %v11152_v41  ;;  %v4696_v45 = vmul.f32 0.5, %v4680_v48  ;;  %v4655_v46 = vmul.f32 0.7978846, %v4639_v51  ;;  %v4641_v1 = vadd.f32 %v4625_v44, %v11221_v21 }
0x1b2b   :  { %9820 = vtanh.f32 %v4654_v24  ;;  %v4656_v40 = vmul.f32 0.7978846, %v4640_v55  ;;  %v4610_v10 = vmul.f32 %v4594_v39, %v11233_v3  ;;  %v4595_v5 = vmul.f32 %v11240_v52, %v11240_v52 }
0x1b2c   :  { %v4712_v25 = vmul.f32 %v4696_v45, %v11160_v19  ;;  %9822 = vtanh.f32 %v4655_v46  ;;  %v4657_v9 = vmul.f32 0.7978846, %v4641_v1  ;;  %v11249_v58 = vadd.f32 %v4577_v53, %v11145_v43 }
0x1b2d   :  { %v9813_v28 = vpop.eup %9812  ;;  %9824 = vtanh.f32 %v4656_v40  ;;  %v4626_v41 = vmul.f32 0.044715, %v4610_v10  ;;  %v4611_v42 = vmul.f32 %v4595_v5, %v11240_v52  ;;  %v11253_v62 = vadd.f32 %v4579_v49, %v11149_v15 }
0x1b2e   :  { %v9815_v14 = vpop.eup %9814  ;;  %v4726_v8 = vpack.c.bf16 %v4712_v25, %v4710_v56  ;;  %9826 = vtanh.f32 %v4657_v9  ;;  %v4596_v29 = vmul.f32 %v11249_v58, %v11249_v58  ;;  %v4681_v19 = vadd.f32 1.0, %v9811_v63 }
0x1b2f   :  { %v9817_v33 = vpop.eup %9816  ;;  %v4642_v23 = vadd.f32 %v4626_v41, %v11233_v3  ;;  %v4627_v43 = vmul.f32 0.044715, %v4611_v42  ;;  %v4597_v11 = vmul.f32 %v11253_v62, %v11253_v62  ;;  %v4695_v16 = vmul.f32 0.5, %v4679_v38 }
0x1b30   :  { %v9819_v35 = vpop.eup %9818  ;;  %v4612_v36 = vmul.f32 %v4596_v29, %v11249_v58  ;;  %v4697_v15 = vmul.f32 0.5, %v4681_v19  ;;  %v4683_v57 = vadd.f32 1.0, %v9815_v14  ;;  %v4682_v61 = vadd.f32 1.0, %v9813_v28 }
0x1b31   :  { %v4658_v60 = vmul.f32 0.7978846, %v4642_v23  ;;  %v4643_v17 = vadd.f32 %v4627_v43, %v11240_v52  ;;  %v4613_v48 = vmul.f32 %v4597_v11, %v11253_v62  ;;  %v4711_v51 = vmul.f32 %v4695_v16, %v11155_v0 }
0x1b32   :  { %v4628_v44 = vmul.f32 0.044715, %v4612_v36  ;;  %v4713_v53 = vmul.f32 %v4697_v15, %v11165_v37  ;;  %v4685_v24 = vadd.f32 1.0, %v9819_v35  ;;  %v4699_v55 = vmul.f32 0.5, %v4683_v57 }
0x1b33   :  { %9828 = vtanh.f32 %v4658_v60  ;;  %v4659_v38 = vmul.f32 0.7978846, %v4643_v17  ;;  %v4629_v39 = vmul.f32 0.044715, %v4613_v48  ;;  %v4684_v49 = vadd.f32 1.0, %v9817_v33 }
0x1b34   :  { %v4644_v63 = vadd.f32 %v4628_v44, %v11249_v58  ;;  %v4727_v56 = vpack.c.bf16 %v4713_v53, %v4711_v51  ;;  %v4701_v45 = vmul.f32 0.5, %v4685_v24  ;;  %v4698_v40 = vmul.f32 0.5, %v4682_v61 }
0x1b35   :  { %v9821_v46 = vpop.eup %9820  ;;  %9830 = vtanh.f32 %v4659_v38  ;;  %v4645_v1 = vadd.f32 %v4629_v39, %v11253_v62  ;;  %v4700_v10 = vmul.f32 0.5, %v4684_v49  ;;  %v4715_v37 = vmul.f32 %v4699_v55, %v11181_v30 }
0x1b36   :  { %v9823_v0 = vpop.eup %9822  ;;  %v4660_v5 = vmul.f32 0.7978846, %v4644_v63  ;;  %4901 = vmatprep.mubr.bf16.mxu1 %v4727_v56  ;;  %v4717_v25 = vmul.f32 %v4701_v45, %v11193_v31  ;;  %v4686_v9 = vadd.f32 1.0, %v9821_v46  ;;  %v4714_v42 = vmul.f32 %v4698_v40, %v11177_v27  ;;  %v7931_v46 = vld [vmem:[%s10200_s9] ss:$0 sm:$0xff] }
0x1b37   :  { %v9825_v28 = vpop.eup %9824  ;;  %v4661_v41 = vmul.f32 0.7978846, %v4645_v1  ;;  %4902 = vmatmul.mubr.bf16.vlgmr.msra.gmra.mrb[72].mxu1 %v4726_v8  ;;  %v4716_v14 = vmul.f32 %v4700_v10, %v11187_v34  ;;  %v4687_v29 = vadd.f32 1.0, %v9823_v0 }
0x1b38   :  { %v9827_v19 = vpop.eup %9826  ;;  %9832 = vtanh.f32 %v4660_v5  ;;  %v4729_v33 = vpack.c.bf16 %v4717_v25, %v4715_v37  ;;  %v4688_v23 = vadd.f32 1.0, %v9825_v28  ;;  %v4702_v43 = vmul.f32 0.5, %v4686_v9 }
0x1b39   :  { %9834 = vtanh.f32 %v4661_v41  ;;  %v4728_v11 = vpack.c.bf16 %v4716_v14, %v4714_v42  ;;  %v4689_v16 = vadd.f32 1.0, %v9827_v19  ;;  %v4703_v30 = vmul.f32 0.5, %v4687_v29 }
0x1b3a   :  { %4909 = vmatprep.mubr.bf16.mxu1 %v4729_v33  ;;  %v4704_v31 = vmul.f32 0.5, %v4688_v23  ;;  %v4718_v36 = vmul.f32 %v4702_v43, %v11205_v7 }
0x1b3b   :  { %v4705_v35 = vmul.f32 0.5, %v4689_v16  ;;  %v4719_v34 = vmul.f32 %v4703_v30, %v11209_v22 }
0x1b3c   :  { %v4720_v8 = vmul.f32 %v4704_v31, %v11215_v47 }
0x1b3d   :  { %v9829_v27 = vpop.eup %9828  ;;  %v4721_v15 = vmul.f32 %v4705_v35, %v11221_v21 }
0x1b3e   :  { %v4730_v57 = vpack.c.bf16 %v4720_v8, %v4718_v36  ;;  %v4690_v17 = vadd.f32 1.0, %v9829_v27 }
0x1b3f   :  { %v9831_v61 = vpop.eup %9830  ;;  %4910 = vmatmul.mubr.bf16.gmra.mrb[76].mxu1 %v4728_v11  ;;  %v4731_v60 = vpack.c.bf16 %v4721_v15, %v4719_v34 }
0x1b40   :  { %v4691_v48 = vadd.f32 1.0, %v9831_v61  ;;  %v4706_v24 = vmul.f32 0.5, %v4690_v17 }
0x1b41   :  { %4917 = vmatprep.mubr.bf16.mxu1 %v4731_v60 }
0x1b42   :  { %v9833_v51 = vpop.eup %9832  ;;  %v4707_v55 = vmul.f32 0.5, %v4691_v48  ;;  %v4722_v22 = vmul.f32 %v4706_v24, %v11233_v3 }
0x1b43   :  { %v9835_v44 = vpop.eup %9834  ;;  %v4692_v53 = vadd.f32 1.0, %v9833_v51 }
0x1b44   :  { %v4693_v7 = vadd.f32 1.0, %v9835_v44  ;;  %v4723_v39 = vmul.f32 %v4707_v55, %v11240_v52 }
0x1b45   :  { %v4708_v47 = vmul.f32 0.5, %v4692_v53 }
0x1b46   :  { %v4709_v38 = vmul.f32 0.5, %v4693_v7 }
0x1b47   :  { %4918 = vmatmul.mubr.bf16.gmra.mrb[80].mxu1 %v4730_v57  ;;  %v4724_v21 = vmul.f32 %v4708_v47, %v11249_v58 }
0x1b48   :  { %v4725_v49 = vmul.f32 %v4709_v38, %v11253_v62 }
0x1b49   :  { %v4732_v63 = vpack.c.bf16 %v4724_v21, %v4722_v22 }
0x1b4a   :  { %v4733_v56 = vpack.c.bf16 %v4725_v49, %v4723_v39 }
0x1b4c   :  { %4925 = vmatprep.mubr.bf16.mxu1 %v4733_v56 }
0x1b4f   :  { %4926 = vmatmul.mubr.bf16.gmra.mrb[84].mxu1 %v4732_v63 }
0x1c0a   :  { %v8484_v45 = vpop.f32.mrb[72].mxu1 }
0x1c0b   :  { %v8485_v1 = vpop.f32.mrb[73].mxu1 }
0x1c0c   :  { %v8486_v40 = vadd.f32 %v8485_v1, %v8484_v45  ;;  %v8487_v10 = vpop.f32.mrb[74].mxu1  ;;  %v9596_v1 = vld [vmem:[%s10135_s6 + $0x80] sm:$0xff]  }
0x1c0d   :  { %v8488_v0 = vpop.f32.mrb[75].mxu1  ;;  %9102 = vmatprep.subr.bf16.mxu0 %v9596_v1 }
0x1c0e   :  { %v4904_v5 = vadd.f32 %v8486_v40, %v7931_v46  ;;  %v8489_v37 = vadd.f32 %v8488_v0, %v8487_v10  ;;  %v9597_v0 = vld [vmem:[%s10140_s12 + $0x80] sm:$0xff]   ;;  %9103 = vmatpush3.bf16.msra.mxu0 %v9596_v1 }
0x1c0f   :  { %9126 = vmatprep.subr.bf16.mxu1 %v9597_v0 }
0x1c10   :  { %v4934_v3 = vadd.f32 %v4904_v5, %v11027_v2  ;;  %v4907_v25 = vadd.f32 %v8489_v37, %v7931_v46  ;;  %9127 = vmatpush3.bf16.msra.mxu1 %v9597_v0 }
0x1c12   :  { %4943 = vst [vmem:[#allocation2 + $0x40] sm:$0xff] %v4934_v3  ;;  %v4935_v52 = vadd.f32 %v4907_v25, %v11029_v18  ;;  %4955 = vadd.xlane.f32.xlu0 %v4934_v3  ;;  %v8490_v58 = vpop.f32.mrb[76].mxu1 }
0x1c13   :  { %v8491_v62 = vpop.f32.mrb[77].mxu1 }
0x1c14   :  { %4944 = vst [vmem:[#allocation2 + $0x48] sm:$0xff] %v4935_v52  ;;  %v8492_v9 = vadd.f32 %v8491_v62, %v8490_v58  ;;  %4957 = vadd.xlane.f32.xlu1 %v4935_v52  ;;  %v8493_v28 = vpop.f32.mrb[78].mxu1 }
0x1c15   :  { %v8494_v41 = vpop.f32.mrb[79].mxu1 }
0x1c16   :  { %v4912_v42 = vadd.f32 %v8492_v9, %v7931_v46  ;;  %v8495_v14 = vadd.f32 %v8494_v41, %v8493_v28  ;;  %v9600_v28 = vld [vmem:[%s10135_s6 + $0x90] sm:$0xff]  }
0x1c18   :  { %v4936_v29 = vadd.f32 %v4912_v42, %v11032_v50  ;;  %v4915_v19 = vadd.f32 %v8495_v14, %v7931_v46  ;;  %v9601_v14 = vld [vmem:[%s10140_s12 + $0x90] sm:$0xff]  }
0x1c1a   :  { %4945 = vst [vmem:[#allocation2 + $0x50] sm:$0xff] %v4936_v29  ;;  %v4937_v2 = vadd.f32 %v4915_v19, %v11035_v20  ;;  %4959 = vadd.xlane.f32.xlu0 %v4936_v29  ;;  %v8496_v33 = vpop.f32.mrb[80].mxu1  ;;  %v9602_v19 = vld [vmem:[%s10135_s6 + $0x98] sm:$0xff]  }
0x1c1b   :  { %v8497_v23 = vpop.f32.mrb[81].mxu1 }
0x1c1c   :  { %4946 = vst [vmem:[#allocation2 + $0x58] sm:$0xff] %v4937_v2  ;;  %v8498_v18 = vadd.f32 %v8497_v23, %v8496_v33  ;;  %4961 = vadd.xlane.f32.xlu1 %v4937_v2  ;;  %v8499_v43 = vpop.f32.mrb[82].mxu1  ;;  %v9604_v33 = vld [vmem:[%s10135_s6 + $0xa0] sm:$0xff]  }
0x1c1d   :  { %v8500_v11 = vpop.f32.mrb[83].mxu1  ;;  %v9605_v23 = vld [vmem:[%s10140_s12 + $0xa0] sm:$0xff]  }
0x1c1e   :  { %v4920_v16 = vadd.f32 %v8498_v18, %v7931_v46  ;;  %v8501_v30 = vadd.f32 %v8500_v11, %v8499_v43  ;;  %v9606_v18 = vld [vmem:[%s10135_s6 + $0xa8] sm:$0xff]   ;;  %v9608_v11 = vld [vmem:[%s10135_s6 + $0xb0] sm:$0xff]  }
0x1c1f   :  { %v9607_v43 = vld [vmem:[%s10140_s12 + $0xa8] sm:$0xff]  }
0x1c20   :  { %v4938_v31 = vadd.f32 %v4920_v16, %v11038_v13  ;;  %v4923_v35 = vadd.f32 %v8501_v30, %v7931_v46  ;;  %v9609_v16 = vld [vmem:[%s10140_s12 + $0xb0] sm:$0xff]   ;;  %v9610_v30 = vld [vmem:[%s10135_s6 + $0xb8] sm:$0xff]  }
0x1c22   :  { %4947 = vst [vmem:[#allocation2 + $0x60] sm:$0xff] %v4938_v31  ;;  %v4939_v50 = vadd.f32 %v4923_v35, %v11041_v6  ;;  %4963 = vadd.xlane.f32.xlu0 %v4938_v31  ;;  %v8502_v36 = vpop.f32.mrb[84].mxu1  ;;  %v11337_v35 = vld [vmem:[%s10145_s20 + $0x80] sm:$0xff]  }
0x1c23   :  { %v8503_v8 = vpop.f32.mrb[85].mxu1 }
0x1c24   :  { %4948 = vst [vmem:[#allocation2 + $0x68] sm:$0xff] %v4939_v50  ;;  %v8504_v20 = vadd.f32 %v8503_v8, %v8502_v36  ;;  %4965 = vadd.xlane.f32.xlu1 %v4939_v50  ;;  %v8505_v27 = vpop.f32.mrb[86].mxu1 }
0x1c25   :  { %v8506_v34 = vpop.f32.mrb[87].mxu1 }
0x1c26   :  { %v4928_v15 = vadd.f32 %v8504_v20, %v7931_v46  ;;  %v8507_v57 = vadd.f32 %v8506_v34, %v8505_v27 }
0x1c28   :  { %v4940_v61 = vadd.f32 %v4928_v15, %v11044_v54  ;;  %v4931_v60 = vadd.f32 %v8507_v57, %v7931_v46 }
0x1c2a   :  { %4949 = vst [vmem:[#allocation2 + $0x70] sm:$0xff] %v4940_v61  ;;  %v4941_v13 = vadd.f32 %v4931_v60, %v11047_v32  ;;  %4967 = vadd.xlane.f32.xlu0 %v4940_v61 }
0x1c2c   :  { %4950 = vst [vmem:[#allocation2 + $0x78] sm:$0xff] %v4941_v13  ;;  %4969 = vadd.xlane.f32.xlu1 %v4941_v13 }
0x1c9f   :  { %v4956_v6 = vpop.xlane.xlu0 %4955 }
0x1ca0   :  { %v4971_v17 = vmul.f32 0.0078125, %v4956_v6 }
0x1ca1   :  { %v4958_v48 = vpop.xlane.xlu1 %4957 }
0x1ca2   :  { %v11288_v51 = vsub.f32 %v4934_v3, %v4971_v17  ;;  %v4972_v44 = vmul.f32 0.0078125, %v4958_v48  ;;  %v9598_v3 = vld [vmem:[%s10135_s6 + $0x88] sm:$0xff]   ;;  %v11341_v48 = vld [vmem:[%s10125_s24 + $0x1] ss:$0 sm:$0xff] }
0x1ca3   :  { %9104 = vmatprep.subr.bf16.mxu0 %v9598_v3 }
0x1ca4   :  { %v11290_v53 = vsub.f32 %v4935_v52, %v4972_v44  ;;  %v4987_v24 = vmul.f32 %v11288_v51, %v11288_v51  ;;  %v9599_v52 = vld [vmem:[%s10140_s12 + $0x88] sm:$0xff]   ;;  %9105 = vmatpush3.bf16.msra.mxu0 %v9598_v3 }
0x1ca5   :  { %9128 = vmatprep.subr.bf16.mxu1 %v9599_v52  ;;  %9106 = vmatprep.subr.bf16.mxu0 %v9600_v28 }
0x1ca6   :  { %4995 = vadd.xlane.f32.xlu0 %v4987_v24  ;;  %v4988_v54 = vmul.f32 %v11290_v53, %v11290_v53  ;;  %9129 = vmatpush3.bf16.msra.mxu1 %v9599_v52 }
0x1ca7   :  { %v4960_v7 = vpop.xlane.xlu0 %4959  ;;  %9130 = vmatprep.subr.bf16.mxu1 %v9601_v14 }
0x1ca8   :  { %v4973_v32 = vmul.f32 0.0078125, %v4960_v7  ;;  %4997 = vadd.xlane.f32.xlu1 %v4988_v54  ;;  %9107 = vmatpush3.bf16.msra.mxu0 %v9600_v28 }
0x1ca9   :  { %v4962_v55 = vpop.xlane.xlu1 %4961  ;;  %9108 = vmatprep.subr.bf16.mxu0 %v9602_v19 }
0x1caa   :  { %v11296_v47 = vsub.f32 %v4936_v29, %v4973_v32  ;;  %v4974_v38 = vmul.f32 0.0078125, %v4962_v55  ;;  %9131 = vmatpush3.bf16.msra.mxu1 %v9601_v14 }
0x1cac   :  { %v11298_v22 = vsub.f32 %v4937_v2, %v4974_v38  ;;  %v4989_v21 = vmul.f32 %v11296_v47, %v11296_v47  ;;  %v9603_v2 = vld [vmem:[%s10140_s12 + $0x98] sm:$0xff]   ;;  %9109 = vmatpush3.bf16.msra.mxu0 %v9602_v19 }
0x1cad   :  { %9132 = vmatprep.subr.bf16.mxu1 %v9603_v2  ;;  %9110 = vmatprep.subr.bf16.mxu0 %v9604_v33 }
0x1cae   :  { %4999 = vadd.xlane.f32.xlu0 %v4989_v21  ;;  %v4990_v39 = vmul.f32 %v11298_v22, %v11298_v22  ;;  %9133 = vmatpush3.bf16.msra.mxu1 %v9603_v2  ;;  %v7951_v21 = vld [vmem:[%s11937_s0 + $0x1] ss:$0 sm:$0xff] }
0x1caf   :  { %v4964_v49 = vpop.xlane.xlu0 %4963  ;;  %9134 = vmatprep.subr.bf16.mxu1 %v9605_v23 }
0x1cb0   :  { %v4975_v63 = vmul.f32 0.0078125, %v4964_v49  ;;  %5001 = vadd.xlane.f32.xlu1 %v4990_v39  ;;  %9111 = vmatpush3.bf16.msra.mxu0 %v9604_v33 }
0x1cb1   :  { %v4966_v56 = vpop.xlane.xlu1 %4965  ;;  %9112 = vmatprep.subr.bf16.mxu0 %v9606_v18 }
0x1cb2   :  { %v11304_v45 = vsub.f32 %v4938_v31, %v4975_v63  ;;  %v4976_v46 = vmul.f32 0.0078125, %v4966_v56  ;;  %9135 = vmatpush3.bf16.msra.mxu1 %v9605_v23  ;;  %v9611_v31 = vld [vmem:[%s10140_s12 + $0xb8] sm:$0xff]  }
0x1cb3   :  { %9136 = vmatprep.subr.bf16.mxu1 %v9607_v43 }
0x1cb4   :  { %v11307_v40 = vsub.f32 %v4939_v50, %v4976_v46  ;;  %v4991_v10 = vmul.f32 %v11304_v45, %v11304_v45  ;;  %9113 = vmatpush3.bf16.msra.mxu0 %v9606_v18 }
0x1cb5   :  { %9114 = vmatprep.subr.bf16.mxu0 %v9608_v11 }
0x1cb6   :  { %5003 = vadd.xlane.f32.xlu0 %v4991_v10  ;;  %v4992_v5 = vmul.f32 %v11307_v40, %v11307_v40  ;;  %9137 = vmatpush3.bf16.msra.mxu1 %v9607_v43 }
0x1cb7   :  { %v4968_v37 = vpop.xlane.xlu0 %4967  ;;  %9138 = vmatprep.subr.bf16.mxu1 %v9609_v16 }
0x1cb8   :  { %v4977_v25 = vmul.f32 0.0078125, %v4968_v37  ;;  %5005 = vadd.xlane.f32.xlu1 %v4992_v5  ;;  %9115 = vmatpush3.bf16.msra.mxu0 %v9608_v11  ;;  %v9614_v11 = vld [vmem:[%s10145_s20 + $0x90] sm:$0xff]  }
0x1cb9   :  { %v4970_v58 = vpop.xlane.xlu1 %4969  ;;  %9116 = vmatprep.subr.bf16.mxu0 %v9610_v30 }
0x1cba   :  { %v11316_v62 = vsub.f32 %v4940_v61, %v4977_v25  ;;  %v4978_v9 = vmul.f32 0.0078125, %v4970_v58  ;;  %9139 = vmatpush3.bf16.msra.mxu1 %v9609_v16 }
0x1cbb   :  { %9140 = vmatprep.subr.bf16.mxu1 %v9611_v31 }
0x1cbc   :  { %v11319_v41 = vsub.f32 %v4941_v13, %v4978_v9  ;;  %v4993_v42 = vmul.f32 %v11316_v62, %v11316_v62  ;;  %9117 = vmatpush3.bf16.msra.mxu0 %v9610_v30 }
0x1cbd   :  { %9150 = vmatprep.subr.bf16.mxu0 %v11337_v35 }
0x1cbe   :  { %5007 = vadd.xlane.f32.xlu0 %v4993_v42  ;;  %v4994_v29 = vmul.f32 %v11319_v41, %v11319_v41  ;;  %9141 = vmatpush3.bf16.msra.mxu1 %v9611_v31 }
0x1cc0   :  { %5009 = vadd.xlane.f32.xlu1 %v4994_v29 }
0x1d33   :  { %v4996_v50 = vpop.xlane.xlu0 %4995 }
0x1d34   :  { %v5011_v36 = vmul.f32 0.0078125, %v4996_v50 }
0x1d35   :  { %v4998_v8 = vpop.xlane.xlu1 %4997 }
0x1d36   :  { %v5019_v20 = vadd.f32 1e-05, %v5011_v36  ;;  %v5012_v27 = vmul.f32 0.0078125, %v4998_v8 }
0x1d38   :  { %9836 = vrsqrt.f32 %v5019_v20  ;;  %v5020_v34 = vadd.f32 1e-05, %v5012_v27 }
0x1d3a   :  { %9838 = vrsqrt.f32 %v5020_v34 }
0x1d3b   :  { %v5000_v15 = vpop.xlane.xlu0 %4999 }
0x1d3c   :  { %v5013_v57 = vmul.f32 0.0078125, %v5000_v15 }
0x1d3d   :  { %v5002_v61 = vpop.xlane.xlu1 %5001 }
0x1d3e   :  { %v5021_v60 = vadd.f32 1e-05, %v5013_v57  ;;  %v5014_v13 = vmul.f32 0.0078125, %v5002_v61  ;;  %v9617_v57 = vld [vmem:[%s10145_s20 + $0xa8] sm:$0xff]   ;;  %v9619_v61 = vld [vmem:[%s10145_s20 + $0xb8] sm:$0xff]  }
0x1d40   :  { %9840 = vrsqrt.f32 %v5021_v60  ;;  %v5022_v6 = vadd.f32 1e-05, %v5014_v13  ;;  %v7969_v13 = vld [vmem:[%s11938_s5 + $0x2] ss:$0 sm:$0xff] }
0x1d42   :  { %v9837_v17 = vpop.eup %9836  ;;  %9842 = vrsqrt.f32 %v5022_v6 }
0x1d43   :  { %v5035_v44 = vmul.f32 %v9837_v17, %v11288_v51  ;;  %v5004_v24 = vpop.xlane.xlu0 %5003  ;;  %v7995_v17 = vld [vmem:[%s11939_s13 + $0x2] ss:$0 sm:$0xff] }
0x1d44   :  { %v9839_v54 = vpop.eup %9838  ;;  %v5015_v7 = vmul.f32 0.0078125, %v5004_v24 }
0x1d45   :  { %v5049_v32 = vmul.f32 %v11341_v48, %v5035_v44  ;;  %v5036_v55 = vmul.f32 %v9839_v54, %v11290_v53  ;;  %v5006_v38 = vpop.xlane.xlu1 %5005 }
0x1d46   :  { %v5023_v39 = vadd.f32 1e-05, %v5015_v7  ;;  %v5016_v49 = vmul.f32 0.0078125, %v5006_v38 }
0x1d47   :  { %v5050_v63 = vmul.f32 %v11341_v48, %v5036_v55  ;;  %v5063_v46 = vadd.f32 %v7951_v21, %v5049_v32 }
0x1d48   :  { %9844 = vrsqrt.f32 %v5023_v39  ;;  %v5024_v56 = vadd.f32 1e-05, %v5016_v49 }
0x1d49   :  { %v5064_v1 = vadd.f32 %v7951_v21, %v5050_v63 }
0x1d4a   :  { %v9841_v10 = vpop.eup %9840  ;;  %9846 = vrsqrt.f32 %v5024_v56 }
0x1d4b   :  { %v5037_v51 = vmul.f32 %v9841_v10, %v11296_v47  ;;  %v5008_v0 = vpop.xlane.xlu0 %5007  ;;  %v11349_v5 = vpack.c.bf16 %v5064_v1, %v5063_v46 }
0x1d4c   :  { %v9843_v37 = vpop.eup %9842  ;;  %v5017_v3 = vmul.f32 0.0078125, %v5008_v0 }
0x1d4d   :  { %v5051_v53 = vmul.f32 %v11341_v48, %v5037_v51  ;;  %v5038_v25 = vmul.f32 %v9843_v37, %v11298_v22  ;;  %9118 = vmatprep.mubr.bf16.mxu0 %v11349_v5  ;;  %9142 = vmatprep.mubr.bf16.mxu1 %v11349_v5  ;;  %v5010_v52 = vpop.xlane.xlu1 %5009  ;;  %v9613_v22 = vld [vmem:[%s10145_s20 + $0x88] sm:$0xff]  }
0x1d4e   :  { %v5025_v58 = vadd.f32 1e-05, %v5017_v3  ;;  %v5018_v9 = vmul.f32 0.0078125, %v5010_v52 }
0x1d4f   :  { %v5052_v28 = vmul.f32 %v11341_v48, %v5038_v25  ;;  %v5065_v42 = vadd.f32 %v7951_v21, %v5051_v53 }
0x1d50   :  { %9848 = vrsqrt.f32 %v5025_v58  ;;  %v5026_v47 = vadd.f32 1e-05, %v5018_v9 }
0x1d51   :  { %v5066_v14 = vadd.f32 %v7951_v21, %v5052_v28 }
0x1d52   :  { %v9845_v29 = vpop.eup %9844  ;;  %9850 = vrsqrt.f32 %v5026_v47 }
0x1d53   :  { %v5039_v19 = vmul.f32 %v9845_v29, %v11304_v45  ;;  %v11357_v2 = vpack.c.bf16 %v5066_v14, %v5065_v42 }
0x1d54   :  { %v9847_v33 = vpop.eup %9846 }
0x1d55   :  { %v5053_v23 = vmul.f32 %v11341_v48, %v5039_v19  ;;  %v5040_v18 = vmul.f32 %v9847_v33, %v11307_v40  ;;  %9119 = vmatmul.mubr.bf16.vlgmr.msra.gmra.mrb[112].mxu0 %v11357_v2  ;;  %9143 = vmatmul.mubr.bf16.vlgmr.msra.gmra.mrb[88].mxu1 %v11357_v2  ;;  %v9615_v40 = vld [vmem:[%s10145_s20 + $0x98] sm:$0xff]  }
0x1d56   :  { %9151 = vmatpush3.bf16.msra.mxu0 %v11337_v35 }
0x1d57   :  { %v5054_v43 = vmul.f32 %v11341_v48, %v5040_v18  ;;  %9152 = vmatprep.subr.bf16.mxu0 %v9613_v22  ;;  %v5067_v45 = vadd.f32 %v7951_v21, %v5053_v23 }
0x1d59   :  { %v5068_v16 = vadd.f32 %v7951_v21, %v5054_v43 }
0x1d5a   :  { %v9849_v30 = vpop.eup %9848  ;;  %9153 = vmatpush3.bf16.msra.mxu0 %v9613_v22 }
0x1d5b   :  { %v5041_v31 = vmul.f32 %v9849_v30, %v11316_v62  ;;  %9154 = vmatprep.subr.bf16.mxu0 %v9614_v11  ;;  %v11368_v50 = vpack.c.bf16 %v5068_v16, %v5067_v45  ;;  %v9616_v62 = vld [vmem:[%s10145_s20 + $0xa0] sm:$0xff]  }
0x1d5c   :  { %v9851_v36 = vpop.eup %9850 }
0x1d5d   :  { %v5055_v8 = vmul.f32 %v11341_v48, %v5041_v31  ;;  %v5042_v35 = vmul.f32 %v9851_v36, %v11319_v41  ;;  %9122 = vmatprep.mubr.bf16.mxu0 %v11368_v50  ;;  %9146 = vmatprep.mubr.bf16.mxu1 %v11368_v50  ;;  %v9618_v41 = vld [vmem:[%s10145_s20 + $0xb0] sm:$0xff]  }
0x1d5e   :  { %9155 = vmatpush3.bf16.msra.mxu0 %v9614_v11 }
0x1d5f   :  { %v5056_v20 = vmul.f32 %v11341_v48, %v5042_v35  ;;  %9156 = vmatprep.subr.bf16.mxu0 %v9615_v40  ;;  %v5069_v27 = vadd.f32 %v7951_v21, %v5055_v8  ;;  %v8021_v8 = vld [vmem:[%s11940_s17 + $0x2] ss:$0 sm:$0xff] }
0x1d61   :  { %v5070_v34 = vadd.f32 %v7951_v21, %v5056_v20 }
0x1d62   :  { %9157 = vmatpush3.bf16.msra.mxu0 %v9615_v40  ;;  %v9620_v40 = vld [vmem:[%s10140_s12 + $0xc0] sm:$0xff]  }
0x1d63   :  { %9158 = vmatprep.subr.bf16.mxu0 %v9616_v62  ;;  %v11377_v15 = vpack.c.bf16 %v5070_v34, %v5069_v27 }
0x1d65   :  { %9123 = vmatmul.mubr.bf16.gmra.mrb[116].mxu0 %v11377_v15  ;;  %9147 = vmatmul.mubr.bf16.gmra.mrb[92].mxu1 %v11377_v15 }
0x1d66   :  { %9159 = vmatpush3.bf16.msra.mxu0 %v9616_v62  ;;  %9166 = vmatprep.mubr.bf16.mxu0 %v11349_v5 }
0x1d67   :  { %9160 = vmatprep.subr.bf16.mxu0 %v9617_v57 }
0x1d6a   :  { %9161 = vmatpush3.bf16.msra.mxu0 %v9617_v57 }
0x1d6b   :  { %9162 = vmatprep.subr.bf16.mxu0 %v9618_v41 }
0x1d6e   :  { %9163 = vmatpush3.bf16.msra.mxu0 %v9618_v41 }
0x1d6f   :  { %9164 = vmatprep.subr.bf16.mxu0 %v9619_v61 }
0x1d72   :  { %9165 = vmatpush3.bf16.msra.mxu0 %v9619_v61 }
0x1d75   :  { %9167 = vmatmul.mubr.bf16.vlgmr.msra.gmra.mrb[120].mxu0 %v11357_v2 }
0x1d76   :  { %9170 = vmatprep.mubr.bf16.mxu0 %v11368_v50 }
0x1d7d   :  { %9171 = vmatmul.mubr.bf16.gmra.mrb[124].mxu0 %v11377_v15 }
0x1e28   :  { %v9120_v60 = vpop.f32.mrb[112].mxu0  ;;  %v9144_v6 = vpop.f32.mrb[88].mxu1 }
0x1e29   :  { %v5182_v48 = vpop.f32.mrb[113].mxu0  ;;  %v5320_v44 = vpop.f32.mrb[89].mxu1  ;;  %v11390_v7 = vadd.f32 %v9120_v60, %v7969_v13  ;;  %v5329_v32 = vadd.f32 %v9144_v6, %v7995_v17  ;;  %v9621_v6 = vld [vmem:[%s10140_s12 + $0xc8] sm:$0xff]  }
0x1e2a   :  { %v9121_v24 = vpop.f32.mrb[114].mxu0  ;;  %v9145_v54 = vpop.f32.mrb[90].mxu1  ;;  %v5183_v49 = vadd.f32 %v7969_v13, %v5182_v48  ;;  %v5321_v63 = vadd.f32 %v7995_v17, %v5320_v44 }
0x1e2b   :  { %v5194_v55 = vadd.f32 %v9121_v24, %v7969_v13  ;;  %v5332_v38 = vadd.f32 %v9145_v54, %v7995_v17  ;;  %v5185_v21 = vpop.f32.mrb[115].mxu0  ;;  %v5323_v39 = vpop.f32.mrb[91].mxu1 }
0x1e2c   :  { %v5186_v56 = vadd.f32 %v7969_v13, %v5185_v21  ;;  %v5324_v46 = vadd.f32 %v7995_v17, %v5323_v39 }
0x1e2d   :  { %v5490_v1 = vpack.c.bf16 %v5194_v55, %v11390_v7  ;;  %v5494_v10 = vpack.c.bf16 %v5332_v38, %v5329_v32  ;;  %v9622_v32 = vld [vmem:[%s10140_s12 + $0xd0] sm:$0xff]  }
0x1e2e   :  { %v5489_v51 = vpack.c.bf16 %v5186_v56, %v5183_v49  ;;  %v5493_v0 = vpack.c.bf16 %v5324_v46, %v5321_v63  ;;  %v9623_v49 = vld [vmem:[%s10140_s12 + $0xd8] sm:$0xff]   ;;  %v9624_v63 = vld [vmem:[%s10140_s12 + $0xe0] sm:$0xff]   ;;  %v9625_v56 = vld [vmem:[%s10140_s12 + $0xe8] sm:$0xff]  }
0x1e2f   :  { %v5513_v25 = vsel %vm589_vm10, %v5494_v10, 0  ;;  %v9626_v46 = vld [vmem:[%s10140_s12 + $0xf0] sm:$0xff]  }
0x1e30   :  { %9422 = vmatprep.subr.msk.bf16.mxu1 %vm589_vm10, %v5493_v0  ;;  %9182 = vmatprep.mubr.msk.bf16.mxu1 %vm589_vm10, %v5489_v51  ;;  %v5510_v37 = vsel %vm589_vm10, %v5493_v0, 0 }
0x1e31   :  { %9175 = vmatpush3.bf16.xpose.msra.mxu1 %v5510_v37 }
0x1e32   :  { %9423 = vmatprep.subr.msk.bf16.mxu1 %vm589_vm10, %v5494_v10 }
0x1e38   :  { %v9124_v3 = vpop.f32.mrb[116].mxu0  ;;  %v9148_v53 = vpop.f32.mrb[92].mxu1 }
0x1e39   :  { %v5198_v52 = vpop.f32.mrb[117].mxu0  ;;  %v5336_v58 = vpop.f32.mrb[93].mxu1  ;;  %9177 = vmatpush3.bf16.xpose.msra.mxu1 %v5513_v25  ;;  %v5207_v47 = vadd.f32 %v9124_v3, %v7969_v13  ;;  %v5345_v42 = vadd.f32 %v9148_v53, %v7995_v17  ;;  %v11419_v25 = vld [vmem:[%s11941_s21] sm:$0xff] }
0x1e3a   :  { %v9125_v9 = vpop.f32.mrb[118].mxu0  ;;  %v9149_v28 = vpop.f32.mrb[94].mxu1  ;;  %v5199_v33 = vadd.f32 %v7969_v13, %v5198_v52  ;;  %v5337_v23 = vadd.f32 %v7995_v17, %v5336_v58 }
0x1e3b   :  { %v5210_v14 = vadd.f32 %v9125_v9, %v7969_v13  ;;  %v5348_v29 = vadd.f32 %v9149_v28, %v7995_v17  ;;  %v5201_v19 = vpop.f32.mrb[119].mxu0  ;;  %v5339_v22 = vpop.f32.mrb[95].mxu1  ;;  %v11425_v28 = vld [vmem:[%s11941_s21 + $0x10] sm:$0xff] }
0x1e3c   :  { %v5202_v18 = vadd.f32 %v7969_v13, %v5201_v19  ;;  %v5340_v43 = vadd.f32 %v7995_v17, %v5339_v22  ;;  %v11439_v19 = vld [vmem:[%s11941_s21 + $0x18] sm:$0xff] }
0x1e3d   :  { %v5492_v11 = vpack.c.bf16 %v5210_v14, %v5207_v47  ;;  %v5496_v45 = vpack.c.bf16 %v5348_v29, %v5345_v42  ;;  %v11431_v42 = vld [vmem:[%s11941_s21 + $0x8] sm:$0xff] }
0x1e3e   :  { %v5491_v16 = vpack.c.bf16 %v5202_v18, %v5199_v33  ;;  %v5495_v30 = vpack.c.bf16 %v5340_v43, %v5337_v23 }
0x1e3f   :  { %v5519_v35 = vsel %vm589_vm10, %v5496_v45, 0 }
0x1e40   :  { %9424 = vmatprep.subr.msk.bf16.mxu1 %vm589_vm10, %v5495_v30  ;;  %v5516_v31 = vsel %vm589_vm10, %v5495_v30, 0 }
0x1e41   :  { %9179 = vmatpush3.bf16.xpose.msra.mxu1 %v5516_v31  ;;  %v11449_v31 = vld [vmem:[%s11941_s21 + $0x20] sm:$0xff] }
0x1e42   :  { %9425 = vmatprep.subr.msk.bf16.mxu1 %vm589_vm10, %v5496_v45 }
0x1e48   :  { %v9168_v36 = vpop.f32.mrb[120].mxu0 }
0x1e49   :  { %v5458_v20 = vpop.f32.mrb[121].mxu0  ;;  %9181 = vmatpush3.bf16.xpose.msra.mxu1 %v5519_v35  ;;  %v5467_v27 = vadd.f32 %v9168_v36, %v8021_v8 }
0x1e4a   :  { %v9169_v62 = vpop.f32.mrb[122].mxu0  ;;  %9230 = vmatprep.subr.bf16.mxu1 %v9620_v40  ;;  %v5459_v41 = vadd.f32 %v8021_v8, %v5458_v20  ;;  %v11457_v20 = vld [vmem:[%s11941_s21 + $0x30] sm:$0xff] }
0x1e4b   :  { %v5470_v34 = vadd.f32 %v9169_v62, %v8021_v8  ;;  %v5461_v57 = vpop.f32.mrb[123].mxu0 }
0x1e4c   :  { %v5462_v61 = vadd.f32 %v8021_v8, %v5461_v57 }
0x1e4d   :  { %v5695_v60 = vpack.c.bf16 %v5470_v34, %v5467_v27  ;;  %v11463_v27 = vld [vmem:[%s11941_s21 + $0x28] sm:$0xff] }
0x1e4e   :  { %v5694_v13 = vpack.c.bf16 %v5462_v61, %v5459_v41  ;;  %v11471_v41 = vld [vmem:[%s11941_s21 + $0x38] sm:$0xff] }
0x1e50   :  { %v9172_v17 = vpop.f32.mrb[124].mxu0  ;;  %9190 = vmatprep.subr.bf16.mxu0 %v5694_v13  ;;  %9183 = vmatmul.mubr.msk.bf16.vlgmr.msra.gmra.mrb[96].mxu1 %vm589_vm10, %v5490_v1  ;;  %v9627_v1 = vld [vmem:[%s10140_s12 + $0xf8] sm:$0xff]  }
0x1e51   :  { %v5474_v48 = vpop.f32.mrb[125].mxu0  ;;  %9191 = vmatpush3.bf16.msra.mxu0 %v5694_v13  ;;  %9186 = vmatprep.mubr.msk.bf16.mxu1 %vm589_vm10, %v5491_v16  ;;  %v5483_v24 = vadd.f32 %v9172_v17, %v8021_v8 }
0x1e52   :  { %v9173_v44 = vpop.f32.mrb[126].mxu0  ;;  %9192 = vmatprep.subr.bf16.mxu0 %v5695_v60  ;;  %9231 = vmatpush3.bf16.msra.mxu1 %v9620_v40  ;;  %v5475_v55 = vadd.f32 %v8021_v8, %v5474_v48  ;;  %v8089_v48 = vld [vmem:[%s11939_s13 + $0x3] ss:$0 sm:$0xff] }
0x1e53   :  { %v5486_v54 = vadd.f32 %v9173_v44, %v8021_v8  ;;  %v5477_v7 = vpop.f32.mrb[127].mxu0  ;;  %9232 = vmatprep.subr.bf16.mxu1 %v9621_v6 }
0x1e54   :  { %v5478_v38 = vadd.f32 %v8021_v8, %v5477_v7 }
0x1e55   :  { %v5697_v21 = vpack.c.bf16 %v5486_v54, %v5483_v24  ;;  %9193 = vmatpush3.bf16.msra.mxu0 %v5695_v60 }
0x1e56   :  { %v5696_v39 = vpack.c.bf16 %v5478_v38, %v5475_v55  ;;  %9233 = vmatpush3.bf16.msra.mxu1 %v9621_v6 }
0x1e57   :  { %9234 = vmatprep.subr.bf16.mxu1 %v9622_v32 }
0x1e58   :  { %9194 = vmatprep.subr.bf16.mxu0 %v5696_v39  ;;  %9187 = vmatmul.mubr.msk.bf16.gmra.mrb[100].mxu1 %vm589_vm10, %v5492_v11 }
0x1e59   :  { %9195 = vmatpush3.bf16.msra.mxu0 %v5696_v39  ;;  %9246 = vmatprep.mubr.bf16.mxu1 %v11349_v5 }
0x1e5a   :  { %9196 = vmatprep.subr.bf16.mxu0 %v5697_v21  ;;  %9235 = vmatpush3.bf16.msra.mxu1 %v9622_v32 }
0x1e5b   :  { %9236 = vmatprep.subr.bf16.mxu1 %v9623_v49 }
0x1e5d   :  { %9197 = vmatpush3.bf16.msra.mxu0 %v5697_v21 }
0x1e5e   :  { %9237 = vmatpush3.bf16.msra.mxu1 %v9623_v49 }
0x1e5f   :  { %9238 = vmatprep.subr.bf16.mxu1 %v9624_v63 }
0x1e62   :  { %9239 = vmatpush3.bf16.msra.mxu1 %v9624_v63 }
0x1e63   :  { %9240 = vmatprep.subr.bf16.mxu1 %v9625_v56 }
0x1e66   :  { %9241 = vmatpush3.bf16.msra.mxu1 %v9625_v56 }
0x1e67   :  { %9242 = vmatprep.subr.bf16.mxu1 %v9626_v46 }
0x1e6a   :  { %9243 = vmatpush3.bf16.msra.mxu1 %v9626_v46 }
0x1e6b   :  { %9244 = vmatprep.subr.bf16.mxu1 %v9627_v1 }
0x1e6e   :  { %9245 = vmatpush3.bf16.msra.mxu1 %v9627_v1 }
0x1e71   :  { %9247 = vmatmul.mubr.bf16.vlgmr.msra.gmra.mrb[104].mxu1 %v11357_v2 }
0x1e72   :  { %9250 = vmatprep.mubr.bf16.mxu1 %v11368_v50 }
0x1e79   :  { %9251 = vmatmul.mubr.bf16.gmra.mrb[108].mxu1 %v11377_v15 }
0x1f23   :  { %v9184_v10 = vpop.f32.mrb[96].mxu1 }
0x1f24   :  { %v5555_v51 = vpop.f32.mrb[97].mxu1  ;;  %v5588_v0 = vmul.f32 0.125, %v9184_v10 }
0x1f25   :  { %v5586_v37 = vmul.f32 0.125, %v5555_v51  ;;  %v9185_v3 = vpop.f32.mrb[98].mxu1 }
0x1f26   :  { %v5558_v53 = vpop.f32.mrb[99].mxu1  ;;  %v5589_v58 = vmul.f32 0.125, %v9185_v3  ;;  %v11428_v47 = vadd.f32 %v11425_v28, %v5588_v0 }
0x1f27   :  { %v11422_v52 = vadd.f32 %v11419_v25, %v5586_v37  ;;  %v5587_v9 = vmul.f32 0.125, %v5558_v53 }
0x1f28   :  { %v11442_v22 = vadd.f32 %v11439_v19, %v5589_v58  ;;  %v5608_v16 = vsel %vm589_vm10, %v11428_v47, -inf }
0x1f29   :  { %v11434_v14 = vadd.f32 %v11431_v42, %v5587_v9  ;;  %v5602_v29 = vsel %vm589_vm10, %v11422_v52, -inf }
0x1f2a   :  { %5603 = vmax.xlane.f32.xlu0 %v5602_v29  ;;  %v5611_v35 = vsel %vm589_vm10, %v11442_v22, -inf }
0x1f2b   :  { %v9188_v33 = vpop.f32.mrb[100].mxu1  ;;  %v5605_v23 = vsel %vm589_vm10, %v11434_v14, -inf }
0x1f2c   :  { %5606 = vmax.xlane.f32.xlu1 %v5605_v23  ;;  %v5571_v18 = vpop.f32.mrb[101].mxu1  ;;  %v5592_v43 = vmul.f32 0.125, %v9188_v33 }
0x1f2d   :  { %v5590_v11 = vmul.f32 0.125, %v5571_v18  ;;  %v9189_v45 = vpop.f32.mrb[102].mxu1 }
0x1f2e   :  { %5609 = vmax.xlane.f32.xlu0 %v5608_v16  ;;  %v5574_v30 = vpop.f32.mrb[103].mxu1  ;;  %v5593_v36 = vmul.f32 0.125, %v9189_v45  ;;  %v11460_v62 = vadd.f32 %v11457_v20, %v5592_v43 }
0x1f2f   :  { %v11452_v40 = vadd.f32 %v11449_v31, %v5590_v11  ;;  %v5591_v8 = vmul.f32 0.125, %v5574_v30 }
0x1f30   :  { %5612 = vmax.xlane.f32.xlu1 %v5611_v35  ;;  %v11474_v61 = vadd.f32 %v11471_v41, %v5593_v36  ;;  %v5620_v13 = vsel %vm589_vm10, %v11460_v62, -inf }
0x1f31   :  { %v11466_v34 = vadd.f32 %v11463_v27, %v5591_v8  ;;  %v5614_v57 = vsel %vm589_vm10, %v11452_v40, -inf }
0x1f32   :  { %5615 = vmax.xlane.f32.xlu0 %v5614_v57  ;;  %v5623_v6 = vsel %vm589_vm10, %v11474_v61, -inf }
0x1f33   :  { %v5617_v60 = vsel %vm589_vm10, %v11466_v34, -inf }
0x1f34   :  { %5618 = vmax.xlane.f32.xlu1 %v5617_v60 }
0x1f36   :  { %5621 = vmax.xlane.f32.xlu0 %v5620_v13 }
0x1f38   :  { %5624 = vmax.xlane.f32.xlu1 %v5623_v6 }
0x1f44   :  { %v9248_v17 = vpop.f32.mrb[104].mxu1 }
0x1f45   :  { %v6033_v44 = vpop.f32.mrb[105].mxu1  ;;  %v6042_v54 = vadd.f32 %v9248_v17, %v8089_v48 }
0x1f46   :  { %v9249_v24 = vpop.f32.mrb[106].mxu1  ;;  %v6034_v55 = vadd.f32 %v8089_v48, %v6033_v44 }
0x1f47   :  { %v6045_v7 = vadd.f32 %v9249_v24, %v8089_v48  ;;  %v6036_v32 = vpop.f32.mrb[107].mxu1 }
0x1f48   :  { %v6037_v38 = vadd.f32 %v8089_v48, %v6036_v32 }
0x1f49   :  { %v6207_v21 = vpack.c.bf16 %v6045_v7, %v6042_v54 }
0x1f4a   :  { %v6206_v39 = vpack.c.bf16 %v6037_v38, %v6034_v55 }
0x1f4b   :  { %v6226_v58 = vsel %vm589_vm10, %v6207_v21, 0 }
0x1f4c   :  { %v9252_v49 = vpop.f32.mrb[108].mxu1  ;;  %9426 = vmatprep.subr.msk.bf16.mxu1 %vm589_vm10, %v6206_v39  ;;  %v6223_v63 = vsel %vm589_vm10, %v6206_v39, 0 }
0x1f4d   :  { %v6049_v56 = vpop.f32.mrb[109].mxu1  ;;  %9279 = vmatpush3.bf16.xpose.msra.mxu1 %v6223_v63  ;;  %v6058_v1 = vadd.f32 %v9252_v49, %v8089_v48 }
0x1f4e   :  { %v9253_v46 = vpop.f32.mrb[110].mxu1  ;;  %9427 = vmatprep.subr.msk.bf16.mxu1 %vm589_vm10, %v6207_v21  ;;  %v6050_v0 = vadd.f32 %v8089_v48, %v6049_v56 }
0x1f4f   :  { %v6061_v10 = vadd.f32 %v9253_v46, %v8089_v48  ;;  %v6052_v51 = vpop.f32.mrb[111].mxu1 }
0x1f50   :  { %v6053_v37 = vadd.f32 %v8089_v48, %v6052_v51  ;;  %v9628_v51 = vld [vmem:[%s10135_s6 + $0xc0] sm:$0xff]  }
0x1f51   :  { %v6209_v3 = vpack.c.bf16 %v6061_v10, %v6058_v1  ;;  %9206 = vmatprep.subr.bf16.mxu0 %v9628_v51 }
0x1f52   :  { %v6208_v53 = vpack.c.bf16 %v6053_v37, %v6050_v0 }
0x1f53   :  { %v6232_v29 = vsel %vm589_vm10, %v6209_v3, 0 }
0x1f54   :  { %v6229_v9 = vsel %vm589_vm10, %v6208_v53, 0 }
0x1f55   :  { %9281 = vmatpush3.bf16.xpose.msra.mxu1 %v6226_v58 }
0x1f56   :  { %9428 = vmatprep.subr.msk.bf16.mxu1 %vm589_vm10, %v6208_v53 }
0x1f5d   :  { %9283 = vmatpush3.bf16.xpose.msra.mxu1 %v6229_v9 }
0x1f5e   :  { %9429 = vmatprep.subr.msk.bf16.mxu1 %vm589_vm10, %v6209_v3 }
0x1f65   :  { %9285 = vmatpush3.bf16.xpose.msra.mxu1 %v6232_v29 }
0x1fb7   :  { %v5604_v33 = vpop.xlane.xlu0 %5603 }
0x1fb8   :  { %v5626_v23 = vsub.f32 %v11422_v52, %v5604_v33 }
0x1fb9   :  { %v5607_v18 = vpop.xlane.xlu1 %5606 }
0x1fba   :  { %v5634_v43 = vmul.f32 1.442695, %v5626_v23  ;;  %v5627_v11 = vsub.f32 %v11434_v14, %v5607_v18 }
0x1fbb   :  { %v5610_v45 = vpop.xlane.xlu0 %5609 }
0x1fbc   :  { %9852 = vpow2.f32 %v5634_v43  ;;  %v5636_v16 = vmul.f32 1.442695, %v5627_v11  ;;  %v5628_v30 = vsub.f32 %v11428_v47, %v5610_v45 }
0x1fbd   :  { %v5613_v36 = vpop.xlane.xlu1 %5612 }
0x1fbe   :  { %9854 = vpow2.f32 %v5636_v16  ;;  %v5638_v8 = vmul.f32 1.442695, %v5628_v30  ;;  %v5629_v35 = vsub.f32 %v11442_v22, %v5613_v36 }
0x1fbf   :  { %v5616_v57 = vpop.xlane.xlu0 %5615 }
0x1fc0   :  { %9856 = vpow2.f32 %v5638_v8  ;;  %v5640_v60 = vmul.f32 1.442695, %v5629_v35  ;;  %v5630_v13 = vsub.f32 %v11452_v40, %v5616_v57 }
0x1fc1   :  { %v5619_v52 = vpop.xlane.xlu1 %5618 }
0x1fc2   :  { %9858 = vpow2.f32 %v5640_v60  ;;  %v5642_v6 = vmul.f32 1.442695, %v5630_v13  ;;  %v5631_v14 = vsub.f32 %v11466_v34, %v5619_v52  ;;  %v9629_v60 = vld [vmem:[%s10135_s6 + $0xc8] sm:$0xff]  }
0x1fc3   :  { %v5622_v17 = vpop.xlane.xlu0 %5621 }
0x1fc4   :  { %9860 = vpow2.f32 %v5642_v6  ;;  %v5644_v48 = vmul.f32 1.442695, %v5631_v14  ;;  %v5632_v47 = vsub.f32 %v11460_v62, %v5622_v17 }
0x1fc5   :  { %v5625_v44 = vpop.xlane.xlu1 %5624 }
0x1fc6   :  { %v9853_v24 = vpop.eup %9852  ;;  %9862 = vpow2.f32 %v5644_v48  ;;  %v5646_v54 = vmul.f32 1.442695, %v5632_v47  ;;  %v5633_v22 = vsub.f32 %v11474_v61, %v5625_v44  ;;  %v9630_v48 = vld [vmem:[%s10135_s6 + $0xd0] sm:$0xff]  }
0x1fc7   :  { %v5650_v7 = vsel %vm589_vm10, %v9853_v24, 0.0 }
0x1fc8   :  { %v9855_v32 = vpop.eup %9854  ;;  %9864 = vpow2.f32 %v5646_v54  ;;  %v5648_v40 = vmul.f32 1.442695, %v5633_v22  ;;  %5651 = vadd.xlane.f32.xlu0 %v5650_v7  ;;  %v9631_v22 = vld [vmem:[%s10135_s6 + $0xd8] sm:$0xff]   ;;  %v9632_v7 = vld [vmem:[%s10135_s6 + $0xe0] sm:$0xff]  }
0x1fc9   :  { %v5653_v55 = vsel %vm589_vm10, %v9855_v32, 0.0 }
0x1fca   :  { %v9857_v34 = vpop.eup %9856  ;;  %9866 = vpow2.f32 %v5648_v40  ;;  %5654 = vadd.xlane.f32.xlu1 %v5653_v55  ;;  %v9634_v40 = vld [vmem:[%s10135_s6 + $0xf0] sm:$0xff]   ;;  %v9635_v55 = vld [vmem:[%s10135_s6 + $0xf8] sm:$0xff]  }
0x1fcb   :  { %v5656_v38 = vsel %vm589_vm10, %v9857_v34, 0.0 }
0x1fcc   :  { %v9859_v62 = vpop.eup %9858  ;;  %5657 = vadd.xlane.f32.xlu0 %v5656_v38  ;;  %v9637_v38 = vld [vmem:[%s10145_s20 + $0xc8] sm:$0xff]  }
0x1fcd   :  { %v5659_v21 = vsel %vm589_vm10, %v9859_v62, 0.0 }
0x1fce   :  { %v9861_v39 = vpop.eup %9860  ;;  %5660 = vadd.xlane.f32.xlu1 %v5659_v21  ;;  %v9639_v21 = vld [vmem:[%s10145_s20 + $0xd8] sm:$0xff]  }
0x1fcf   :  { %v5662_v61 = vsel %vm589_vm10, %v9861_v39, 0.0 }
0x1fd0   :  { %v9863_v49 = vpop.eup %9862  ;;  %5663 = vadd.xlane.f32.xlu0 %v5662_v61  ;;  %v9641_v61 = vld [vmem:[%s10145_s20 + $0xe8] sm:$0xff]  }
0x1fd1   :  { %v5665_v63 = vsel %vm589_vm10, %v9863_v49, 0.0 }
0x1fd2   :  { %v9865_v56 = vpop.eup %9864  ;;  %5666 = vadd.xlane.f32.xlu1 %v5665_v63  ;;  %v9643_v63 = vld [vmem:[%s10145_s20 + $0xf8] sm:$0xff]  }
0x1fd3   :  { %v5668_v46 = vsel %vm589_vm10, %v9865_v56, 0.0 }
0x1fd4   :  { %v9867_v1 = vpop.eup %9866  ;;  %5669 = vadd.xlane.f32.xlu0 %v5668_v46 }
0x1fd5   :  { %v5671_v10 = vsel %vm589_vm10, %v9867_v1, 0.0 }
0x1fd6   :  { %5672 = vadd.xlane.f32.xlu1 %v5671_v10 }
0x2055   :  { %v5652_v0 = vpop.xlane.xlu0 %5651 }
0x2056   :  { %9868 = vrcp.f32 %v5652_v0 }
0x2057   :  { %v5655_v37 = vpop.xlane.xlu1 %5654 }
0x2058   :  { %9870 = vrcp.f32 %v5655_v37 }
0x2059   :  { %v5658_v3 = vpop.xlane.xlu0 %5657 }
0x205a   :  { %9872 = vrcp.f32 %v5658_v3 }
0x205b   :  { %v5661_v53 = vpop.xlane.xlu1 %5660 }
0x205c   :  { %9874 = vrcp.f32 %v5661_v53 }
0x205d   :  { %v5664_v58 = vpop.xlane.xlu0 %5663 }
0x205e   :  { %9876 = vrcp.f32 %v5664_v58  ;;  %v8063_v58 = vld [vmem:[%s11938_s5 + $0x3] ss:$0 sm:$0xff] }
0x205f   :  { %v5667_v9 = vpop.xlane.xlu1 %5666 }
0x2060   :  { %v9869_v29 = vpop.eup %9868  ;;  %9878 = vrcp.f32 %v5667_v9 }
0x2061   :  { %v5670_v33 = vpop.xlane.xlu0 %5669  ;;  %v5675_v43 = vmul.f32 %v9869_v29, %v9853_v24 }
0x2062   :  { %v9871_v23 = vpop.eup %9870  ;;  %9880 = vrcp.f32 %v5670_v33 }
0x2063   :  { %v5673_v18 = vpop.xlane.xlu1 %5672  ;;  %v5677_v11 = vmul.f32 %v9871_v23, %v9855_v32  ;;  %v9633_v32 = vld [vmem:[%s10135_s6 + $0xe8] sm:$0xff]  }
0x2064   :  { %v9873_v45 = vpop.eup %9872  ;;  %9882 = vrcp.f32 %v5673_v18 }
0x2065   :  { %v5690_v16 = vpack.c.bf16 %v5677_v11, %v5675_v43  ;;  %v5679_v36 = vmul.f32 %v9873_v45, %v9857_v34  ;;  %v9636_v34 = vld [vmem:[%s10145_s20 + $0xc0] sm:$0xff]  }
0x2066   :  { %v9875_v30 = vpop.eup %9874 }
0x2067   :  { %v5681_v8 = vmul.f32 %v9875_v30, %v9859_v62  ;;  %9198 = vmatprep.mubr.msk.bf16.mxu0 %vm589_vm10, %v5690_v16  ;;  %v9638_v62 = vld [vmem:[%s10145_s20 + $0xd0] sm:$0xff]  }
0x2068   :  { %v9877_v35 = vpop.eup %9876 }
0x2069   :  { %v5691_v57 = vpack.c.bf16 %v5681_v8, %v5679_v36  ;;  %v5683_v52 = vmul.f32 %v9877_v35, %v9861_v39  ;;  %v9640_v39 = vld [vmem:[%s10145_s20 + $0xe0] sm:$0xff]  }
0x206a   :  { %v9879_v13 = vpop.eup %9878 }
0x206b   :  { %9199 = vmatmul.mubr.msk.bf16.vlgmr.msra.gmra.mrb[128].mxu0 %vm589_vm10, %v5691_v57  ;;  %v5685_v6 = vmul.f32 %v9879_v13, %v9863_v49  ;;  %v9642_v49 = vld [vmem:[%s10145_s20 + $0xf0] sm:$0xff]  }
0x206c   :  { %v9881_v14 = vpop.eup %9880  ;;  %9207 = vmatpush3.bf16.msra.mxu0 %v9628_v51 }
0x206d   :  { %9208 = vmatprep.subr.bf16.mxu0 %v9629_v60  ;;  %v5692_v17 = vpack.c.bf16 %v5685_v6, %v5683_v52  ;;  %v5687_v44 = vmul.f32 %v9881_v14, %v9865_v56 }
0x206e   :  { %v9883_v47 = vpop.eup %9882 }
0x206f   :  { %9202 = vmatprep.mubr.msk.bf16.mxu0 %vm589_vm10, %v5692_v17  ;;  %v5689_v24 = vmul.f32 %v9883_v47, %v9867_v1 }
0x2070   :  { %9209 = vmatpush3.bf16.msra.mxu0 %v9629_v60 }
0x2071   :  { %9210 = vmatprep.subr.bf16.mxu0 %v9630_v48  ;;  %v5693_v54 = vpack.c.bf16 %v5689_v24, %v5687_v44 }
0x2073   :  { %9203 = vmatmul.mubr.msk.bf16.gmra.mrb[132].mxu0 %vm589_vm10, %v5693_v54 }
0x2074   :  { %9211 = vmatpush3.bf16.msra.mxu0 %v9630_v48  ;;  %9222 = vmatprep.mubr.bf16.mxu0 %v11349_v5  ;;  %v8115_v48 = vld [vmem:[%s11940_s17 + $0x3] ss:$0 sm:$0xff] }
0x2075   :  { %9212 = vmatprep.subr.bf16.mxu0 %v9631_v22 }
0x2078   :  { %9213 = vmatpush3.bf16.msra.mxu0 %v9631_v22 }
0x2079   :  { %9214 = vmatprep.subr.bf16.mxu0 %v9632_v7 }
0x207c   :  { %9215 = vmatpush3.bf16.msra.mxu0 %v9632_v7 }
0x207d   :  { %9216 = vmatprep.subr.bf16.mxu0 %v9633_v32 }
0x2080   :  { %9217 = vmatpush3.bf16.msra.mxu0 %v9633_v32 }
0x2081   :  { %9218 = vmatprep.subr.bf16.mxu0 %v9634_v40 }
0x2084   :  { %9219 = vmatpush3.bf16.msra.mxu0 %v9634_v40 }
0x2085   :  { %9220 = vmatprep.subr.bf16.mxu0 %v9635_v55 }
0x2088   :  { %9221 = vmatpush3.bf16.msra.mxu0 %v9635_v55 }
0x2089   :  { %9254 = vmatprep.subr.bf16.mxu0 %v9636_v34 }
0x208b   :  { %9223 = vmatmul.mubr.bf16.vlgmr.msra.gmra.mrb[136].mxu0 %v11357_v2 }
0x208c   :  { %9226 = vmatprep.mubr.bf16.mxu0 %v11368_v50  ;;  %9255 = vmatpush3.bf16.msra.mxu0 %v9636_v34 }
0x208d   :  { %9256 = vmatprep.subr.bf16.mxu0 %v9637_v38 }
0x2090   :  { %9257 = vmatpush3.bf16.msra.mxu0 %v9637_v38 }
0x2091   :  { %9258 = vmatprep.subr.bf16.mxu0 %v9638_v62 }
0x2093   :  { %9227 = vmatmul.mubr.bf16.gmra.mrb[140].mxu0 %v11377_v15 }
0x2094   :  { %9259 = vmatpush3.bf16.msra.mxu0 %v9638_v62  ;;  %9270 = vmatprep.mubr.bf16.mxu0 %v11349_v5 }
0x2095   :  { %9260 = vmatprep.subr.bf16.mxu0 %v9639_v21 }
0x2098   :  { %9261 = vmatpush3.bf16.msra.mxu0 %v9639_v21 }
0x2099   :  { %9262 = vmatprep.subr.bf16.mxu0 %v9640_v39 }
0x209c   :  { %9263 = vmatpush3.bf16.msra.mxu0 %v9640_v39 }
0x209d   :  { %9264 = vmatprep.subr.bf16.mxu0 %v9641_v61 }
0x20a0   :  { %9265 = vmatpush3.bf16.msra.mxu0 %v9641_v61 }
0x20a1   :  { %9266 = vmatprep.subr.bf16.mxu0 %v9642_v49 }
0x20a4   :  { %9267 = vmatpush3.bf16.msra.mxu0 %v9642_v49 }
0x20a5   :  { %9268 = vmatprep.subr.bf16.mxu0 %v9643_v63 }
0x20a8   :  { %9269 = vmatpush3.bf16.msra.mxu0 %v9643_v63 }
0x20ab   :  { %9271 = vmatmul.mubr.bf16.vlgmr.msra.gmra.mrb[144].mxu0 %v11357_v2 }
0x20ac   :  { %9274 = vmatprep.mubr.bf16.mxu0 %v11368_v50 }
0x20b3   :  { %9275 = vmatmul.mubr.bf16.gmra.mrb[148].mxu0 %v11377_v15 }
0x213e   :  { %v11535_v5 = vpop.f32.mrb[128].mxu0 }
0x213f   :  { %v11537_v56 = vpop.f32.mrb[129].mxu0 }
0x2140   :  { %v11539_v46 = vpop.f32.mrb[130].mxu0 }
0x2141   :  { %v5776_v1 = vpack.c.bf16 %v11539_v46, %v11535_v5  ;;  %v11543_v10 = vpop.f32.mrb[131].mxu0  ;;  %v9997_v5 = vld [vmem:[#allocation2 + $0x50] sm:$0xff] }
0x2142   :  { %v5775_v51 = vpack.c.bf16 %v11543_v10, %v11537_v56  ;;  %v8157_v10 = vld [vmem:[%s11943_s29 + $0x1] ss:$0 sm:$0xff] }
0x2146   :  { %v11547_v2 = vpop.f32.mrb[132].mxu0 }
0x2147   :  { %v11549_v0 = vpop.f32.mrb[133].mxu0 }
0x2148   :  { %v11551_v50 = vpop.f32.mrb[134].mxu0 }
0x2149   :  { %v5778_v15 = vpack.c.bf16 %v11551_v50, %v11547_v2  ;;  %v11555_v37 = vpop.f32.mrb[135].mxu0 }
0x214a   :  { %v5777_v3 = vpack.c.bf16 %v11555_v37, %v11549_v0  ;;  %v9999_v37 = vld [vmem:[#allocation2 + $0x58] sm:$0xff] }
0x215e   :  { %v9224_v53 = vpop.f32.mrb[136].mxu0 }
0x215f   :  { %v5895_v9 = vpop.f32.mrb[137].mxu0  ;;  %v5904_v33 = vadd.f32 %v9224_v53, %v8063_v58 }
0x2160   :  { %v9225_v29 = vpop.f32.mrb[138].mxu0  ;;  %v5896_v43 = vadd.f32 %v8063_v58, %v5895_v9 }
0x2161   :  { %v5907_v23 = vadd.f32 %v9225_v29, %v8063_v58  ;;  %v5898_v18 = vpop.f32.mrb[139].mxu0 }
0x2162   :  { %v5899_v11 = vadd.f32 %v8063_v58, %v5898_v18 }
0x2163   :  { %v6203_v45 = vpack.c.bf16 %v5907_v23, %v5904_v33 }
0x2164   :  { %v6202_v16 = vpack.c.bf16 %v5899_v11, %v5896_v43 }
0x2166   :  { %v9228_v30 = vpop.f32.mrb[140].mxu0  ;;  %9286 = vmatprep.mubr.msk.bf16.mxu1 %vm589_vm10, %v6202_v16 }
0x2167   :  { %v5911_v36 = vpop.f32.mrb[141].mxu0  ;;  %9287 = vmatmul.mubr.msk.bf16.vlgmr.msra.gmra.mrb[112].mxu1 %vm589_vm10, %v6203_v45  ;;  %v5920_v35 = vadd.f32 %v9228_v30, %v8063_v58 }
0x2168   :  { %v9229_v8 = vpop.f32.mrb[142].mxu0  ;;  %v5912_v13 = vadd.f32 %v8063_v58, %v5911_v36 }
0x2169   :  { %v5923_v57 = vadd.f32 %v9229_v8, %v8063_v58  ;;  %v5914_v60 = vpop.f32.mrb[143].mxu0 }
0x216a   :  { %v5915_v52 = vadd.f32 %v8063_v58, %v5914_v60 }
0x216b   :  { %v6205_v6 = vpack.c.bf16 %v5923_v57, %v5920_v35 }
0x216c   :  { %v6204_v14 = vpack.c.bf16 %v5915_v52, %v5912_v13 }
0x216e   :  { %9290 = vmatprep.mubr.msk.bf16.mxu1 %vm589_vm10, %v6204_v14 }
0x216f   :  { %9291 = vmatmul.mubr.msk.bf16.gmra.mrb[116].mxu1 %vm589_vm10, %v6205_v6 }
0x217e   :  { %v9272_v17 = vpop.f32.mrb[144].mxu0 }
0x217f   :  { %v6171_v47 = vpop.f32.mrb[145].mxu0  ;;  %v6180_v24 = vadd.f32 %v9272_v17, %v8115_v48 }
0x2180   :  { %v9273_v44 = vpop.f32.mrb[146].mxu0  ;;  %v6172_v7 = vadd.f32 %v8115_v48, %v6171_v47 }
0x2181   :  { %v6183_v54 = vadd.f32 %v9273_v44, %v8115_v48  ;;  %v6174_v22 = vpop.f32.mrb[147].mxu0 }
0x2182   :  { %v6175_v32 = vadd.f32 %v8115_v48, %v6174_v22 }
0x2183   :  { %v6408_v40 = vpack.c.bf16 %v6183_v54, %v6180_v24 }
0x2184   :  { %v6407_v55 = vpack.c.bf16 %v6175_v32, %v6172_v7 }
0x2186   :  { %v9276_v34 = vpop.f32.mrb[148].mxu0  ;;  %9294 = vmatprep.subr.bf16.mxu0 %v6407_v55 }
0x2187   :  { %v6187_v38 = vpop.f32.mrb[149].mxu0  ;;  %9295 = vmatpush3.bf16.msra.mxu0 %v6407_v55  ;;  %v6196_v21 = vadd.f32 %v9276_v34, %v8115_v48 }
0x2188   :  { %v9277_v62 = vpop.f32.mrb[150].mxu0  ;;  %9296 = vmatprep.subr.bf16.mxu0 %v6408_v40  ;;  %v6188_v49 = vadd.f32 %v8115_v48, %v6187_v38 }
0x2189   :  { %v6199_v39 = vadd.f32 %v9277_v62, %v8115_v48  ;;  %v6190_v61 = vpop.f32.mrb[151].mxu0 }
0x218a   :  { %v6191_v63 = vadd.f32 %v8115_v48, %v6190_v61 }
0x218b   :  { %v6410_v53 = vpack.c.bf16 %v6199_v39, %v6196_v21  ;;  %9297 = vmatpush3.bf16.msra.mxu0 %v6408_v40 }
0x218c   :  { %v6409_v58 = vpack.c.bf16 %v6191_v63, %v6188_v49 }
0x218e   :  { %9298 = vmatprep.subr.bf16.mxu0 %v6409_v58 }
0x218f   :  { %9299 = vmatpush3.bf16.msra.mxu0 %v6409_v58 }
0x2190   :  { %9300 = vmatprep.subr.bf16.mxu0 %v6410_v53 }
0x2193   :  { %9301 = vmatpush3.bf16.msra.mxu0 %v6410_v53 }
0x223a   :  { %v9288_v9 = vpop.f32.mrb[112].mxu1 }
0x223b   :  { %v6268_v29 = vpop.f32.mrb[113].mxu1  ;;  %v6301_v33 = vmul.f32 0.125, %v9288_v9 }
0x223c   :  { %v6299_v23 = vmul.f32 0.125, %v6268_v29  ;;  %v9289_v18 = vpop.f32.mrb[114].mxu1 }
0x223d   :  { %v6271_v43 = vpop.f32.mrb[115].mxu1  ;;  %v6302_v45 = vmul.f32 0.125, %v9289_v18  ;;  %v6309_v30 = vadd.f32 %v11425_v28, %v6301_v33 }
0x223e   :  { %v6307_v11 = vadd.f32 %v11419_v25, %v6299_v23  ;;  %v6300_v16 = vmul.f32 0.125, %v6271_v43 }
0x223f   :  { %v6310_v35 = vadd.f32 %v11439_v19, %v6302_v45  ;;  %v6321_v25 = vsel %vm589_vm10, %v6309_v30, -inf }
0x2240   :  { %v6308_v36 = vadd.f32 %v11431_v42, %v6300_v16  ;;  %v6315_v8 = vsel %vm589_vm10, %v6307_v11, -inf }
0x2241   :  { %6316 = vmax.xlane.f32.xlu0 %v6315_v8  ;;  %v6324_v47 = vsel %vm589_vm10, %v6310_v35, -inf }
0x2242   :  { %v9292_v57 = vpop.f32.mrb[116].mxu1  ;;  %v6318_v60 = vsel %vm589_vm10, %v6308_v36, -inf }
0x2243   :  { %6319 = vmax.xlane.f32.xlu1 %v6318_v60  ;;  %v6284_v13 = vpop.f32.mrb[117].mxu1  ;;  %v6305_v52 = vmul.f32 0.125, %v9292_v57 }
0x2244   :  { %v6303_v6 = vmul.f32 0.125, %v6284_v13  ;;  %v9293_v14 = vpop.f32.mrb[118].mxu1 }
0x2245   :  { %6322 = vmax.xlane.f32.xlu0 %v6321_v25  ;;  %v6287_v17 = vpop.f32.mrb[119].mxu1  ;;  %v6306_v42 = vmul.f32 0.125, %v9293_v14  ;;  %v6313_v19 = vadd.f32 %v11457_v20, %v6305_v52 }
0x2246   :  { %v6311_v28 = vadd.f32 %v11449_v31, %v6303_v6  ;;  %v6304_v48 = vmul.f32 0.125, %v6287_v17 }
0x2247   :  { %6325 = vmax.xlane.f32.xlu1 %v6324_v47  ;;  %v6314_v54 = vadd.f32 %v11471_v41, %v6306_v42  ;;  %v6333_v7 = vsel %vm589_vm10, %v6313_v19, -inf  ;;  %v9644_v47 = vld [vmem:[%s11942_s25 + $0x60] sm:$0xff]  }
0x2248   :  { %v6312_v44 = vadd.f32 %v11463_v27, %v6304_v48  ;;  %v6327_v24 = vsel %vm589_vm10, %v6311_v28, -inf  ;;  %9310 = vmatprep.subr.bf16.mxu1 %v9644_v47 }
0x2249   :  { %6328 = vmax.xlane.f32.xlu0 %v6327_v24  ;;  %v6336_v31 = vsel %vm589_vm10, %v6314_v54, -inf  ;;  %9311 = vmatpush3.bf16.msra.mxu1 %v9644_v47  ;;  %v9996_v47 = vld [vmem:[#allocation2 + $0x40] sm:$0xff] }
0x224a   :  { %v6330_v22 = vsel %vm589_vm10, %v6312_v44, -inf }
0x224b   :  { %6331 = vmax.xlane.f32.xlu1 %v6330_v22 }
0x224d   :  { %6334 = vmax.xlane.f32.xlu0 %v6333_v7 }
0x224f   :  { %6337 = vmax.xlane.f32.xlu1 %v6336_v31 }
0x22ce   :  { %v6317_v32 = vpop.xlane.xlu0 %6316 }
0x22cf   :  { %v6339_v40 = vsub.f32 %v6307_v11, %v6317_v32 }
0x22d0   :  { %v6320_v55 = vpop.xlane.xlu1 %6319 }
0x22d1   :  { %v6347_v20 = vmul.f32 1.442695, %v6339_v40  ;;  %v6340_v34 = vsub.f32 %v6308_v36, %v6320_v55 }
0x22d2   :  { %v6323_v27 = vpop.xlane.xlu0 %6322 }
0x22d3   :  { %9884 = vpow2.f32 %v6347_v20  ;;  %v6349_v38 = vmul.f32 1.442695, %v6340_v34  ;;  %v6341_v62 = vsub.f32 %v6309_v30, %v6323_v27 }
0x22d4   :  { %v6326_v21 = vpop.xlane.xlu1 %6325 }
0x22d5   :  { %9886 = vpow2.f32 %v6349_v38  ;;  %v6351_v41 = vmul.f32 1.442695, %v6341_v62  ;;  %v6342_v39 = vsub.f32 %v6310_v35, %v6326_v21 }
0x22d6   :  { %v6329_v61 = vpop.xlane.xlu0 %6328 }
0x22d7   :  { %9888 = vpow2.f32 %v6351_v41  ;;  %v6353_v49 = vmul.f32 1.442695, %v6342_v39  ;;  %v6343_v63 = vsub.f32 %v6311_v28, %v6329_v61 }
0x22d8   :  { %v6332_v53 = vpop.xlane.xlu1 %6331 }
0x22d9   :  { %9890 = vpow2.f32 %v6353_v49  ;;  %v6355_v58 = vmul.f32 1.442695, %v6343_v63  ;;  %v6344_v9 = vsub.f32 %v6312_v44, %v6332_v53  ;;  %v9646_v44 = vld [vmem:[%s11942_s25 + $0x70] sm:$0xff]  }
0x22da   :  { %v6335_v29 = vpop.xlane.xlu0 %6334 }
0x22db   :  { %9892 = vpow2.f32 %v6355_v58  ;;  %v6357_v33 = vmul.f32 1.442695, %v6344_v9  ;;  %v6345_v23 = vsub.f32 %v6313_v19, %v6335_v29  ;;  %v9645_v19 = vld [vmem:[%s11942_s25 + $0x68] sm:$0xff]  }
0x22dc   :  { %v6338_v18 = vpop.xlane.xlu1 %6337  ;;  %9312 = vmatprep.subr.bf16.mxu1 %v9645_v19 }
0x22dd   :  { %v9885_v43 = vpop.eup %9884  ;;  %9894 = vpow2.f32 %v6357_v33  ;;  %v6359_v11 = vmul.f32 1.442695, %v6345_v23  ;;  %v6346_v45 = vsub.f32 %v6314_v54, %v6338_v18  ;;  %9313 = vmatpush3.bf16.msra.mxu1 %v9645_v19 }
0x22de   :  { %v6363_v16 = vsel %vm589_vm10, %v9885_v43, 0.0  ;;  %9314 = vmatprep.subr.bf16.mxu1 %v9646_v44 }
0x22df   :  { %v9887_v30 = vpop.eup %9886  ;;  %9896 = vpow2.f32 %v6359_v11  ;;  %v6361_v36 = vmul.f32 1.442695, %v6346_v45  ;;  %6364 = vadd.xlane.f32.xlu0 %v6363_v16  ;;  %v9647_v45 = vld [vmem:[%s11942_s25 + $0x78] sm:$0xff]   ;;  %v9648_v16 = vld [vmem:[%s11942_s25 + $0x40] sm:$0xff]  }
0x22e0   :  { %v6366_v8 = vsel %vm589_vm10, %v9887_v30, 0.0 }
0x22e1   :  { %v9889_v35 = vpop.eup %9888  ;;  %9898 = vpow2.f32 %v6361_v36  ;;  %6367 = vadd.xlane.f32.xlu1 %v6366_v8  ;;  %9315 = vmatpush3.bf16.msra.mxu1 %v9646_v44 }
0x22e2   :  { %v6369_v57 = vsel %vm589_vm10, %v9889_v35, 0.0  ;;  %9316 = vmatprep.subr.bf16.mxu1 %v9647_v45 }
0x22e3   :  { %v9891_v60 = vpop.eup %9890  ;;  %6370 = vadd.xlane.f32.xlu0 %v6369_v57 }
0x22e4   :  { %v6372_v13 = vsel %vm589_vm10, %v9891_v60, 0.0 }
0x22e5   :  { %v9893_v52 = vpop.eup %9892  ;;  %6373 = vadd.xlane.f32.xlu1 %v6372_v13  ;;  %9317 = vmatpush3.bf16.msra.mxu1 %v9647_v45  ;;  %v9649_v13 = vld [vmem:[%s11942_s25 + $0x48] sm:$0xff]  }
0x22e6   :  { %v6375_v6 = vsel %vm589_vm10, %v9893_v52, 0.0  ;;  %9326 = vmatprep.subr.bf16.mxu1 %v9648_v16 }
0x22e7   :  { %v9895_v14 = vpop.eup %9894  ;;  %6376 = vadd.xlane.f32.xlu0 %v6375_v6 }
0x22e8   :  { %v6378_v25 = vsel %vm589_vm10, %v9895_v14, 0.0 }
0x22e9   :  { %v9897_v17 = vpop.eup %9896  ;;  %6379 = vadd.xlane.f32.xlu1 %v6378_v25 }
0x22ea   :  { %v6381_v28 = vsel %vm589_vm10, %v9897_v17, 0.0 }
0x22eb   :  { %v9899_v42 = vpop.eup %9898  ;;  %6382 = vadd.xlane.f32.xlu0 %v6381_v28 }
0x22ec   :  { %v6384_v48 = vsel %vm589_vm10, %v9899_v42, 0.0 }
0x22ed   :  { %6385 = vadd.xlane.f32.xlu1 %v6384_v48  ;;  %v9651_v48 = vld [vmem:[%s11942_s25 + $0x58] sm:$0xff]  }
0x236c   :  { %v6365_v24 = vpop.xlane.xlu0 %6364 }
0x236d   :  { %9900 = vrcp.f32 %v6365_v24 }
0x236e   :  { %v6368_v54 = vpop.xlane.xlu1 %6367 }
0x236f   :  { %9902 = vrcp.f32 %v6368_v54  ;;  %v9998_v54 = vld [vmem:[#allocation2 + $0x48] sm:$0xff] }
0x2370   :  { %v6371_v22 = vpop.xlane.xlu0 %6370 }
0x2371   :  { %9904 = vrcp.f32 %v6371_v22 }
0x2372   :  { %v6374_v7 = vpop.xlane.xlu1 %6373 }
0x2373   :  { %9906 = vrcp.f32 %v6374_v7 }
0x2374   :  { %v6377_v31 = vpop.xlane.xlu0 %6376 }
0x2375   :  { %9908 = vrcp.f32 %v6377_v31  ;;  %v10000_v31 = vld [vmem:[#allocation2 + $0x60] sm:$0xff] }
0x2376   :  { %v6380_v32 = vpop.xlane.xlu1 %6379 }
0x2377   :  { %v9901_v40 = vpop.eup %9900  ;;  %9910 = vrcp.f32 %v6380_v32 }
0x2378   :  { %v6383_v55 = vpop.xlane.xlu0 %6382  ;;  %v6388_v27 = vmul.f32 %v9901_v40, %v9885_v43 }
0x2379   :  { %v9903_v20 = vpop.eup %9902  ;;  %9912 = vrcp.f32 %v6383_v55 }
0x237a   :  { %v6386_v34 = vpop.xlane.xlu1 %6385  ;;  %v6390_v38 = vmul.f32 %v9903_v20, %v9887_v30  ;;  %v10001_v20 = vld [vmem:[#allocation2 + $0x70] sm:$0xff] }
0x237b   :  { %v9905_v62 = vpop.eup %9904  ;;  %9914 = vrcp.f32 %v6386_v34 }
0x237c   :  { %v6403_v21 = vpack.c.bf16 %v6390_v38, %v6388_v27  ;;  %v6392_v39 = vmul.f32 %v9905_v62, %v9889_v35  ;;  %v10002_v38 = vld [vmem:[#allocation2 + $0x68] sm:$0xff] }
0x237d   :  { %v9907_v41 = vpop.eup %9906 }
0x237e   :  { %v6394_v61 = vmul.f32 %v9907_v41, %v9891_v60  ;;  %9302 = vmatprep.mubr.msk.bf16.mxu0 %vm589_vm10, %v6403_v21  ;;  %v10003_v21 = vld [vmem:[#allocation2 + $0x78] sm:$0xff] }
0x237f   :  { %v9909_v49 = vpop.eup %9908 }
0x2380   :  { %v6404_v63 = vpack.c.bf16 %v6394_v61, %v6392_v39  ;;  %v6396_v58 = vmul.f32 %v9909_v49, %v9893_v52 }
0x2381   :  { %v9911_v53 = vpop.eup %9910 }
0x2382   :  { %9303 = vmatmul.mubr.msk.bf16.vlgmr.msra.gmra.mrb[152].mxu0 %vm589_vm10, %v6404_v63  ;;  %v6398_v9 = vmul.f32 %v9911_v53, %v9895_v14  ;;  %v9650_v14 = vld [vmem:[%s11942_s25 + $0x50] sm:$0xff]   ;;  %v9652_v63 = vld [vmem:[%s11944_s3 + $0x80] ss:$8 sps:$4 sm:$0xff]   ;;  %v9654_v53 = vld [vmem:[%s11944_s3 + $0x84] ss:$8 sps:$4 sm:$0xff]  }
0x2383   :  { %v9913_v29 = vpop.eup %9912  ;;  %6961 = vmatprep.subr.bf16.mxu0 %v9654_v53 }
0x2384   :  { %v6405_v33 = vpack.c.bf16 %v6398_v9, %v6396_v58  ;;  %v6400_v18 = vmul.f32 %v9913_v29, %v9897_v17  ;;  %v9657_v58 = vld [vmem:[%s11944_s3 + $0x94] ss:$8 sps:$4 sm:$0xff]   ;;  %6962 = vmatpush1.bf16.msra.mxu0 %v9652_v63  ;;  %v9655_v9 = vld [vmem:[%s11944_s3 + $0x90] ss:$8 sps:$4 sm:$0xff]  }
0x2385   :  { %v9915_v23 = vpop.eup %9914  ;;  %6963 = vmatprep.subr.bf16.mxu0 %v9657_v58 }
0x2386   :  { %9306 = vmatprep.mubr.msk.bf16.mxu0 %vm589_vm10, %v6405_v33  ;;  %v6402_v43 = vmul.f32 %v9915_v23, %v9899_v42 }
0x2388   :  { %v6406_v11 = vpack.c.bf16 %v6402_v43, %v6400_v18  ;;  %6964 = vmatpush1.bf16.msra.mxu0 %v9655_v9 }
0x238a   :  { %9307 = vmatmul.mubr.msk.bf16.gmra.mrb[156].mxu0 %vm589_vm10, %v6406_v11 }
0x238b   :  { %6993 = vmatprep.mubr.bf16.mxu0 %v10058_v26 }
0x2455   :  { %v9304_v30 = vpop.f32.mrb[152].mxu0 }
0x2456   :  { %v6457_v36 = vpop.f32.mrb[153].mxu0 }
0x2457   :  { %v9305_v8 = vpop.f32.mrb[154].mxu0 }
0x2458   :  { %v6489_v35 = vpack.c.bf16 %v9305_v8, %v9304_v30  ;;  %v6460_v57 = vpop.f32.mrb[155].mxu0 }
0x2459   :  { %v6488_v60 = vpack.c.bf16 %v6460_v57, %v6457_v36 }
0x245b   :  { %9318 = vmatprep.mubr.msk.bf16.mxu1 %vm589_vm10, %v6488_v60 }
0x245c   :  { %9319 = vmatmul.mubr.msk.bf16.vlgmr.msra.gmra.mrb[120].mxu1 %vm589_vm10, %v6489_v35 }
0x245d   :  { %9327 = vmatpush3.bf16.msra.mxu1 %v9648_v16  ;;  %v9308_v52 = vpop.f32.mrb[156].mxu0 }
0x245e   :  { %v6473_v6 = vpop.f32.mrb[157].mxu0  ;;  %9328 = vmatprep.subr.bf16.mxu1 %v9649_v13 }
0x245f   :  { %v9309_v25 = vpop.f32.mrb[158].mxu0 }
0x2460   :  { %v6491_v17 = vpack.c.bf16 %v9309_v25, %v9308_v52  ;;  %v6476_v28 = vpop.f32.mrb[159].mxu0 }
0x2461   :  { %v6490_v42 = vpack.c.bf16 %v6476_v28, %v6473_v6  ;;  %9329 = vmatpush3.bf16.msra.mxu1 %v9649_v13 }
0x2462   :  { %9330 = vmatprep.subr.bf16.mxu1 %v9650_v14 }
0x2463   :  { %9322 = vmatprep.mubr.msk.bf16.mxu1 %vm589_vm10, %v6490_v42 }
0x2464   :  { %9323 = vmatmul.mubr.msk.bf16.gmra.mrb[124].mxu1 %vm589_vm10, %v6491_v17 }
0x2465   :  { %9331 = vmatpush3.bf16.msra.mxu1 %v9650_v14  ;;  %9334 = vmatprep.mubr.msk.bf16.mxu1 %vm589_vm10, %v5775_v51 }
0x2466   :  { %9332 = vmatprep.subr.bf16.mxu1 %v9651_v48 }
0x2469   :  { %9333 = vmatpush3.bf16.msra.mxu1 %v9651_v48 }
0x246c   :  { %9335 = vmatmul.mubr.msk.bf16.vlgmr.msra.gmra.mrb[120].mxu1 %vm589_vm10, %v5776_v1 }
0x246d   :  { %9338 = vmatprep.mubr.msk.bf16.mxu1 %vm589_vm10, %v5777_v3 }
0x2474   :  { %9339 = vmatmul.mubr.msk.bf16.gmra.mrb[124].mxu1 %vm589_vm10, %v5778_v15 }
0x253f   :  { %v9336_v56 = vpop.f32.mrb[120].mxu1 }
0x2540   :  { %v6672_v51 = vpop.f32.mrb[121].mxu1  ;;  %v6705_v46 = vadd.f32 %v9997_v5, %v9336_v56 }
0x2541   :  { %v6703_v19 = vadd.f32 %v9996_v47, %v6672_v51  ;;  %v9337_v44 = vpop.f32.mrb[122].mxu1 }
0x2542   :  { %v6675_v24 = vpop.f32.mrb[123].mxu1  ;;  %v6706_v3 = vadd.f32 %v9999_v37, %v9337_v44  ;;  %v11628_v2 = vadd.f32 %v8157_v10, %v6705_v46  ;;  %v9663_v37 = vld [vmem:[%s11944_s3 + $0xb4] ss:$8 sps:$4 sm:$0xff]  }
0x2543   :  { %v11623_v1 = vadd.f32 %v8157_v10, %v6703_v19  ;;  %v6704_v0 = vadd.f32 %v9998_v54, %v6675_v24  ;;  %v9660_v54 = vld [vmem:[%s11944_s3 + $0xa4] ss:$8 sps:$4 sm:$0xff]  }
0x2544   :  { %v11631_v7 = vadd.f32 %v8157_v10, %v6706_v3  ;;  %6965 = vmatprep.subr.bf16.mxu0 %v9660_v54  ;;  %v9661_v3 = vld [vmem:[%s11944_s3 + $0xb0] ss:$8 sps:$4 sm:$0xff]  }
0x2545   :  { %v11625_v22 = vadd.f32 %v8157_v10, %v6704_v0  ;;  %6731 = vadd.xlane.f32.xlu0 %v11623_v1  ;;  %v9658_v0 = vld [vmem:[%s11944_s3 + $0xa0] ss:$8 sps:$4 sm:$0xff]  }
0x2546   :  { %6966 = vmatpush1.bf16.msra.mxu0 %v9658_v0 }
0x2547   :  { %6733 = vadd.xlane.f32.xlu1 %v11625_v22  ;;  %v9340_v50 = vpop.f32.mrb[124].mxu1  ;;  %6967 = vmatprep.subr.bf16.mxu0 %v9663_v37 }
0x2548   :  { %v6688_v15 = vpop.f32.mrb[125].mxu1  ;;  %v6709_v34 = vadd.f32 %v10001_v20, %v9340_v50  ;;  %v9666_v50 = vld [vmem:[%s11944_s3 + $0xc4] ss:$8 sps:$4 sm:$0xff]   ;;  %v9673_v20 = vld [vmem:[%s11944_s3 + $0xf0] ss:$8 sps:$4 sm:$0xff]  }
0x2549   :  { %v6707_v32 = vadd.f32 %v10000_v31, %v6688_v15  ;;  %6735 = vadd.xlane.f32.xlu0 %v11628_v2  ;;  %v9341_v40 = vpop.f32.mrb[126].mxu1  ;;  %v9664_v15 = vld [vmem:[%s11944_s3 + $0xc0] ss:$8 sps:$4 sm:$0xff]   ;;  %v9669_v31 = vld [vmem:[%s11944_s3 + $0xd4] ss:$8 sps:$4 sm:$0xff]  }
0x254a   :  { %v6691_v55 = vpop.f32.mrb[127].mxu1  ;;  %v6710_v41 = vadd.f32 %v10003_v21, %v9341_v40  ;;  %v11640_v61 = vadd.f32 %v8157_v10, %v6709_v34  ;;  %6968 = vmatpush1.bf16.msra.mxu0 %v9661_v3  ;;  %v9672_v40 = vld [vmem:[%s11944_s3 + $0xe4] ss:$8 sps:$4 sm:$0xff]   ;;  %v9675_v34 = vld [vmem:[%s11944_s3 + $0xf4] ss:$8 sps:$4 sm:$0xff]  }
0x254b   :  { %v11634_v27 = vadd.f32 %v8157_v10, %v6707_v32  ;;  %v6708_v62 = vadd.f32 %v10002_v38, %v6691_v55  ;;  %6737 = vadd.xlane.f32.xlu1 %v11631_v7  ;;  %6969 = vmatprep.subr.bf16.mxu0 %v9666_v50  ;;  %v9667_v32 = vld [vmem:[%s11944_s3 + $0xd0] ss:$8 sps:$4 sm:$0xff]   ;;  %v9670_v55 = vld [vmem:[%s11944_s3 + $0xe0] ss:$8 sps:$4 sm:$0xff]  }
0x254c   :  { %v11643_v49 = vadd.f32 %v8157_v10, %v6710_v41 }
0x254d   :  { %v11637_v39 = vadd.f32 %v8157_v10, %v6708_v62  ;;  %6739 = vadd.xlane.f32.xlu0 %v11634_v27 }
0x254e   :  { %6970 = vmatpush1.bf16.msra.mxu0 %v9664_v15 }
0x254f   :  { %6741 = vadd.xlane.f32.xlu1 %v11637_v39  ;;  %6971 = vmatprep.subr.bf16.mxu0 %v9669_v31 }
0x2551   :  { %6743 = vadd.xlane.f32.xlu0 %v11640_v61 }
0x2552   :  { %6972 = vmatpush1.bf16.msra.mxu0 %v9667_v32 }
0x2553   :  { %6745 = vadd.xlane.f32.xlu1 %v11643_v49  ;;  %6973 = vmatprep.subr.bf16.mxu0 %v9672_v40 }
0x2556   :  { %6974 = vmatpush1.bf16.msra.mxu0 %v9670_v55 }
0x2557   :  { %6975 = vmatprep.subr.bf16.mxu0 %v9675_v34 }
0x255a   :  { %6976 = vmatpush1.bf16.msra.mxu0 %v9673_v20 }
0x25d2   :  { %v6732_v29 = vpop.xlane.xlu0 %6731 }
0x25d3   :  { %v6747_v33 = vmul.f32 0.0078125, %v6732_v29 }
0x25d4   :  { %v6734_v23 = vpop.xlane.xlu1 %6733 }
0x25d5   :  { %v11652_v18 = vsub.f32 %v11623_v1, %v6747_v33  ;;  %v6748_v43 = vmul.f32 0.0078125, %v6734_v23 }
0x25d6   :  { %v6736_v11 = vpop.xlane.xlu0 %6735 }
0x25d7   :  { %v11655_v45 = vsub.f32 %v11625_v22, %v6748_v43  ;;  %v6749_v16 = vmul.f32 0.0078125, %v6736_v11  ;;  %v6763_v30 = vmul.f32 %v11652_v18, %v11652_v18 }
0x25d8   :  { %v6738_v36 = vpop.xlane.xlu1 %6737 }
0x25d9   :  { %v11660_v8 = vsub.f32 %v11628_v2, %v6749_v16  ;;  %v6750_v35 = vmul.f32 0.0078125, %v6738_v36  ;;  %6771 = vadd.xlane.f32.xlu0 %v6763_v30  ;;  %v6764_v57 = vmul.f32 %v11655_v45, %v11655_v45 }
0x25da   :  { %v6740_v60 = vpop.xlane.xlu0 %6739 }
0x25db   :  { %v11665_v13 = vsub.f32 %v11631_v7, %v6750_v35  ;;  %v6751_v52 = vmul.f32 0.0078125, %v6740_v60  ;;  %6773 = vadd.xlane.f32.xlu1 %v6764_v57  ;;  %v6765_v6 = vmul.f32 %v11660_v8, %v11660_v8 }
0x25dc   :  { %v6742_v14 = vpop.xlane.xlu1 %6741 }
0x25dd   :  { %v11670_v25 = vsub.f32 %v11634_v27, %v6751_v52  ;;  %v6752_v17 = vmul.f32 0.0078125, %v6742_v14  ;;  %6775 = vadd.xlane.f32.xlu0 %v6765_v6  ;;  %v6766_v28 = vmul.f32 %v11665_v13, %v11665_v13  ;;  %v8160_v14 = vld [vmem:[%s11945_s8 + $0x1] ss:$0 sm:$0xff] }
0x25de   :  { %v6744_v42 = vpop.xlane.xlu0 %6743 }
0x25df   :  { %v11675_v48 = vsub.f32 %v11637_v39, %v6752_v17  ;;  %v6753_v56 = vmul.f32 0.0078125, %v6744_v42  ;;  %6777 = vadd.xlane.f32.xlu1 %v6766_v28  ;;  %v6767_v10 = vmul.f32 %v11670_v25, %v11670_v25 }
0x25e0   :  { %v6746_v51 = vpop.xlane.xlu1 %6745 }
0x25e1   :  { %v11680_v47 = vsub.f32 %v11640_v61, %v6753_v56  ;;  %v6754_v19 = vmul.f32 0.0078125, %v6746_v51  ;;  %6779 = vadd.xlane.f32.xlu0 %v6767_v10  ;;  %v6768_v44 = vmul.f32 %v11675_v48, %v11675_v48 }
0x25e3   :  { %v11685_v24 = vsub.f32 %v11643_v49, %v6754_v19  ;;  %6781 = vadd.xlane.f32.xlu1 %v6768_v44  ;;  %v6769_v5 = vmul.f32 %v11680_v47, %v11680_v47 }
0x25e5   :  { %6783 = vadd.xlane.f32.xlu0 %v6769_v5  ;;  %v6770_v46 = vmul.f32 %v11685_v24, %v11685_v24  ;;  %v8161_v5 = vld [vmem:[%s11946_s14 + $0x1] ss:$0 sm:$0xff] }
0x25e7   :  { %6785 = vadd.xlane.f32.xlu1 %v6770_v46 }
0x2666   :  { %v6772_v38 = vpop.xlane.xlu0 %6771 }
0x2667   :  { %v6787_v62 = vmul.f32 0.0078125, %v6772_v38 }
0x2668   :  { %v6774_v21 = vpop.xlane.xlu1 %6773 }
0x2669   :  { %v6795_v41 = vadd.f32 1e-05, %v6787_v62  ;;  %v6788_v63 = vmul.f32 0.0078125, %v6774_v21 }
0x266a   :  { %v6776_v53 = vpop.xlane.xlu0 %6775 }
0x266b   :  { %9916 = vrsqrt.f32 %v6795_v41  ;;  %v6796_v58 = vadd.f32 1e-05, %v6788_v63  ;;  %v6789_v9 = vmul.f32 0.0078125, %v6776_v53 }
0x266c   :  { %v6778_v29 = vpop.xlane.xlu1 %6777 }
0x266d   :  { %9918 = vrsqrt.f32 %v6796_v58  ;;  %v6797_v33 = vadd.f32 1e-05, %v6789_v9  ;;  %v6790_v23 = vmul.f32 0.0078125, %v6778_v29 }
0x266e   :  { %v6780_v43 = vpop.xlane.xlu0 %6779 }
0x266f   :  { %9920 = vrsqrt.f32 %v6797_v33  ;;  %v6798_v11 = vadd.f32 1e-05, %v6790_v23  ;;  %v6791_v16 = vmul.f32 0.0078125, %v6780_v43 }
0x2670   :  { %v6782_v30 = vpop.xlane.xlu1 %6781 }
0x2671   :  { %9922 = vrsqrt.f32 %v6798_v11  ;;  %v6792_v36 = vmul.f32 0.0078125, %v6782_v30  ;;  %v6799_v35 = vadd.f32 1e-05, %v6791_v16  ;;  %v9676_v11 = vld [vmem:[%s11947_s19 + $0xc0] sm:$0xff]   ;;  %v9681_v30 = vld [vmem:[%s11947_s19 + $0x90] sm:$0xff]  }
0x2672   :  { %v6784_v60 = vpop.xlane.xlu0 %6783  ;;  %v9677_v16 = vld [vmem:[%s11947_s19 + $0x80] sm:$0xff]   ;;  %8628 = vmatprep.subr.bf16.mxu0 %v9676_v11  ;;  %9350 = vmatprep.subr.bf16.mxu1 %v9676_v11 }
0x2673   :  { %v6800_v57 = vadd.f32 1e-05, %v6792_v36  ;;  %v6793_v56 = vmul.f32 0.0078125, %v6784_v60  ;;  %9358 = vmatpush3.bf16.msra.mxu1 %v9677_v16  ;;  %v9682_v36 = vld [vmem:[%s11947_s19 + $0xd8] sm:$0xff]   ;;  %v9685_v60 = vld [vmem:[%s11947_s19 + $0xa0] sm:$0xff]  }
0x2674   :  { %v6786_v52 = vpop.xlane.xlu1 %6785 }
0x2675   :  { %v9917_v6 = vpop.eup %9916  ;;  %9924 = vrsqrt.f32 %v6800_v57  ;;  %v6794_v17 = vmul.f32 0.0078125, %v6786_v52  ;;  %v6801_v0 = vadd.f32 1e-05, %v6793_v56  ;;  %v9684_v57 = vld [vmem:[%s11947_s19 + $0xe0] sm:$0xff]   ;;  %v9686_v52 = vld [vmem:[%s11947_s19 + $0xe8] sm:$0xff]  }
0x2676   :  { %v6811_v28 = vmul.f32 %v9917_v6, %v11652_v18  ;;  %9926 = vrsqrt.f32 %v6799_v35  ;;  %v9683_v35 = vld [vmem:[%s11947_s19 + $0x98] sm:$0xff]   ;;  %v9687_v6 = vld [vmem:[%s11947_s19 + $0xa8] sm:$0xff]   ;;  %v8178_v56 = vld [vmem:[%s11948_s7 + $0x2] sm:$0x3] }
0x2677   :  { %v9919_v42 = vpop.eup %9918  ;;  %v6802_v44 = vadd.f32 1e-05, %v6794_v17  ;;  %v9689_v17 = vld [vmem:[%s11947_s19 + $0xb0] sm:$0xff]  }
0x2678   :  { %v6825_v10 = vmul.f32 %v8160_v14, %v6811_v28  ;;  %v6812_v51 = vmul.f32 %v9919_v42, %v11655_v45  ;;  %v9690_v28 = vld [vmem:[%s11947_s19 + $0xf8] sm:$0xff]  }
0x2679   :  { %v9921_v19 = vpop.eup %9920  ;;  %9928 = vrsqrt.f32 %v6802_v44  ;;  %v9691_v42 = vld [vmem:[%s11947_s19 + $0xb8] sm:$0xff]  }
0x267a   :  { %v6826_v46 = vmul.f32 %v8160_v14, %v6812_v51  ;;  %v6839_v37 = vadd.f32 %v8161_v5, %v6825_v10  ;;  %v6813_v50 = vmul.f32 %v9921_v19, %v11660_v8  ;;  %9930 = vrsqrt.f32 %v6801_v0 }
0x267b   :  { %v9923_v54 = vpop.eup %9922  ;;  %v11735_v10 = vrot.slane %v8178_v56, %v4421_v4  ;;  %v11739_v51 = vrot.slane %v8178_v56, %v4425_v12 }
0x267c   :  { %v6840_v3 = vadd.f32 %v8161_v5, %v6826_v46  ;;  %v6814_v15 = vmul.f32 %v9923_v54, %v11665_v13  ;;  %v6827_v40 = vmul.f32 %v8160_v14, %v6813_v50 }
0x267e   :  { %v6847_v18 = vpack.c.bf16 %v6840_v3, %v6839_v37  ;;  %v6828_v31 = vmul.f32 %v8160_v14, %v6814_v15  ;;  %v6841_v34 = vadd.f32 %v8161_v5, %v6827_v40 }
0x267f   :  { %v9925_v32 = vpop.eup %9924 }
0x2680   :  { %6994 = vmatmul.mubr.bf16.vlgmr.msra.gmra.mrb[160].mxu0 %v6847_v18  ;;  %v9927_v45 = vpop.eup %9926  ;;  %v6842_v55 = vadd.f32 %v8161_v5, %v6828_v31  ;;  %v6816_v20 = vmul.f32 %v9925_v32, %v11675_v48 }
0x2681   :  { %7003 = vmatprep.mubr.bf16.mxu0 %v10058_v26  ;;  %v6815_v38 = vmul.f32 %v9927_v45, %v11670_v25  ;;  %8629 = vmatpush3.bf16.msra.mxu0 %v9677_v16 }
0x2682   :  { %v6848_v62 = vpack.c.bf16 %v6842_v55, %v6841_v34  ;;  %v6830_v8 = vmul.f32 %v8160_v14, %v6816_v20 }
0x2683   :  { %v9929_v21 = vpop.eup %9928  ;;  %v6829_v13 = vmul.f32 %v8160_v14, %v6815_v38 }
0x2684   :  { %v9931_v41 = vpop.eup %9930  ;;  %v6844_v63 = vadd.f32 %v8161_v5, %v6830_v8  ;;  %v6818_v53 = vmul.f32 %v9929_v21, %v11685_v24  ;;  %v9679_v24 = vld [vmem:[%s11947_s19 + $0x88] sm:$0xff]  }
0x2685   :  { %v6843_v58 = vadd.f32 %v8161_v5, %v6829_v13  ;;  %v6817_v9 = vmul.f32 %v9931_v41, %v11680_v47  ;;  %v9678_v47 = vld [vmem:[%s11947_s19 + $0xc8] sm:$0xff]  }
0x2686   :  { %v6832_v25 = vmul.f32 %v8160_v14, %v6818_v53  ;;  %8630 = vmatprep.subr.bf16.mxu0 %v9678_v47  ;;  %9351 = vmatprep.subr.bf16.mxu1 %v9678_v47 }
0x2687   :  { %v6849_v48 = vpack.c.bf16 %v6844_v63, %v6843_v58  ;;  %v6831_v29 = vmul.f32 %v8160_v14, %v6817_v9  ;;  %8631 = vmatpush3.bf16.msra.mxu0 %v9679_v24  ;;  %9359 = vmatpush3.bf16.msra.mxu1 %v9679_v24  ;;  %v9688_v14 = vld [vmem:[%s11947_s19 + $0xf0] sm:$0xff]  }
0x2688   :  { %7004 = vmatmul.mubr.bf16.gmra.mrb[164].mxu0 %v6848_v62  ;;  %v6846_v33 = vadd.f32 %v8161_v5, %v6832_v25 }
0x2689   :  { %7013 = vmatprep.mubr.bf16.mxu0 %v10058_v26  ;;  %v6845_v23 = vadd.f32 %v8161_v5, %v6831_v29 }
0x268b   :  { %v6850_v43 = vpack.c.bf16 %v6846_v33, %v6845_v23 }
0x2690   :  { %7014 = vmatmul.mubr.bf16.gmra.mrb[168].mxu0 %v6849_v48 }
0x2691   :  { %7023 = vmatprep.mubr.bf16.mxu0 %v10058_v26  ;;  %v9680_v26 = vld [vmem:[%s11947_s19 + $0xd0] sm:$0xff]  }
0x2692   :  { %8632 = vmatprep.subr.bf16.mxu0 %v9680_v26  ;;  %9352 = vmatprep.subr.bf16.mxu1 %v9680_v26 }
0x2693   :  { %8633 = vmatpush3.bf16.msra.mxu0 %v9681_v30  ;;  %9360 = vmatpush3.bf16.msra.mxu1 %v9681_v30 }
0x2694   :  { %8634 = vmatprep.subr.bf16.mxu0 %v9682_v36  ;;  %9353 = vmatprep.subr.bf16.mxu1 %v9682_v36 }
0x2697   :  { %8635 = vmatpush3.bf16.msra.mxu0 %v9683_v35  ;;  %9361 = vmatpush3.bf16.msra.mxu1 %v9683_v35 }
0x2698   :  { %7024 = vmatmul.mubr.bf16.gmra.mrb[172].mxu0 %v6850_v43  ;;  %8636 = vmatprep.subr.bf16.mxu0 %v9684_v57 }
0x2699   :  { %9354 = vmatprep.subr.bf16.mxu1 %v9684_v57 }
0x269b   :  { %8637 = vmatpush3.bf16.msra.mxu0 %v9685_v60  ;;  %9362 = vmatpush3.bf16.msra.mxu1 %v9685_v60 }
0x269c   :  { %8638 = vmatprep.subr.bf16.mxu0 %v9686_v52  ;;  %9355 = vmatprep.subr.bf16.mxu1 %v9686_v52 }
0x269f   :  { %8639 = vmatpush3.bf16.msra.mxu0 %v9687_v6  ;;  %9363 = vmatpush3.bf16.msra.mxu1 %v9687_v6 }
0x26a0   :  { %8640 = vmatprep.subr.bf16.mxu0 %v9688_v14  ;;  %9356 = vmatprep.subr.bf16.mxu1 %v9688_v14 }
0x26a3   :  { %8641 = vmatpush3.bf16.msra.mxu0 %v9689_v17  ;;  %9364 = vmatpush3.bf16.msra.mxu1 %v9689_v17 }
0x26a4   :  { %8642 = vmatprep.subr.bf16.mxu0 %v9690_v28  ;;  %9357 = vmatprep.subr.bf16.mxu1 %v9690_v28 }
0x26a7   :  { %8643 = vmatpush3.bf16.msra.mxu0 %v9691_v42  ;;  %9365 = vmatpush3.bf16.msra.mxu1 %v9691_v42 }
0x2753   :  { %v6995_v19 = vpop.f32.mrb[160].mxu0 }
0x2754   :  { %v11742_v44 = vadd.f32 %v6995_v19, %v11735_v10  ;;  %v6997_v5 = vpop.f32.mrb[161].mxu0 }
0x2755   :  { %v11745_v46 = vadd.f32 %v6997_v5, %v11739_v51  ;;  %v6999_v54 = vpop.f32.mrb[162].mxu0 }
0x2756   :  { %v7034_v0 = vmul.f32 %v11742_v44, %v11742_v44  ;;  %v11750_v37 = vadd.f32 %v6999_v54, %v11735_v10  ;;  %v7001_v4 = vpop.f32.mrb[163].mxu0 }
0x2757   :  { %v7035_v59 = vmul.f32 %v11745_v46, %v11745_v46  ;;  %v11755_v12 = vadd.f32 %v7001_v4, %v11739_v51 }
0x2758   :  { %v7050_v3 = vmul.f32 %v7034_v0, %v11742_v44  ;;  %v7036_v50 = vmul.f32 %v11750_v37, %v11750_v37 }
0x2759   :  { %v7051_v15 = vmul.f32 %v7035_v59, %v11745_v46  ;;  %v7037_v18 = vmul.f32 %v11755_v12, %v11755_v12 }
0x275a   :  { %v7066_v31 = vmul.f32 0.044715, %v7050_v3  ;;  %v7052_v32 = vmul.f32 %v7036_v50, %v11750_v37 }
0x275b   :  { %v7067_v40 = vmul.f32 0.044715, %v7051_v15  ;;  %v7053_v45 = vmul.f32 %v7037_v18, %v11755_v12  ;;  %v7005_v55 = vpop.f32.mrb[164].mxu0 }
0x275c   :  { %v7082_v20 = vadd.f32 %v7066_v31, %v11742_v44  ;;  %v7068_v34 = vmul.f32 0.044715, %v7052_v32  ;;  %v11767_v38 = vadd.f32 %v7005_v55, %v11735_v10  ;;  %v7007_v62 = vpop.f32.mrb[165].mxu0 }
0x275d   :  { %v7083_v8 = vadd.f32 %v7067_v40, %v11745_v46  ;;  %v7069_v21 = vmul.f32 0.044715, %v7053_v45  ;;  %v11771_v13 = vadd.f32 %v7007_v62, %v11739_v51  ;;  %v7009_v41 = vpop.f32.mrb[166].mxu0 }
0x275e   :  { %v7098_v63 = vmul.f32 0.7978846, %v7082_v20  ;;  %v7084_v53 = vadd.f32 %v7068_v34, %v11750_v37  ;;  %v7038_v58 = vmul.f32 %v11767_v38, %v11767_v38  ;;  %v11777_v9 = vadd.f32 %v7009_v41, %v11735_v10  ;;  %v7011_v48 = vpop.f32.mrb[167].mxu0 }
0x275f   :  { %v7099_v25 = vmul.f32 0.7978846, %v7083_v8  ;;  %v7085_v29 = vadd.f32 %v7069_v21, %v11755_v12  ;;  %v7039_v33 = vmul.f32 %v11771_v13, %v11771_v13  ;;  %v11783_v23 = vadd.f32 %v7011_v48, %v11739_v51 }
0x2760   :  { %9932 = vtanh.f32 %v7098_v63  ;;  %v7100_v43 = vmul.f32 0.7978846, %v7084_v53  ;;  %v7054_v11 = vmul.f32 %v7038_v58, %v11767_v38  ;;  %v7040_v16 = vmul.f32 %v11777_v9, %v11777_v9 }
0x2761   :  { %9934 = vtanh.f32 %v7099_v25  ;;  %v7101_v47 = vmul.f32 0.7978846, %v7085_v29  ;;  %v7055_v24 = vmul.f32 %v7039_v33, %v11771_v13  ;;  %v7041_v26 = vmul.f32 %v11783_v23, %v11783_v23 }
0x2762   :  { %9936 = vtanh.f32 %v7100_v43  ;;  %v7070_v30 = vmul.f32 0.044715, %v7054_v11  ;;  %v7056_v36 = vmul.f32 %v7040_v16, %v11777_v9 }
0x2763   :  { %v7071_v35 = vmul.f32 0.044715, %v7055_v24  ;;  %v7057_v57 = vmul.f32 %v7041_v26, %v11783_v23  ;;  %v7015_v60 = vpop.f32.mrb[168].mxu0  ;;  %9938 = vtanh.f32 %v7101_v47 }
0x2764   :  { %v7086_v52 = vadd.f32 %v7070_v30, %v11767_v38  ;;  %v7072_v6 = vmul.f32 0.044715, %v7056_v36  ;;  %v11795_v14 = vadd.f32 %v7015_v60, %v11735_v10  ;;  %v7017_v17 = vpop.f32.mrb[169].mxu0 }
0x2765   :  { %v7087_v28 = vadd.f32 %v7071_v35, %v11771_v13  ;;  %v7073_v42 = vmul.f32 0.044715, %v7057_v57  ;;  %v11799_v56 = vadd.f32 %v7017_v17, %v11739_v51  ;;  %v7019_v19 = vpop.f32.mrb[170].mxu0 }
0x2766   :  { %v7102_v5 = vmul.f32 0.7978846, %v7086_v52  ;;  %v7088_v54 = vadd.f32 %v7072_v6, %v11777_v9  ;;  %v7042_v0 = vmul.f32 %v11795_v14, %v11795_v14  ;;  %v11805_v4 = vadd.f32 %v7019_v19, %v11735_v10  ;;  %v7021_v59 = vpop.f32.mrb[171].mxu0 }
0x2767   :  { %v7103_v3 = vmul.f32 0.7978846, %v7087_v28  ;;  %v7089_v50 = vadd.f32 %v7073_v42, %v11783_v23  ;;  %v7043_v15 = vmul.f32 %v11799_v56, %v11799_v56  ;;  %v11811_v18 = vadd.f32 %v7021_v59, %v11739_v51 }
0x2768   :  { %9940 = vtanh.f32 %v7102_v5  ;;  %v7104_v31 = vmul.f32 0.7978846, %v7088_v54  ;;  %v7058_v32 = vmul.f32 %v7042_v0, %v11795_v14  ;;  %v7044_v40 = vmul.f32 %v11805_v4, %v11805_v4 }
0x2769   :  { %9942 = vtanh.f32 %v7103_v3  ;;  %v7105_v45 = vmul.f32 0.7978846, %v7089_v50  ;;  %v7059_v55 = vmul.f32 %v7043_v15, %v11799_v56  ;;  %v7045_v20 = vmul.f32 %v11811_v18, %v11811_v18 }
0x276a   :  { %v9933_v34 = vpop.eup %9932  ;;  %9944 = vtanh.f32 %v7104_v31  ;;  %v7074_v62 = vmul.f32 0.044715, %v7058_v32  ;;  %v7060_v8 = vmul.f32 %v7044_v40, %v11805_v4 }
0x276b   :  { %v9935_v21 = vpop.eup %9934  ;;  %v7130_v41 = vadd.f32 1.0, %v9933_v34  ;;  %9946 = vtanh.f32 %v7105_v45  ;;  %v7075_v63 = vmul.f32 0.044715, %v7059_v55  ;;  %v7061_v53 = vmul.f32 %v7045_v20, %v11811_v18  ;;  %v7025_v58 = vpop.f32.mrb[172].mxu0 }
0x276c   :  { %v9937_v48 = vpop.eup %9936  ;;  %v7090_v25 = vadd.f32 %v7074_v62, %v11795_v14  ;;  %v7076_v29 = vmul.f32 0.044715, %v7060_v8  ;;  %v11823_v33 = vadd.f32 %v7025_v58, %v11735_v10  ;;  %v7027_v43 = vpop.f32.mrb[173].mxu0  ;;  %v7131_v11 = vadd.f32 1.0, %v9935_v21 }
0x276d   :  { %v7146_v16 = vmul.f32 0.5, %v7130_v41  ;;  %v7132_v47 = vadd.f32 1.0, %v9937_v48  ;;  %v7091_v24 = vadd.f32 %v7075_v63, %v11799_v56  ;;  %v7077_v26 = vmul.f32 0.044715, %v7061_v53  ;;  %v7029_v30 = vpop.f32.mrb[174].mxu0  ;;  %v9939_v6 = vpop.eup %9938 }
0x276e   :  { %v7106_v36 = vmul.f32 0.7978846, %v7090_v25  ;;  %v7092_v35 = vadd.f32 %v7076_v29, %v11805_v4  ;;  %v7046_v57 = vmul.f32 %v11823_v33, %v11823_v33  ;;  %v11830_v60 = vadd.f32 %v7027_v43, %v11739_v51  ;;  %v7031_v52 = vpop.f32.mrb[175].mxu0 }
0x276f   :  { %v11833_v17 = vmul.f32 %v7146_v16, %v11742_v44  ;;  %v7148_v28 = vmul.f32 0.5, %v7132_v47  ;;  %v7107_v42 = vmul.f32 0.7978846, %v7091_v24  ;;  %v7093_v19 = vadd.f32 %v7077_v26, %v11811_v18 }
0x2770   :  { %9948 = vtanh.f32 %v7106_v36  ;;  %v7108_v5 = vmul.f32 0.7978846, %v7092_v35  ;;  %v7062_v54 = vmul.f32 %v7046_v57, %v11823_v33  ;;  %v7047_v0 = vmul.f32 %v11830_v60, %v11830_v60 }
0x2771   :  { %v7164_v59 = vmul.f32 %v7148_v28, %v11750_v37  ;;  %9950 = vtanh.f32 %v7107_v42  ;;  %v7109_v3 = vmul.f32 0.7978846, %v7093_v19  ;;  %v11841_v50 = vadd.f32 %v7029_v30, %v11735_v10 }
0x2772   :  { %v9941_v44 = vpop.eup %9940  ;;  %9952 = vtanh.f32 %v7108_v5  ;;  %v7078_v15 = vmul.f32 0.044715, %v7062_v54  ;;  %v7063_v31 = vmul.f32 %v7047_v0, %v11830_v60  ;;  %v11845_v32 = vadd.f32 %v7031_v52, %v11739_v51 }
0x2773   :  { %v9943_v40 = vpop.eup %9942  ;;  %v7178_v45 = vpack.c.bf16 %v7164_v59, %v11833_v17  ;;  %v7134_v55 = vadd.f32 1.0, %v9941_v44  ;;  %9954 = vtanh.f32 %v7109_v3  ;;  %v7048_v37 = vmul.f32 %v11841_v50, %v11841_v50 }
0x2774   :  { %v9945_v20 = vpop.eup %9944  ;;  %v7094_v10 = vadd.f32 %v7078_v15, %v11823_v33  ;;  %v7079_v34 = vmul.f32 0.044715, %v7063_v31  ;;  %v7049_v62 = vmul.f32 %v11845_v32, %v11845_v32  ;;  %v7133_v8 = vadd.f32 1.0, %v9939_v6 }
0x2775   :  { %v9947_v21 = vpop.eup %9946  ;;  %v7150_v41 = vmul.f32 0.5, %v7134_v55  ;;  %v7136_v51 = vadd.f32 1.0, %v9945_v20  ;;  %v7064_v63 = vmul.f32 %v7048_v37, %v11841_v50  ;;  %v7147_v53 = vmul.f32 0.5, %v7131_v11 }
0x2776   :  { %v7110_v58 = vmul.f32 0.7978846, %v7094_v10  ;;  %v7095_v48 = vadd.f32 %v7079_v34, %v11830_v60  ;;  %v7065_v25 = vmul.f32 %v7049_v62, %v11845_v32  ;;  %v7149_v29 = vmul.f32 0.5, %v7133_v8 }
0x2777   :  { %v7166_v43 = vmul.f32 %v7150_v41, %v11767_v38  ;;  %v7152_v16 = vmul.f32 0.5, %v7136_v51  ;;  %v7080_v47 = vmul.f32 0.044715, %v7064_v63  ;;  %v7163_v24 = vmul.f32 %v7147_v53, %v11745_v46 }
0x2778   :  { %9956 = vtanh.f32 %v7110_v58  ;;  %v7111_v26 = vmul.f32 0.7978846, %v7095_v48  ;;  %v7081_v30 = vmul.f32 0.044715, %v7065_v25  ;;  %v7165_v36 = vmul.f32 %v7149_v29, %v11755_v12 }
0x2779   :  { %v7168_v35 = vmul.f32 %v7152_v16, %v11777_v9  ;;  %v7096_v11 = vadd.f32 %v7080_v47, %v11841_v50  ;;  %v7135_v57 = vadd.f32 1.0, %v9943_v40  ;;  %v7137_v52 = vadd.f32 1.0, %v9947_v21 }
0x277a   :  { %v9949_v6 = vpop.eup %9948  ;;  %9958 = vtanh.f32 %v7111_v26  ;;  %v7097_v17 = vadd.f32 %v7081_v30, %v11845_v32  ;;  %v7179_v38 = vpack.c.bf16 %v7165_v36, %v7163_v24  ;;  %v8228_v36 = vld [vmem:[%s10200_s9 + $0x1] ss:$0 sm:$0xff]  ;;  %s10059_s9 = smov [#allocation2]  }
0x277b   :  { %v9951_v28 = vpop.eup %9950  ;;  %v7180_v42 = vpack.c.bf16 %v7168_v35, %v7166_v43  ;;  %v7112_v19 = vmul.f32 0.7978846, %v7096_v11  ;;  %v7151_v46 = vmul.f32 0.5, %v7135_v57  ;;  %v7153_v5 = vmul.f32 0.5, %v7137_v52  ;;  %s7528_s24 = sshll.u32 %s10059_s9, 4  ;;  %s7529_s24 = int_to_ptr.vmem [resolvable:$true] %s7528_s24 }
0x277c   :  { %v9953_v54 = vpop.eup %9952  ;;  %v7113_v0 = vmul.f32 0.7978846, %v7097_v17  ;;  %7355 = vmatprep.mubr.bf16.mxu0 %v7179_v38  ;;  %v7139_v12 = vadd.f32 1.0, %v9951_v28  ;;  %v7138_v59 = vadd.f32 1.0, %v9949_v6  ;;  %p10009_p1 = scmp.lt.s32.totalorder %s7529_s24, %s7529_s24 }
0x277d   :  { %v9955_v9 = vpop.eup %9954  ;;  %9960 = vtanh.f32 %v7112_v19  ;;  %7356 = vmatmul.mubr.bf16.vlgmr.msra.gmra.mrb[176].mxu0 %v7178_v45  ;;  %v7167_v3 = vmul.f32 %v7151_v46, %v11771_v13  ;;  %v7169_v44 = vmul.f32 %v7153_v5, %v11783_v23  ;;  %v7140_v15 = vadd.f32 1.0, %v9953_v54 }
0x277e   :  { %9962 = vtanh.f32 %v7113_v0  ;;  %v7141_v31 = vadd.f32 1.0, %v9955_v9  ;;  %v7155_v40 = vmul.f32 0.5, %v7139_v12  ;;  %v7154_v55 = vmul.f32 0.5, %v7138_v59 }
0x277f   :  { %v7181_v37 = vpack.c.bf16 %v7169_v44, %v7167_v3  ;;  %v7156_v20 = vmul.f32 0.5, %v7140_v15 }
0x2780   :  { %v7157_v10 = vmul.f32 0.5, %v7141_v31  ;;  %v7170_v34 = vmul.f32 %v7154_v55, %v11795_v14  ;;  %v7171_v45 = vmul.f32 %v7155_v40, %v11799_v56 }
0x2781   :  { %7363 = vmatprep.mubr.bf16.mxu1 %v7181_v37  ;;  %v7172_v62 = vmul.f32 %v7156_v20, %v11805_v4 }
0x2782   :  { %v9957_v8 = vpop.eup %9956  ;;  %7364 = vmatmul.mubr.bf16.vlgmr.msra.gmra.mrb[128].mxu1 %v7180_v42  ;;  %v7173_v13 = vmul.f32 %v7157_v10, %v11811_v18 }
0x2783   :  { %v7182_v23 = vpack.c.bf16 %v7172_v62, %v7170_v34  ;;  %v7142_v51 = vadd.f32 1.0, %v9957_v8 }
0x2784   :  { %v9959_v21 = vpop.eup %9958  ;;  %v7183_v41 = vpack.c.bf16 %v7173_v13, %v7171_v45 }
0x2785   :  { %v7143_v63 = vadd.f32 1.0, %v9959_v21  ;;  %v7158_v25 = vmul.f32 0.5, %v7142_v51 }
0x2786   :  { %7371 = vmatprep.mubr.bf16.mxu1 %v7183_v41 }
0x2787   :  { %v9961_v53 = vpop.eup %9960  ;;  %v7159_v29 = vmul.f32 0.5, %v7143_v63  ;;  %v7174_v56 = vmul.f32 %v7158_v25, %v11823_v33 }
0x2788   :  { %v9963_v58 = vpop.eup %9962  ;;  %v7144_v48 = vadd.f32 1.0, %v9961_v53 }
0x2789   :  { %v7145_v14 = vadd.f32 1.0, %v9963_v58  ;;  %v7175_v16 = vmul.f32 %v7159_v29, %v11830_v60 }
0x278a   :  { %7372 = vmatmul.mubr.bf16.gmra.mrb[132].mxu1 %v7182_v23  ;;  %v7160_v4 = vmul.f32 0.5, %v7144_v48 }
0x278b   :  { %v7161_v43 = vmul.f32 0.5, %v7145_v14 }
0x278c   :  { %v7176_v18 = vmul.f32 %v7160_v4, %v11841_v50 }
0x278d   :  { %v7177_v47 = vmul.f32 %v7161_v43, %v11845_v32 }
0x278e   :  { %v7184_v24 = vpack.c.bf16 %v7176_v18, %v7174_v56 }
0x278f   :  { %v7185_v26 = vpack.c.bf16 %v7177_v47, %v7175_v16 }
0x2791   :  { %7379 = vmatprep.mubr.bf16.mxu1 %v7185_v26 }
0x2792   :  { %7380 = vmatmul.mubr.bf16.gmra.mrb[136].mxu1 %v7184_v24 }
0x2850   :  { %v8644_v30 = vpop.f32.mrb[176].mxu0 }
0x2851   :  { %v8645_v35 = vpop.f32.mrb[177].mxu0 }
0x2852   :  { %v8646_v11 = vadd.f32 %v8645_v35, %v8644_v30  ;;  %v8647_v57 = vpop.f32.mrb[178].mxu0 }
0x2853   :  { %v8648_v52 = vpop.f32.mrb[179].mxu0 }
0x2854   :  { %v7358_v6 = vadd.f32 %v8646_v11, %v8228_v36  ;;  %v8649_v17 = vadd.f32 %v8648_v52, %v8647_v57 }
0x2855   :  { %v8650_v38 = vpop.f32.mrb[128].mxu1 }
0x2856   :  { %v7361_v33 = vadd.f32 %v8649_v17, %v8228_v36  ;;  %v7388_v50 = vadd.f32 %v7358_v6, %v11623_v1  ;;  %v8651_v28 = vpop.f32.mrb[129].mxu1 }
0x2857   :  { %v8652_v60 = vadd.f32 %v8651_v28, %v8650_v38  ;;  %v8653_v42 = vpop.f32.mrb[130].mxu1 }
0x2858   :  { %7398 = vadd.xlane.f32.xlu0 %v7388_v50  ;;  %v7389_v32 = vadd.f32 %v7361_v33, %v11625_v22  ;;  %v8654_v19 = vpop.f32.mrb[131].mxu1 }
0x2859   :  { %v7366_v46 = vadd.f32 %v8652_v60, %v8228_v36  ;;  %v8655_v5 = vadd.f32 %v8654_v19, %v8653_v42 }
0x285a   :  { %7400 = vadd.xlane.f32.xlu1 %v7389_v32 }
0x285b   :  { %v7369_v54 = vadd.f32 %v8655_v5, %v8228_v36  ;;  %v7390_v0 = vadd.f32 %v7366_v46, %v11628_v2 }
0x285d   :  { %v8656_v12 = vpop.f32.mrb[132].mxu1  ;;  %7402 = vadd.xlane.f32.xlu0 %v7390_v0  ;;  %v7391_v59 = vadd.f32 %v7369_v54, %v11631_v7 }
0x285e   :  { %v8657_v9 = vpop.f32.mrb[133].mxu1 }
0x285f   :  { %v8658_v3 = vadd.f32 %v8657_v9, %v8656_v12  ;;  %v8659_v1 = vpop.f32.mrb[134].mxu1  ;;  %7404 = vadd.xlane.f32.xlu1 %v7391_v59 }
0x2860   :  { %v8660_v44 = vpop.f32.mrb[135].mxu1 }
0x2861   :  { %v7374_v15 = vadd.f32 %v8658_v3, %v8228_v36  ;;  %v8661_v31 = vadd.f32 %v8660_v44, %v8659_v1  ;;  %v8245_v1 = vld [vmem:[%s10205_s30] ss:$0 sm:$0xff]  ;;  %s10004_s30 = scalar_lea.vmem %s7529_s24, 3072 }
0x2862   :  { %p10005_p0 = scmp.ne.s32.totalorder %s7529_s24, %s10004_s30  ;;  %p10010_p2 = scmp.lt.s32.totalorder %s10004_s30, %s10004_s30 }
0x2863   :  { %v7377_v40 = vadd.f32 %v8661_v31, %v8228_v36  ;;  %v7392_v22 = vadd.f32 %v7374_v15, %v11634_v27 }
0x2864   :  { %p10011_p3 = por %p10010_p2, %p10009_p1 }
0x2865   :  { %7406 = vadd.xlane.f32.xlu0 %v7392_v22  ;;  %v8662_v55 = vpop.f32.mrb[136].mxu1  ;;  %v7393_v37 = vadd.f32 %v7377_v40, %v11637_v39 }
0x2866   :  { %v8663_v20 = vpop.f32.mrb[137].mxu1  ;;  %p10012_p4 = pnand %p10011_p3, %p10005_p0 }
0x2867   :  { %v8664_v2 = vadd.f32 %v8663_v20, %v8662_v55  ;;  %7408 = vadd.xlane.f32.xlu1 %v7393_v37  ;;  %v8665_v10 = vpop.f32.mrb[138].mxu1  ;;  %v8246_v55 = vld [vmem:[%s10210_s27] ss:$0 sm:$0xff] }
0x2868   :  { %v8666_v34 = vpop.f32.mrb[139].mxu1 }
0x2869   :  { %v7382_v7 = vadd.f32 %v8664_v2, %v8228_v36  ;;  %v8667_v62 = vadd.f32 %v8666_v34, %v8665_v10 }
0x286b   :  { %v7385_v8 = vadd.f32 %v8667_v62, %v8228_v36  ;;  %v7394_v45 = vadd.f32 %v7382_v7, %v11640_v61 }
0x286d   :  { %7410 = vadd.xlane.f32.xlu0 %v7394_v45  ;;  %v7395_v13 = vadd.f32 %v7385_v8, %v11643_v49 }
0x286f   :  { %7412 = vadd.xlane.f32.xlu1 %v7395_v13 }
0x28e5   :  { %v7399_v23 = vpop.xlane.xlu0 %7398 }
0x28e6   :  { %v7414_v27 = vmul.f32 0.0078125, %v7399_v23 }
0x28e7   :  { %v7401_v21 = vpop.xlane.xlu1 %7400 }
0x28e8   :  { %v7422_v41 = vsub.f32 %v7388_v50, %v7414_v27  ;;  %v7415_v51 = vmul.f32 0.0078125, %v7401_v21 }
0x28ea   :  { %v7423_v39 = vsub.f32 %v7389_v32, %v7415_v51  ;;  %v7430_v63 = vmul.f32 %v7422_v41, %v7422_v41  ;;  %v7403_v53 = vpop.xlane.xlu0 %7402 }
0x28eb   :  { %v7416_v58 = vmul.f32 0.0078125, %v7403_v53 }
0x28ec   :  { %7438 = vadd.xlane.f32.xlu0 %v7430_v63  ;;  %v7431_v48 = vmul.f32 %v7423_v39, %v7423_v39  ;;  %v7405_v25 = vpop.xlane.xlu1 %7404 }
0x28ed   :  { %v7424_v14 = vsub.f32 %v7390_v0, %v7416_v58  ;;  %v7417_v29 = vmul.f32 0.0078125, %v7405_v25 }
0x28ee   :  { %7440 = vadd.xlane.f32.xlu1 %v7431_v48 }
0x28ef   :  { %v11881_v61 = vsub.f32 %v7391_v59, %v7417_v29  ;;  %v7432_v4 = vmul.f32 %v7424_v14, %v7424_v14 }
0x28f1   :  { %7442 = vadd.xlane.f32.xlu0 %v7432_v4  ;;  %v7433_v49 = vmul.f32 %v11881_v61, %v11881_v61 }
0x28f2   :  { %v7407_v43 = vpop.xlane.xlu0 %7406 }
0x28f3   :  { %v7418_v56 = vmul.f32 0.0078125, %v7407_v43  ;;  %7444 = vadd.xlane.f32.xlu1 %v7433_v49 }
0x28f4   :  { %v7409_v18 = vpop.xlane.xlu1 %7408 }
0x28f5   :  { %v11885_v16 = vsub.f32 %v7392_v22, %v7418_v56  ;;  %v7419_v47 = vmul.f32 0.0078125, %v7409_v18 }
0x28f7   :  { %v11887_v24 = vsub.f32 %v7393_v37, %v7419_v47  ;;  %v7434_v26 = vmul.f32 %v11885_v16, %v11885_v16 }
0x28f9   :  { %7446 = vadd.xlane.f32.xlu0 %v7434_v26  ;;  %v7435_v30 = vmul.f32 %v11887_v24, %v11887_v24 }
0x28fa   :  { %v7411_v36 = vpop.xlane.xlu0 %7410 }
0x28fb   :  { %v7420_v35 = vmul.f32 0.0078125, %v7411_v36  ;;  %7448 = vadd.xlane.f32.xlu1 %v7435_v30 }
0x28fc   :  { %v7413_v11 = vpop.xlane.xlu1 %7412 }
0x28fd   :  { %v11893_v57 = vsub.f32 %v7394_v45, %v7420_v35  ;;  %v7421_v52 = vmul.f32 0.0078125, %v7413_v11 }
0x28ff   :  { %v11895_v6 = vsub.f32 %v7395_v13, %v7421_v52  ;;  %v7436_v17 = vmul.f32 %v11893_v57, %v11893_v57 }
0x2901   :  { %7450 = vadd.xlane.f32.xlu0 %v7436_v17  ;;  %v7437_v38 = vmul.f32 %v11895_v6, %v11895_v6 }
0x2903   :  { %7452 = vadd.xlane.f32.xlu1 %v7437_v38 }
0x2979   :  { %v7439_v33 = vpop.xlane.xlu0 %7438 }
0x297a   :  { %v7454_v50 = vmul.f32 0.0078125, %v7439_v33 }
0x297b   :  { %v7441_v28 = vpop.xlane.xlu1 %7440 }
0x297c   :  { %v7462_v60 = vadd.f32 1e-05, %v7454_v50  ;;  %v7455_v42 = vmul.f32 0.0078125, %v7441_v28 }
0x297e   :  { %9964 = vrsqrt.f32 %v7462_v60  ;;  %v7463_v32 = vadd.f32 1e-05, %v7455_v42  ;;  %v7443_v19 = vpop.xlane.xlu0 %7442 }
0x297f   :  { %v7456_v46 = vmul.f32 0.0078125, %v7443_v19 }
0x2980   :  { %9966 = vrsqrt.f32 %v7463_v32  ;;  %v7445_v5 = vpop.xlane.xlu1 %7444 }
0x2981   :  { %v7464_v54 = vadd.f32 1e-05, %v7456_v46  ;;  %v7457_v0 = vmul.f32 0.0078125, %v7445_v5 }
0x2983   :  { %9968 = vrsqrt.f32 %v7464_v54  ;;  %v7465_v12 = vadd.f32 1e-05, %v7457_v0 }
0x2985   :  { %9970 = vrsqrt.f32 %v7465_v12 }
0x2986   :  { %v7447_v59 = vpop.xlane.xlu0 %7446 }
0x2987   :  { %v7458_v9 = vmul.f32 0.0078125, %v7447_v59 }
0x2988   :  { %v9965_v3 = vpop.eup %9964  ;;  %v7449_v44 = vpop.xlane.xlu1 %7448 }
0x2989   :  { %v7478_v15 = vmul.f32 %v9965_v3, %v7422_v41  ;;  %v7466_v31 = vadd.f32 1e-05, %v7458_v9  ;;  %v7459_v40 = vmul.f32 0.0078125, %v7449_v44 }
0x298a   :  { %v9967_v22 = vpop.eup %9966 }
0x298b   :  { %v7492_v37 = vmul.f32 %v8245_v1, %v7478_v15  ;;  %v7479_v20 = vmul.f32 %v9967_v22, %v7423_v39  ;;  %9972 = vrsqrt.f32 %v7466_v31  ;;  %v7467_v2 = vadd.f32 1e-05, %v7459_v40 }
0x298d   :  { %v9969_v10 = vpop.eup %9968  ;;  %v7506_v34 = vadd.f32 %v8246_v55, %v7492_v37  ;;  %v7493_v7 = vmul.f32 %v8245_v1, %v7479_v20  ;;  %9974 = vrsqrt.f32 %v7467_v2 }
0x298e   :  { %v7480_v62 = vmul.f32 %v9969_v10, %v7424_v14  ;;  %v7451_v8 = vpop.xlane.xlu0 %7450 }
0x298f   :  { %v9971_v45 = vpop.eup %9970  ;;  %7515 = vst [vmem:[#allocation2 + $0x80] sm:$0xff] %v7506_v34  ;;  %v7507_v13 = vadd.f32 %v8246_v55, %v7493_v7  ;;  %v7460_v23 = vmul.f32 0.0078125, %v7451_v8 }
0x2990   :  { %v7494_v27 = vmul.f32 %v8245_v1, %v7480_v62  ;;  %v7481_v21 = vmul.f32 %v9971_v45, %v11881_v61  ;;  %v7453_v41 = vpop.xlane.xlu1 %7452 }
0x2991   :  { %7516 = vst [vmem:[#allocation2 + $0x88] sm:$0xff] %v7507_v13  ;;  %v7468_v51 = vadd.f32 1e-05, %v7460_v23  ;;  %v7461_v63 = vmul.f32 0.0078125, %v7453_v41 }
0x2992   :  { %v7508_v39 = vadd.f32 %v8246_v55, %v7494_v27  ;;  %v7495_v53 = vmul.f32 %v8245_v1, %v7481_v21 }
0x2993   :  { %9976 = vrsqrt.f32 %v7468_v51  ;;  %v7469_v58 = vadd.f32 1e-05, %v7461_v63 }
0x2994   :  { %7517 = vst [vmem:[#allocation2 + $0x90] sm:$0xff] %v7508_v39  ;;  %v7509_v48 = vadd.f32 %v8246_v55, %v7495_v53 }
0x2995   :  { %v9973_v25 = vpop.eup %9972  ;;  %9978 = vrsqrt.f32 %v7469_v58 }
0x2996   :  { %7518 = vst [vmem:[#allocation2 + $0x98] sm:$0xff] %v7509_v48  ;;  %v7482_v14 = vmul.f32 %v9973_v25, %v11885_v16 }
0x2997   :  { %v9975_v29 = vpop.eup %9974 }
0x2998   :  { %v7496_v4 = vmul.f32 %v8245_v1, %v7482_v14  ;;  %v7483_v49 = vmul.f32 %v9975_v29, %v11887_v24 }
0x299a   :  { %v7510_v61 = vadd.f32 %v8246_v55, %v7496_v4  ;;  %v7497_v43 = vmul.f32 %v8245_v1, %v7483_v49 }
0x299c   :  { %7519 = vst [vmem:[#allocation2 + $0xa0] sm:$0xff] %v7510_v61  ;;  %v7511_v56 = vadd.f32 %v8246_v55, %v7497_v43 }
0x299d   :  { %v9977_v18 = vpop.eup %9976 }
0x299e   :  { %7520 = vst [vmem:[#allocation2 + $0xa8] sm:$0xff] %v7511_v56  ;;  %v7484_v47 = vmul.f32 %v9977_v18, %v11893_v57 }
0x299f   :  { %v9979_v26 = vpop.eup %9978 }
0x29a0   :  { %v7498_v30 = vmul.f32 %v8245_v1, %v7484_v47  ;;  %v7485_v36 = vmul.f32 %v9979_v26, %v11895_v6 }
0x29a2   :  { %v7512_v35 = vadd.f32 %v8246_v55, %v7498_v30  ;;  %v7499_v16 = vmul.f32 %v8245_v1, %v7485_v36 }
0x29a4   :  { %7521 = vst [vmem:[#allocation2 + $0xb0] sm:$0xff] %v7512_v35  ;;  %v7513_v11 = vadd.f32 %v8246_v55, %v7499_v16 }
0x29a6   :  { %7522 = vst [vmem:[#allocation2 + $0xb8] sm:$0xff] %v7513_v11 }
0x29a7   :  { %10015 = shalt.err (!%p10012_p4)
}
0x29a8   :  { %s10016_s6 = scalar_lea.hbm %s10215_s4, 3072 }
0x29a9   :  { %p10017_p5 = scmp.ne.s32.totalorder %s10215_s4, %s10016_s6  ;;  %p10020_p6 = scmp.lt.u32.totalorder %s10016_s6, %s10215_s4 }
0x29ab   :  { %p10022_p7 = pnand %p10020_p6, %p10017_p5 }
0x29ad   :  { %10025 = shalt.err (!%p10022_p7)
}
0x29ae   :  { %s10060_s12 = smov 128   ;;  %s10061_s20 = smov 8  }
0x29af   :  { %7534 = dma.vmem_to_hbm [thread:$0]  %s7529_s24, 3072, %s10215_s4, [#allocation3], %s10060_s12, %s10060_s12, %s10061_s20  }
0x29b0   :  { %10026 = dma.done.wait [#allocation3], 3072  }
0x29b1   :  { %10027 = vsyncadd [#allocation3], 4294964224 }
0x29b2   :  { %7538 = vsyncpa [#allocation3], 1 }

</bundles_post_ra>
